<compile_context>
chip_gen: v7x
topology: tpu7x:2x2x1
jax: 0.10.0
libtpu: 0.0.40
codegen_flags: <defaults>
</compile_context>

<pallas_src>
import jax
import jax.numpy as jnp
from jax import lax
from jax.experimental import pallas as pl
from jax.experimental.pallas import tpu as pltpu

ETA = 0.005
LAMBDA_MSE = 1.0 - ETA
RHO = 0.01

_HIGHEST = lax.Precision.HIGHEST


# ---------------------------------------------------------------------------
# Fused kernel: both Gram matrices (all batches) + sum((mod1 - mod2)^2)
# ---------------------------------------------------------------------------
def _fused_loss_kernel(h1_ref, m1_ref, h2_ref, m2_ref, g_ref, sq_ref):
    """Single-grid-point fused kernel.

    h*_ref : [B, 2, M, K]   (channel 0 = real, channel 1 = imag), VMEM
    m*_ref : [B, 2, K, N]   VMEM
    g_ref  : [B, N, 4*N]    VMEM, lane-dense slab [Gr1 | Gi1 | Gr2 | Gi2]
                            (WITHOUT the +rho*I term — added in the wrapper)
    sq_ref : [1]            SMEM, sum((mod1 - mod2)**2)
    """
    B = h1_ref.shape[0]
    N = m1_ref.shape[-1]
    dn_t = (((0,), (0,)), ((), ()))   # X^T Y : contract dim 0 of both operands

    def prep(h_ref, m_ref):
        # Whole-batch real/imag stacking, hoisted out of the per-batch loop.
        hs = jnp.concatenate([h_ref[:, 0], h_ref[:, 1]], axis=-1)         # [B, M, 2K]
        mr, mi = m_ref[:, 0], m_ref[:, 1]
        rhs = jnp.concatenate(
            [jnp.concatenate([mr, mi], axis=-1),
             jnp.concatenate([-mi, mr], axis=-1)], axis=-2)               # [B, 2K, 2N]
        return hs, rhs

    hs1, rhs1 = prep(h1_ref, m1_ref)
    hs2, rhs2 = prep(h2_ref, m2_ref)

    def gram_slab(hs_b, rhs_b):
        # A-slab = [Hr|Hi] @ [[Mr, Mi], [-Mi, Mr]] = [Ar | Ai]   (1 MXU dot)
        a = jnp.dot(hs_b, rhs_b, precision=_HIGHEST,
                    preferred_element_type=jnp.float32)                   # [M, 2N]
        ar, ai = a[:, :N], a[:, N:]
        # ST = [[Ar, Ai], [Ai, -Ar]];  S = ST[:, :N] = [Ar; Ai]
        st = jnp.concatenate(
            [a, jnp.concatenate([ai, -ar], axis=-1)], axis=0)             # [2M, 2N]
        # [Gr | Gi] = S^T @ [S | T]                               (1 MXU dot)
        return lax.dot_general(st[:, :N], st, dn_t, precision=_HIGHEST,
                               preferred_element_type=jnp.float32)        # [N, 2N]

    sq_acc = jnp.zeros(m1_ref.shape[2:], dtype=jnp.float32)               # [K, N]
    for b in range(B):   # B is tiny -> static unroll inside a single grid point
        g1 = gram_slab(hs1[b], rhs1[b])
        g2 = gram_slab(hs2[b], rhs2[b])
        # Lane-dense (N, 4N) store (= 128 lanes at N=32) -> unmasked vst.
        g_ref[b] = jnp.concatenate([g1, g2], axis=-1)
        # Fused F.mse_loss numerator: vector accumulate, no per-iter reduction.
        for c in range(2):
            d = m1_ref[b, c] - m2_ref[b, c]
            sq_acc = sq_acc + d * d
    sq_ref[0] = jnp.sum(sq_acc)       # single cross-lane reduction, SMEM scalar


def fused_grams_and_sqdiff(H1, mod1, H2, mod2):
    B = H1.shape[0]
    N = mod1.shape[-1]
    g, sq = pl.pallas_call(
        _fused_loss_kernel,
        out_shape=(jax.ShapeDtypeStruct((B, N, 4 * N), jnp.float32),
                   jax.ShapeDtypeStruct((1,), jnp.float32)),
        in_specs=[pl.BlockSpec(memory_space=pltpu.MemorySpace.VMEM)] * 4,
        out_specs=(pl.BlockSpec(memory_space=pltpu.MemorySpace.VMEM),
                   pl.BlockSpec(memory_space=pltpu.MemorySpace.SMEM)),
    )(H1, mod1, H2, mod2)
    gr1 = g[:, :, 0 * N:1 * N]
    gi1 = g[:, :, 1 * N:2 * N]
    gr2 = g[:, :, 2 * N:3 * N]
    gi2 = g[:, :, 3 * N:4 * N]
    return gr1, gi1, gr2, gi2, sq[0]


# ---------------------------------------------------------------------------
# diag(real(inv(G))) for Hermitian PD G = Gr + i*Gi, via a real Cholesky.
#
# The real 2Nx2N block matrix  Br = [[Gr, -Gi], [Gi, Gr]]  is symmetric PD
# (G = A^H A + rho*I), and the top-left NxN block of inv(Br) equals
# real(inv(G)).  With Br = L L^T and X = L^{-1} [I_N; 0]:
#     diag(real(inv(G)))_i = sum_k X[k, i]^2,
# so one batched N-column triangular solve replaces the general inverse.
# ---------------------------------------------------------------------------
def complex_inv_real_diag(gr, gi):
    # TODO(synk): Cholesky / triangular solve have no Pallas TPU primitive;
    #             this post-processing stays in plain JAX (XLA).
    b, n, _ = gr.shape
    blk = jnp.concatenate(
        [jnp.concatenate([gr, -gi], axis=-1),
         jnp.concatenate([gi, gr], axis=-1)], axis=-2)                # [B, 2N, 2N]
    L = jnp.linalg.cholesky(blk)
    rhs = jnp.concatenate([jnp.eye(n, dtype=blk.dtype),
                           jnp.zeros((n, n), dtype=blk.dtype)], axis=0)   # [2N, N]
    rhs = jnp.broadcast_to(rhs, (b, 2 * n, n))
    x = lax.linalg.triangular_solve(L, rhs, left_side=True, lower=True)   # L^{-1}[:, :N]
    return jnp.sum(x * x, axis=-2)                                    # [B, N]


# ---------------------------------------------------------------------------
# Full forward pass of Loss_my
# ---------------------------------------------------------------------------
def loss_my(H1, mtx_mod1, H2, mtx_mod2):
    N = mtx_mod1.shape[-1]

    gr1, gi1, gr2, gi2, sq_sum = fused_grams_and_sqdiff(H1, mtx_mod1, H2, mtx_mod2)

    # + rho*I on the real part only (tiny diagonal update, kept out of the
    # MXU kernel epilogue).
    rho_eye = RHO * jnp.eye(N, dtype=jnp.float32)
    diag1 = complex_inv_real_diag(gr1 + rho_eye, gi1)                 # [B, N]
    diag2 = complex_inv_real_diag(gr2 + rho_eye, gi2)                 # [B, N]

    mse1 = diag1 / jnp.sum(diag1, axis=1, keepdims=True)
    mse2 = diag2 / jnp.sum(diag2, axis=1, keepdims=True)

    best = 1.0 / N
    distance1 = jnp.mean((mse1 - best) ** 2) * N * N                  # F.mse_loss * N^2
    distance2 = jnp.mean((mse2 - best) ** 2) * N * N
    nmse_data = (distance1 + distance2) / 2.0

    nmse_mod = (sq_sum / mtx_mod1.size) * 2.0 * N                     # F.mse_loss * 2N
    loss = (1.0 - LAMBDA_MSE) * nmse_data + LAMBDA_MSE * nmse_mod
    return nmse_data, nmse_mod, loss


if __name__ == "__main__":
    # Small shapes consistent with the forward: H*: [B, 2, M, K], mod*: [B, 2, K, N]
    B, M, K, N = 2, 8, 8, 32

    key = jax.random.PRNGKey(0)
    k1, k2, k3, k4 = jax.random.split(key, 4)
    H1 = jax.random.normal(k1, (B, 2, M, K), dtype=jnp.float32)
    H2 = jax.random.normal(k2, (B, 2, M, K), dtype=jnp.float32)
    mtx_mod1 = jax.random.normal(k3, (B, 2, K, N), dtype=jnp.float32)
    mtx_mod2 = jax.random.normal(k4, (B, 2, K, N), dtype=jnp.float32)

    nmse_data, nmse_mod, loss = jax.jit(loss_my)(H1, mtx_mod1, H2, mtx_mod2)
    jax.block_until_ready((nmse_data, nmse_mod, loss))

    print("KERNEL_OK")
</pallas_src>

<mosaic_0001>
module attributes {stable_mosaic.version = 11 : i64} {
  func.func @_fused_loss_kernel(%arg0: memref<2x2x8x8xf32, #tpu.memory_space<vmem>>, %arg1: memref<2x2x8x32xf32, #tpu.memory_space<vmem>>, %arg2: memref<2x2x8x8xf32, #tpu.memory_space<vmem>>, %arg3: memref<2x2x8x32xf32, #tpu.memory_space<vmem>>, %arg4: memref<2x32x128xf32, #tpu.memory_space<vmem>>, %arg5: memref<1xf32, #tpu.memory_space<smem>>) attributes {dimension_semantics = [], scalar_prefetch = 0 : i64, scratch_operands = 0 : i64, tpu.core_type = #tpu.core_type<tc>} {
    %c0 = arith.constant 0 : index
    %c0_0 = arith.constant 0 : index
    %c0_1 = arith.constant 0 : index
    %c0_2 = arith.constant 0 : index
    %0 = vector.load %arg0[%c0, %c0_0, %c0_1, %c0_2] : memref<2x2x8x8xf32, #tpu.memory_space<vmem>>, vector<2x1x8x8xf32>
    %1 = vector.shape_cast %0 : vector<2x1x8x8xf32> to vector<2x8x8xf32>
    %c0_3 = arith.constant 0 : index
    %c1 = arith.constant 1 : index
    %c0_4 = arith.constant 0 : index
    %c0_5 = arith.constant 0 : index
    %2 = vector.load %arg0[%c0_3, %c1, %c0_4, %c0_5] : memref<2x2x8x8xf32, #tpu.memory_space<vmem>>, vector<2x1x8x8xf32>
    %3 = vector.shape_cast %2 : vector<2x1x8x8xf32> to vector<2x8x8xf32>
    %4 = tpu.concatenate %1, %3 in 2 : vector<2x8x8xf32>, vector<2x8x8xf32> -> vector<2x8x16xf32>
    %c0_6 = arith.constant 0 : index
    %c0_7 = arith.constant 0 : index
    %c0_8 = arith.constant 0 : index
    %c0_9 = arith.constant 0 : index
    %5 = vector.load %arg1[%c0_6, %c0_7, %c0_8, %c0_9] : memref<2x2x8x32xf32, #tpu.memory_space<vmem>>, vector<2x1x8x32xf32>
    %6 = vector.shape_cast %5 : vector<2x1x8x32xf32> to vector<2x8x32xf32>
    %c0_10 = arith.constant 0 : index
    %c1_11 = arith.constant 1 : index
    %c0_12 = arith.constant 0 : index
    %c0_13 = arith.constant 0 : index
    %7 = vector.load %arg1[%c0_10, %c1_11, %c0_12, %c0_13] : memref<2x2x8x32xf32, #tpu.memory_space<vmem>>, vector<2x1x8x32xf32>
    %8 = vector.shape_cast %7 : vector<2x1x8x32xf32> to vector<2x8x32xf32>
    %9 = tpu.concatenate %6, %8 in 2 : vector<2x8x32xf32>, vector<2x8x32xf32> -> vector<2x8x64xf32>
    %cst = arith.constant 0.000000e+00 : f32
    %10 = vector.broadcast %cst : f32 to vector<2x8x32xf32>
    %11 = arith.subf %10, %8 : vector<2x8x32xf32>
    %12 = tpu.concatenate %11, %6 in 2 : vector<2x8x32xf32>, vector<2x8x32xf32> -> vector<2x8x64xf32>
    %13 = tpu.concatenate %9, %12 in 1 : vector<2x8x64xf32>, vector<2x8x64xf32> -> vector<2x16x64xf32>
    %c0_14 = arith.constant 0 : index
    %c0_15 = arith.constant 0 : index
    %c0_16 = arith.constant 0 : index
    %c0_17 = arith.constant 0 : index
    %14 = vector.load %arg2[%c0_14, %c0_15, %c0_16, %c0_17] : memref<2x2x8x8xf32, #tpu.memory_space<vmem>>, vector<2x1x8x8xf32>
    %15 = vector.shape_cast %14 : vector<2x1x8x8xf32> to vector<2x8x8xf32>
    %c0_18 = arith.constant 0 : index
    %c1_19 = arith.constant 1 : index
    %c0_20 = arith.constant 0 : index
    %c0_21 = arith.constant 0 : index
    %16 = vector.load %arg2[%c0_18, %c1_19, %c0_20, %c0_21] : memref<2x2x8x8xf32, #tpu.memory_space<vmem>>, vector<2x1x8x8xf32>
    %17 = vector.shape_cast %16 : vector<2x1x8x8xf32> to vector<2x8x8xf32>
    %18 = tpu.concatenate %15, %17 in 2 : vector<2x8x8xf32>, vector<2x8x8xf32> -> vector<2x8x16xf32>
    %c0_22 = arith.constant 0 : index
    %c0_23 = arith.constant 0 : index
    %c0_24 = arith.constant 0 : index
    %c0_25 = arith.constant 0 : index
    %19 = vector.load %arg3[%c0_22, %c0_23, %c0_24, %c0_25] : memref<2x2x8x32xf32, #tpu.memory_space<vmem>>, vector<2x1x8x32xf32>
    %20 = vector.shape_cast %19 : vector<2x1x8x32xf32> to vector<2x8x32xf32>
    %c0_26 = arith.constant 0 : index
    %c1_27 = arith.constant 1 : index
    %c0_28 = arith.constant 0 : index
    %c0_29 = arith.constant 0 : index
    %21 = vector.load %arg3[%c0_26, %c1_27, %c0_28, %c0_29] : memref<2x2x8x32xf32, #tpu.memory_space<vmem>>, vector<2x1x8x32xf32>
    %22 = vector.shape_cast %21 : vector<2x1x8x32xf32> to vector<2x8x32xf32>
    %23 = tpu.concatenate %20, %22 in 2 : vector<2x8x32xf32>, vector<2x8x32xf32> -> vector<2x8x64xf32>
    %cst_30 = arith.constant 0.000000e+00 : f32
    %24 = vector.broadcast %cst_30 : f32 to vector<2x8x32xf32>
    %25 = arith.subf %24, %22 : vector<2x8x32xf32>
    %26 = tpu.concatenate %25, %20 in 2 : vector<2x8x32xf32>, vector<2x8x32xf32> -> vector<2x8x64xf32>
    %27 = tpu.concatenate %23, %26 in 1 : vector<2x8x64xf32>, vector<2x8x64xf32> -> vector<2x16x64xf32>
    %cst_31 = arith.constant 0.000000e+00 : f32
    %28 = vector.broadcast %cst_31 : f32 to vector<8x32xf32>
    %29 = vector.extract_strided_slice %4 {offsets = [0, 0, 0], sizes = [1, 8, 16], strides = [1, 1, 1]} : vector<2x8x16xf32> to vector<1x8x16xf32>
    %30 = vector.shape_cast %29 : vector<1x8x16xf32> to vector<8x16xf32>
    %31 = vector.extract_strided_slice %13 {offsets = [0, 0, 0], sizes = [1, 16, 64], strides = [1, 1, 1]} : vector<2x16x64xf32> to vector<1x16x64xf32>
    %32 = vector.shape_cast %31 : vector<1x16x64xf32> to vector<16x64xf32>
    %cst_32 = arith.constant dense<0.000000e+00> : vector<8x64xf32>
    %33 = tpu.matmul %30, %32, %cst_32 {dimension_numbers = #tpu.dot_dimension_numbers<[1], [0], [0], [1], [0, 0, 1, 1], [], []>, precision = #tpu.contract_precision<fp32>} : vector<8x16xf32>, vector<16x64xf32>, vector<8x64xf32> -> vector<8x64xf32>
    %34 = vector.extract_strided_slice %33 {offsets = [0, 0], sizes = [8, 32], strides = [1, 1]} : vector<8x64xf32> to vector<8x32xf32>
    %35 = vector.extract_strided_slice %33 {offsets = [0, 32], sizes = [8, 32], strides = [1, 1]} : vector<8x64xf32> to vector<8x32xf32>
    %cst_33 = arith.constant 0.000000e+00 : f32
    %36 = vector.broadcast %cst_33 : f32 to vector<8x32xf32>
    %37 = arith.subf %36, %34 : vector<8x32xf32>
    %38 = tpu.concatenate %35, %37 in 1 : vector<8x32xf32>, vector<8x32xf32> -> vector<8x64xf32>
    %39 = tpu.concatenate %33, %38 in 0 : vector<8x64xf32>, vector<8x64xf32> -> vector<16x64xf32>
    %40 = vector.extract_strided_slice %39 {offsets = [0, 0], sizes = [16, 32], strides = [1, 1]} : vector<16x64xf32> to vector<16x32xf32>
    %cst_34 = arith.constant dense<0.000000e+00> : vector<32x64xf32>
    %41 = tpu.matmul %40, %39, %cst_34 {dimension_numbers = #tpu.dot_dimension_numbers<[0], [0], [1], [1], [0, 1, 1, 1], [], []>, precision = #tpu.contract_precision<fp32>} : vector<16x32xf32>, vector<16x64xf32>, vector<32x64xf32> -> vector<32x64xf32>
    %42 = vector.extract_strided_slice %18 {offsets = [0, 0, 0], sizes = [1, 8, 16], strides = [1, 1, 1]} : vector<2x8x16xf32> to vector<1x8x16xf32>
    %43 = vector.shape_cast %42 : vector<1x8x16xf32> to vector<8x16xf32>
    %44 = vector.extract_strided_slice %27 {offsets = [0, 0, 0], sizes = [1, 16, 64], strides = [1, 1, 1]} : vector<2x16x64xf32> to vector<1x16x64xf32>
    %45 = vector.shape_cast %44 : vector<1x16x64xf32> to vector<16x64xf32>
    %cst_35 = arith.constant dense<0.000000e+00> : vector<8x64xf32>
    %46 = tpu.matmul %43, %45, %cst_35 {dimension_numbers = #tpu.dot_dimension_numbers<[1], [0], [0], [1], [0, 0, 1, 1], [], []>, precision = #tpu.contract_precision<fp32>} : vector<8x16xf32>, vector<16x64xf32>, vector<8x64xf32> -> vector<8x64xf32>
    %47 = vector.extract_strided_slice %46 {offsets = [0, 0], sizes = [8, 32], strides = [1, 1]} : vector<8x64xf32> to vector<8x32xf32>
    %48 = vector.extract_strided_slice %46 {offsets = [0, 32], sizes = [8, 32], strides = [1, 1]} : vector<8x64xf32> to vector<8x32xf32>
    %cst_36 = arith.constant 0.000000e+00 : f32
    %49 = vector.broadcast %cst_36 : f32 to vector<8x32xf32>
    %50 = arith.subf %49, %47 : vector<8x32xf32>
    %51 = tpu.concatenate %48, %50 in 1 : vector<8x32xf32>, vector<8x32xf32> -> vector<8x64xf32>
    %52 = tpu.concatenate %46, %51 in 0 : vector<8x64xf32>, vector<8x64xf32> -> vector<16x64xf32>
    %53 = vector.extract_strided_slice %52 {offsets = [0, 0], sizes = [16, 32], strides = [1, 1]} : vector<16x64xf32> to vector<16x32xf32>
    %cst_37 = arith.constant dense<0.000000e+00> : vector<32x64xf32>
    %54 = tpu.matmul %53, %52, %cst_37 {dimension_numbers = #tpu.dot_dimension_numbers<[0], [0], [1], [1], [0, 1, 1, 1], [], []>, precision = #tpu.contract_precision<fp32>} : vector<16x32xf32>, vector<16x64xf32>, vector<32x64xf32> -> vector<32x64xf32>
    %55 = tpu.concatenate %41, %54 in 1 : vector<32x64xf32>, vector<32x64xf32> -> vector<32x128xf32>
    %c0_38 = arith.constant 0 : index
    %c0_39 = arith.constant 0 : index
    %c0_40 = arith.constant 0 : index
    %56 = vector.load %arg4[%c0_38, %c0_39, %c0_40] : memref<2x32x128xf32, #tpu.memory_space<vmem>>, vector<1x32x128xf32>
    %57 = vector.shape_cast %56 : vector<1x32x128xf32> to vector<32x128xf32>
    %58 = vector.shape_cast %55 : vector<32x128xf32> to vector<1x32x128xf32>
    tpu.vector_store %arg4[%c0_38, %c0_39, %c0_40], %58 {strides = array<i32>} : memref<2x32x128xf32, #tpu.memory_space<vmem>>, vector<1x32x128xf32>,
    %c0_41 = arith.constant 0 : index
    %c0_42 = arith.constant 0 : index
    %c0_43 = arith.constant 0 : index
    %c0_44 = arith.constant 0 : index
    %59 = vector.load %arg1[%c0_41, %c0_42, %c0_43, %c0_44] : memref<2x2x8x32xf32, #tpu.memory_space<vmem>>, vector<1x1x8x32xf32>
    %60 = vector.shape_cast %59 : vector<1x1x8x32xf32> to vector<8x32xf32>
    %c0_45 = arith.constant 0 : index
    %c0_46 = arith.constant 0 : index
    %c0_47 = arith.constant 0 : index
    %c0_48 = arith.constant 0 : index
    %61 = vector.load %arg3[%c0_45, %c0_46, %c0_47, %c0_48] : memref<2x2x8x32xf32, #tpu.memory_space<vmem>>, vector<1x1x8x32xf32>
    %62 = vector.shape_cast %61 : vector<1x1x8x32xf32> to vector<8x32xf32>
    %63 = arith.subf %60, %62 : vector<8x32xf32>
    %64 = arith.mulf %63, %63 : vector<8x32xf32>
    %65 = arith.addf %28, %64 : vector<8x32xf32>
    %c0_49 = arith.constant 0 : index
    %c1_50 = arith.constant 1 : index
    %c0_51 = arith.constant 0 : index
    %c0_52 = arith.constant 0 : index
    %66 = vector.load %arg1[%c0_49, %c1_50, %c0_51, %c0_52] : memref<2x2x8x32xf32, #tpu.memory_space<vmem>>, vector<1x1x8x32xf32>
    %67 = vector.shape_cast %66 : vector<1x1x8x32xf32> to vector<8x32xf32>
    %c0_53 = arith.constant 0 : index
    %c1_54 = arith.constant 1 : index
    %c0_55 = arith.constant 0 : index
    %c0_56 = arith.constant 0 : index
    %68 = vector.load %arg3[%c0_53, %c1_54, %c0_55, %c0_56] : memref<2x2x8x32xf32, #tpu.memory_space<vmem>>, vector<1x1x8x32xf32>
    %69 = vector.shape_cast %68 : vector<1x1x8x32xf32> to vector<8x32xf32>
    %70 = arith.subf %67, %69 : vector<8x32xf32>
    %71 = arith.mulf %70, %70 : vector<8x32xf32>
    %72 = arith.addf %65, %71 : vector<8x32xf32>
    %73 = vector.extract_strided_slice %4 {offsets = [1, 0, 0], sizes = [1, 8, 16], strides = [1, 1, 1]} : vector<2x8x16xf32> to vector<1x8x16xf32>
    %74 = vector.shape_cast %73 : vector<1x8x16xf32> to vector<8x16xf32>
    %75 = vector.extract_strided_slice %13 {offsets = [1, 0, 0], sizes = [1, 16, 64], strides = [1, 1, 1]} : vector<2x16x64xf32> to vector<1x16x64xf32>
    %76 = vector.shape_cast %75 : vector<1x16x64xf32> to vector<16x64xf32>
    %cst_57 = arith.constant dense<0.000000e+00> : vector<8x64xf32>
    %77 = tpu.matmul %74, %76, %cst_57 {dimension_numbers = #tpu.dot_dimension_numbers<[1], [0], [0], [1], [0, 0, 1, 1], [], []>, precision = #tpu.contract_precision<fp32>} : vector<8x16xf32>, vector<16x64xf32>, vector<8x64xf32> -> vector<8x64xf32>
    %78 = vector.extract_strided_slice %77 {offsets = [0, 0], sizes = [8, 32], strides = [1, 1]} : vector<8x64xf32> to vector<8x32xf32>
    %79 = vector.extract_strided_slice %77 {offsets = [0, 32], sizes = [8, 32], strides = [1, 1]} : vector<8x64xf32> to vector<8x32xf32>
    %cst_58 = arith.constant 0.000000e+00 : f32
    %80 = vector.broadcast %cst_58 : f32 to vector<8x32xf32>
    %81 = arith.subf %80, %78 : vector<8x32xf32>
    %82 = tpu.concatenate %79, %81 in 1 : vector<8x32xf32>, vector<8x32xf32> -> vector<8x64xf32>
    %83 = tpu.concatenate %77, %82 in 0 : vector<8x64xf32>, vector<8x64xf32> -> vector<16x64xf32>
    %84 = vector.extract_strided_slice %83 {offsets = [0, 0], sizes = [16, 32], strides = [1, 1]} : vector<16x64xf32> to vector<16x32xf32>
    %cst_59 = arith.constant dense<0.000000e+00> : vector<32x64xf32>
    %85 = tpu.matmul %84, %83, %cst_59 {dimension_numbers = #tpu.dot_dimension_numbers<[0], [0], [1], [1], [0, 1, 1, 1], [], []>, precision = #tpu.contract_precision<fp32>} : vector<16x32xf32>, vector<16x64xf32>, vector<32x64xf32> -> vector<32x64xf32>
    %86 = vector.extract_strided_slice %18 {offsets = [1, 0, 0], sizes = [1, 8, 16], strides = [1, 1, 1]} : vector<2x8x16xf32> to vector<1x8x16xf32>
    %87 = vector.shape_cast %86 : vector<1x8x16xf32> to vector<8x16xf32>
    %88 = vector.extract_strided_slice %27 {offsets = [1, 0, 0], sizes = [1, 16, 64], strides = [1, 1, 1]} : vector<2x16x64xf32> to vector<1x16x64xf32>
    %89 = vector.shape_cast %88 : vector<1x16x64xf32> to vector<16x64xf32>
    %cst_60 = arith.constant dense<0.000000e+00> : vector<8x64xf32>
    %90 = tpu.matmul %87, %89, %cst_60 {dimension_numbers = #tpu.dot_dimension_numbers<[1], [0], [0], [1], [0, 0, 1, 1], [], []>, precision = #tpu.contract_precision<fp32>} : vector<8x16xf32>, vector<16x64xf32>, vector<8x64xf32> -> vector<8x64xf32>
    %91 = vector.extract_strided_slice %90 {offsets = [0, 0], sizes = [8, 32], strides = [1, 1]} : vector<8x64xf32> to vector<8x32xf32>
    %92 = vector.extract_strided_slice %90 {offsets = [0, 32], sizes = [8, 32], strides = [1, 1]} : vector<8x64xf32> to vector<8x32xf32>
    %cst_61 = arith.constant 0.000000e+00 : f32
    %93 = vector.broadcast %cst_61 : f32 to vector<8x32xf32>
    %94 = arith.subf %93, %91 : vector<8x32xf32>
    %95 = tpu.concatenate %92, %94 in 1 : vector<8x32xf32>, vector<8x32xf32> -> vector<8x64xf32>
    %96 = tpu.concatenate %90, %95 in 0 : vector<8x64xf32>, vector<8x64xf32> -> vector<16x64xf32>
    %97 = vector.extract_strided_slice %96 {offsets = [0, 0], sizes = [16, 32], strides = [1, 1]} : vector<16x64xf32> to vector<16x32xf32>
    %cst_62 = arith.constant dense<0.000000e+00> : vector<32x64xf32>
    %98 = tpu.matmul %97, %96, %cst_62 {dimension_numbers = #tpu.dot_dimension_numbers<[0], [0], [1], [1], [0, 1, 1, 1], [], []>, precision = #tpu.contract_precision<fp32>} : vector<16x32xf32>, vector<16x64xf32>, vector<32x64xf32> -> vector<32x64xf32>
    %99 = tpu.concatenate %85, %98 in 1 : vector<32x64xf32>, vector<32x64xf32> -> vector<32x128xf32>
    %c1_63 = arith.constant 1 : index
    %c0_64 = arith.constant 0 : index
    %c0_65 = arith.constant 0 : index
    %100 = vector.load %arg4[%c1_63, %c0_64, %c0_65] : memref<2x32x128xf32, #tpu.memory_space<vmem>>, vector<1x32x128xf32>
    %101 = vector.shape_cast %100 : vector<1x32x128xf32> to vector<32x128xf32>
    %102 = vector.shape_cast %99 : vector<32x128xf32> to vector<1x32x128xf32>
    tpu.vector_store %arg4[%c1_63, %c0_64, %c0_65], %102 {strides = array<i32>} : memref<2x32x128xf32, #tpu.memory_space<vmem>>, vector<1x32x128xf32>,
    %c1_66 = arith.constant 1 : index
    %c0_67 = arith.constant 0 : index
    %c0_68 = arith.constant 0 : index
    %c0_69 = arith.constant 0 : index
    %103 = vector.load %arg1[%c1_66, %c0_67, %c0_68, %c0_69] : memref<2x2x8x32xf32, #tpu.memory_space<vmem>>, vector<1x1x8x32xf32>
    %104 = vector.shape_cast %103 : vector<1x1x8x32xf32> to vector<8x32xf32>
    %c1_70 = arith.constant 1 : index
    %c0_71 = arith.constant 0 : index
    %c0_72 = arith.constant 0 : index
    %c0_73 = arith.constant 0 : index
    %105 = vector.load %arg3[%c1_70, %c0_71, %c0_72, %c0_73] : memref<2x2x8x32xf32, #tpu.memory_space<vmem>>, vector<1x1x8x32xf32>
    %106 = vector.shape_cast %105 : vector<1x1x8x32xf32> to vector<8x32xf32>
    %107 = arith.subf %104, %106 : vector<8x32xf32>
    %108 = arith.mulf %107, %107 : vector<8x32xf32>
    %109 = arith.addf %72, %108 : vector<8x32xf32>
    %c1_74 = arith.constant 1 : index
    %c1_75 = arith.constant 1 : index
    %c0_76 = arith.constant 0 : index
    %c0_77 = arith.constant 0 : index
    %110 = vector.load %arg1[%c1_74, %c1_75, %c0_76, %c0_77] : memref<2x2x8x32xf32, #tpu.memory_space<vmem>>, vector<1x1x8x32xf32>
    %111 = vector.shape_cast %110 : vector<1x1x8x32xf32> to vector<8x32xf32>
    %c1_78 = arith.constant 1 : index
    %c1_79 = arith.constant 1 : index
    %c0_80 = arith.constant 0 : index
    %c0_81 = arith.constant 0 : index
    %112 = vector.load %arg3[%c1_78, %c1_79, %c0_80, %c0_81] : memref<2x2x8x32xf32, #tpu.memory_space<vmem>>, vector<1x1x8x32xf32>
    %113 = vector.shape_cast %112 : vector<1x1x8x32xf32> to vector<8x32xf32>
    %114 = arith.subf %111, %113 : vector<8x32xf32>
    %115 = arith.mulf %114, %114 : vector<8x32xf32>
    %116 = arith.addf %109, %115 : vector<8x32xf32>
    %117 = vector.shape_cast %116 : vector<8x32xf32> to vector<1x8x32xf32>
    %cst_82 = arith.constant dense<0.000000e+00> : vector<1xf32>
    %118 = vector.multi_reduction <add>, %117, %cst_82 [1, 2] : vector<1x8x32xf32> to vector<1xf32>
    %119 = vector.shape_cast %118 : vector<1xf32> to vector<1x1x1xf32>
    %120 = vector.extract %119[0, 0, 0] : f32 from vector<1x1x1xf32>
    %c0_83 = arith.constant 0 : index
    %121 = memref.load %arg5[%c0_83] : memref<1xf32, #tpu.memory_space<smem>>
    memref.store %120, %arg5[%c0_83] : memref<1xf32, #tpu.memory_space<smem>>
    return
  }
}

</mosaic_0001>

<bundles_post_ra>
// kernel: custom-call.5
= control target key start
LH: loop header
LB: loop body
LE: loop exit
PB: predicated region body
PF: predicated region fallthrough
CT: control target
= control target key end

     0   :  { %s5921_s6 = smov 0   ;;  %s5923_s7 = smov 0   ;;  %s7690_s0 = inlined_call_operand.vmem [shape: f32[2,64,64], index: 0, kind: input, shape index: {}]   ;;  %s7691_s1 = inlined_call_operand.vmem [shape: f32[2,64,64], index: 1, kind: output, shape index: {}]  }
   0x1   :  { %s5925_s8 = smov 0  }
   0x2 LB: > { %s4739_s9 = sadd.s32 4294967295, %s5908_s8   ;;  %s26_s10 = sadd.s32 1, %s5904_s7  ;;  %s5908_s8 = sphi %s5925_s8, %s7_s8   ;;  %s5904_s7 = sphi %s5923_s7, %s7693_s7   ;;  %s5900_s6 = sphi %s5921_s6, %s7692_s6  }
   0x3   : > { %p28_p0 = scmp.ge.s32.totalorder %s26_s10, 2  ;;  %p4741_p1 = scmp.ge.s32.totalorder %s5908_s8, 2 }
   0x4   : > { %s42_s11 = sand.u32 (!%p4741_p1), 1, %s5908_s8   ;;  %s5726_s12 = sshll.u32 (!%p4741_p1), %s5904_s7, 6 }
   0x5   : > { %s7695_s10 = smov (%p28_p0, %s26_s10), 0  ;;  %40 = sbr.rel (%p4741_p1) target bundleno = 12 (0xc), region = 16 }
   0x6   : > { %s4742_s13 = sshll.u32 (!%p4741_p1), %s42_s11, 6  ;;  %s49_s16 = scalar_lea.vmem (!%p4741_p1), %s7690_s0, %s5726_s12 }
   0x7   : > { %v91_v0 = vld [vmem:[%s49_s16] sm:$0xff] (!%p4741_p1)  ;;  %v93_v1 = vld [vmem:[%s49_s16 + $0x8] sm:$0xff] (!%p4741_p1)  ;;  %v95_v2 = vld [vmem:[%s49_s16 + $0x10] sm:$0xff] (!%p4741_p1)  ;;  %s44_s17 = scalar_lea.vmem (!%p4741_p1), [#allocation0], %s4742_s13 }
   0x8   : > { %92 = vst [vmem:[%s44_s17] sm:$0xff] (!%p4741_p1), %v91_v0  ;;  %94 = vst [vmem:[%s44_s17 + $0x8] sm:$0xff] (!%p4741_p1), %v93_v1  ;;  %v97_v3 = vld [vmem:[%s49_s16 + $0x18] sm:$0xff] (!%p4741_p1)  ;;  %v99_v4 = vld [vmem:[%s49_s16 + $0x20] sm:$0xff] (!%p4741_p1) }
   0x9   : > { %96 = vst [vmem:[%s44_s17 + $0x10] sm:$0xff] (!%p4741_p1), %v95_v2  ;;  %v101_v5 = vld [vmem:[%s49_s16 + $0x28] sm:$0xff] (!%p4741_p1)  ;;  %98 = vst [vmem:[%s44_s17 + $0x18] sm:$0xff] (!%p4741_p1), %v97_v3  ;;  %v103_v6 = vld [vmem:[%s49_s16 + $0x30] sm:$0xff] (!%p4741_p1) }
   0xa   : > { %100 = vst [vmem:[%s44_s17 + $0x20] sm:$0xff] (!%p4741_p1), %v99_v4  ;;  %102 = vst [vmem:[%s44_s17 + $0x28] sm:$0xff] (!%p4741_p1), %v101_v5  ;;  %v105_v7 = vld [vmem:[%s49_s16 + $0x38] sm:$0xff] (!%p4741_p1) }
   0xb   : > { %104 = vst [vmem:[%s44_s17 + $0x30] sm:$0xff] (!%p4741_p1), %v103_v6  ;;  %106 = vst [vmem:[%s44_s17 + $0x38] sm:$0xff] (!%p4741_p1), %v105_v7 }
   0xc PF: > { %p4745_p2 = scmp.ge.s32.totalorder %s5908_s8, 1  ;;  %p111_p3 = scmp.lt.s32.totalorder %s5908_s8, 3 }
   0xe   : > { %p112_p4 = pnand %p4745_p2, %p111_p3 }
   0xf   : > { %s118_s18 = sand.u32 (!%p112_p4), 1, %s4739_s9   ;;  %v5910_v8 = vmov (!%p112_p4), 0.0   ;;  %vm144_vm0 = vcmask (!%p112_p4), 7168   ;;  %vm253_vm1 = vcmask (!%p112_p4), 15368   ;;  %vm270_vm2 = vcmask (!%p112_p4), 1047553   ;;  %s5727_s22 = sshll.u32 (!%p112_p4), %s5900_s6, 6 }
  0x10   : > { %115 = sbr.rel (%p112_p4) target bundleno = 10899 (0x2a93), region = 54  ;;  %s4746_s19 = sshll.u32 (!%p112_p4), %s118_s18, 6  ;;  %vm271_vm3 = vmand (!%p112_p4), %vm253_vm1, %vm270_vm2  ;;  %vm366_vm4 = vcmask (!%p112_p4), 23568   ;;  %vm383_vm5 = vcmask (!%p112_p4), 1047554   ;;  %vm479_vm7 = vcmask (!%p112_p4), 31768   ;;  %vm496_vm8 = vcmask (!%p112_p4), 1047555  }
  0x11   : > { %s5950_s20 = scalar_lea.vmem (!%p112_p4), [#allocation1], %s4746_s19  ;;  %s5958_s21 = scalar_lea.vmem (!%p112_p4), [#allocation0], %s4746_s19  ;;  %vm384_vm6 = vmand (!%p112_p4), %vm366_vm4, %vm383_vm5  ;;  %vm592_vm10 = vcmask (!%p112_p4), 39968   ;;  %vm609_vm11 = vcmask (!%p112_p4), 1047556   ;;  %vm705_vm13 = vcmask (!%p112_p4), 48168   ;;  %vm722_vm14 = vcmask (!%p112_p4), 1047557  }
  0x12   : > { %129 = vst [vmem:[%s5950_s20] sm:$0xff] (!%p112_p4), %v5910_v8  ;;  %v146_v12 = vld [vmem:[%s5958_s21] ss:$0 sm:$0xff] (!%p112_p4)  ;;  %v5969_v21 = vld [vmem:[%s5958_s21 + $0x8] sm:$0xff] (!%p112_p4)  ;;  %v4777_v30 = vld [vmem:[%s5958_s21 + $0x1] ss:$0 sm:$0xff] (!%p112_p4)  ;;  %s7630_s25 = scalar_lea.vmem (!%p112_p4), %s7691_s1, %s5727_s22 }
  0x13   : > { %v5962_v16 = vld [vmem:[%s5958_s21] sm:$0xff] (!%p112_p4)  ;;  %v5991_v36 = vld [vmem:[%s5958_s21 + $0x10] sm:$0xff] (!%p112_p4)  ;;  %v6015_v60 = vld [vmem:[%s5958_s21 + $0x18] sm:$0xff] (!%p112_p4) }
  0x14   : > { %v4800_v54 = vld [vmem:[%s5958_s21 + $0x2] ss:$0 sm:$0xff] (!%p112_p4)  ;;  %vm497_vm9 = vmand (!%p112_p4), %vm479_vm7, %vm496_vm8 }
  0x15   : > { %vm610_vm12 = vmand (!%p112_p4), %vm592_vm10, %vm609_vm11 }
  0x16   : > { %vm723_vm15 = vmand (!%p112_p4), %vm705_vm13, %vm722_vm14 }
  0x19   : > { %v145_v9 = vld [vmem:[%s5950_s20] ss:$0 sm:$0xff] }
  0x1a   : > { %v147_v10 = vmul.f32 %v145_v9, %v145_v9  ;;  %v5954_v11 = vmul.f32 0.0, %v145_v9 }
  0x1c   : > { %148 = vadd.xlane.f32.xlu0 %v147_v10  ;;  %167 = vadd.xlane.f32.xlu1 %v5954_v11 }
  0x20   : > { %155 = vadd.xlane.f32.xlu0 %v5954_v11 }
  0xa9   : > { %v149_v13 = vpop.xlane.xlu0 %148  ;;  %v168_v20 = vpop.xlane.xlu1 %167 }
  0xaa   : > { %v150_v14 = vsub.f32 %v146_v12, %v149_v13  ;;  %v169_v23 = vsub.f32 %v5969_v21, %v168_v20 }
  0xac   : > { %5753 = vrsqrt.f32 %v150_v14 }
  0xad   : > { %v156_v15 = vpop.xlane.xlu0 %155 }
  0xae   : > { %v157_v17 = vsub.f32 %v5962_v16, %v156_v15 }
  0xb6   : > { %v5965_v18 = vpop.eup %5753 }
  0xb7   : > { %v158_v19 = vmul.f32 %v5965_v18, %v157_v17  ;;  %v170_v24 = vmul.f32 %v5965_v18, %v169_v23 }
  0xb9   : > { %v159_v22 = vsel %vm144_vm0, %v158_v19, 0.0  ;;  %v171_v25 = vsel %vm144_vm0, %v170_v24, 0.0  ;;  %v4823_v24 = vld [vmem:[%s5958_s21 + $0x3] ss:$0 sm:$0xff] }
  0xba   : > { %161 = vst [vmem:[%s5950_s20] sm:$0xff] %v159_v22 }
  0xc1   : > { %v5977_v26 = vld [vmem:[%s5950_s20 + $0x1] ss:$0 sm:$0xff] }
  0xc2   : > { %v265_v27 = vmul.f32 %v5977_v26, %v159_v22  ;;  %v258_v28 = vmul.f32 %v5977_v26, %v5977_v26  ;;  %v279_v29 = vmul.f32 %v5977_v26, %v171_v25 }
  0xc4   : > { %266 = vadd.xlane.f32.xlu0 %v265_v27  ;;  %259 = vadd.xlane.f32.xlu1 %v258_v28 }
  0xc8   : > { %280 = vadd.xlane.f32.xlu0 %v279_v29  ;;  %180 = vadd.xlane.f32.xlu1 %v5954_v11 }
 0x151   : > { %v260_v31 = vpop.xlane.xlu1 %259  ;;  %v267_v33 = vpop.xlane.xlu0 %266 }
 0x152   : > { %v261_v32 = vsub.f32 %v4777_v30, %v260_v31  ;;  %v268_v34 = vsub.f32 %v5962_v16, %v267_v33 }
 0x154   : > { %5755 = vrsqrt.f32 %v261_v32  ;;  %v6047_v32 = vld [vmem:[%s5958_s21 + $0x20] sm:$0xff] }
 0x155   : > { %v181_v37 = vpop.xlane.xlu1 %180  ;;  %v281_v43 = vpop.xlane.xlu0 %280 }
 0x156   : > { %v182_v40 = vsub.f32 %v5991_v36, %v181_v37  ;;  %v282_v44 = vsub.f32 %v5969_v21, %v281_v43 }
 0x158   : > { %v183_v42 = vmul.f32 %v5965_v18, %v182_v40 }
 0x15a   : > { %v184_v45 = vsel %vm144_vm0, %v183_v42, 0.0 }
 0x15b   : > { %v292_v51 = vmul.f32 %v5977_v26, %v184_v45 }
 0x15e   : > { %v5986_v35 = vpop.eup %5755 }
 0x15f   : > { %v269_v38 = vmul.f32 %v5986_v35, %v268_v34  ;;  %v283_v46 = vmul.f32 %v5986_v35, %v282_v44 }
 0x161   : > { %v272_v39 = vsel %vm271_vm3, %v269_v38, 0.0  ;;  %v284_v50 = vsel %vm253_vm1, %v283_v46, 0.0  ;;  %vm818_vm3 = vcmask 56368  }
 0x162   : > { %v273_v41 = vadd.f32 %v272_v39, %v159_v22  ;;  %v285_v52 = vadd.f32 %v284_v50, %v171_v25 }
 0x164   : > { %274 = vst [vmem:[%s5950_s20] sm:$0xff] %v273_v41 }
 0x16b   : > { %v6001_v47 = vld [vmem:[%s5950_s20 + $0x2] ss:$0 sm:$0xff] }
 0x16c   : > { %v378_v48 = vmul.f32 %v6001_v47, %v273_v41  ;;  %v371_v49 = vmul.f32 %v6001_v47, %v6001_v47  ;;  %v392_v53 = vmul.f32 %v6001_v47, %v285_v52 }
 0x16e   : > { %379 = vadd.xlane.f32.xlu0 %v378_v48  ;;  %372 = vadd.xlane.f32.xlu1 %v371_v49 }
 0x172   : > { %193 = vadd.xlane.f32.xlu1 %v5954_v11  ;;  %293 = vadd.xlane.f32.xlu0 %v292_v51 }
 0x176   : > { %393 = vadd.xlane.f32.xlu1 %v392_v53 }
 0x1fb   : > { %v373_v55 = vpop.xlane.xlu1 %372  ;;  %v380_v57 = vpop.xlane.xlu0 %379 }
 0x1fc   : > { %v374_v56 = vsub.f32 %v4800_v54, %v373_v55  ;;  %v381_v58 = vsub.f32 %v5962_v16, %v380_v57 }
 0x1fe   : > { %5757 = vrsqrt.f32 %v374_v56 }
 0x1ff   : > { %v194_v61 = vpop.xlane.xlu1 %193  ;;  %v294_v1 = vpop.xlane.xlu0 %293 }
 0x200   : > { %v195_v63 = vsub.f32 %v6015_v60, %v194_v61  ;;  %v295_v3 = vsub.f32 %v5991_v36, %v294_v1 }
 0x202   : > { %v196_v4 = vmul.f32 %v5965_v18, %v195_v63  ;;  %v296_v6 = vmul.f32 %v5986_v35, %v295_v3 }
 0x203   : > { %v394_v5 = vpop.xlane.xlu1 %393 }
 0x204   : > { %v197_v7 = vsel %vm144_vm0, %v196_v4, 0.0  ;;  %v395_v8 = vsub.f32 %v5969_v21, %v394_v5  ;;  %v297_v14 = vsel %vm253_vm1, %v296_v6, 0.0 }
 0x205   : > { %v298_v17 = vadd.f32 %v297_v14, %v184_v45  ;;  %v305_v19 = vmul.f32 %v5977_v26, %v197_v7 }
 0x207   : > { %v405_v22 = vmul.f32 %v6001_v47, %v298_v17 }
 0x208   : > { %v6012_v59 = vpop.eup %5757 }
 0x209   : > { %v382_v62 = vmul.f32 %v6012_v59, %v381_v58  ;;  %v396_v9 = vmul.f32 %v6012_v59, %v395_v8 }
 0x20b   : > { %v385_v0 = vsel %vm384_vm6, %v382_v62, 0.0  ;;  %v397_v15 = vsel %vm366_vm4, %v396_v9, 0.0  ;;  %v6084_v9 = vld [vmem:[%s5958_s21 + $0x28] sm:$0xff]  ;;  %vm835_vm6 = vcmask 1047558  }
 0x20c   : > { %v386_v2 = vadd.f32 %v385_v0, %v273_v41  ;;  %v398_v20 = vadd.f32 %v397_v15, %v285_v52 }
 0x20e   : > { %387 = vst [vmem:[%s5950_s20] sm:$0xff] %v386_v2 }
 0x215   : > { %v6029_v10 = vld [vmem:[%s5950_s20 + $0x3] ss:$0 sm:$0xff] }
 0x216   : > { %v491_v12 = vmul.f32 %v6029_v10, %v386_v2  ;;  %v484_v13 = vmul.f32 %v6029_v10, %v6029_v10  ;;  %v505_v23 = vmul.f32 %v6029_v10, %v398_v20 }
 0x218   : > { %492 = vadd.xlane.f32.xlu1 %v491_v12  ;;  %485 = vadd.xlane.f32.xlu0 %v484_v13 }
 0x21c   : > { %206 = vadd.xlane.f32.xlu0 %v5954_v11  ;;  %306 = vadd.xlane.f32.xlu1 %v305_v19 }
 0x220   : > { %406 = vadd.xlane.f32.xlu0 %v405_v22  ;;  %506 = vadd.xlane.f32.xlu1 %v505_v23 }
 0x2a5   : > { %v486_v25 = vpop.xlane.xlu0 %485  ;;  %v493_v28 = vpop.xlane.xlu1 %492 }
 0x2a6   : > { %v487_v27 = vsub.f32 %v4823_v24, %v486_v25  ;;  %v494_v30 = vsub.f32 %v5962_v16, %v493_v28 }
 0x2a8   : > { %5759 = vrsqrt.f32 %v487_v27 }
 0x2a9   : > { %v207_v29 = vpop.xlane.xlu0 %206  ;;  %v307_v39 = vpop.xlane.xlu1 %306 }
 0x2aa   : > { %v208_v37 = vsub.f32 %v6047_v32, %v207_v29  ;;  %v308_v42 = vsub.f32 %v6015_v60, %v307_v39 }
 0x2ac   : > { %v209_v41 = vmul.f32 %v5965_v18, %v208_v37  ;;  %v309_v45 = vmul.f32 %v5986_v35, %v308_v42 }
 0x2ad   : > { %v407_v40 = vpop.xlane.xlu0 %406  ;;  %v507_v48 = vpop.xlane.xlu1 %506 }
 0x2ae   : > { %v408_v43 = vsub.f32 %v5991_v36, %v407_v40  ;;  %v6056_v44 = vsel %vm144_vm0, %v209_v41, 0.0  ;;  %v310_v52 = vsel %vm253_vm1, %v309_v45, 0.0  ;;  %v508_v54 = vsub.f32 %v5969_v21, %v507_v48 }
 0x2af   : > { %v311_v56 = vadd.f32 %v310_v52, %v197_v7  ;;  %v318_v58 = vmul.f32 %v5977_v26, %v6056_v44 }
 0x2b0   : > { %v409_v46 = vmul.f32 %v6012_v59, %v408_v43 }
 0x2b1   : > { %v418_v63 = vmul.f32 %v6001_v47, %v311_v56 }
 0x2b2   : > { %v6042_v31 = vpop.eup %5759  ;;  %v410_v53 = vsel %vm366_vm4, %v409_v46, 0.0 }
 0x2b3   : > { %v495_v33 = vmul.f32 %v6042_v31, %v494_v30  ;;  %v509_v55 = vmul.f32 %v6042_v31, %v508_v54  ;;  %v411_v57 = vadd.f32 %v410_v53, %v298_v17 }
 0x2b5   : > { %v498_v34 = vsel %vm497_vm9, %v495_v33, 0.0  ;;  %v510_v61 = vsel %vm479_vm7, %v509_v55, 0.0  ;;  %v518_v62 = vmul.f32 %v6029_v10, %v411_v57 }
 0x2b6   : > { %v499_v38 = vadd.f32 %v498_v34, %v386_v2  ;;  %v511_v0 = vadd.f32 %v510_v61, %v398_v20  ;;  %v4846_v2 = vld [vmem:[%s5958_s21 + $0x4] ss:$0 sm:$0xff] }
 0x2b8   : > { %500 = vst [vmem:[%s5950_s20] sm:$0xff] %v499_v38 }
 0x2bf   : > { %v6061_v49 = vld [vmem:[%s5950_s20 + $0x4] ss:$0 sm:$0xff] }
 0x2c0   : > { %v604_v50 = vmul.f32 %v6061_v49, %v499_v38  ;;  %v597_v51 = vmul.f32 %v6061_v49, %v6061_v49  ;;  %v618_v1 = vmul.f32 %v6061_v49, %v511_v0 }
 0x2c2   : > { %605 = vadd.xlane.f32.xlu1 %v604_v50  ;;  %598 = vadd.xlane.f32.xlu0 %v597_v51 }
 0x2c6   : > { %319 = vadd.xlane.f32.xlu1 %v318_v58  ;;  %219 = vadd.xlane.f32.xlu0 %v5954_v11 }
 0x2ca   : > { %519 = vadd.xlane.f32.xlu1 %v518_v62  ;;  %419 = vadd.xlane.f32.xlu0 %v418_v63 }
 0x2ce   : > { %619 = vadd.xlane.f32.xlu0 %v618_v1  ;;  %v6130_v1 = vld [vmem:[%s5958_s21 + $0x30] sm:$0xff] }
 0x34f   : > { %v599_v3 = vpop.xlane.xlu0 %598  ;;  %v606_v5 = vpop.xlane.xlu1 %605 }
 0x350   : > { %v600_v4 = vsub.f32 %v4846_v2, %v599_v3  ;;  %v607_v7 = vsub.f32 %v5962_v16, %v606_v5 }
 0x352   : > { %5761 = vrsqrt.f32 %v600_v4 }
 0x353   : > { %v220_v6 = vpop.xlane.xlu0 %219  ;;  %v320_v13 = vpop.xlane.xlu1 %319 }
 0x354   : > { %v221_v15 = vsub.f32 %v6084_v9, %v220_v6  ;;  %v321_v22 = vsub.f32 %v6047_v32, %v320_v13 }
 0x356   : > { %v222_v20 = vmul.f32 %v5965_v18, %v221_v15  ;;  %v322_v28 = vmul.f32 %v5986_v35, %v321_v22 }
 0x357   : > { %v420_v19 = vpop.xlane.xlu0 %419  ;;  %v520_v24 = vpop.xlane.xlu1 %519 }
 0x358   : > { %v421_v23 = vsub.f32 %v6015_v60, %v420_v19  ;;  %v6093_v27 = vsel %vm144_vm0, %v222_v20, 0.0  ;;  %v521_v30 = vsub.f32 %v5991_v36, %v520_v24  ;;  %v323_v39 = vsel %vm253_vm1, %v322_v28, 0.0 }
 0x359   : > { %v324_v43 = vadd.f32 %v323_v39, %v6056_v44  ;;  %v331_v46 = vmul.f32 %v5977_v26, %v6093_v27 }
 0x35a   : > { %v422_v29 = vmul.f32 %v6012_v59, %v421_v23  ;;  %v522_v41 = vmul.f32 %v6042_v31, %v521_v30 }
 0x35b   : > { %v620_v25 = vpop.xlane.xlu0 %619  ;;  %v431_v53 = vmul.f32 %v6001_v47, %v324_v43 }
 0x35c   : > { %v6079_v8 = vpop.eup %5761  ;;  %v621_v33 = vsub.f32 %v5969_v21, %v620_v25  ;;  %v423_v40 = vsel %vm366_vm4, %v422_v29, 0.0  ;;  %v523_v48 = vsel %vm479_vm7, %v522_v41, 0.0 }
 0x35d   : > { %v608_v12 = vmul.f32 %v6079_v8, %v607_v7  ;;  %v6110_v45 = vadd.f32 %v423_v40, %v311_v56  ;;  %v524_v51 = vadd.f32 %v523_v48, %v411_v57  ;;  %v4869_v56 = vld [vmem:[%s5958_s21 + $0x5] ss:$0 sm:$0xff] }
 0x35e   : > { %v622_v42 = vmul.f32 %v6079_v8, %v621_v33 }
 0x35f   : > { %v611_v14 = vsel %vm610_vm12, %v608_v12, 0.0  ;;  %v531_v52 = vmul.f32 %v6029_v10, %v6110_v45  ;;  %v631_v55 = vmul.f32 %v6061_v49, %v524_v51 }
 0x360   : > { %v612_v17 = vadd.f32 %v611_v14, %v499_v38  ;;  %v623_v50 = vsel %vm592_vm10, %v622_v42, 0.0 }
 0x361   : > { %v6120_v44 = vadd.f32 %v623_v50, %v511_v0 }
 0x362   : > { %613 = vst [vmem:[%s5950_s20] sm:$0xff] %v612_v17 }
 0x369   : > { %v6100_v34 = vld [vmem:[%s5950_s20 + $0x5] ss:$0 sm:$0xff] }
 0x36a   : > { %v717_v37 = vmul.f32 %v6100_v34, %v612_v17  ;;  %v710_v38 = vmul.f32 %v6100_v34, %v6100_v34  ;;  %v731_v54 = vmul.f32 %v6100_v34, %v6120_v44 }
 0x36c   : > { %718 = vadd.xlane.f32.xlu0 %v717_v37  ;;  %711 = vadd.xlane.f32.xlu1 %v710_v38 }
 0x370   : > { %332 = vadd.xlane.f32.xlu0 %v331_v46  ;;  %232 = vadd.xlane.f32.xlu1 %v5954_v11 }
 0x374   : > { %532 = vadd.xlane.f32.xlu0 %v531_v52  ;;  %432 = vadd.xlane.f32.xlu1 %v431_v53 }
 0x378   : > { %732 = vadd.xlane.f32.xlu0 %v731_v54  ;;  %632 = vadd.xlane.f32.xlu1 %v631_v55 }
 0x3f9   : > { %v712_v58 = vpop.xlane.xlu1 %711  ;;  %v719_v61 = vpop.xlane.xlu0 %718 }
 0x3fa   : > { %v713_v57 = vsub.f32 %v4869_v56, %v712_v58  ;;  %v720_v63 = vsub.f32 %v5962_v16, %v719_v61 }
 0x3fc   : > { %5763 = vrsqrt.f32 %v713_v57 }
 0x3fd   : > { %v233_v62 = vpop.xlane.xlu1 %232  ;;  %v333_v3 = vpop.xlane.xlu0 %332 }
 0x3fe   : > { %v234_v5 = vsub.f32 %v6130_v1, %v233_v62  ;;  %v334_v12 = vsub.f32 %v6084_v9, %v333_v3  ;;  %v6185_v62 = vld [vmem:[%s5958_s21 + $0x38] sm:$0xff] }
 0x400   : > { %v235_v13 = vmul.f32 %v5965_v18, %v234_v5  ;;  %v335_v20 = vmul.f32 %v5986_v35, %v334_v12 }
 0x401   : > { %v433_v4 = vpop.xlane.xlu1 %432  ;;  %v533_v15 = vpop.xlane.xlu0 %532 }
 0x402   : > { %v434_v14 = vsub.f32 %v6047_v32, %v433_v4  ;;  %v6145_v22 = vsel %vm144_vm0, %v235_v13, 0.0  ;;  %v534_v23 = vsub.f32 %v6015_v60, %v533_v15  ;;  %v336_v33 = vsel %vm253_vm1, %v335_v20, 0.0 }
 0x403   : > { %v337_v41 = vadd.f32 %v336_v33, %v6093_v27  ;;  %v344_v46 = vmul.f32 %v5977_v26, %v6145_v22 }
 0x404   : > { %v535_v37 = vmul.f32 %v6042_v31, %v534_v23 }
 0x405   : > { %v633_v19 = vpop.xlane.xlu1 %632  ;;  %v733_v28 = vpop.xlane.xlu0 %732  ;;  %v444_v27 = vmul.f32 %v6001_v47, %v337_v41 }
 0x406   : > { %v6127_v0 = vpop.eup %5763  ;;  %v634_v24 = vsub.f32 %v5991_v36, %v633_v19  ;;  %v734_v40 = vsub.f32 %v5969_v21, %v733_v28  ;;  %v536_v48 = vsel %vm479_vm7, %v535_v37, 0.0 }
 0x407   : > { %v721_v2 = vmul.f32 %v6127_v0, %v720_v63  ;;  %v537_v53 = vadd.f32 %v536_v48, %v6110_v45 }
 0x408   : > { %v635_v39 = vmul.f32 %v6079_v8, %v634_v24  ;;  %v735_v52 = vmul.f32 %v6127_v0, %v734_v40 }
 0x409   : > { %v724_v6 = vsel %vm723_vm15, %v721_v2, 0.0 }
 0x40a   : > { %v6136_v7 = vadd.f32 %v724_v6, %v612_v17  ;;  %v435_v17 = vmul.f32 %v6012_v59, %v434_v14  ;;  %v636_v50 = vsel %vm592_vm10, %v635_v39, 0.0  ;;  %v736_v55 = vsel %vm705_vm13, %v735_v52, 0.0 }
 0x40b   : > { %v6172_v54 = vadd.f32 %v636_v50, %v524_v51  ;;  %v737_v58 = vadd.f32 %v736_v55, %v6120_v44  ;;  %v4892_v51 = vld [vmem:[%s5958_s21 + $0x6] ss:$0 sm:$0xff] }
 0x40c   : > { %726 = vst [vmem:[%s5950_s20] sm:$0xff] %v6136_v7  ;;  %v436_v38 = vsel %vm366_vm4, %v435_v17, 0.0 }
 0x40d   : > { %v6163_v42 = vadd.f32 %v436_v38, %v324_v43  ;;  %v744_v56 = vmul.f32 %v6100_v34, %v6172_v54 }
 0x40f   : > { %v544_v43 = vmul.f32 %v6029_v10, %v6163_v42 }
 0x413   : > { %v6151_v25 = vld [vmem:[%s5950_s20 + $0x6] ss:$0 sm:$0xff] }
 0x414   : > { %v830_v29 = vmul.f32 %v6151_v25, %v6136_v7  ;;  %v823_v30 = vmul.f32 %v6151_v25, %v6151_v25  ;;  %v844_v45 = vmul.f32 %v6151_v25, %v737_v58 }
 0x416   : > { %831 = vadd.xlane.f32.xlu0 %v830_v29  ;;  %824 = vadd.xlane.f32.xlu1 %v823_v30 }
 0x41a   : > { %245 = vadd.xlane.f32.xlu1 %v5954_v11  ;;  %345 = vadd.xlane.f32.xlu0 %v344_v46  ;;  %v644_v11 = vmul.f32 %v6061_v49, %v537_v53 }
 0x41e   : > { %445 = vadd.xlane.f32.xlu1 %v444_v27  ;;  %545 = vadd.xlane.f32.xlu0 %v544_v43 }
 0x422   : > { %645 = vadd.xlane.f32.xlu1 %v644_v11  ;;  %745 = vadd.xlane.f32.xlu0 %v744_v56 }
 0x426   : > { %845 = vadd.xlane.f32.xlu1 %v844_v45 }
 0x4a3   : > { %v825_v57 = vpop.xlane.xlu1 %824  ;;  %v832_v63 = vpop.xlane.xlu0 %831 }
 0x4a4   : > { %v826_v61 = vsub.f32 %v4892_v51, %v825_v57  ;;  %v833_v14 = vsub.f32 %v5962_v16, %v832_v63 }
 0x4a6   : > { %5765 = vrsqrt.f32 %v826_v61 }
 0x4a7   : > { %v246_v2 = vpop.xlane.xlu1 %245  ;;  %v346_v6 = vpop.xlane.xlu0 %345 }
 0x4a8   : > { %v247_v3 = vsub.f32 %v6185_v62, %v246_v2  ;;  %v347_v29 = vsub.f32 %v6130_v1, %v346_v6 }
 0x4aa   : > { %v248_v4 = vmul.f32 %v5965_v18, %v247_v3  ;;  %v348_v46 = vmul.f32 %v5986_v35, %v347_v29  ;;  %v4915_v29 = vld [vmem:[%s5958_s21 + $0x7] ss:$0 sm:$0xff] }
 0x4ab   : > { %v446_v5 = vpop.xlane.xlu1 %445  ;;  %v546_v28 = vpop.xlane.xlu0 %545 }
 0x4ac   : > { %v249_v44 = vsel %vm144_vm0, %v248_v4, 0.0  ;;  %v447_v12 = vsub.f32 %v6084_v9, %v446_v5  ;;  %vm836_vm0 = vmand %vm818_vm3, %vm835_vm6  ;;  %v547_v48 = vsub.f32 %v6047_v32, %v546_v28 }
 0x4ad   : > { %v357_v19 = vmul.f32 %v5977_v26, %v249_v44 }
 0x4ae   : > { %v448_v13 = vmul.f32 %v6012_v59, %v447_v12  ;;  %v548_v43 = vmul.f32 %v6042_v31, %v547_v48 }
 0x4af   : > { %v646_v15 = vpop.xlane.xlu1 %645  ;;  %358 = vadd.xlane.f32.xlu1 %v357_v19  ;;  %v746_v52 = vpop.xlane.xlu0 %745 }
 0x4b0   : > { %v6194_v20 = vpop.eup %5765  ;;  %v449_v23 = vsel %vm366_vm4, %v448_v13, 0.0  ;;  %v647_v18 = vsub.f32 %v6015_v60, %v646_v15  ;;  %v549_v57 = vsel %vm479_vm7, %v548_v43, 0.0 }
 0x4b1   : > { %v450_v17 = vadd.f32 %v449_v23, %v337_v41  ;;  %v834_v24 = vmul.f32 %v6194_v20, %v833_v14  ;;  %v550_v63 = vadd.f32 %v549_v57, %v6163_v42 }
 0x4b2   : > { %v648_v16 = vmul.f32 %v6079_v8, %v647_v18 }
 0x4b3   : > { %v837_v26 = vsel %vm836_vm0, %v834_v24, 0.0  ;;  %v846_v30 = vpop.xlane.xlu1 %845  ;;  %v557_v33 = vmul.f32 %v6029_v10, %v450_v17  ;;  %v657_v3 = vmul.f32 %v6061_v49, %v550_v63 }
 0x4b4   : > { %v649_v37 = vsel %vm592_vm10, %v648_v16, 0.0  ;;  %v838_v38 = vadd.f32 %v837_v26, %v6136_v7  ;;  %v847_v39 = vsub.f32 %v5969_v21, %v846_v30  ;;  %v349_v7 = vsel %vm253_vm1, %v348_v46, 0.0 }
 0x4b5   : > { %v650_v40 = vadd.f32 %v649_v37, %v537_v53  ;;  %558 = vadd.xlane.f32.xlu1 %v557_v33  ;;  %v747_v53 = vsub.f32 %v5991_v36, %v746_v52  ;;  %v350_v56 = vadd.f32 %v349_v7, %v6145_v22 }
 0x4b6   : > { %v848_v41 = vmul.f32 %v6194_v20, %v847_v39  ;;  %839 = vst [vmem:[%s5950_s20] sm:$0xff] %v838_v38 }
 0x4b7   : > { %v757_v50 = vmul.f32 %v6100_v34, %v650_v40  ;;  %v748_v61 = vmul.f32 %v6127_v0, %v747_v53 }
 0x4b8   : > { %v849_v27 = vsel %vm818_vm3, %v848_v41, 0.0 }
 0x4b9   : > { %758 = vadd.xlane.f32.xlu1 %v757_v50  ;;  %v6216_v55 = vadd.f32 %v849_v27, %v737_v58  ;;  %v457_v58 = vmul.f32 %v6001_v47, %v350_v56  ;;  %v749_v2 = vsel %vm705_vm13, %v748_v61, 0.0 }
 0x4ba   : > { %v750_v22 = vadd.f32 %v749_v2, %v6172_v54 }
 0x4bc   : > { %v857_v4 = vmul.f32 %v6151_v25, %v750_v22 }
 0x4bd   : > { %v6219_v11 = vld [vmem:[%s5950_s20 + $0x7] ss:$0 sm:$0xff] }
 0x4be   : > { %v936_v45 = vmul.f32 %v6219_v11, %v6219_v11  ;;  %v957_v51 = vmul.f32 %v6219_v11, %v6216_v55 }
 0x4c0   : > { %937 = vadd.xlane.f32.xlu0 %v936_v45  ;;  %958 = vadd.xlane.f32.xlu1 %v957_v51 }
 0x4c4   : > { %458 = vadd.xlane.f32.xlu0 %v457_v58 }
 0x4c8   : > { %658 = vadd.xlane.f32.xlu0 %v657_v3 }
 0x4cc   : > { %858 = vadd.xlane.f32.xlu0 %v857_v4 }
 0x53c   : > { %v359_v5 = vpop.xlane.xlu1 %358 }
 0x53d   : > { %v360_v6 = vsub.f32 %v6185_v62, %v359_v5 }
 0x53f   : > { %v361_v12 = vmul.f32 %v5986_v35, %v360_v6 }
 0x541   : > { %v362_v13 = vsel %vm253_vm1, %v361_v12, 0.0  ;;  %vm931_vm1 = vcmask 64568  }
 0x542   : > { %v559_v42 = vpop.xlane.xlu1 %558  ;;  %v363_v15 = vadd.f32 %v362_v13, %v249_v44 }
 0x543   : > { %v560_v14 = vsub.f32 %v6084_v9, %v559_v42 }
 0x544   : > { %v470_v23 = vmul.f32 %v6001_v47, %v363_v15 }
 0x545   : > { %v561_v54 = vmul.f32 %v6042_v31, %v560_v14 }
 0x546   : > { %v759_v19 = vpop.xlane.xlu1 %758  ;;  %471 = vadd.xlane.f32.xlu0 %v470_v23 }
 0x547   : > { %v562_v18 = vsel %vm479_vm7, %v561_v54, 0.0  ;;  %v760_v24 = vsub.f32 %v6015_v60, %v759_v19 }
 0x548   : > { %v563_v28 = vadd.f32 %v562_v18, %v450_v17 }
 0x549   : > { %v761_v16 = vmul.f32 %v6127_v0, %v760_v24 }
 0x54a   : > { %v670_v35 = vmul.f32 %v6061_v49, %v563_v28 }
 0x54b   : > { %v762_v26 = vsel %vm705_vm13, %v761_v16, 0.0 }
 0x54c   : > { %v763_v30 = vadd.f32 %v762_v26, %v650_v40  ;;  %671 = vadd.xlane.f32.xlu0 %v670_v35 }
 0x54d   : > { %v938_v44 = vpop.xlane.xlu0 %937  ;;  %v959_v46 = vpop.xlane.xlu1 %958 }
 0x54e   : > { %v939_v33 = vsub.f32 %v4915_v29, %v938_v44  ;;  %v870_v37 = vmul.f32 %v6151_v25, %v763_v30  ;;  %v960_v52 = vsub.f32 %v5969_v21, %v959_v46 }
 0x550   : > { %5767 = vrsqrt.f32 %v939_v33  ;;  %871 = vadd.xlane.f32.xlu0 %v870_v37 }
 0x551   : > { %v459_v47 = vpop.xlane.xlu0 %458 }
 0x552   : > { %v460_v38 = vsub.f32 %v6130_v1, %v459_v47 }
 0x554   : > { %v461_v17 = vmul.f32 %v6012_v59, %v460_v38  ;;  %v6293_v38 = vld [vmem:[%s5958_s21 + $0x10] sm:$0xff] }
 0x555   : > { %v659_v39 = vpop.xlane.xlu0 %658 }
 0x556   : > { %v462_v41 = vsel %vm366_vm4, %v461_v17, 0.0  ;;  %v660_v48 = vsub.f32 %v6047_v32, %v659_v39 }
 0x557   : > { %v463_v50 = vadd.f32 %v462_v41, %v350_v56 }
 0x558   : > { %v661_v40 = vmul.f32 %v6079_v8, %v660_v48 }
 0x559   : > { %v859_v27 = vpop.xlane.xlu0 %858  ;;  %v570_v7 = vmul.f32 %v6029_v10, %v463_v50 }
 0x55a   : > { %v6254_v43 = vpop.eup %5767  ;;  %v662_v53 = vsel %vm592_vm10, %v661_v40, 0.0  ;;  %v860_v45 = vsub.f32 %v5991_v36, %v859_v27  ;;  %v4938_v27 = vld [vmem:[%s5958_s21 + $0x8] ss:$0 sm:$0xff] }
 0x55b   : > { %v961_v51 = vmul.f32 %v6254_v43, %v960_v52  ;;  %v663_v57 = vadd.f32 %v662_v53, %v550_v63  ;;  %571 = vadd.xlane.f32.xlu1 %v570_v7 }
 0x55c   : > { %v861_v56 = vmul.f32 %v6194_v20, %v860_v45 }
 0x55d   : > { %v962_v21 = vsel %vm931_vm1, %v961_v51, 0.0  ;;  %v770_v61 = vmul.f32 %v6100_v34, %v663_v57 }
 0x55e   : > { %v6263_v58 = vadd.f32 %v962_v21, %v6216_v55  ;;  %v862_v2 = vsel %vm818_vm3, %v861_v56, 0.0  ;;  %v6305_v56 = vld [vmem:[%s5958_s21 + $0x8] sm:$0xff] }
 0x55f   : > { %v863_v3 = vadd.f32 %v862_v2, %v750_v22  ;;  %771 = vadd.xlane.f32.xlu1 %v770_v61 }
 0x560   : > { %4918 = vst [vmem:[%s5950_s20 + $0x8] sm:$0xff] %v6263_v58 }
 0x561   : > { %v970_v36 = vmul.f32 %v6219_v11, %v863_v3 }
 0x563   : > { %971 = vadd.xlane.f32.xlu1 %v970_v36 }
 0x567   : > { %v6270_v63 = vld [vmem:[%s5950_s20 + $0x8] ss:$0 sm:$0xff] }
 0x568   : > { %v1049_v4 = vmul.f32 %v6270_v63, %v6270_v63  ;;  %v1058_v5 = vmul.f32 %v6270_v63, %v6263_v58 }
 0x56a   : > { %1050 = vadd.xlane.f32.xlu0 %v1049_v4  ;;  %1059 = vadd.xlane.f32.xlu1 %v1058_v5 }
 0x5d3   : > { %v472_v55 = vpop.xlane.xlu0 %471 }
 0x5d4   : > { %v473_v6 = vsub.f32 %v6185_v62, %v472_v55 }
 0x5d6   : > { %v474_v22 = vmul.f32 %v6012_v59, %v473_v6 }
 0x5d8   : > { %v475_v42 = vsel %vm366_vm4, %v474_v22, 0.0  ;;  %vm1044_vm4 = vcmask 72768  }
 0x5d9   : > { %v672_v12 = vpop.xlane.xlu0 %671  ;;  %v476_v14 = vadd.f32 %v475_v42, %v363_v15 }
 0x5da   : > { %v673_v13 = vsub.f32 %v6084_v9, %v672_v12 }
 0x5db   : > { %v583_v23 = vmul.f32 %v6029_v10, %v476_v14 }
 0x5dc   : > { %v674_v54 = vmul.f32 %v6079_v8, %v673_v13 }
 0x5dd   : > { %v872_v19 = vpop.xlane.xlu0 %871  ;;  %584 = vadd.xlane.f32.xlu0 %v583_v23 }
 0x5de   : > { %v675_v18 = vsel %vm592_vm10, %v674_v54, 0.0  ;;  %v873_v24 = vsub.f32 %v6015_v60, %v872_v19  ;;  %v6325_v19 = vld [vmem:[%s5958_s21 + $0x18] sm:$0xff] }
 0x5df   : > { %v676_v16 = vadd.f32 %v675_v18, %v563_v28 }
 0x5e0   : > { %v874_v59 = vmul.f32 %v6194_v20, %v873_v24 }
 0x5e1   : > { %v783_v35 = vmul.f32 %v6100_v34, %v676_v16 }
 0x5e2   : > { %v875_v29 = vsel %vm818_vm3, %v874_v59, 0.0 }
 0x5e3   : > { %v876_v26 = vadd.f32 %v875_v29, %v763_v30  ;;  %784 = vadd.xlane.f32.xlu0 %v783_v35 }
 0x5e5   : > { %v983_v15 = vmul.f32 %v6219_v11, %v876_v26 }
 0x5e7   : > { %984 = vadd.xlane.f32.xlu0 %v983_v15 }
 0x5e8   : > { %v572_v44 = vpop.xlane.xlu1 %571 }
 0x5e9   : > { %v573_v10 = vsub.f32 %v6130_v1, %v572_v44 }
 0x5eb   : > { %v574_v60 = vmul.f32 %v6042_v31, %v573_v10 }
 0x5ec   : > { %v772_v28 = vpop.xlane.xlu1 %771 }
 0x5ed   : > { %v575_v33 = vsel %vm479_vm7, %v574_v60, 0.0  ;;  %v773_v37 = vsub.f32 %v6047_v32, %v772_v28 }
 0x5ee   : > { %v576_v47 = vadd.f32 %v575_v33, %v463_v50 }
 0x5ef   : > { %v774_v30 = vmul.f32 %v6127_v0, %v773_v37 }
 0x5f0   : > { %v972_v17 = vpop.xlane.xlu1 %971  ;;  %v683_v39 = vmul.f32 %v6061_v49, %v576_v47 }
 0x5f1   : > { %v775_v41 = vsel %vm705_vm13, %v774_v30, 0.0  ;;  %v973_v46 = vsub.f32 %v6293_v38, %v972_v17 }
 0x5f2   : > { %v776_v48 = vadd.f32 %v775_v41, %v663_v57  ;;  %684 = vadd.xlane.f32.xlu1 %v683_v39 }
 0x5f3   : > { %v974_v40 = vmul.f32 %v6254_v43, %v973_v46 }
 0x5f4   : > { %v883_v52 = vmul.f32 %v6151_v25, %v776_v48 }
 0x5f5   : > { %v975_v50 = vsel %vm931_vm1, %v974_v40, 0.0 }
 0x5f6   : > { %v976_v7 = vadd.f32 %v975_v50, %v863_v3  ;;  %884 = vadd.xlane.f32.xlu1 %v883_v52 }
 0x5f7   : > { %v1051_v53 = vpop.xlane.xlu0 %1050  ;;  %v1060_v57 = vpop.xlane.xlu1 %1059 }
 0x5f8   : > { %v1052_v45 = vsub.f32 %v4938_v27, %v1051_v53  ;;  %v1071_v51 = vmul.f32 %v6270_v63, %v976_v7  ;;  %v1061_v21 = vsub.f32 %v6305_v56, %v1060_v57  ;;  %v4961_v53 = vld [vmem:[%s5958_s21 + $0x9] ss:$0 sm:$0xff] }
 0x5fa   : > { %5769 = vrsqrt.f32 %v1052_v45  ;;  %1072 = vadd.xlane.f32.xlu1 %v1071_v51 }
 0x604   : > { %v6308_v61 = vpop.eup %5769 }
 0x605   : > { %v1062_v2 = vmul.f32 %v6308_v61, %v1061_v21 }
 0x607   : > { %v1063_v3 = vsel %vm1044_vm4, %v1062_v2, 0.0 }
 0x608   : > { %v1064_v36 = vadd.f32 %v1063_v3, %v6263_v58 }
 0x60a   : > { %4941 = vst [vmem:[%s5950_s20 + $0x8] sm:$0xff] %v1064_v36 }
 0x611   : > { %v6315_v4 = vld [vmem:[%s5950_s20 + $0x9] ss:$0 sm:$0xff] }
 0x612   : > { %v1159_v5 = vmul.f32 %v6315_v4, %v1064_v36  ;;  %v1150_v55 = vmul.f32 %v6315_v4, %v6315_v4 }
 0x614   : > { %1160 = vadd.xlane.f32.xlu1 %v1159_v5  ;;  %1151 = vadd.xlane.f32.xlu0 %v1150_v55 }
 0x66a   : > { %v585_v6 = vpop.xlane.xlu0 %584 }
 0x66b   : > { %v586_v22 = vsub.f32 %v6185_v62, %v585_v6 }
 0x66d   : > { %v587_v12 = vmul.f32 %v6042_v31, %v586_v22 }
 0x66f   : > { %v588_v13 = vsel %vm479_vm7, %v587_v12, 0.0  ;;  %vm1145_vm7 = vcmask 80968  }
 0x670   : > { %v785_v42 = vpop.xlane.xlu0 %784  ;;  %v589_v54 = vadd.f32 %v588_v13, %v476_v14  ;;  %vm1165_vm9 = vmand %vm1145_vm7, %vm270_vm2 }
 0x671   : > { %v786_v58 = vsub.f32 %v6084_v9, %v785_v42 }
 0x672   : > { %v696_v24 = vmul.f32 %v6061_v49, %v589_v54 }
 0x673   : > { %v787_v23 = vmul.f32 %v6127_v0, %v786_v58 }
 0x674   : > { %v985_v18 = vpop.xlane.xlu0 %984  ;;  %697 = vadd.xlane.f32.xlu0 %v696_v24 }
 0x675   : > { %v788_v59 = vsel %vm705_vm13, %v787_v23, 0.0  ;;  %v986_v35 = vsub.f32 %v6325_v19, %v985_v18 }
 0x676   : > { %v789_v29 = vadd.f32 %v788_v59, %v676_v16 }
 0x677   : > { %v987_v31 = vmul.f32 %v6254_v43, %v986_v35 }
 0x678   : > { %v896_v15 = vmul.f32 %v6151_v25, %v789_v29 }
 0x679   : > { %v988_v44 = vsel %vm931_vm1, %v987_v31, 0.0 }
 0x67a   : > { %v989_v14 = vadd.f32 %v988_v44, %v876_v26  ;;  %897 = vadd.xlane.f32.xlu0 %v896_v15 }
 0x67c   : > { %v1084_v10 = vmul.f32 %v6270_v63, %v989_v14 }
 0x67e   : > { %1085 = vadd.xlane.f32.xlu0 %v1084_v10 }
 0x67f   : > { %v685_v60 = vpop.xlane.xlu1 %684 }
 0x680   : > { %v686_v49 = vsub.f32 %v6130_v1, %v685_v60 }
 0x682   : > { %v687_v28 = vmul.f32 %v6079_v8, %v686_v49  ;;  %v6375_v49 = vld [vmem:[%s5958_s21 + $0x20] sm:$0xff] }
 0x683   : > { %v885_v33 = vpop.xlane.xlu1 %884 }
 0x684   : > { %v688_v16 = vsel %vm592_vm10, %v687_v28, 0.0  ;;  %v886_v37 = vsub.f32 %v6047_v32, %v885_v33 }
 0x685   : > { %v689_v30 = vadd.f32 %v688_v16, %v576_v47 }
 0x686   : > { %v887_v17 = vmul.f32 %v6194_v20, %v886_v37 }
 0x687   : > { %v1073_v39 = vpop.xlane.xlu1 %1072  ;;  %v796_v26 = vmul.f32 %v6100_v34, %v689_v30 }
 0x688   : > { %v888_v41 = vsel %vm818_vm3, %v887_v17, 0.0  ;;  %v1074_v46 = vsub.f32 %v6293_v38, %v1073_v39 }
 0x689   : > { %v889_v40 = vadd.f32 %v888_v41, %v776_v48  ;;  %797 = vadd.xlane.f32.xlu1 %v796_v26 }
 0x68a   : > { %v1075_v52 = vmul.f32 %v6308_v61, %v1074_v46 }
 0x68b   : > { %v996_v27 = vmul.f32 %v6219_v11, %v889_v40 }
 0x68c   : > { %v1076_v50 = vsel %vm1044_vm4, %v1075_v52, 0.0 }
 0x68d   : > { %v1077_v32 = vadd.f32 %v1076_v50, %v976_v7  ;;  %997 = vadd.xlane.f32.xlu1 %v996_v27 }
 0x68f   : > { %v1174_v47 = vmul.f32 %v6315_v4, %v1077_v32 }
 0x691   : > { %1175 = vadd.xlane.f32.xlu1 %v1174_v47 }
 0x6a1   : > { %v1152_v45 = vpop.xlane.xlu0 %1151  ;;  %v1161_v57 = vpop.xlane.xlu1 %1160 }
 0x6a2   : > { %v1153_v51 = vsub.f32 %v4961_v53, %v1152_v45  ;;  %v1162_v48 = vsub.f32 %v6305_v56, %v1161_v57  ;;  %v4984_v53 = vld [vmem:[%s5958_s21 + $0xa] ss:$0 sm:$0xff] }
 0x6a4   : > { %5771 = vrsqrt.f32 %v1153_v51 }
 0x6ae   : > { %v6349_v21 = vpop.eup %5771 }
 0x6af   : > { %v1163_v7 = vmul.f32 %v6349_v21, %v1162_v48 }
 0x6b1   : > { %v1166_v2 = vsel %vm1165_vm9, %v1163_v7, 0.0  ;;  %vm1557_vm9 = vcmask 113768  }
 0x6b2   : > { %v1167_v3 = vadd.f32 %v1166_v2, %v1064_v36 }
 0x6b4   : > { %4964 = vst [vmem:[%s5950_s20 + $0x8] sm:$0xff] %v1167_v3 }
 0x6bb   : > { %v6356_v5 = vld [vmem:[%s5950_s20 + $0xa] ss:$0 sm:$0xff] }
 0x6bc   : > { %v1262_v55 = vmul.f32 %v6356_v5, %v1167_v3  ;;  %v1253_v6 = vmul.f32 %v6356_v5, %v6356_v5 }
 0x6be   : > { %1263 = vadd.xlane.f32.xlu1 %v1262_v55  ;;  %1254 = vadd.xlane.f32.xlu0 %v1253_v6 }
 0x701   : > { %v698_v22 = vpop.xlane.xlu0 %697 }
 0x702   : > { %v699_v12 = vsub.f32 %v6185_v62, %v698_v22 }
 0x704   : > { %v700_v42 = vmul.f32 %v6079_v8, %v699_v12 }
 0x706   : > { %v701_v58 = vsel %vm592_vm10, %v700_v42, 0.0  ;;  %vm1248_vm10 = vcmask 89168  }
 0x707   : > { %v898_v13 = vpop.xlane.xlu0 %897  ;;  %v702_v23 = vadd.f32 %v701_v58, %v589_v54  ;;  %vm1268_vm12 = vmand %vm1248_vm10, %vm383_vm5 }
 0x708   : > { %v899_v36 = vsub.f32 %v6084_v9, %v898_v13  ;;  %v6404_v13 = vld [vmem:[%s5958_s21 + $0x28] sm:$0xff] }
 0x709   : > { %v809_v59 = vmul.f32 %v6100_v34, %v702_v23 }
 0x70a   : > { %v900_v18 = vmul.f32 %v6194_v20, %v899_v36 }
 0x70b   : > { %v1086_v24 = vpop.xlane.xlu0 %1085  ;;  %810 = vadd.xlane.f32.xlu0 %v809_v59 }
 0x70c   : > { %v901_v35 = vsel %vm818_vm3, %v900_v18, 0.0  ;;  %v1087_v31 = vsub.f32 %v6325_v19, %v1086_v24 }
 0x70d   : > { %v902_v15 = vadd.f32 %v901_v35, %v789_v29 }
 0x70e   : > { %v1088_v8 = vmul.f32 %v6308_v61, %v1087_v31 }
 0x70f   : > { %v1009_v44 = vmul.f32 %v6219_v11, %v902_v15 }
 0x710   : > { %v1089_v10 = vsel %vm1044_vm4, %v1088_v8, 0.0 }
 0x711   : > { %v1090_v9 = vadd.f32 %v1089_v10, %v989_v14  ;;  %1010 = vadd.xlane.f32.xlu0 %v1009_v44 }
 0x713   : > { %v1187_v54 = vmul.f32 %v6315_v4, %v1090_v9 }
 0x715   : > { %1188 = vadd.xlane.f32.xlu0 %v1187_v54 }
 0x716   : > { %v798_v60 = vpop.xlane.xlu1 %797 }
 0x717   : > { %v799_v34 = vsub.f32 %v6130_v1, %v798_v60 }
 0x719   : > { %v800_v28 = vmul.f32 %v6127_v0, %v799_v34 }
 0x71a   : > { %v998_v29 = vpop.xlane.xlu1 %997 }
 0x71b   : > { %v801_v33 = vsel %vm705_vm13, %v800_v28, 0.0  ;;  %v999_v16 = vsub.f32 %v6375_v49, %v998_v29 }
 0x71c   : > { %v802_v37 = vadd.f32 %v801_v33, %v689_v30 }
 0x71d   : > { %v1000_v14 = vmul.f32 %v6254_v43, %v999_v16 }
 0x71e   : > { %v1176_v17 = vpop.xlane.xlu1 %1175  ;;  %v909_v39 = vmul.f32 %v6151_v25, %v802_v37 }
 0x71f   : > { %v1001_v26 = vsel %vm931_vm1, %v1000_v14, 0.0  ;;  %v1177_v41 = vsub.f32 %v6293_v38, %v1176_v17 }
 0x720   : > { %v1002_v46 = vadd.f32 %v1001_v26, %v889_v40  ;;  %910 = vadd.xlane.f32.xlu1 %v909_v39 }
 0x721   : > { %v1178_v52 = vmul.f32 %v6349_v21, %v1177_v41 }
 0x722   : > { %v1097_v27 = vmul.f32 %v6270_v63, %v1002_v46 }
 0x723   : > { %v1179_v50 = vsel %vm1145_vm7, %v1178_v52, 0.0 }
 0x724   : > { %v1180_v47 = vadd.f32 %v1179_v50, %v1077_v32  ;;  %1098 = vadd.xlane.f32.xlu1 %v1097_v27 }
 0x726   : > { %v1277_v30 = vmul.f32 %v6356_v5, %v1180_v47 }
 0x728   : > { %1278 = vadd.xlane.f32.xlu1 %v1277_v30 }
 0x74b   : > { %v1255_v45 = vpop.xlane.xlu0 %1254  ;;  %v1264_v57 = vpop.xlane.xlu1 %1263 }
 0x74c   : > { %v1256_v51 = vsub.f32 %v4984_v53, %v1255_v45  ;;  %v1265_v40 = vsub.f32 %v6305_v56, %v1264_v57  ;;  %v5007_v53 = vld [vmem:[%s5958_s21 + $0xb] ss:$0 sm:$0xff] }
 0x74e   : > { %5773 = vrsqrt.f32 %v1256_v51 }
 0x758   : > { %v6390_v48 = vpop.eup %5773 }
 0x759   : > { %v1266_v32 = vmul.f32 %v6390_v48, %v1265_v40 }
 0x75b   : > { %v1269_v7 = vsel %vm1268_vm12, %v1266_v32, 0.0  ;;  %vm1577_vm12 = vmand %vm1557_vm9, %vm722_vm14 }
 0x75c   : > { %v1270_v2 = vadd.f32 %v1269_v7, %v1167_v3 }
 0x75e   : > { %4987 = vst [vmem:[%s5950_s20 + $0x8] sm:$0xff] %v1270_v2 }
 0x765   : > { %v6397_v55 = vld [vmem:[%s5950_s20 + $0xb] ss:$0 sm:$0xff] }
 0x766   : > { %v1365_v6 = vmul.f32 %v6397_v55, %v1270_v2  ;;  %v1356_v22 = vmul.f32 %v6397_v55, %v6397_v55 }
 0x768   : > { %1366 = vadd.xlane.f32.xlu1 %v1365_v6  ;;  %1357 = vadd.xlane.f32.xlu0 %v1356_v22 }
 0x798   : > { %v811_v12 = vpop.xlane.xlu0 %810 }
 0x799   : > { %v812_v42 = vsub.f32 %v6185_v62, %v811_v12 }
 0x79b   : > { %v813_v58 = vmul.f32 %v6127_v0, %v812_v42 }
 0x79d   : > { %v814_v3 = vsel %vm705_vm13, %v813_v58, 0.0  ;;  %vm1351_vm13 = vcmask 97368  }
 0x79e   : > { %v1011_v36 = vpop.xlane.xlu0 %1010  ;;  %v815_v24 = vadd.f32 %v814_v3, %v702_v23  ;;  %vm1371_vm15 = vmand %vm1351_vm13, %vm496_vm8 }
 0x79f   : > { %v1012_v18 = vsub.f32 %v6404_v13, %v1011_v36 }
 0x7a0   : > { %v922_v31 = vmul.f32 %v6151_v25, %v815_v24 }
 0x7a1   : > { %v1013_v59 = vmul.f32 %v6254_v43, %v1012_v18 }
 0x7a2   : > { %v1189_v35 = vpop.xlane.xlu0 %1188  ;;  %923 = vadd.xlane.f32.xlu0 %v922_v31 }
 0x7a3   : > { %v1014_v8 = vsel %vm931_vm1, %v1013_v59, 0.0  ;;  %v1190_v44 = vsub.f32 %v6325_v19, %v1189_v35 }
 0x7a4   : > { %v1015_v10 = vadd.f32 %v1014_v8, %v902_v15 }
 0x7a5   : > { %v1191_v54 = vmul.f32 %v6349_v21, %v1190_v44 }
 0x7a6   : > { %v1110_v0 = vmul.f32 %v6270_v63, %v1015_v10 }
 0x7a7   : > { %v1192_v60 = vsel %vm1145_vm7, %v1191_v54, 0.0 }
 0x7a8   : > { %v1193_v34 = vadd.f32 %v1192_v60, %v1090_v9  ;;  %1111 = vadd.xlane.f32.xlu0 %v1110_v0 }
 0x7aa   : > { %v1290_v23 = vmul.f32 %v6356_v5, %v1193_v34 }
 0x7ac   : > { %1291 = vadd.xlane.f32.xlu0 %v1290_v23 }
 0x7ad   : > { %v911_v28 = vpop.xlane.xlu1 %910 }
 0x7ae   : > { %v912_v25 = vsub.f32 %v6130_v1, %v911_v28  ;;  %v6456_v28 = vld [vmem:[%s5958_s21 + $0x30] sm:$0xff] }
 0x7b0   : > { %v913_v29 = vmul.f32 %v6194_v20, %v912_v25 }
 0x7b1   : > { %v1099_v33 = vpop.xlane.xlu1 %1098 }
 0x7b2   : > { %v914_v15 = vsel %vm818_vm3, %v913_v29, 0.0  ;;  %v1100_v16 = vsub.f32 %v6375_v49, %v1099_v33 }
 0x7b3   : > { %v915_v14 = vadd.f32 %v914_v15, %v802_v37 }
 0x7b4   : > { %v1101_v17 = vmul.f32 %v6308_v61, %v1100_v16 }
 0x7b5   : > { %v1279_v39 = vpop.xlane.xlu1 %1278  ;;  %v1022_v9 = vmul.f32 %v6219_v11, %v915_v14 }
 0x7b6   : > { %v1102_v26 = vsel %vm1044_vm4, %v1101_v17, 0.0  ;;  %v1280_v41 = vsub.f32 %v6293_v38, %v1279_v39 }
 0x7b7   : > { %v1103_v52 = vadd.f32 %v1102_v26, %v1002_v46  ;;  %1023 = vadd.xlane.f32.xlu1 %v1022_v9 }
 0x7b8   : > { %v1281_v1 = vmul.f32 %v6390_v48, %v1280_v41 }
 0x7b9   : > { %v1200_v27 = vmul.f32 %v6315_v4, %v1103_v52 }
 0x7ba   : > { %v1282_v50 = vsel %vm1248_vm10, %v1281_v1, 0.0 }
 0x7bb   : > { %v1283_v30 = vadd.f32 %v1282_v50, %v1180_v47  ;;  %1201 = vadd.xlane.f32.xlu1 %v1200_v27 }
 0x7bd   : > { %v1380_v37 = vmul.f32 %v6397_v55, %v1283_v30 }
 0x7bf   : > { %1381 = vadd.xlane.f32.xlu1 %v1380_v37 }
 0x7f5   : > { %v1358_v45 = vpop.xlane.xlu0 %1357  ;;  %v1367_v57 = vpop.xlane.xlu1 %1366 }
 0x7f6   : > { %v1359_v51 = vsub.f32 %v5007_v53, %v1358_v45  ;;  %v1368_v46 = vsub.f32 %v6305_v56, %v1367_v57  ;;  %v5030_v53 = vld [vmem:[%s5958_s21 + $0xc] ss:$0 sm:$0xff] }
 0x7f8   : > { %5775 = vrsqrt.f32 %v1359_v51 }
 0x802   : > { %v6431_v40 = vpop.eup %5775 }
 0x803   : > { %v1369_v47 = vmul.f32 %v6431_v40, %v1368_v46 }
 0x805   : > { %v1372_v32 = vsel %vm1371_vm15, %v1369_v47, 0.0 }
 0x806   : > { %v1373_v7 = vadd.f32 %v1372_v32, %v1270_v2 }
 0x808   : > { %5010 = vst [vmem:[%s5950_s20 + $0x8] sm:$0xff] %v1373_v7 }
 0x80f   : > { %v6438_v6 = vld [vmem:[%s5950_s20 + $0xc] ss:$0 sm:$0xff] }
 0x810   : > { %v1468_v22 = vmul.f32 %v6438_v6, %v1373_v7  ;;  %v1459_v12 = vmul.f32 %v6438_v6, %v6438_v6 }
 0x812   : > { %1469 = vadd.xlane.f32.xlu1 %v1468_v22  ;;  %1460 = vadd.xlane.f32.xlu0 %v1459_v12 }
 0x82f   : > { %v924_v42 = vpop.xlane.xlu0 %923 }
 0x830   : > { %v925_v58 = vsub.f32 %v6185_v62, %v924_v42 }
 0x832   : > { %v926_v36 = vmul.f32 %v6194_v20, %v925_v58  ;;  %v6485_v58 = vld [vmem:[%s5958_s21 + $0x38] sm:$0xff] }
 0x834   : > { %v927_v18 = vsel %vm818_vm3, %v926_v36, 0.0  ;;  %vm1454_vm3 = vcmask 105568  }
 0x835   : > { %v1112_v3 = vpop.xlane.xlu0 %1111  ;;  %v928_v59 = vadd.f32 %v927_v18, %v815_v24  ;;  %vm1474_vm0 = vmand %vm1454_vm3, %vm609_vm11 }
 0x836   : > { %v1113_v2 = vsub.f32 %v6404_v13, %v1112_v3 }
 0x837   : > { %v1035_v8 = vmul.f32 %v6219_v11, %v928_v59 }
 0x838   : > { %v1114_v35 = vmul.f32 %v6308_v61, %v1113_v2 }
 0x839   : > { %v1292_v31 = vpop.xlane.xlu0 %1291  ;;  %1036 = vadd.xlane.f32.xlu0 %v1035_v8 }
 0x83a   : > { %v1115_v44 = vsel %vm1044_vm4, %v1114_v35, 0.0  ;;  %v1293_v54 = vsub.f32 %v6325_v19, %v1292_v31 }
 0x83b   : > { %v1116_v0 = vadd.f32 %v1115_v44, %v1015_v10 }
 0x83c   : > { %v1294_v62 = vmul.f32 %v6390_v48, %v1293_v54 }
 0x83d   : > { %v1213_v20 = vmul.f32 %v6315_v4, %v1116_v0 }
 0x83e   : > { %v1295_v60 = vsel %vm1248_vm10, %v1294_v62, 0.0 }
 0x83f   : > { %v1296_v23 = vadd.f32 %v1295_v60, %v1193_v34  ;;  %1214 = vadd.xlane.f32.xlu0 %v1213_v20 }
 0x841   : > { %v1393_v24 = vmul.f32 %v6397_v55, %v1296_v23 }
 0x843   : > { %1394 = vadd.xlane.f32.xlu0 %v1393_v24 }
 0x844   : > { %v1024_v11 = vpop.xlane.xlu1 %1023 }
 0x845   : > { %v1025_v25 = vsub.f32 %v6456_v28, %v1024_v11 }
 0x847   : > { %v1026_v29 = vmul.f32 %v6254_v43, %v1025_v25 }
 0x848   : > { %v1202_v10 = vpop.xlane.xlu1 %1201 }
 0x849   : > { %v1027_v33 = vsel %vm931_vm1, %v1026_v29, 0.0  ;;  %v1203_v15 = vsub.f32 %v6375_v49, %v1202_v10 }
 0x84a   : > { %v1028_v16 = vadd.f32 %v1027_v33, %v915_v14 }
 0x84b   : > { %v1204_v34 = vmul.f32 %v6349_v21, %v1203_v15 }
 0x84c   : > { %v1382_v17 = vpop.xlane.xlu1 %1381  ;;  %v1123_v39 = vmul.f32 %v6270_v63, %v1028_v16 }
 0x84d   : > { %v1205_v9 = vsel %vm1145_vm7, %v1204_v34, 0.0  ;;  %v1383_v26 = vsub.f32 %v6293_v38, %v1382_v17 }
 0x84e   : > { %v1206_v41 = vadd.f32 %v1205_v9, %v1103_v52  ;;  %1124 = vadd.xlane.f32.xlu1 %v1123_v39 }
 0x84f   : > { %v1384_v1 = vmul.f32 %v6431_v40, %v1383_v26 }
 0x850   : > { %v1303_v27 = vmul.f32 %v6356_v5, %v1206_v41 }
 0x851   : > { %v1385_v50 = vsel %vm1351_vm13, %v1384_v1, 0.0 }
 0x852   : > { %v1386_v37 = vadd.f32 %v1385_v50, %v1283_v30  ;;  %1304 = vadd.xlane.f32.xlu1 %v1303_v27 }
 0x854   : > { %v1483_v14 = vmul.f32 %v6438_v6, %v1386_v37 }
 0x856   : > { %1484 = vadd.xlane.f32.xlu1 %v1483_v14 }
 0x89f   : > { %v1461_v45 = vpop.xlane.xlu0 %1460  ;;  %v1470_v52 = vpop.xlane.xlu1 %1469 }
 0x8a0   : > { %v1462_v51 = vsub.f32 %v5030_v53, %v1461_v45  ;;  %v1471_v57 = vsub.f32 %v6305_v56, %v1470_v52 }
 0x8a2   : > { %5777 = vrsqrt.f32 %v1462_v51  ;;  %v5053_v51 = vld [vmem:[%s5958_s21 + $0xd] ss:$0 sm:$0xff] }
 0x8ac   : > { %v6472_v46 = vpop.eup %5777 }
 0x8ad   : > { %v1472_v30 = vmul.f32 %v6472_v46, %v1471_v57 }
 0x8af   : > { %v1475_v47 = vsel %vm1474_vm0, %v1472_v30, 0.0  ;;  %vm2044_vm0 = vcmask 154768  }
 0x8b0   : > { %v1476_v32 = vadd.f32 %v1475_v47, %v1373_v7 }
 0x8b2   : > { %5033 = vst [vmem:[%s5950_s20 + $0x8] sm:$0xff] %v1476_v32 }
 0x8b9   : > { %v6479_v22 = vld [vmem:[%s5950_s20 + $0xd] ss:$0 sm:$0xff] }
 0x8ba   : > { %v1571_v12 = vmul.f32 %v6479_v22, %v1476_v32  ;;  %v1562_v42 = vmul.f32 %v6479_v22, %v6479_v22 }
 0x8bc   : > { %1572 = vadd.xlane.f32.xlu1 %v1571_v12  ;;  %1563 = vadd.xlane.f32.xlu0 %v1562_v42 }
 0x8c6   : > { %v1037_v36 = vpop.xlane.xlu0 %1036 }
 0x8c7   : > { %v1038_v3 = vsub.f32 %v6485_v58, %v1037_v36 }
 0x8c9   : > { %v1039_v18 = vmul.f32 %v6254_v43, %v1038_v3 }
 0x8cb   : > { %v1040_v7 = vsel %vm931_vm1, %v1039_v18, 0.0 }
 0x8cc   : > { %v1215_v2 = vpop.xlane.xlu0 %1214  ;;  %v1041_v31 = vadd.f32 %v1040_v7, %v928_v59 }
 0x8cd   : > { %v1216_v35 = vsub.f32 %v6404_v13, %v1215_v2 }
 0x8ce   : > { %v1136_v54 = vmul.f32 %v6270_v63, %v1041_v31 }
 0x8cf   : > { %v1217_v8 = vmul.f32 %v6349_v21, %v1216_v35 }
 0x8d0   : > { %v1395_v44 = vpop.xlane.xlu0 %1394  ;;  %1137 = vadd.xlane.f32.xlu0 %v1136_v54 }
 0x8d1   : > { %v1218_v62 = vsel %vm1145_vm7, %v1217_v8, 0.0  ;;  %v1396_v20 = vsub.f32 %v6325_v19, %v1395_v44 }
 0x8d2   : > { %v1219_v60 = vadd.f32 %v1218_v62, %v1116_v0 }
 0x8d3   : > { %v1397_v24 = vmul.f32 %v6431_v40, %v1396_v20 }
 0x8d4   : > { %v1316_v11 = vmul.f32 %v6356_v5, %v1219_v60 }
 0x8d5   : > { %v1398_v25 = vsel %vm1351_vm13, %v1397_v24, 0.0 }
 0x8d6   : > { %v1399_v29 = vadd.f32 %v1398_v25, %v1296_v23  ;;  %1317 = vadd.xlane.f32.xlu0 %v1316_v11 }
 0x8d8   : > { %v1496_v59 = vmul.f32 %v6438_v6, %v1399_v29 }
 0x8da   : > { %1497 = vadd.xlane.f32.xlu0 %v1496_v59 }
 0x8db   : > { %v1125_v10 = vpop.xlane.xlu1 %1124 }
 0x8dc   : > { %v1126_v63 = vsub.f32 %v6456_v28, %v1125_v10 }
 0x8de   : > { %v1127_v33 = vmul.f32 %v6308_v61, %v1126_v63 }
 0x8df   : > { %v1305_v15 = vpop.xlane.xlu1 %1304 }
 0x8e0   : > { %v1128_v0 = vsel %vm1044_vm4, %v1127_v33, 0.0  ;;  %v1306_v34 = vsub.f32 %v6375_v49, %v1305_v15 }
 0x8e1   : > { %v1129_v17 = vadd.f32 %v1128_v0, %v1028_v16 }
 0x8e2   : > { %v1307_v39 = vmul.f32 %v6390_v48, %v1306_v34 }
 0x8e3   : > { %v1485_v9 = vpop.xlane.xlu1 %1484  ;;  %v1226_v23 = vmul.f32 %v6315_v4, %v1129_v17 }
 0x8e4   : > { %v1308_v26 = vsel %vm1248_vm10, %v1307_v39, 0.0  ;;  %v1486_v1 = vsub.f32 %v6293_v38, %v1485_v9 }
 0x8e5   : > { %v1309_v27 = vadd.f32 %v1308_v26, %v1206_v41  ;;  %1227 = vadd.xlane.f32.xlu1 %v1226_v23 }
 0x8e6   : > { %v1487_v50 = vmul.f32 %v6472_v46, %v1486_v1 }
 0x8e7   : > { %v1406_v14 = vmul.f32 %v6397_v55, %v1309_v27 }
 0x8e8   : > { %v1488_v53 = vsel %vm1454_vm3, %v1487_v50, 0.0 }
 0x8e9   : > { %v1489_v45 = vadd.f32 %v1488_v53, %v1386_v37  ;;  %1407 = vadd.xlane.f32.xlu1 %v1406_v14 }
 0x8eb   : > { %v1586_v16 = vmul.f32 %v6479_v22, %v1489_v45 }
 0x8ed   : > { %1587 = vadd.xlane.f32.xlu1 %v1586_v16 }
 0x949   : > { %v1564_v52 = vpop.xlane.xlu0 %1563  ;;  %v1573_v30 = vpop.xlane.xlu1 %1572 }
 0x94a   : > { %v1565_v57 = vsub.f32 %v5053_v51, %v1564_v52  ;;  %v1574_v41 = vsub.f32 %v6305_v56, %v1573_v30 }
 0x94c   : > { %5779 = vrsqrt.f32 %v1565_v57  ;;  %v5076_v57 = vld [vmem:[%s5958_s21 + $0xe] ss:$0 sm:$0xff] }
 0x956   : > { %v6513_v47 = vpop.eup %5779 }
 0x957   : > { %v1575_v37 = vmul.f32 %v6513_v47, %v1574_v41 }
 0x959   : > { %v1578_v12 = vsel %vm1577_vm12, %v1575_v37, 0.0  ;;  %vm2134_vm12 = vcmask 162968  }
 0x95a   : > { %v6518_v42 = vadd.f32 %v1578_v12, %v1476_v32 }
 0x95c   : > { %5056 = vst [vmem:[%s5950_s20 + $0x8] sm:$0xff] %v6518_v42 }
 0x95d   : > { %v1138_v36 = vpop.xlane.xlu0 %1137 }
 0x95e   : > { %v1139_v3 = vsub.f32 %v6485_v58, %v1138_v36 }
 0x960   : > { %v1140_v18 = vmul.f32 %v6308_v61, %v1139_v3 }
 0x962   : > { %v1141_v44 = vsel %vm1044_vm4, %v1140_v18, 0.0  ;;  %vm1660_vm4 = vcmask 121968  }
 0x963   : > { %v6525_v2 = vld [vmem:[%s5950_s20 + $0xe] ss:$0 sm:$0xff]  ;;  %v1318_v7 = vpop.xlane.xlu0 %1317  ;;  %v1142_v54 = vadd.f32 %v1141_v44, %v1041_v31  ;;  %vm1680_vm15 = vmand %vm1660_vm4, %vm835_vm6 }
 0x964   : > { %v1674_v35 = vmul.f32 %v6525_v2, %v6518_v42  ;;  %v1665_v8 = vmul.f32 %v6525_v2, %v6525_v2  ;;  %v1319_v32 = vsub.f32 %v6404_v13, %v1318_v7 }
 0x965   : > { %v1239_v61 = vmul.f32 %v6315_v4, %v1142_v54 }
 0x966   : > { %1675 = vadd.xlane.f32.xlu1 %v1674_v35  ;;  %1666 = vadd.xlane.f32.xlu0 %v1665_v8  ;;  %v1320_v62 = vmul.f32 %v6390_v48, %v1319_v32 }
 0x967   : > { %v1498_v20 = vpop.xlane.xlu0 %1497 }
 0x968   : > { %v1321_v24 = vsel %vm1248_vm10, %v1320_v62, 0.0  ;;  %v1499_v11 = vsub.f32 %v6325_v19, %v1498_v20 }
 0x969   : > { %v1322_v25 = vadd.f32 %v1321_v24, %v1219_v60 }
 0x96a   : > { %v1500_v59 = vmul.f32 %v6472_v46, %v1499_v11  ;;  %1240 = vadd.xlane.f32.xlu0 %v1239_v61 }
 0x96b   : > { %v1419_v10 = vmul.f32 %v6397_v55, %v1322_v25 }
 0x96c   : > { %v1501_v63 = vsel %vm1454_vm3, %v1500_v59, 0.0 }
 0x96d   : > { %v1502_v31 = vadd.f32 %v1501_v63, %v1399_v29 }
 0x96e   : > { %1420 = vadd.xlane.f32.xlu0 %v1419_v10 }
 0x96f   : > { %v1599_v33 = vmul.f32 %v6479_v22, %v1502_v31 }
 0x972   : > { %v1228_v15 = vpop.xlane.xlu1 %1227  ;;  %1600 = vadd.xlane.f32.xlu0 %v1599_v33 }
 0x973   : > { %v1229_v4 = vsub.f32 %v6456_v28, %v1228_v15 }
 0x975   : > { %v1230_v0 = vmul.f32 %v6349_v21, %v1229_v4 }
 0x976   : > { %v1408_v34 = vpop.xlane.xlu1 %1407 }
 0x977   : > { %v1231_v60 = vsel %vm1145_vm7, %v1230_v0, 0.0  ;;  %v1409_v39 = vsub.f32 %v6375_v49, %v1408_v34  ;;  %v6584_v34 = vld [vmem:[%s5958_s21 + $0x10] sm:$0xff] }
 0x978   : > { %v1232_v9 = vadd.f32 %v1231_v60, %v1129_v17 }
 0x979   : > { %v1410_v23 = vmul.f32 %v6431_v40, %v1409_v39 }
 0x97a   : > { %v1588_v26 = vpop.xlane.xlu1 %1587  ;;  %v1329_v29 = vmul.f32 %v6356_v5, %v1232_v9 }
 0x97b   : > { %v1411_v1 = vsel %vm1351_vm13, %v1410_v23, 0.0  ;;  %v1589_v50 = vsub.f32 %v6293_v38, %v1588_v26 }
 0x97c   : > { %v1412_v14 = vadd.f32 %v1411_v1, %v1309_v27  ;;  %1330 = vadd.xlane.f32.xlu1 %v1329_v29 }
 0x97d   : > { %v1590_v53 = vmul.f32 %v6513_v47, %v1589_v50 }
 0x97e   : > { %v1509_v16 = vmul.f32 %v6438_v6, %v1412_v14 }
 0x97f   : > { %v1591_v51 = vsel %vm1557_vm9, %v1590_v53, 0.0 }
 0x980   : > { %v1592_v52 = vadd.f32 %v1591_v51, %v1489_v45  ;;  %1510 = vadd.xlane.f32.xlu1 %v1509_v16 }
 0x982   : > { %v1689_v17 = vmul.f32 %v6525_v2, %v1592_v52 }
 0x984   : > { %1690 = vadd.xlane.f32.xlu1 %v1689_v17 }
 0x9f3   : > { %v1667_v30 = vpop.xlane.xlu0 %1666  ;;  %v1676_v36 = vpop.xlane.xlu1 %1675 }
 0x9f4   : > { %v1668_v41 = vsub.f32 %v5076_v57, %v1667_v30  ;;  %v1677_v35 = vsub.f32 %v6305_v56, %v1676_v36 }
 0x9f6   : > { %5781 = vrsqrt.f32 %v1668_v41 }
 0x9f7   : > { %v1241_v37 = vpop.xlane.xlu0 %1240 }
 0x9f8   : > { %v1242_v38 = vsub.f32 %v6485_v58, %v1241_v37 }
 0x9fa   : > { %v1243_v27 = vmul.f32 %v6349_v21, %v1242_v38 }
 0x9fb   : > { %v1421_v12 = vpop.xlane.xlu0 %1420 }
 0x9fc   : > { %v1244_v3 = vsel %vm1145_vm7, %v1243_v27, 0.0  ;;  %v1422_v18 = vsub.f32 %v6404_v13, %v1421_v12  ;;  %v6599_v27 = vld [vmem:[%s5958_s21 + $0x18] sm:$0xff]  ;;  %vm1763_vm7 = vcmask 130168  }
 0x9fd   : > { %v1245_v45 = vadd.f32 %v1244_v3, %v1142_v54 }
 0x9fe   : > { %v1423_v7 = vmul.f32 %v6431_v40, %v1422_v18 }
 0x9ff   : > { %v1601_v8 = vpop.xlane.xlu0 %1600  ;;  %v1342_v44 = vmul.f32 %v6356_v5, %v1245_v45 }
 0xa00   : > { %v6561_v32 = vpop.eup %5781  ;;  %v1424_v21 = vsel %vm1351_vm13, %v1423_v7, 0.0  ;;  %v1602_v62 = vsub.f32 %v6325_v19, %v1601_v8  ;;  %v5099_v8 = vld [vmem:[%s5958_s21 + $0xf] ss:$0 sm:$0xff] }
 0xa01   : > { %v1678_v20 = vmul.f32 %v6561_v32, %v1677_v35  ;;  %v1425_v54 = vadd.f32 %v1424_v21, %v1322_v25  ;;  %1343 = vadd.xlane.f32.xlu1 %v1342_v44 }
 0xa02   : > { %v1603_v56 = vmul.f32 %v6513_v47, %v1602_v62 }
 0xa03   : > { %v1681_v61 = vsel %vm1680_vm15, %v1678_v20, 0.0  ;;  %v1522_v24 = vmul.f32 %v6438_v6, %v1425_v54  ;;  %vm2224_vm15 = vcmask 171168  }
 0xa04   : > { %v1682_v5 = vadd.f32 %v1681_v61, %v6518_v42  ;;  %v1604_v11 = vsel %vm1557_vm9, %v1603_v56, 0.0 }
 0xa05   : > { %v1605_v59 = vadd.f32 %v1604_v11, %v1502_v31  ;;  %1523 = vadd.xlane.f32.xlu1 %v1522_v24 }
 0xa06   : > { %5079 = vst [vmem:[%s5950_s20 + $0x8] sm:$0xff] %v1682_v5 }
 0xa07   : > { %v1702_v19 = vmul.f32 %v6525_v2, %v1605_v59 }
 0xa09   : > { %v1331_v10 = vpop.xlane.xlu1 %1330  ;;  %1703 = vadd.xlane.f32.xlu1 %v1702_v19 }
 0xa0a   : > { %v1332_v25 = vsub.f32 %v6456_v28, %v1331_v10 }
 0xa0c   : > { %v1333_v63 = vmul.f32 %v6390_v48, %v1332_v25 }
 0xa0d   : > { %v6577_v33 = vld [vmem:[%s5950_s20 + $0xf] ss:$0 sm:$0xff]  ;;  %v1511_v15 = vpop.xlane.xlu1 %1510 }
 0xa0e   : > { %v1768_v42 = vmul.f32 %v6577_v33, %v6577_v33  ;;  %v1334_v4 = vsel %vm1248_vm10, %v1333_v63, 0.0  ;;  %v1512_v31 = vsub.f32 %v6375_v49, %v1511_v15 }
 0xa0f   : > { %v1335_v0 = vadd.f32 %v1334_v4, %v1232_v9 }
 0xa10   : > { %1769 = vadd.xlane.f32.xlu0 %v1768_v42  ;;  %v1513_v60 = vmul.f32 %v6472_v46, %v1512_v31 }
 0xa11   : > { %v1691_v39 = vpop.xlane.xlu1 %1690  ;;  %v1432_v23 = vmul.f32 %v6397_v55, %v1335_v0 }
 0xa12   : > { %v1514_v26 = vsel %vm1454_vm3, %v1513_v60, 0.0  ;;  %v1692_v29 = vsub.f32 %v6584_v34, %v1691_v39 }
 0xa13   : > { %v1515_v1 = vadd.f32 %v1514_v26, %v1412_v14 }
 0xa14   : > { %v1693_v50 = vmul.f32 %v6561_v32, %v1692_v29  ;;  %1433 = vadd.xlane.f32.xlu0 %v1432_v23 }
 0xa15   : > { %v1612_v53 = vmul.f32 %v6479_v22, %v1515_v1 }
 0xa16   : > { %v1694_v9 = vsel %vm1660_vm4, %v1693_v50, 0.0 }
 0xa17   : > { %v1695_v16 = vadd.f32 %v1694_v9, %v1592_v52 }
 0xa18   : > { %1613 = vadd.xlane.f32.xlu0 %v1612_v53 }
 0xa19   : > { %v1792_v51 = vmul.f32 %v6577_v33, %v1695_v16 }
 0xa1c   : > { %1793 = vadd.xlane.f32.xlu0 %v1792_v51 }
 0xa8e   : > { %v1344_v17 = vpop.xlane.xlu1 %1343 }
 0xa8f   : > { %v1345_v57 = vsub.f32 %v6485_v58, %v1344_v17 }
 0xa91   : > { %v1346_v30 = vmul.f32 %v6390_v48, %v1345_v57 }
 0xa92   : > { %v1524_v14 = vpop.xlane.xlu1 %1523 }
 0xa93   : > { %v1347_v41 = vsel %vm1248_vm10, %v1346_v30, 0.0  ;;  %v1525_v37 = vsub.f32 %v6404_v13, %v1524_v14  ;;  %vm1866_vm10 = vcmask 138368  }
 0xa94   : > { %v1348_v38 = vadd.f32 %v1347_v41, %v1245_v45 }
 0xa95   : > { %v1526_v52 = vmul.f32 %v6472_v46, %v1525_v37 }
 0xa96   : > { %v1704_v12 = vpop.xlane.xlu1 %1703  ;;  %v1445_v36 = vmul.f32 %v6397_v55, %v1348_v38 }
 0xa97   : > { %v1527_v3 = vsel %vm1454_vm3, %v1526_v52, 0.0  ;;  %v1705_v18 = vsub.f32 %v6599_v27, %v1704_v12 }
 0xa98   : > { %v1528_v7 = vadd.f32 %v1527_v3, %v1425_v54  ;;  %1446 = vadd.xlane.f32.xlu1 %v1445_v36  ;;  %v6644_v3 = vld [vmem:[%s5958_s21 + $0x20] sm:$0xff] }
 0xa99   : > { %v1706_v48 = vmul.f32 %v6561_v32, %v1705_v18 }
 0xa9a   : > { %v1625_v35 = vmul.f32 %v6479_v22, %v1528_v7 }
 0xa9b   : > { %v1707_v45 = vsel %vm1660_vm4, %v1706_v48, 0.0 }
 0xa9c   : > { %v1708_v44 = vadd.f32 %v1707_v45, %v1605_v59  ;;  %1626 = vadd.xlane.f32.xlu1 %v1625_v35 }
 0xa9d   : > { %v1770_v21 = vpop.xlane.xlu0 %1769 }
 0xa9e   : > { %v1771_v62 = vsub.f32 %v5099_v8, %v1770_v21  ;;  %v1805_v20 = vmul.f32 %v6577_v33, %v1708_v44 }
 0xaa0   : > { %5783 = vrsqrt.f32 %v1771_v62  ;;  %1806 = vadd.xlane.f32.xlu1 %v1805_v20 }
 0xaa1   : > { %v1434_v55 = vpop.xlane.xlu0 %1433 }
 0xaa2   : > { %v1435_v56 = vsub.f32 %v6456_v28, %v1434_v55  ;;  %v5122_v55 = vld [vmem:[%s5958_s21 + $0x10] ss:$0 sm:$0xff] }
 0xaa4   : > { %v1436_v54 = vmul.f32 %v6431_v40, %v1435_v56 }
 0xaa5   : > { %v1614_v61 = vpop.xlane.xlu0 %1613 }
 0xaa6   : > { %v1437_v24 = vsel %vm1351_vm13, %v1436_v54, 0.0  ;;  %v1615_v5 = vsub.f32 %v6375_v49, %v1614_v61 }
 0xaa7   : > { %v1438_v11 = vadd.f32 %v1437_v24, %v1335_v0 }
 0xaa8   : > { %v1616_v59 = vmul.f32 %v6513_v47, %v1615_v5 }
 0xaa9   : > { %v1794_v19 = vpop.xlane.xlu0 %1793  ;;  %v1535_v10 = vmul.f32 %v6438_v6, %v1438_v11 }
 0xaaa   : > { %v6616_v25 = vpop.eup %5783  ;;  %v1617_v63 = vsel %vm1557_vm9, %v1616_v59, 0.0  ;;  %v1795_v15 = vsub.f32 %v6584_v34, %v1794_v19 }
 0xaab   : > { %v1618_v42 = vadd.f32 %v1617_v63, %v1515_v1  ;;  %1536 = vadd.xlane.f32.xlu0 %v1535_v10 }
 0xaac   : > { %v1796_v4 = vmul.f32 %v6616_v25, %v1795_v15 }
 0xaad   : > { %v1715_v49 = vmul.f32 %v6525_v2, %v1618_v42 }
 0xaae   : > { %v1797_v31 = vsel %vm1763_vm7, %v1796_v4, 0.0 }
 0xaaf   : > { %v1798_v0 = vadd.f32 %v1797_v31, %v1695_v16  ;;  %1716 = vadd.xlane.f32.xlu0 %v1715_v49 }
 0xab1   : > { %5105 = vst [vmem:[%s5950_s20 + $0x10] sm:$0xff] %v1798_v0 }
 0xab8   : > { %v6625_v60 = vld [vmem:[%s5950_s20 + $0x10] ss:$0 sm:$0xff] }
 0xab9   : > { %v1871_v39 = vmul.f32 %v6625_v60, %v6625_v60  ;;  %v1880_v23 = vmul.f32 %v6625_v60, %v1798_v0 }
 0xabb   : > { %1872 = vadd.xlane.f32.xlu0 %v1871_v39  ;;  %1881 = vadd.xlane.f32.xlu1 %v1880_v23 }
 0xb25   : > { %v1447_v26 = vpop.xlane.xlu1 %1446 }
 0xb26   : > { %v1448_v29 = vsub.f32 %v6485_v58, %v1447_v26 }
 0xb28   : > { %v1449_v1 = vmul.f32 %v6431_v40, %v1448_v29 }
 0xb29   : > { %v1627_v50 = vpop.xlane.xlu1 %1626 }
 0xb2a   : > { %v1450_v53 = vsel %vm1351_vm13, %v1449_v1, 0.0  ;;  %v1628_v9 = vsub.f32 %v6404_v13, %v1627_v50  ;;  %vm1954_vm13 = vcmask 146568  }
 0xb2b   : > { %v1451_v16 = vadd.f32 %v1450_v53, %v1348_v38 }
 0xb2c   : > { %v1629_v51 = vmul.f32 %v6513_v47, %v1628_v9 }
 0xb2d   : > { %v1807_v17 = vpop.xlane.xlu1 %1806  ;;  %v1548_v57 = vmul.f32 %v6438_v6, %v1451_v16 }
 0xb2e   : > { %v1630_v30 = vsel %vm1557_vm9, %v1629_v51, 0.0  ;;  %v1808_v14 = vsub.f32 %v6599_v27, %v1807_v17 }
 0xb2f   : > { %v1631_v41 = vadd.f32 %v1630_v30, %v1528_v7  ;;  %1549 = vadd.xlane.f32.xlu0 %v1548_v57 }
 0xb30   : > { %v1809_v40 = vmul.f32 %v6616_v25, %v1808_v14 }
 0xb31   : > { %v1728_v37 = vmul.f32 %v6525_v2, %v1631_v41 }
 0xb32   : > { %v1810_v52 = vsel %vm1763_vm7, %v1809_v40, 0.0 }
 0xb33   : > { %v1811_v12 = vadd.f32 %v1810_v52, %v1708_v44  ;;  %1729 = vadd.xlane.f32.xlu0 %v1728_v37 }
 0xb35   : > { %v1893_v38 = vmul.f32 %v6625_v60, %v1811_v12 }
 0xb37   : > { %1894 = vadd.xlane.f32.xlu0 %v1893_v38 }
 0xb38   : > { %v1537_v36 = vpop.xlane.xlu0 %1536 }
 0xb39   : > { %v1538_v6 = vsub.f32 %v6456_v28, %v1537_v36 }
 0xb3b   : > { %v1539_v18 = vmul.f32 %v6472_v46, %v1538_v6 }
 0xb3c   : > { %v1717_v7 = vpop.xlane.xlu0 %1716 }
 0xb3d   : > { %v1540_v48 = vsel %vm1454_vm3, %v1539_v18, 0.0  ;;  %v1718_v35 = vsub.f32 %v6644_v3, %v1717_v7  ;;  %v5142_v18 = vld [vmem:[%s5958_s21 + $0x11] ss:$0 sm:$0xff] }
 0xb3e   : > { %v1541_v8 = vadd.f32 %v1540_v48, %v1438_v11 }
 0xb3f   : > { %v1719_v45 = vmul.f32 %v6561_v32, %v1718_v35 }
 0xb40   : > { %v1638_v44 = vmul.f32 %v6479_v22, %v1541_v8 }
 0xb41   : > { %v1720_v21 = vsel %vm1660_vm4, %v1719_v45, 0.0 }
 0xb42   : > { %v1721_v62 = vadd.f32 %v1720_v21, %v1618_v42  ;;  %1639 = vadd.xlane.f32.xlu1 %v1638_v44 }
 0xb44   : > { %v1818_v20 = vmul.f32 %v6577_v33, %v1721_v62 }
 0xb46   : > { %1819 = vadd.xlane.f32.xlu1 %v1818_v20 }
 0xb48   : > { %v1873_v56 = vpop.xlane.xlu0 %1872  ;;  %v1882_v61 = vpop.xlane.xlu1 %1881 }
 0xb49   : > { %v1874_v54 = vsub.f32 %v5122_v55, %v1873_v56  ;;  %v1883_v24 = vsub.f32 %v6584_v34, %v1882_v61 }
 0xb4b   : > { %5785 = vrsqrt.f32 %v1874_v54 }
 0xb55   : > { %v6655_v5 = vpop.eup %5785 }
 0xb56   : > { %v1884_v11 = vmul.f32 %v6655_v5, %v1883_v24  ;;  %v6702_v24 = vld [vmem:[%s5958_s21 + $0x28] sm:$0xff] }
 0xb58   : > { %v1885_v59 = vsel %vm1866_vm10, %v1884_v11, 0.0 }
 0xb59   : > { %v1886_v19 = vadd.f32 %v1885_v59, %v1798_v0 }
 0xb5b   : > { %5125 = vst [vmem:[%s5950_s20 + $0x10] sm:$0xff] %v1886_v19 }
 0xb62   : > { %v6661_v10 = vld [vmem:[%s5950_s20 + $0x11] ss:$0 sm:$0xff] }
 0xb63   : > { %v1968_v63 = vmul.f32 %v6661_v10, %v1886_v19  ;;  %v1959_v15 = vmul.f32 %v6661_v10, %v6661_v10 }
 0xb65   : > { %1969 = vadd.xlane.f32.xlu0 %v1968_v63  ;;  %1960 = vadd.xlane.f32.xlu1 %v1959_v15 }
 0xbbc   : > { %v1550_v42 = vpop.xlane.xlu0 %1549 }
 0xbbd   : > { %v1551_v4 = vsub.f32 %v6485_v58, %v1550_v42 }
 0xbbf   : > { %v1552_v49 = vmul.f32 %v6472_v46, %v1551_v4 }
 0xbc0   : > { %v1730_v31 = vpop.xlane.xlu0 %1729 }
 0xbc1   : > { %v1553_v39 = vsel %vm1454_vm3, %v1552_v49, 0.0  ;;  %v1731_v0 = vsub.f32 %v6404_v13, %v1730_v31  ;;  %vm1974_vm3 = vmand %vm1954_vm13, %vm270_vm2 }
 0xbc2   : > { %v1554_v23 = vadd.f32 %v1553_v39, %v1451_v16 }
 0xbc3   : > { %v1732_v26 = vmul.f32 %v6561_v32, %v1731_v0 }
 0xbc4   : > { %v1895_v29 = vpop.xlane.xlu0 %1894  ;;  %v1651_v1 = vmul.f32 %v6479_v22, %v1554_v23 }
 0xbc5   : > { %v1733_v50 = vsel %vm1660_vm4, %v1732_v26, 0.0  ;;  %v1896_v53 = vsub.f32 %v6599_v27, %v1895_v29 }
 0xbc6   : > { %v1734_v9 = vadd.f32 %v1733_v50, %v1631_v41  ;;  %1652 = vadd.xlane.f32.xlu1 %v1651_v1 }
 0xbc7   : > { %v1897_v51 = vmul.f32 %v6655_v5, %v1896_v53 }
 0xbc8   : > { %v1831_v46 = vmul.f32 %v6577_v33, %v1734_v9 }
 0xbc9   : > { %v1898_v17 = vsel %vm1866_vm10, %v1897_v51, 0.0 }
 0xbca   : > { %v1899_v57 = vadd.f32 %v1898_v17, %v1811_v12  ;;  %1832 = vadd.xlane.f32.xlu1 %v1831_v46 }
 0xbcc   : > { %v1983_v13 = vmul.f32 %v6661_v10, %v1899_v57 }
 0xbce   : > { %1984 = vadd.xlane.f32.xlu1 %v1983_v13 }
 0xbcf   : > { %v1640_v16 = vpop.xlane.xlu1 %1639 }
 0xbd0   : > { %v1641_v22 = vsub.f32 %v6456_v28, %v1640_v16 }
 0xbd2   : > { %v1642_v30 = vmul.f32 %v6513_v47, %v1641_v22 }
 0xbd3   : > { %v1820_v14 = vpop.xlane.xlu1 %1819 }
 0xbd4   : > { %v1643_v41 = vsel %vm1557_vm9, %v1642_v30, 0.0  ;;  %v1821_v40 = vsub.f32 %v6644_v3, %v1820_v14  ;;  %v5162_v30 = vld [vmem:[%s5958_s21 + $0x12] ss:$0 sm:$0xff] }
 0xbd5   : > { %v1644_v37 = vadd.f32 %v1643_v41, %v1541_v8 }
 0xbd6   : > { %v1822_v52 = vmul.f32 %v6616_v25, %v1821_v40 }
 0xbd7   : > { %v1741_v12 = vmul.f32 %v6525_v2, %v1644_v37 }
 0xbd8   : > { %v1823_v38 = vsel %vm1763_vm7, %v1822_v52, 0.0 }
 0xbd9   : > { %v1824_v36 = vadd.f32 %v1823_v38, %v1721_v62  ;;  %1742 = vadd.xlane.f32.xlu0 %v1741_v12 }
 0xbdb   : > { %v1906_v6 = vmul.f32 %v6625_v60, %v1824_v36 }
 0xbdd   : > { %1907 = vadd.xlane.f32.xlu0 %v1906_v6 }
 0xbf2   : > { %v1961_v7 = vpop.xlane.xlu1 %1960  ;;  %v1970_v35 = vpop.xlane.xlu0 %1969 }
 0xbf3   : > { %v1962_v48 = vsub.f32 %v5142_v18, %v1961_v7  ;;  %v1971_v8 = vsub.f32 %v6584_v34, %v1970_v35 }
 0xbf5   : > { %5787 = vrsqrt.f32 %v1962_v48 }
 0xbff   : > { %v6688_v45 = vpop.eup %5787 }
 0xc00   : > { %v1972_v44 = vmul.f32 %v6688_v45, %v1971_v8 }
 0xc02   : > { %v1975_v21 = vsel %vm1974_vm3, %v1972_v44, 0.0  ;;  %vm2244_vm3 = vmand %vm2224_vm15, %vm609_vm11 }
 0xc03   : > { %v1976_v62 = vadd.f32 %v1975_v21, %v1886_v19 }
 0xc05   : > { %5145 = vst [vmem:[%s5950_s20 + $0x10] sm:$0xff] %v1976_v62 }
 0xc0c   : > { %v6695_v20 = vld [vmem:[%s5950_s20 + $0x12] ss:$0 sm:$0xff] }
 0xc0d   : > { %v2058_v55 = vmul.f32 %v6695_v20, %v1976_v62  ;;  %v2049_v56 = vmul.f32 %v6695_v20, %v6695_v20 }
 0xc0f   : > { %2059 = vadd.xlane.f32.xlu1 %v2058_v55  ;;  %2050 = vadd.xlane.f32.xlu0 %v2049_v56 }
 0xc53   : > { %v1653_v54 = vpop.xlane.xlu1 %1652 }
 0xc54   : > { %v1654_v61 = vsub.f32 %v6485_v58, %v1653_v54 }
 0xc56   : > { %v1655_v11 = vmul.f32 %v6513_v47, %v1654_v61 }
 0xc57   : > { %v1833_v59 = vpop.xlane.xlu1 %1832 }
 0xc58   : > { %v1656_v19 = vsel %vm1557_vm9, %v1655_v11, 0.0  ;;  %v1834_v63 = vsub.f32 %v6702_v24, %v1833_v59  ;;  %vm2064_vm9 = vmand %vm2044_vm0, %vm383_vm5 }
 0xc59   : > { %v1657_v15 = vadd.f32 %v1656_v19, %v1554_v23 }
 0xc5a   : > { %v1835_v42 = vmul.f32 %v6616_v25, %v1834_v63 }
 0xc5b   : > { %v1985_v4 = vpop.xlane.xlu1 %1984  ;;  %v1754_v49 = vmul.f32 %v6525_v2, %v1657_v15 }
 0xc5c   : > { %v1836_v31 = vsel %vm1763_vm7, %v1835_v42, 0.0  ;;  %v1986_v39 = vsub.f32 %v6599_v27, %v1985_v4  ;;  %v6750_v4 = vld [vmem:[%s5958_s21 + $0x30] sm:$0xff] }
 0xc5d   : > { %v1837_v0 = vadd.f32 %v1836_v31, %v1734_v9  ;;  %1755 = vadd.xlane.f32.xlu0 %v1754_v49 }
 0xc5e   : > { %v1987_v26 = vmul.f32 %v6688_v45, %v1986_v39 }
 0xc5f   : > { %v1919_v47 = vmul.f32 %v6625_v60, %v1837_v0 }
 0xc60   : > { %v1988_v29 = vsel %vm1954_vm13, %v1987_v26, 0.0 }
 0xc61   : > { %v1989_v1 = vadd.f32 %v1988_v29, %v1899_v57  ;;  %1920 = vadd.xlane.f32.xlu0 %v1919_v47 }
 0xc63   : > { %v2073_v23 = vmul.f32 %v6695_v20, %v1989_v1 }
 0xc65   : > { %2074 = vadd.xlane.f32.xlu0 %v2073_v23 }
 0xc66   : > { %v1743_v50 = vpop.xlane.xlu0 %1742 }
 0xc67   : > { %v1744_v2 = vsub.f32 %v6456_v28, %v1743_v50 }
 0xc69   : > { %v1745_v53 = vmul.f32 %v6561_v32, %v1744_v2 }
 0xc6a   : > { %v1908_v51 = vpop.xlane.xlu0 %1907 }
 0xc6b   : > { %v1746_v9 = vsel %vm1660_vm4, %v1745_v53, 0.0  ;;  %v1909_v46 = vsub.f32 %v6644_v3, %v1908_v51  ;;  %v5182_v53 = vld [vmem:[%s5958_s21 + $0x13] ss:$0 sm:$0xff] }
 0xc6c   : > { %v1747_v17 = vadd.f32 %v1746_v9, %v1644_v37 }
 0xc6d   : > { %v1910_v13 = vmul.f32 %v6655_v5, %v1909_v46 }
 0xc6e   : > { %v1844_v57 = vmul.f32 %v6577_v33, %v1747_v17 }
 0xc6f   : > { %v1911_v16 = vsel %vm1866_vm10, %v1910_v13, 0.0 }
 0xc70   : > { %v1912_v22 = vadd.f32 %v1911_v16, %v1824_v36  ;;  %1845 = vadd.xlane.f32.xlu1 %v1844_v57 }
 0xc72   : > { %v1996_v28 = vmul.f32 %v6661_v10, %v1912_v22 }
 0xc74   : > { %1997 = vadd.xlane.f32.xlu1 %v1996_v28 }
 0xc9c   : > { %v2051_v14 = vpop.xlane.xlu0 %2050  ;;  %v2060_v40 = vpop.xlane.xlu1 %2059 }
 0xc9d   : > { %v2052_v41 = vsub.f32 %v5162_v30, %v2051_v14  ;;  %v2061_v37 = vsub.f32 %v6584_v34, %v2060_v40 }
 0xc9f   : > { %5789 = vrsqrt.f32 %v2052_v41  ;;  %v6775_v41 = vld [vmem:[%s5958_s21 + $0x38] sm:$0xff] }
 0xca9   : > { %v6725_v52 = vpop.eup %5789 }
 0xcaa   : > { %v2062_v12 = vmul.f32 %v6725_v52, %v2061_v37 }
 0xcac   : > { %v2065_v38 = vsel %vm2064_vm9, %v2062_v12, 0.0 }
 0xcad   : > { %v2066_v36 = vadd.f32 %v2065_v38, %v1976_v62 }
 0xcaf   : > { %5165 = vst [vmem:[%s5950_s20 + $0x10] sm:$0xff] %v2066_v36 }
 0xcb6   : > { %v6732_v6 = vld [vmem:[%s5950_s20 + $0x13] ss:$0 sm:$0xff] }
 0xcb7   : > { %v2148_v18 = vmul.f32 %v6732_v6, %v2066_v36  ;;  %v2139_v7 = vmul.f32 %v6732_v6, %v6732_v6 }
 0xcb9   : > { %2149 = vadd.xlane.f32.xlu0 %v2148_v18  ;;  %2140 = vadd.xlane.f32.xlu1 %v2139_v7 }
 0xcea   : > { %v1756_v48 = vpop.xlane.xlu0 %1755 }
 0xceb   : > { %v1757_v35 = vsub.f32 %v6485_v58, %v1756_v48 }
 0xced   : > { %v1758_v8 = vmul.f32 %v6561_v32, %v1757_v35 }
 0xcee   : > { %v1921_v44 = vpop.xlane.xlu0 %1920 }
 0xcef   : > { %v1759_v21 = vsel %vm1660_vm4, %v1758_v8, 0.0  ;;  %v1922_v62 = vsub.f32 %v6702_v24, %v1921_v44  ;;  %vm2154_vm4 = vmand %vm2134_vm12, %vm496_vm8 }
 0xcf0   : > { %v1760_v55 = vadd.f32 %v1759_v21, %v1657_v15 }
 0xcf1   : > { %v1923_v56 = vmul.f32 %v6655_v5, %v1922_v62 }
 0xcf2   : > { %v2075_v54 = vpop.xlane.xlu0 %2074  ;;  %v1857_v61 = vmul.f32 %v6577_v33, %v1760_v55 }
 0xcf3   : > { %v1924_v11 = vsel %vm1866_vm10, %v1923_v56, 0.0  ;;  %v2076_v59 = vsub.f32 %v6599_v27, %v2075_v54 }
 0xcf4   : > { %v1925_v19 = vadd.f32 %v1924_v11, %v1837_v0  ;;  %1858 = vadd.xlane.f32.xlu1 %v1857_v61 }
 0xcf5   : > { %v2077_v58 = vmul.f32 %v6725_v52, %v2076_v59 }
 0xcf6   : > { %v2009_v32 = vmul.f32 %v6661_v10, %v1925_v19 }
 0xcf7   : > { %v2078_v63 = vsel %vm2044_vm0, %v2077_v58, 0.0 }
 0xcf8   : > { %v2079_v42 = vadd.f32 %v2078_v63, %v1989_v1  ;;  %2010 = vadd.xlane.f32.xlu1 %v2009_v32 }
 0xcfa   : > { %v2163_v15 = vmul.f32 %v6732_v6, %v2079_v42 }
 0xcfc   : > { %2164 = vadd.xlane.f32.xlu1 %v2163_v15 }
 0xcfd   : > { %v1846_v33 = vpop.xlane.xlu1 %1845 }
 0xcfe   : > { %v1847_v49 = vsub.f32 %v6750_v4, %v1846_v33 }
 0xd00   : > { %v1848_v31 = vmul.f32 %v6616_v25, %v1847_v49 }
 0xd01   : > { %v1998_v39 = vpop.xlane.xlu1 %1997 }
 0xd02   : > { %v1849_v0 = vsel %vm1763_vm7, %v1848_v31, 0.0  ;;  %v1999_v26 = vsub.f32 %v6644_v3, %v1998_v39 }
 0xd03   : > { %v1850_v47 = vadd.f32 %v1849_v0, %v1747_v17  ;;  %v5202_v0 = vld [vmem:[%s5958_s21 + $0x14] ss:$0 sm:$0xff] }
 0xd04   : > { %v2000_v29 = vmul.f32 %v6688_v45, %v1999_v26 }
 0xd05   : > { %v1932_v1 = vmul.f32 %v6625_v60, %v1850_v47 }
 0xd06   : > { %v2001_v23 = vsel %vm1954_vm13, %v2000_v29, 0.0 }
 0xd07   : > { %v2002_v50 = vadd.f32 %v2001_v23, %v1912_v22  ;;  %1933 = vadd.xlane.f32.xlu0 %v1932_v1 }
 0xd09   : > { %v2086_v2 = vmul.f32 %v6695_v20, %v2002_v50 }
 0xd0b   : > { %2087 = vadd.xlane.f32.xlu0 %v2086_v2 }
 0xd46   : > { %v2141_v51 = vpop.xlane.xlu1 %2140  ;;  %v2150_v46 = vpop.xlane.xlu0 %2149 }
 0xd47   : > { %v2142_v9 = vsub.f32 %v5182_v53, %v2141_v51  ;;  %v2151_v17 = vsub.f32 %v6584_v34, %v2150_v46 }
 0xd49   : > { %5791 = vrsqrt.f32 %v2142_v9 }
 0xd53   : > { %v6762_v13 = vpop.eup %5791 }
 0xd54   : > { %v2152_v57 = vmul.f32 %v6762_v13, %v2151_v17 }
 0xd56   : > { %v2155_v16 = vsel %vm2154_vm4, %v2152_v57, 0.0 }
 0xd57   : > { %v2156_v22 = vadd.f32 %v2155_v16, %v2066_v36 }
 0xd59   : > { %5185 = vst [vmem:[%s5950_s20 + $0x10] sm:$0xff] %v2156_v22 }
 0xd60   : > { %v6769_v28 = vld [vmem:[%s5950_s20 + $0x14] ss:$0 sm:$0xff] }
 0xd61   : > { %v2238_v30 = vmul.f32 %v6769_v28, %v2156_v22  ;;  %v2229_v14 = vmul.f32 %v6769_v28, %v6769_v28 }
 0xd63   : > { %2239 = vadd.xlane.f32.xlu1 %v2238_v30  ;;  %2230 = vadd.xlane.f32.xlu0 %v2229_v14 }
 0xd81   : > { %v1859_v40 = vpop.xlane.xlu1 %1858 }
 0xd82   : > { %v1860_v37 = vsub.f32 %v6775_v41, %v1859_v40 }
 0xd84   : > { %v1861_v12 = vmul.f32 %v6616_v25, %v1860_v37 }
 0xd85   : > { %v2011_v38 = vpop.xlane.xlu1 %2010 }
 0xd86   : > { %v1862_v36 = vsel %vm1763_vm7, %v1861_v12, 0.0  ;;  %v2012_v18 = vsub.f32 %v6702_v24, %v2011_v38 }
 0xd87   : > { %v1863_v7 = vadd.f32 %v1862_v36, %v1760_v55 }
 0xd88   : > { %v2013_v48 = vmul.f32 %v6688_v45, %v2012_v18 }
 0xd89   : > { %v2165_v35 = vpop.xlane.xlu1 %2164  ;;  %v1945_v8 = vmul.f32 %v6625_v60, %v1863_v7 }
 0xd8a   : > { %v2014_v44 = vsel %vm1954_vm13, %v2013_v48, 0.0  ;;  %v2166_v21 = vsub.f32 %v6599_v27, %v2165_v35 }
 0xd8b   : > { %v2015_v62 = vadd.f32 %v2014_v44, %v1925_v19  ;;  %1946 = vadd.xlane.f32.xlu0 %v1945_v8 }
 0xd8c   : > { %v2167_v56 = vmul.f32 %v6762_v13, %v2166_v21 }
 0xd8d   : > { %v2099_v54 = vmul.f32 %v6695_v20, %v2015_v62 }
 0xd8e   : > { %v2168_v61 = vsel %vm2134_vm12, %v2167_v56, 0.0 }
 0xd8f   : > { %v2169_v11 = vadd.f32 %v2168_v61, %v2079_v42  ;;  %2100 = vadd.xlane.f32.xlu0 %v2099_v54 }
 0xd91   : > { %v2253_v55 = vmul.f32 %v6769_v28, %v2169_v11 }
 0xd93   : > { %2254 = vadd.xlane.f32.xlu0 %v2253_v55 }
 0xd94   : > { %v1934_v59 = vpop.xlane.xlu0 %1933 }
 0xd95   : > { %v1935_v60 = vsub.f32 %v6750_v4, %v1934_v59 }
 0xd97   : > { %v1936_v58 = vmul.f32 %v6655_v5, %v1935_v60 }
 0xd98   : > { %v2088_v32 = vpop.xlane.xlu0 %2087 }
 0xd99   : > { %v1937_v19 = vsel %vm1866_vm10, %v1936_v58, 0.0  ;;  %v2089_v63 = vsub.f32 %v6644_v3, %v2088_v32 }
 0xd9a   : > { %v1938_v15 = vadd.f32 %v1937_v19, %v1850_v47  ;;  %v5222_v19 = vld [vmem:[%s5958_s21 + $0x15] ss:$0 sm:$0xff] }
 0xd9b   : > { %v2090_v33 = vmul.f32 %v6725_v52, %v2089_v63 }
 0xd9c   : > { %v2022_v42 = vmul.f32 %v6661_v10, %v1938_v15 }
 0xd9d   : > { %v2091_v49 = vsel %vm2044_vm0, %v2090_v33, 0.0 }
 0xd9e   : > { %v2092_v31 = vadd.f32 %v2091_v49, %v2002_v50  ;;  %2023 = vadd.xlane.f32.xlu1 %v2022_v42 }
 0xda0   : > { %v2176_v39 = vmul.f32 %v6732_v6, %v2092_v31 }
 0xda2   : > { %2177 = vadd.xlane.f32.xlu1 %v2176_v39 }
 0xdf0   : > { %v2231_v26 = vpop.xlane.xlu0 %2230  ;;  %v2240_v1 = vpop.xlane.xlu1 %2239 }
 0xdf1   : > { %v2232_v29 = vsub.f32 %v5202_v0, %v2231_v26  ;;  %v2241_v47 = vsub.f32 %v6584_v34, %v2240_v1 }
 0xdf3   : > { %5793 = vrsqrt.f32 %v2232_v29 }
 0xdfd   : > { %v6799_v23 = vpop.eup %5793 }
 0xdfe   : > { %v2242_v50 = vmul.f32 %v6799_v23, %v2241_v47 }
 0xe00   : > { %v2245_v2 = vsel %vm2244_vm3, %v2242_v50, 0.0 }
 0xe01   : > { %v2246_v53 = vadd.f32 %v2245_v2, %v2156_v22 }
 0xe03   : > { %5205 = vst [vmem:[%s5950_s20 + $0x10] sm:$0xff] %v2246_v53 }
 0xe0a   : > { %v6806_v51 = vld [vmem:[%s5950_s20 + $0x15] ss:$0 sm:$0xff] }
 0xe0b   : > { %v2328_v9 = vmul.f32 %v6806_v51, %v2246_v53  ;;  %v2319_v46 = vmul.f32 %v6806_v51, %v6806_v51 }
 0xe0d   : > { %2329 = vadd.xlane.f32.xlu0 %v2328_v9  ;;  %2320 = vadd.xlane.f32.xlu1 %v2319_v46 }
 0xe18   : > { %v1947_v17 = vpop.xlane.xlu0 %1946 }
 0xe19   : > { %v1948_v57 = vsub.f32 %v6775_v41, %v1947_v17 }
 0xe1b   : > { %v1949_v16 = vmul.f32 %v6655_v5, %v1948_v57 }
 0xe1c   : > { %v2101_v30 = vpop.xlane.xlu0 %2100 }
 0xe1d   : > { %v1950_v14 = vsel %vm1866_vm10, %v1949_v16, 0.0  ;;  %v2102_v22 = vsub.f32 %v6702_v24, %v2101_v30  ;;  %vm2314_vm10 = vcmask 179368  }
 0xe1e   : > { %v1951_v40 = vadd.f32 %v1950_v14, %v1863_v7  ;;  %vm2334_vm9 = vmand %vm2314_vm10, %vm722_vm14 }
 0xe1f   : > { %v2103_v37 = vmul.f32 %v6725_v52, %v2102_v22 }
 0xe20   : > { %v2255_v12 = vpop.xlane.xlu0 %2254  ;;  %v2035_v38 = vmul.f32 %v6661_v10, %v1951_v40 }
 0xe21   : > { %v2104_v36 = vsel %vm2044_vm0, %v2103_v37, 0.0  ;;  %v2256_v18 = vsub.f32 %v6599_v27, %v2255_v12 }
 0xe22   : > { %v2105_v48 = vadd.f32 %v2104_v36, %v2015_v62  ;;  %2036 = vadd.xlane.f32.xlu1 %v2035_v38 }
 0xe23   : > { %v2257_v35 = vmul.f32 %v6799_v23, %v2256_v18 }
 0xe24   : > { %v2189_v5 = vmul.f32 %v6732_v6, %v2105_v48 }
 0xe25   : > { %v2258_v8 = vsel %vm2224_vm15, %v2257_v35, 0.0 }
 0xe26   : > { %v2259_v44 = vadd.f32 %v2258_v8, %v2169_v11  ;;  %2190 = vadd.xlane.f32.xlu1 %v2189_v5 }
 0xe28   : > { %v2343_v7 = vmul.f32 %v6806_v51, %v2259_v44 }
 0xe2a   : > { %2344 = vadd.xlane.f32.xlu1 %v2343_v7 }
 0xe2b   : > { %v2024_v21 = vpop.xlane.xlu1 %2023 }
 0xe2c   : > { %v2025_v10 = vsub.f32 %v6750_v4, %v2024_v21 }
 0xe2e   : > { %v2026_v56 = vmul.f32 %v6688_v45, %v2025_v10 }
 0xe2f   : > { %v2178_v54 = vpop.xlane.xlu1 %2177 }
 0xe30   : > { %v2027_v62 = vsel %vm1954_vm13, %v2026_v56, 0.0  ;;  %v2179_v61 = vsub.f32 %v6644_v3, %v2178_v54  ;;  %v5242_v56 = vld [vmem:[%s5958_s21 + $0x16] ss:$0 sm:$0xff] }
 0xe31   : > { %v2028_v55 = vadd.f32 %v2027_v62, %v1938_v15 }
 0xe32   : > { %v2180_v59 = vmul.f32 %v6762_v13, %v2179_v61 }
 0xe33   : > { %v2112_v11 = vmul.f32 %v6695_v20, %v2028_v55 }
 0xe34   : > { %v2181_v60 = vsel %vm2134_vm12, %v2180_v59, 0.0 }
 0xe35   : > { %v2182_v58 = vadd.f32 %v2181_v60, %v2092_v31  ;;  %2113 = vadd.xlane.f32.xlu0 %v2112_v11  ;;  %v5243_v60 = vld [vmem:[%s5958_s21 + $0x10] sm:$0xff] }
 0xe37   : > { %v2266_v32 = vmul.f32 %v6769_v28, %v2182_v58 }
 0xe39   : > { %2267 = vadd.xlane.f32.xlu0 %v2266_v32 }
 0xe9a   : > { %v2321_v63 = vpop.xlane.xlu1 %2320  ;;  %v2330_v42 = vpop.xlane.xlu0 %2329 }
 0xe9b   : > { %v2322_v33 = vsub.f32 %v5222_v19, %v2321_v63  ;;  %v2331_v15 = vsub.f32 %v6584_v34, %v2330_v42  ;;  %v6877_v42 = vld [vmem:[%s5958_s21 + $0x18] sm:$0xff] }
 0xe9d   : > { %5795 = vrsqrt.f32 %v2322_v33 }
 0xea7   : > { %v6833_v49 = vpop.eup %5795 }
 0xea8   : > { %v2332_v31 = vmul.f32 %v6833_v49, %v2331_v15 }
 0xeaa   : > { %v2335_v39 = vsel %vm2334_vm9, %v2332_v31, 0.0 }
 0xeab   : > { %v6838_v0 = vadd.f32 %v2335_v39, %v2246_v53 }
 0xead   : > { %5225 = vst [vmem:[%s5950_s20 + $0x10] sm:$0xff] %v6838_v0 }
 0xeaf   : > { %v2037_v26 = vpop.xlane.xlu1 %2036 }
 0xeb0   : > { %v2038_v29 = vsub.f32 %v6775_v41, %v2037_v26 }
 0xeb2   : > { %v2039_v1 = vmul.f32 %v6688_v45, %v2038_v29 }
 0xeb3   : > { %v2191_v47 = vpop.xlane.xlu1 %2190 }
 0xeb4   : > { %v6845_v50 = vld [vmem:[%s5950_s20 + $0x16] ss:$0 sm:$0xff]  ;;  %v2040_v34 = vsel %vm1954_vm13, %v2039_v1, 0.0  ;;  %v2192_v2 = vsub.f32 %v6702_v24, %v2191_v47  ;;  %vm2404_vm13 = vcmask 187568  }
 0xeb5   : > { %v2418_v9 = vmul.f32 %v6845_v50, %v6838_v0  ;;  %v2409_v53 = vmul.f32 %v6845_v50, %v6845_v50  ;;  %v2041_v46 = vadd.f32 %v2040_v34, %v1951_v40  ;;  %vm2424_vm4 = vmand %vm2404_vm13, %vm835_vm6 }
 0xeb6   : > { %v2193_v17 = vmul.f32 %v6762_v13, %v2192_v2 }
 0xeb7   : > { %2419 = vadd.xlane.f32.xlu1 %v2418_v9  ;;  %2410 = vadd.xlane.f32.xlu0 %v2409_v53  ;;  %v2345_v57 = vpop.xlane.xlu1 %2344  ;;  %v2125_v14 = vmul.f32 %v6695_v20, %v2041_v46 }
 0xeb8   : > { %v2194_v45 = vsel %vm2134_vm12, %v2193_v17, 0.0  ;;  %v2346_v16 = vsub.f32 %v6599_v27, %v2345_v57 }
 0xeb9   : > { %v2195_v30 = vadd.f32 %v2194_v45, %v2105_v48 }
 0xeba   : > { %v2347_v22 = vmul.f32 %v6833_v49, %v2346_v16 }
 0xebb   : > { %2126 = vadd.xlane.f32.xlu0 %v2125_v14  ;;  %v2279_v40 = vmul.f32 %v6769_v28, %v2195_v30 }
 0xebc   : > { %v2348_v37 = vsel %vm2314_vm10, %v2347_v22, 0.0 }
 0xebd   : > { %v2349_v12 = vadd.f32 %v2348_v37, %v2259_v44 }
 0xebf   : > { %2280 = vadd.xlane.f32.xlu0 %v2279_v40  ;;  %v2433_v38 = vmul.f32 %v6845_v50, %v2349_v12 }
 0xec2   : > { %v2114_v36 = vpop.xlane.xlu0 %2113 }
 0xec3   : > { %v2115_v18 = vsub.f32 %v6750_v4, %v2114_v36  ;;  %2434 = vadd.xlane.f32.xlu0 %v2433_v38 }
 0xec5   : > { %v2116_v27 = vmul.f32 %v6725_v52, %v2115_v18 }
 0xec6   : > { %v2268_v48 = vpop.xlane.xlu0 %2267 }
 0xec7   : > { %v2117_v20 = vsel %vm2044_vm0, %v2116_v27, 0.0  ;;  %v2269_v35 = vsub.f32 %v6644_v3, %v2268_v48 }
 0xec8   : > { %v2118_v5 = vadd.f32 %v2117_v20, %v2028_v55 }
 0xec9   : > { %v2270_v8 = vmul.f32 %v6799_v23, %v2269_v35 }
 0xeca   : > { %v2202_v44 = vmul.f32 %v6732_v6, %v2118_v5 }
 0xecb   : > { %v2271_v7 = vsel %vm2224_vm15, %v2270_v8, 0.0 }
 0xecc   : > { %v2272_v21 = vadd.f32 %v2271_v7, %v2182_v58  ;;  %2203 = vadd.xlane.f32.xlu1 %v2202_v44 }
 0xece   : > { %v2356_v10 = vmul.f32 %v6806_v51, %v2272_v21 }
 0xed0   : > { %2357 = vadd.xlane.f32.xlu1 %v2356_v10 }
 0xf44   : > { %v2411_v54 = vpop.xlane.xlu0 %2410  ;;  %v2420_v32 = vpop.xlane.xlu1 %2419 }
 0xf45   : > { %v2412_v62 = vsub.f32 %v5242_v56, %v2411_v54  ;;  %v2421_v15 = vsub.f32 %v5243_v60, %v2420_v32 }
 0xf47   : > { %5797 = vrsqrt.f32 %v2412_v62  ;;  %v5262_v62 = vld [vmem:[%s5958_s21 + $0x17] ss:$0 sm:$0xff] }
 0xf48   : > { %v2127_v61 = vpop.xlane.xlu0 %2126 }
 0xf49   : > { %v2128_v55 = vsub.f32 %v6775_v41, %v2127_v61 }
 0xf4b   : > { %v2129_v59 = vmul.f32 %v6725_v52, %v2128_v55 }
 0xf4c   : > { %v2281_v11 = vpop.xlane.xlu0 %2280 }
 0xf4d   : > { %v2130_v19 = vsel %vm2044_vm0, %v2129_v59, 0.0  ;;  %v2282_v58 = vsub.f32 %v6702_v24, %v2281_v11  ;;  %v6917_v11 = vld [vmem:[%s5958_s21 + $0x20] sm:$0xff]  ;;  %vm2494_vm0 = vcmask 195768  }
 0xf4e   : > { %v2131_v63 = vadd.f32 %v2130_v19, %v2041_v46 }
 0xf4f   : > { %v2283_v33 = vmul.f32 %v6799_v23, %v2282_v58 }
 0xf50   : > { %v2435_v31 = vpop.xlane.xlu0 %2434  ;;  %v2215_v39 = vmul.f32 %v6732_v6, %v2131_v63 }
 0xf51   : > { %v6880_v26 = vpop.eup %5797  ;;  %v2284_v52 = vsel %vm2224_vm15, %v2283_v33, 0.0  ;;  %v2436_v47 = vsub.f32 %v6877_v42, %v2435_v31 }
 0xf52   : > { %v2422_v29 = vmul.f32 %v6880_v26, %v2421_v15  ;;  %v2285_v1 = vadd.f32 %v2284_v52, %v2195_v30  ;;  %2216 = vadd.xlane.f32.xlu0 %v2215_v39 }
 0xf53   : > { %v2437_v6 = vmul.f32 %v6880_v26, %v2436_v47 }
 0xf54   : > { %v2425_v34 = vsel %vm2424_vm4, %v2422_v29, 0.0  ;;  %v2369_v2 = vmul.f32 %v6806_v51, %v2285_v1 }
 0xf55   : > { %v2426_v9 = vadd.f32 %v2425_v34, %v6838_v0  ;;  %v2438_v46 = vsel %vm2404_vm13, %v2437_v6, 0.0 }
 0xf56   : > { %2370 = vadd.xlane.f32.xlu0 %v2369_v2  ;;  %v2439_v45 = vadd.f32 %v2438_v46, %v2349_v12 }
 0xf57   : > { %5245 = vst [vmem:[%s5950_s20 + $0x10] sm:$0xff] %v2426_v9 }
 0xf59   : > { %v2204_v53 = vpop.xlane.xlu1 %2203 }
 0xf5a   : > { %v2205_v17 = vsub.f32 %v6750_v4, %v2204_v53 }
 0xf5c   : > { %v2206_v57 = vmul.f32 %v6762_v13, %v2205_v17 }
 0xf5d   : > { %v2358_v16 = vpop.xlane.xlu1 %2357 }
 0xf5e   : > { %v6895_v30 = vld [vmem:[%s5950_s20 + $0x17] ss:$0 sm:$0xff]  ;;  %v2207_v14 = vsel %vm2134_vm12, %v2206_v57, 0.0  ;;  %v2359_v22 = vsub.f32 %v6644_v3, %v2358_v16 }
 0xf5f   : > { %v2499_v0 = vmul.f32 %v6895_v30, %v6895_v30  ;;  %v2208_v37 = vadd.f32 %v2207_v14, %v2118_v5  ;;  %v2523_v40 = vmul.f32 %v6895_v30, %v2439_v45 }
 0xf60   : > { %v2360_v38 = vmul.f32 %v6833_v49, %v2359_v22 }
 0xf61   : > { %2500 = vadd.xlane.f32.xlu1 %v2499_v0  ;;  %2524 = vadd.xlane.f32.xlu0 %v2523_v40  ;;  %v2292_v18 = vmul.f32 %v6769_v28, %v2208_v37 }
 0xf62   : > { %v2361_v36 = vsel %vm2314_vm10, %v2360_v38, 0.0 }
 0xf63   : > { %v2362_v12 = vadd.f32 %v2361_v36, %v2272_v21 }
 0xf65   : > { %2293 = vadd.xlane.f32.xlu1 %v2292_v18  ;;  %v2446_v27 = vmul.f32 %v6845_v50, %v2362_v12 }
 0xf69   : > { %2447 = vadd.xlane.f32.xlu1 %v2446_v27 }
 0xfdf   : > { %v2217_v3 = vpop.xlane.xlu0 %2216 }
 0xfe0   : > { %v2218_v48 = vsub.f32 %v6775_v41, %v2217_v3 }
 0xfe2   : > { %v2219_v20 = vmul.f32 %v6762_v13, %v2218_v48 }
 0xfe3   : > { %v2371_v35 = vpop.xlane.xlu0 %2370 }
 0xfe4   : > { %v2220_v5 = vsel %vm2134_vm12, %v2219_v20, 0.0  ;;  %v2372_v8 = vsub.f32 %v6702_v24, %v2371_v35  ;;  %vm2584_vm12 = vcmask 203968  }
 0xfe5   : > { %v2221_v44 = vadd.f32 %v2220_v5, %v2131_v63 }
 0xfe6   : > { %v2373_v7 = vmul.f32 %v6833_v49, %v2372_v8 }
 0xfe7   : > { %v2305_v21 = vmul.f32 %v6769_v28, %v2221_v44 }
 0xfe8   : > { %v2374_v10 = vsel %vm2314_vm10, %v2373_v7, 0.0  ;;  %v5282_v7 = vld [vmem:[%s5958_s21 + $0x18] ss:$0 sm:$0xff] }
 0xfe9   : > { %v2375_v56 = vadd.f32 %v2374_v10, %v2285_v1  ;;  %2306 = vadd.xlane.f32.xlu1 %v2305_v21 }
 0xfeb   : > { %v2459_v54 = vmul.f32 %v6845_v50, %v2375_v56 }
 0xfed   : > { %2460 = vadd.xlane.f32.xlu1 %v2459_v54 }
 0xfee   : > { %v2501_v13 = vpop.xlane.xlu1 %2500  ;;  %v2525_v28 = vpop.xlane.xlu0 %2524 }
 0xfef   : > { %v2502_v61 = vsub.f32 %v5262_v62, %v2501_v13  ;;  %v2526_v15 = vsub.f32 %v6877_v42, %v2525_v28 }
 0xff1   : > { %5799 = vrsqrt.f32 %v2502_v61 }
 0xff2   : > { %v2294_v55 = vpop.xlane.xlu1 %2293 }
 0xff3   : > { %v2295_v59 = vsub.f32 %v6750_v4, %v2294_v55 }
 0xff5   : > { %v2296_v60 = vmul.f32 %v6799_v23, %v2295_v59 }
 0xff6   : > { %v2448_v32 = vpop.xlane.xlu1 %2447 }
 0xff7   : > { %v2297_v19 = vsel %vm2224_vm15, %v2296_v60, 0.0  ;;  %v2449_v58 = vsub.f32 %v6917_v11, %v2448_v32 }
 0xff8   : > { %v2298_v63 = vadd.f32 %v2297_v19, %v2208_v37 }
 0xff9   : > { %v2450_v33 = vmul.f32 %v6880_v26, %v2449_v58 }
 0xffa   : > { %v2382_v31 = vmul.f32 %v6806_v51, %v2298_v63 }
 0xffb   : > { %v6925_v39 = vpop.eup %5799  ;;  %v2451_v52 = vsel %vm2404_vm13, %v2450_v33, 0.0 }
 0xffc   : > { %v2527_v29 = vmul.f32 %v6925_v39, %v2526_v15  ;;  %v2452_v1 = vadd.f32 %v2451_v52, %v2362_v12  ;;  %2383 = vadd.xlane.f32.xlu0 %v2382_v31 }
 0xffe   : > { %v2528_v47 = vsel %vm2494_vm0, %v2527_v29, 0.0  ;;  %v2536_v34 = vmul.f32 %v6895_v30, %v2452_v1 }
 0xfff   : > { %v2529_v2 = vadd.f32 %v2528_v47, %v2439_v45 }
0x1000   : > { %2537 = vadd.xlane.f32.xlu0 %v2536_v34 }
0x1001   : > { %5268 = vst [vmem:[%s5950_s20 + $0x18] sm:$0xff] %v2529_v2 }
0x1008   : > { %v6933_v9 = vld [vmem:[%s5950_s20 + $0x18] ss:$0 sm:$0xff] }
0x1009   : > { %v2589_v6 = vmul.f32 %v6933_v9, %v6933_v9  ;;  %v2598_v53 = vmul.f32 %v6933_v9, %v2529_v2 }
0x100b   : > { %2590 = vadd.xlane.f32.xlu1 %v2589_v6  ;;  %2599 = vadd.xlane.f32.xlu0 %v2598_v53 }
0x1076   : > { %v2307_v46 = vpop.xlane.xlu1 %2306 }
0x1077   : > { %v2308_v17 = vsub.f32 %v6775_v41, %v2307_v46 }
0x1079   : > { %v2309_v57 = vmul.f32 %v6799_v23, %v2308_v17 }
0x107a   : > { %v2461_v16 = vpop.xlane.xlu1 %2460 }
0x107b   : > { %v2310_v14 = vsel %vm2224_vm15, %v2309_v57, 0.0  ;;  %v2462_v45 = vsub.f32 %v6702_v24, %v2461_v16  ;;  %vm2659_vm15 = vcmask 212168  }
0x107c   : > { %v2311_v22 = vadd.f32 %v2310_v14, %v2221_v44  ;;  %vm2679_vm3 = vmand %vm2659_vm15, %vm270_vm2 }
0x107d   : > { %v2463_v0 = vmul.f32 %v6880_v26, %v2462_v45 }
0x107e   : > { %v2395_v37 = vmul.f32 %v6806_v51, %v2311_v22 }
0x107f   : > { %v2464_v40 = vsel %vm2404_vm13, %v2463_v0, 0.0 }
0x1080   : > { %v2465_v38 = vadd.f32 %v2464_v40, %v2375_v56  ;;  %2396 = vadd.xlane.f32.xlu1 %v2395_v37 }
0x1082   : > { %v2549_v36 = vmul.f32 %v6895_v30, %v2465_v38 }
0x1084   : > { %2550 = vadd.xlane.f32.xlu1 %v2549_v36 }
0x1089   : > { %v2384_v12 = vpop.xlane.xlu0 %2383 }
0x108a   : > { %v2385_v23 = vsub.f32 %v6750_v4, %v2384_v12 }
0x108c   : > { %v2386_v18 = vmul.f32 %v6833_v49, %v2385_v23 }
0x108d   : > { %v2538_v27 = vpop.xlane.xlu0 %2537 }
0x108e   : > { %v2387_v3 = vsel %vm2314_vm10, %v2386_v18, 0.0  ;;  %v2539_v48 = vsub.f32 %v6917_v11, %v2538_v27 }
0x108f   : > { %v2388_v20 = vadd.f32 %v2387_v3, %v2298_v63 }
0x1090   : > { %v2540_v51 = vmul.f32 %v6925_v39, %v2539_v48 }
0x1091   : > { %v2472_v35 = vmul.f32 %v6845_v50, %v2388_v20 }
0x1092   : > { %v2541_v5 = vsel %vm2494_vm0, %v2540_v51, 0.0 }
0x1093   : > { %v2542_v8 = vadd.f32 %v2541_v5, %v2452_v1  ;;  %2473 = vadd.xlane.f32.xlu0 %v2472_v35  ;;  %v6999_v35 = vld [vmem:[%s5958_s21 + $0x28] sm:$0xff] }
0x1095   : > { %v2611_v44 = vmul.f32 %v6933_v9, %v2542_v8 }
0x1097   : > { %2612 = vadd.xlane.f32.xlu0 %v2611_v44 }
0x1098   : > { %v2591_v21 = vpop.xlane.xlu1 %2590  ;;  %v2600_v56 = vpop.xlane.xlu0 %2599 }
0x1099   : > { %v2592_v10 = vsub.f32 %v5282_v7, %v2591_v21  ;;  %v2601_v54 = vsub.f32 %v6877_v42, %v2600_v56 }
0x109b   : > { %5801 = vrsqrt.f32 %v2592_v10 }
0x10a5   : > { %v6956_v62 = vpop.eup %5801 }
0x10a6   : > { %v2602_v13 = vmul.f32 %v6956_v62, %v2601_v54 }
0x10a8   : > { %v2603_v61 = vsel %vm2584_vm12, %v2602_v13, 0.0 }
0x10a9   : > { %v2604_v55 = vadd.f32 %v2603_v61, %v2529_v2 }
0x10ab   : > { %5285 = vst [vmem:[%s5950_s20 + $0x18] sm:$0xff] %v2604_v55 }
0x10b2   : > { %v6962_v59 = vld [vmem:[%s5950_s20 + $0x19] ss:$0 sm:$0xff] }
0x10b3   : > { %v2673_v60 = vmul.f32 %v6962_v59, %v2604_v55  ;;  %v2664_v32 = vmul.f32 %v6962_v59, %v6962_v59 }
0x10b5   : > { %2674 = vadd.xlane.f32.xlu0 %v2673_v60  ;;  %2665 = vadd.xlane.f32.xlu1 %v2664_v32 }
0x110d   : > { %v2397_v28 = vpop.xlane.xlu1 %2396 }
0x110e   : > { %v2398_v19 = vsub.f32 %v6775_v41, %v2397_v28 }
0x1110   : > { %v2399_v58 = vmul.f32 %v6833_v49, %v2398_v19 }
0x1111   : > { %v2551_v63 = vpop.xlane.xlu1 %2550 }
0x1112   : > { %v2400_v33 = vsel %vm2314_vm10, %v2399_v58, 0.0  ;;  %v2552_v15 = vsub.f32 %v6702_v24, %v2551_v63  ;;  %vm2736_vm10 = vcmask 220368  }
0x1113   : > { %v2401_v31 = vadd.f32 %v2400_v33, %v2311_v22  ;;  %v5299_v22 = vld [vmem:[%s5958_s21 + $0x19] ss:$0 sm:$0xff]  ;;  %vm2756_vm9 = vmand %vm2736_vm10, %vm383_vm5 }
0x1114   : > { %v2553_v52 = vmul.f32 %v6925_v39, %v2552_v15 }
0x1115   : > { %v2485_v29 = vmul.f32 %v6845_v50, %v2401_v31 }
0x1116   : > { %v2554_v1 = vsel %vm2494_vm0, %v2553_v52, 0.0 }
0x1117   : > { %v2555_v47 = vadd.f32 %v2554_v1, %v2465_v38  ;;  %2486 = vadd.xlane.f32.xlu1 %v2485_v29 }
0x1119   : > { %v2624_v34 = vmul.f32 %v6933_v9, %v2555_v47 }
0x111b   : > { %2625 = vadd.xlane.f32.xlu1 %v2624_v34 }
0x1120   : > { %v2474_v2 = vpop.xlane.xlu0 %2473 }
0x1121   : > { %v2475_v49 = vsub.f32 %v6750_v4, %v2474_v2 }
0x1123   : > { %v2476_v6 = vmul.f32 %v6880_v26, %v2475_v49 }
0x1124   : > { %v2613_v53 = vpop.xlane.xlu0 %2612 }
0x1125   : > { %v2477_v24 = vsel %vm2404_vm13, %v2476_v6, 0.0  ;;  %v2614_v46 = vsub.f32 %v6917_v11, %v2613_v53 }
0x1126   : > { %v2478_v17 = vadd.f32 %v2477_v24, %v2388_v20 }
0x1127   : > { %v2615_v50 = vmul.f32 %v6956_v62, %v2614_v46 }
0x1128   : > { %v2562_v57 = vmul.f32 %v6895_v30, %v2478_v17 }
0x1129   : > { %v2616_v16 = vsel %vm2584_vm12, %v2615_v50, 0.0 }
0x112a   : > { %v2617_v14 = vadd.f32 %v2616_v16, %v2542_v8  ;;  %2563 = vadd.xlane.f32.xlu0 %v2562_v57 }
0x112c   : > { %v2688_v45 = vmul.f32 %v6962_v59, %v2617_v14 }
0x112e   : > { %2689 = vadd.xlane.f32.xlu0 %v2688_v45 }
0x1142   : > { %v2666_v0 = vpop.xlane.xlu1 %2665  ;;  %v2675_v40 = vpop.xlane.xlu0 %2674 }
0x1143   : > { %v2667_v37 = vsub.f32 %v5299_v22, %v2666_v0  ;;  %v2676_v38 = vsub.f32 %v6877_v42, %v2675_v40 }
0x1145   : > { %5803 = vrsqrt.f32 %v2667_v37 }
0x114f   : > { %v6985_v36 = vpop.eup %5803 }
0x1150   : > { %v2677_v12 = vmul.f32 %v6985_v36, %v2676_v38 }
0x1152   : > { %v2680_v23 = vsel %vm2679_vm3, %v2677_v12, 0.0 }
0x1153   : > { %v2681_v18 = vadd.f32 %v2680_v23, %v2604_v55 }
0x1155   : > { %5302 = vst [vmem:[%s5950_s20 + $0x18] sm:$0xff] %v2681_v18 }
0x115c   : > { %v6992_v27 = vld [vmem:[%s5950_s20 + $0x1a] ss:$0 sm:$0xff] }
0x115d   : > { %v2750_v3 = vmul.f32 %v6992_v27, %v2681_v18  ;;  %v2741_v48 = vmul.f32 %v6992_v27, %v6992_v27 }
0x115f   : > { %2751 = vadd.xlane.f32.xlu0 %v2750_v3  ;;  %2742 = vadd.xlane.f32.xlu1 %v2741_v48 }
0x11a4   : > { %v2487_v20 = vpop.xlane.xlu1 %2486 }
0x11a5   : > { %v2488_v51 = vsub.f32 %v6775_v41, %v2487_v20 }
0x11a7   : > { %v2489_v5 = vmul.f32 %v6880_v26, %v2488_v51 }
0x11a8   : > { %v2626_v8 = vpop.xlane.xlu1 %2625 }
0x11a9   : > { %v2490_v44 = vsel %vm2404_vm13, %v2489_v5, 0.0  ;;  %v2627_v7 = vsub.f32 %v6999_v35, %v2626_v8  ;;  %vm2813_vm13 = vcmask 228568  }
0x11aa   : > { %v2491_v21 = vadd.f32 %v2490_v44, %v2401_v31  ;;  %v5316_v31 = vld [vmem:[%s5958_s21 + $0x1a] ss:$0 sm:$0xff]  ;;  %vm2833_vm4 = vmand %vm2813_vm13, %vm496_vm8 }
0x11ab   : > { %v2628_v10 = vmul.f32 %v6956_v62, %v2627_v7 }
0x11ac   : > { %v2575_v56 = vmul.f32 %v6895_v30, %v2491_v21 }
0x11ad   : > { %v2629_v54 = vsel %vm2584_vm12, %v2628_v10, 0.0  ;;  %v5333_v10 = vld [vmem:[%s5958_s21 + $0x1b] ss:$0 sm:$0xff] }
0x11ae   : > { %v2630_v13 = vadd.f32 %v2629_v54, %v2555_v47  ;;  %2576 = vadd.xlane.f32.xlu1 %v2575_v56 }
0x11b0   : > { %v2701_v61 = vmul.f32 %v6962_v59, %v2630_v13 }
0x11b2   : > { %2702 = vadd.xlane.f32.xlu1 %v2701_v61 }
0x11b7   : > { %v2564_v55 = vpop.xlane.xlu0 %2563 }
0x11b8   : > { %v2565_v26 = vsub.f32 %v6750_v4, %v2564_v55 }
0x11ba   : > { %v2566_v60 = vmul.f32 %v6925_v39, %v2565_v26 }
0x11bb   : > { %v2690_v32 = vpop.xlane.xlu0 %2689 }
0x11bc   : > { %v2567_v28 = vsel %vm2494_vm0, %v2566_v60, 0.0  ;;  %v2691_v19 = vsub.f32 %v6917_v11, %v2690_v32 }
0x11bd   : > { %v2568_v58 = vadd.f32 %v2567_v28, %v2478_v17 }
0x11be   : > { %v2692_v30 = vmul.f32 %v6985_v36, %v2691_v19 }
0x11bf   : > { %v2637_v63 = vmul.f32 %v6933_v9, %v2568_v58 }
0x11c0   : > { %v2693_v33 = vsel %vm2659_vm15, %v2692_v30, 0.0  ;;  %v7064_v30 = vld [vmem:[%s5958_s21 + $0x38] sm:$0xff] }
0x11c1   : > { %v2694_v15 = vadd.f32 %v2693_v33, %v2617_v14  ;;  %2638 = vadd.xlane.f32.xlu0 %v2637_v63 }
0x11c3   : > { %v2765_v4 = vmul.f32 %v6992_v27, %v2694_v15 }
0x11c5   : > { %2766 = vadd.xlane.f32.xlu0 %v2765_v4 }
0x11ec   : > { %v2743_v52 = vpop.xlane.xlu1 %2742  ;;  %v2752_v1 = vpop.xlane.xlu0 %2751 }
0x11ed   : > { %v2744_v29 = vsub.f32 %v5316_v31, %v2743_v52  ;;  %v2753_v47 = vsub.f32 %v6877_v42, %v2752_v1 }
0x11ef   : > { %5805 = vrsqrt.f32 %v2744_v29 }
0x11f9   : > { %v7018_v34 = vpop.eup %5805 }
0x11fa   : > { %v2754_v2 = vmul.f32 %v7018_v34, %v2753_v47 }
0x11fc   : > { %v2757_v49 = vsel %vm2756_vm9, %v2754_v2, 0.0 }
0x11fd   : > { %v2758_v6 = vadd.f32 %v2757_v49, %v2681_v18 }
0x11ff   : > { %5319 = vst [vmem:[%s5950_s20 + $0x18] sm:$0xff] %v2758_v6 }
0x1206   : > { %v7025_v53 = vld [vmem:[%s5950_s20 + $0x1b] ss:$0 sm:$0xff] }
0x1207   : > { %v2827_v24 = vmul.f32 %v7025_v53, %v2758_v6  ;;  %v2818_v46 = vmul.f32 %v7025_v53, %v7025_v53 }
0x1209   : > { %2828 = vadd.xlane.f32.xlu0 %v2827_v24  ;;  %2819 = vadd.xlane.f32.xlu1 %v2818_v46 }
0x123b   : > { %v2577_v17 = vpop.xlane.xlu1 %2576 }
0x123c   : > { %v2578_v50 = vsub.f32 %v6775_v41, %v2577_v17  ;;  %v7039_v41 = vld [vmem:[%s5958_s21 + $0x30] sm:$0xff] }
0x123e   : > { %v2579_v57 = vmul.f32 %v6925_v39, %v2578_v50 }
0x123f   : > { %v2703_v16 = vpop.xlane.xlu1 %2702 }
0x1240   : > { %v2580_v14 = vsel %vm2494_vm0, %v2579_v57, 0.0  ;;  %v2704_v45 = vsub.f32 %v6999_v35, %v2703_v16 }
0x1241   : > { %v2581_v22 = vadd.f32 %v2580_v14, %v2491_v21 }
0x1242   : > { %v2705_v0 = vmul.f32 %v6985_v36, %v2704_v45 }
0x1243   : > { %v2650_v37 = vmul.f32 %v6933_v9, %v2581_v22 }
0x1244   : > { %v2706_v40 = vsel %vm2659_vm15, %v2705_v0, 0.0 }
0x1245   : > { %v2707_v38 = vadd.f32 %v2706_v40, %v2630_v13  ;;  %2651 = vadd.xlane.f32.xlu1 %v2650_v37  ;;  %v5350_v37 = vld [vmem:[%s5958_s21 + $0x1c] ss:$0 sm:$0xff] }
0x1247   : > { %v2778_v12 = vmul.f32 %v6992_v27, %v2707_v38 }
0x1249   : > { %2779 = vadd.xlane.f32.xlu1 %v2778_v12 }
0x124e   : > { %v2639_v23 = vpop.xlane.xlu0 %2638 }
0x124f   : > { %v2640_v18 = vsub.f32 %v7039_v41, %v2639_v23 }
0x1251   : > { %v2641_v3 = vmul.f32 %v6956_v62, %v2640_v18 }
0x1252   : > { %v2767_v48 = vpop.xlane.xlu0 %2766 }
0x1253   : > { %v2642_v20 = vsel %vm2584_vm12, %v2641_v3, 0.0  ;;  %v2768_v9 = vsub.f32 %v6917_v11, %v2767_v48 }
0x1254   : > { %v2643_v51 = vadd.f32 %v2642_v20, %v2568_v58 }
0x1255   : > { %v2769_v5 = vmul.f32 %v7018_v34, %v2768_v9 }
0x1256   : > { %v2714_v8 = vmul.f32 %v6962_v59, %v2643_v51 }
0x1257   : > { %v2770_v44 = vsel %vm2736_vm10, %v2769_v5, 0.0 }
0x1258   : > { %v2771_v7 = vadd.f32 %v2770_v44, %v2694_v15  ;;  %2715 = vadd.xlane.f32.xlu0 %v2714_v8 }
0x125a   : > { %v2842_v21 = vmul.f32 %v7025_v53, %v2771_v7 }
0x125c   : > { %2843 = vadd.xlane.f32.xlu0 %v2842_v21 }
0x1296   : > { %v2820_v56 = vpop.xlane.xlu1 %2819  ;;  %v2829_v13 = vpop.xlane.xlu0 %2828 }
0x1297   : > { %v2821_v54 = vsub.f32 %v5333_v10, %v2820_v56  ;;  %v2830_v61 = vsub.f32 %v6877_v42, %v2829_v13 }
0x1299   : > { %5807 = vrsqrt.f32 %v2821_v54 }
0x12a3   : > { %v7051_v55 = vpop.eup %5807 }
0x12a4   : > { %v2831_v26 = vmul.f32 %v7051_v55, %v2830_v61 }
0x12a6   : > { %v2834_v60 = vsel %vm2833_vm4, %v2831_v26, 0.0 }
0x12a7   : > { %v2835_v32 = vadd.f32 %v2834_v60, %v2758_v6 }
0x12a9   : > { %5336 = vst [vmem:[%s5950_s20 + $0x18] sm:$0xff] %v2835_v32 }
0x12b0   : > { %v7058_v28 = vld [vmem:[%s5950_s20 + $0x1c] ss:$0 sm:$0xff] }
0x12b1   : > { %v2904_v19 = vmul.f32 %v7058_v28, %v2835_v32  ;;  %v2895_v58 = vmul.f32 %v7058_v28, %v7058_v28 }
0x12b3   : > { %2905 = vadd.xlane.f32.xlu0 %v2904_v19  ;;  %2896 = vadd.xlane.f32.xlu1 %v2895_v58 }
0x12d2   : > { %v2652_v63 = vpop.xlane.xlu1 %2651 }
0x12d3   : > { %v2653_v33 = vsub.f32 %v7064_v30, %v2652_v63 }
0x12d5   : > { %v2654_v15 = vmul.f32 %v6956_v62, %v2653_v33 }
0x12d6   : > { %v2780_v4 = vpop.xlane.xlu1 %2779 }
0x12d7   : > { %v2655_v31 = vsel %vm2584_vm12, %v2654_v15, 0.0  ;;  %v2781_v52 = vsub.f32 %v6999_v35, %v2780_v4  ;;  %vm2890_vm12 = vcmask 236768  }
0x12d8   : > { %v2656_v29 = vadd.f32 %v2655_v31, %v2581_v22  ;;  %vm2910_vm3 = vmand %vm2890_vm12, %vm609_vm11 }
0x12d9   : > { %v2782_v1 = vmul.f32 %v7018_v34, %v2781_v52 }
0x12da   : > { %v2727_v47 = vmul.f32 %v6962_v59, %v2656_v29 }
0x12db   : > { %v2783_v2 = vsel %vm2736_vm10, %v2782_v1, 0.0 }
0x12dc   : > { %v2784_v49 = vadd.f32 %v2783_v2, %v2707_v38  ;;  %2728 = vadd.xlane.f32.xlu1 %v2727_v47  ;;  %v5367_v47 = vld [vmem:[%s5958_s21 + $0x1d] ss:$0 sm:$0xff] }
0x12de   : > { %v2855_v6 = vmul.f32 %v7025_v53, %v2784_v49 }
0x12e0   : > { %2856 = vadd.xlane.f32.xlu1 %v2855_v6 }
0x12e5   : > { %v2716_v24 = vpop.xlane.xlu0 %2715 }
0x12e6   : > { %v2717_v62 = vsub.f32 %v7039_v41, %v2716_v24 }
0x12e8   : > { %v2718_v46 = vmul.f32 %v6985_v36, %v2717_v62 }
0x12e9   : > { %v2844_v17 = vpop.xlane.xlu0 %2843 }
0x12ea   : > { %v2719_v50 = vsel %vm2659_vm15, %v2718_v46, 0.0  ;;  %v2845_v57 = vsub.f32 %v6917_v11, %v2844_v17 }
0x12eb   : > { %v2720_v16 = vadd.f32 %v2719_v50, %v2643_v51 }
0x12ec   : > { %v2846_v59 = vmul.f32 %v7051_v55, %v2845_v57 }
0x12ed   : > { %v2791_v14 = vmul.f32 %v6992_v27, %v2720_v16 }
0x12ee   : > { %v2847_v45 = vsel %vm2813_vm13, %v2846_v59, 0.0 }
0x12ef   : > { %v2848_v22 = vadd.f32 %v2847_v45, %v2771_v7  ;;  %2792 = vadd.xlane.f32.xlu0 %v2791_v14 }
0x12f1   : > { %v2919_v0 = vmul.f32 %v7058_v28, %v2848_v22 }
0x12f3   : > { %2920 = vadd.xlane.f32.xlu0 %v2919_v0 }
0x1340   : > { %v2897_v40 = vpop.xlane.xlu1 %2896  ;;  %v2906_v12 = vpop.xlane.xlu0 %2905 }
0x1341   : > { %v2898_v38 = vsub.f32 %v5350_v37, %v2897_v40  ;;  %v2907_v23 = vsub.f32 %v6877_v42, %v2906_v12 }
0x1343   : > { %5809 = vrsqrt.f32 %v2898_v38 }
0x134d   : > { %v7084_v18 = vpop.eup %5809 }
0x134e   : > { %v2908_v3 = vmul.f32 %v7084_v18, %v2907_v23 }
0x1350   : > { %v2911_v48 = vsel %vm2910_vm3, %v2908_v3, 0.0  ;;  %vm3260_vm3 = vcmask 277768  }
0x1351   : > { %v2912_v20 = vadd.f32 %v2911_v48, %v2835_v32 }
0x1353   : > { %5353 = vst [vmem:[%s5950_s20 + $0x18] sm:$0xff] %v2912_v20 }
0x135a   : > { %v7091_v9 = vld [vmem:[%s5950_s20 + $0x1d] ss:$0 sm:$0xff] }
0x135b   : > { %v2981_v51 = vmul.f32 %v7091_v9, %v2912_v20  ;;  %v2972_v5 = vmul.f32 %v7091_v9, %v7091_v9 }
0x135d   : > { %2982 = vadd.xlane.f32.xlu0 %v2981_v51  ;;  %2973 = vadd.xlane.f32.xlu1 %v2972_v5 }
0x1369   : > { %v2729_v8 = vpop.xlane.xlu1 %2728 }
0x136a   : > { %v2730_v44 = vsub.f32 %v7064_v30, %v2729_v8 }
0x136c   : > { %v2731_v7 = vmul.f32 %v6985_v36, %v2730_v44 }
0x136d   : > { %v2857_v21 = vpop.xlane.xlu1 %2856 }
0x136e   : > { %v2732_v10 = vsel %vm2659_vm15, %v2731_v7, 0.0  ;;  %v2858_v56 = vsub.f32 %v6999_v35, %v2857_v21  ;;  %vm2967_vm15 = vcmask 244968  }
0x136f   : > { %v2733_v54 = vadd.f32 %v2732_v10, %v2656_v29  ;;  %vm2987_vm9 = vmand %vm2967_vm15, %vm722_vm14 }
0x1370   : > { %v2859_v13 = vmul.f32 %v7051_v55, %v2858_v56 }
0x1371   : > { %v2804_v61 = vmul.f32 %v6992_v27, %v2733_v54 }
0x1372   : > { %v2860_v26 = vsel %vm2813_vm13, %v2859_v13, 0.0 }
0x1373   : > { %v2861_v60 = vadd.f32 %v2860_v26, %v2784_v49  ;;  %2805 = vadd.xlane.f32.xlu1 %v2804_v61  ;;  %v5384_v61 = vld [vmem:[%s5958_s21 + $0x1e] ss:$0 sm:$0xff] }
0x1375   : > { %v2932_v32 = vmul.f32 %v7058_v28, %v2861_v60 }
0x1377   : > { %2933 = vadd.xlane.f32.xlu1 %v2932_v32 }
0x137c   : > { %v2793_v19 = vpop.xlane.xlu0 %2792 }
0x137d   : > { %v2794_v36 = vsub.f32 %v7039_v41, %v2793_v19 }
0x137f   : > { %v2795_v58 = vmul.f32 %v7018_v34, %v2794_v36 }
0x1380   : > { %v2921_v63 = vpop.xlane.xlu0 %2920 }
0x1381   : > { %v2796_v33 = vsel %vm2736_vm10, %v2795_v58, 0.0  ;;  %v2922_v15 = vsub.f32 %v6917_v11, %v2921_v63 }
0x1382   : > { %v2797_v4 = vadd.f32 %v2796_v33, %v2720_v16 }
0x1383   : > { %v2923_v27 = vmul.f32 %v7084_v18, %v2922_v15 }
0x1384   : > { %v2868_v31 = vmul.f32 %v7025_v53, %v2797_v4 }
0x1385   : > { %v2924_v52 = vsel %vm2890_vm12, %v2923_v27, 0.0 }
0x1386   : > { %v2925_v29 = vadd.f32 %v2924_v52, %v2848_v22  ;;  %2869 = vadd.xlane.f32.xlu0 %v2868_v31 }
0x1388   : > { %v2996_v1 = vmul.f32 %v7091_v9, %v2925_v29 }
0x138a   : > { %2997 = vadd.xlane.f32.xlu0 %v2996_v1 }
0x13ea   : > { %v2974_v2 = vpop.xlane.xlu1 %2973  ;;  %v2983_v6 = vpop.xlane.xlu0 %2982 }
0x13eb   : > { %v2975_v49 = vsub.f32 %v5367_v47, %v2974_v2  ;;  %v2984_v24 = vsub.f32 %v6877_v42, %v2983_v6 }
0x13ed   : > { %5811 = vrsqrt.f32 %v2975_v49 }
0x13f7   : > { %v7114_v62 = vpop.eup %5811 }
0x13f8   : > { %v2985_v46 = vmul.f32 %v7114_v62, %v2984_v24 }
0x13fa   : > { %v2988_v17 = vsel %vm2987_vm9, %v2985_v46, 0.0  ;;  %vm3324_vm9 = vcmask 285968  }
0x13fb   : > { %v2989_v50 = vadd.f32 %v2988_v17, %v2912_v20 }
0x13fd   : > { %5370 = vst [vmem:[%s5950_s20 + $0x18] sm:$0xff] %v2989_v50 }
0x1400   : > { %v2806_v57 = vpop.xlane.xlu1 %2805 }
0x1401   : > { %v2807_v16 = vsub.f32 %v7064_v30, %v2806_v57 }
0x1403   : > { %v2808_v59 = vmul.f32 %v7018_v34, %v2807_v16 }
0x1404   : > { %v7123_v14 = vld [vmem:[%s5950_s20 + $0x1e] ss:$0 sm:$0xff]  ;;  %v2934_v45 = vpop.xlane.xlu1 %2933 }
0x1405   : > { %v3058_v22 = vmul.f32 %v7123_v14, %v2989_v50  ;;  %v3049_v0 = vmul.f32 %v7123_v14, %v7123_v14  ;;  %v2809_v37 = vsel %vm2736_vm10, %v2808_v59, 0.0  ;;  %v2935_v40 = vsub.f32 %v6999_v35, %v2934_v45 }
0x1406   : > { %v2810_v38 = vadd.f32 %v2809_v37, %v2733_v54  ;;  %vm3044_vm10 = vcmask 253168  }
0x1407   : > { %3059 = vadd.xlane.f32.xlu0 %v3058_v22  ;;  %3050 = vadd.xlane.f32.xlu1 %v3049_v0  ;;  %v2936_v12 = vmul.f32 %v7084_v18, %v2935_v40  ;;  %vm3064_vm4 = vmand %vm3044_vm10, %vm835_vm6 }
0x1408   : > { %v2881_v23 = vmul.f32 %v7025_v53, %v2810_v38 }
0x1409   : > { %v2937_v34 = vsel %vm2890_vm12, %v2936_v12, 0.0 }
0x140a   : > { %v2938_v3 = vadd.f32 %v2937_v34, %v2861_v60 }
0x140b   : > { %2882 = vadd.xlane.f32.xlu1 %v2881_v23 }
0x140c   : > { %v3009_v48 = vmul.f32 %v7091_v9, %v2938_v3 }
0x140f   : > { %3010 = vadd.xlane.f32.xlu1 %v3009_v48 }
0x1413   : > { %v2870_v20 = vpop.xlane.xlu0 %2869 }
0x1414   : > { %v2871_v51 = vsub.f32 %v7039_v41, %v2870_v20 }
0x1416   : > { %v2872_v5 = vmul.f32 %v7051_v55, %v2871_v51 }
0x1417   : > { %v2998_v8 = vpop.xlane.xlu0 %2997 }
0x1418   : > { %v2873_v44 = vsel %vm2813_vm13, %v2872_v5, 0.0  ;;  %v2999_v7 = vsub.f32 %v6917_v11, %v2998_v8 }
0x1419   : > { %v2874_v21 = vadd.f32 %v2873_v44, %v2797_v4 }
0x141a   : > { %v3000_v53 = vmul.f32 %v7114_v62, %v2999_v7 }
0x141b   : > { %v2945_v10 = vmul.f32 %v7058_v28, %v2874_v21 }
0x141c   : > { %v3001_v56 = vsel %vm2967_vm15, %v3000_v53, 0.0 }
0x141d   : > { %v3002_v54 = vadd.f32 %v3001_v56, %v2925_v29  ;;  %2946 = vadd.xlane.f32.xlu0 %v2945_v10 }
0x141f   : > { %v3073_v13 = vmul.f32 %v7123_v14, %v3002_v54 }
0x1421   : > { %3074 = vadd.xlane.f32.xlu0 %v3073_v13 }
0x1494   : > { %v3051_v26 = vpop.xlane.xlu1 %3050  ;;  %v3060_v63 = vpop.xlane.xlu0 %3059 }
0x1495   : > { %v3052_v60 = vsub.f32 %v5384_v61, %v3051_v26  ;;  %v3061_v31 = vsub.f32 %v6877_v42, %v3060_v63 }
0x1497   : > { %5813 = vrsqrt.f32 %v3052_v60 }
0x1498   : > { %v2883_v32 = vpop.xlane.xlu1 %2882 }
0x1499   : > { %v2884_v19 = vsub.f32 %v7064_v30, %v2883_v32 }
0x149b   : > { %v2885_v36 = vmul.f32 %v7051_v55, %v2884_v19 }
0x149c   : > { %v3011_v58 = vpop.xlane.xlu1 %3010 }
0x149d   : > { %v2886_v33 = vsel %vm2813_vm13, %v2885_v36, 0.0  ;;  %v3012_v15 = vsub.f32 %v6999_v35, %v3011_v58  ;;  %vm3121_vm13 = vcmask 261368  }
0x149e   : > { %v2887_v4 = vadd.f32 %v2886_v33, %v2810_v38 }
0x149f   : > { %v3013_v27 = vmul.f32 %v7114_v62, %v3012_v15 }
0x14a0   : > { %v2958_v52 = vmul.f32 %v7058_v28, %v2887_v4 }
0x14a1   : > { %v7150_v29 = vpop.eup %5813  ;;  %v3014_v55 = vsel %vm2967_vm15, %v3013_v27, 0.0 }
0x14a2   : > { %v3062_v1 = vmul.f32 %v7150_v29, %v3061_v31  ;;  %v3015_v47 = vadd.f32 %v3014_v55, %v2938_v3  ;;  %2959 = vadd.xlane.f32.xlu0 %v2958_v52 }
0x14a4   : > { %v3065_v2 = vsel %vm3064_vm4, %v3062_v1, 0.0  ;;  %v3086_v49 = vmul.f32 %v7123_v14, %v3015_v47  ;;  %vm3388_vm4 = vcmask 294168  }
0x14a5   : > { %v3066_v6 = vadd.f32 %v3065_v2, %v2989_v50 }
0x14a6   : > { %3087 = vadd.xlane.f32.xlu0 %v3086_v49 }
0x14a7   : > { %5387 = vst [vmem:[%s5950_s20 + $0x18] sm:$0xff] %v3066_v6 }
0x14aa   : > { %v2947_v42 = vpop.xlane.xlu0 %2946 }
0x14ab   : > { %v2948_v28 = vsub.f32 %v7039_v41, %v2947_v42 }
0x14ad   : > { %v2949_v24 = vmul.f32 %v7084_v18, %v2948_v28 }
0x14ae   : > { %v7161_v46 = vld [vmem:[%s5950_s20 + $0x1f] ss:$0 sm:$0xff]  ;;  %v3075_v17 = vpop.xlane.xlu0 %3074 }
0x14af   : > { %v3126_v57 = vmul.f32 %v7161_v46, %v7161_v46  ;;  %v2950_v16 = vsel %vm2890_vm12, %v2949_v24, 0.0  ;;  %v3076_v59 = vsub.f32 %v6917_v11, %v3075_v17 }
0x14b0   : > { %v2951_v45 = vadd.f32 %v2950_v16, %v2874_v21  ;;  %v5401_v21 = vld [vmem:[%s5958_s21 + $0x1f] ss:$0 sm:$0xff]  ;;  %v5418_v16 = vld [vmem:[%s5958_s21 + $0x20] ss:$0 sm:$0xff] }
0x14b1   : > { %3127 = vadd.xlane.f32.xlu1 %v3126_v57  ;;  %v3077_v50 = vmul.f32 %v7150_v29, %v3076_v59 }
0x14b2   : > { %v3022_v22 = vmul.f32 %v7091_v9, %v2951_v45 }
0x14b3   : > { %v3078_v0 = vsel %vm3044_vm10, %v3077_v50, 0.0  ;;  %v7210_v50 = vld [vmem:[%s5958_s21 + $0x20] sm:$0xff] }
0x14b4   : > { %v3079_v37 = vadd.f32 %v3078_v0, %v3002_v54 }
0x14b5   : > { %3023 = vadd.xlane.f32.xlu1 %v3022_v22 }
0x14b6   : > { %v3150_v40 = vmul.f32 %v7161_v46, %v3079_v37 }
0x14b9   : > { %3151 = vadd.xlane.f32.xlu1 %v3150_v40 }
0x152f   : > { %v2960_v38 = vpop.xlane.xlu0 %2959 }
0x1530   : > { %v2961_v12 = vsub.f32 %v7064_v30, %v2960_v38 }
0x1532   : > { %v2962_v23 = vmul.f32 %v7084_v18, %v2961_v12 }
0x1533   : > { %v3088_v34 = vpop.xlane.xlu0 %3087 }
0x1534   : > { %v2963_v3 = vsel %vm2890_vm12, %v2962_v23, 0.0  ;;  %v3089_v48 = vsub.f32 %v6999_v35, %v3088_v34  ;;  %vm3198_vm12 = vcmask 269568  }
0x1535   : > { %v2964_v20 = vadd.f32 %v2963_v3, %v2887_v4 }
0x1536   : > { %v3090_v51 = vmul.f32 %v7150_v29, %v3089_v48 }
0x1537   : > { %v3035_v5 = vmul.f32 %v7091_v9, %v2964_v20 }
0x1538   : > { %v3091_v8 = vsel %vm3044_vm10, %v3090_v51, 0.0 }
0x1539   : > { %v3092_v44 = vadd.f32 %v3091_v8, %v3015_v47  ;;  %3036 = vadd.xlane.f32.xlu0 %v3035_v5 }
0x153b   : > { %v3163_v7 = vmul.f32 %v7161_v46, %v3092_v44 }
0x153d   : > { %3164 = vadd.xlane.f32.xlu0 %v3163_v7 }
0x153e   : > { %v3128_v53 = vpop.xlane.xlu1 %3127 }
0x153f   : > { %v3129_v18 = vsub.f32 %v5401_v21, %v3128_v53 }
0x1541   : > { %5815 = vrsqrt.f32 %v3129_v18 }
0x1542   : > { %v3024_v10 = vpop.xlane.xlu1 %3023 }
0x1543   : > { %v3025_v56 = vsub.f32 %v7039_v41, %v3024_v10 }
0x1545   : > { %v3026_v54 = vmul.f32 %v7114_v62, %v3025_v56 }
0x1546   : > { %v3152_v13 = vpop.xlane.xlu1 %3151 }
0x1547   : > { %v3027_v9 = vsel %vm2967_vm15, %v3026_v54, 0.0  ;;  %v3153_v26 = vsub.f32 %v6917_v11, %v3152_v13 }
0x1548   : > { %v3028_v61 = vadd.f32 %v3027_v9, %v2951_v45 }
0x154a   : > { %v3099_v60 = vmul.f32 %v7123_v14, %v3028_v61 }
0x154b   : > { %v7185_v32 = vpop.eup %5815 }
0x154c   : > { %v3154_v19 = vmul.f32 %v7185_v32, %v3153_v26  ;;  %3100 = vadd.xlane.f32.xlu1 %v3099_v60 }
0x154e   : > { %v3155_v36 = vsel %vm3121_vm13, %v3154_v19, 0.0 }
0x154f   : > { %v3156_v58 = vadd.f32 %v3155_v36, %v3079_v37 }
0x1551   : > { %5407 = vst [vmem:[%s5950_s20 + $0x20] sm:$0xff] %v3156_v58 }
0x1558   : > { %v7191_v63 = vld [vmem:[%s5950_s20 + $0x20] ss:$0 sm:$0xff] }
0x1559   : > { %v3212_v33 = vmul.f32 %v7191_v63, %v3156_v58  ;;  %v3203_v15 = vmul.f32 %v7191_v63, %v7191_v63 }
0x155b   : > { %3213 = vadd.xlane.f32.xlu0 %v3212_v33  ;;  %3204 = vadd.xlane.f32.xlu1 %v3203_v15 }
0x15c6   : > { %v3037_v11 = vpop.xlane.xlu0 %3036 }
0x15c7   : > { %v3038_v4 = vsub.f32 %v7064_v30, %v3037_v11 }
0x15c9   : > { %v3039_v27 = vmul.f32 %v7114_v62, %v3038_v4 }
0x15ca   : > { %v3165_v31 = vpop.xlane.xlu0 %3164 }
0x15cb   : > { %v3040_v52 = vsel %vm2967_vm15, %v3039_v27, 0.0  ;;  %v3166_v55 = vsub.f32 %v6999_v35, %v3165_v31  ;;  %vm3280_vm15 = vmand %vm3260_vm3, %vm270_vm2 }
0x15cc   : > { %v3041_v1 = vadd.f32 %v3040_v52, %v2964_v20 }
0x15cd   : > { %v3167_v47 = vmul.f32 %v7185_v32, %v3166_v55 }
0x15ce   : > { %v3112_v2 = vmul.f32 %v7123_v14, %v3041_v1 }
0x15cf   : > { %v3168_v49 = vsel %vm3121_vm13, %v3167_v47, 0.0 }
0x15d0   : > { %v3169_v6 = vadd.f32 %v3168_v49, %v3092_v44  ;;  %3113 = vadd.xlane.f32.xlu1 %v3112_v2 }
0x15d2   : > { %v3225_v42 = vmul.f32 %v7191_v63, %v3169_v6 }
0x15d4   : > { %3226 = vadd.xlane.f32.xlu1 %v3225_v42 }
0x15d9   : > { %v3101_v62 = vpop.xlane.xlu1 %3100 }
0x15da   : > { %v3102_v28 = vsub.f32 %v7039_v41, %v3101_v62 }
0x15dc   : > { %v3103_v24 = vmul.f32 %v7150_v29, %v3102_v28 }
0x15de   : > { %v3104_v17 = vsel %vm3044_vm10, %v3103_v24, 0.0 }
0x15df   : > { %v3105_v57 = vadd.f32 %v3104_v17, %v3028_v61 }
0x15e1   : > { %v3176_v14 = vmul.f32 %v7161_v46, %v3105_v57 }
0x15e3   : > { %3177 = vadd.xlane.f32.xlu0 %v3176_v14 }
0x15e8   : > { %v3205_v59 = vpop.xlane.xlu1 %3204  ;;  %v3214_v22 = vpop.xlane.xlu0 %3213 }
0x15e9   : > { %v3206_v45 = vsub.f32 %v5418_v16, %v3205_v59  ;;  %v3215_v0 = vsub.f32 %v7210_v50, %v3214_v22 }
0x15eb   : > { %5817 = vrsqrt.f32 %v3206_v45 }
0x15f5   : > { %v7213_v37 = vpop.eup %5817 }
0x15f6   : > { %v3216_v40 = vmul.f32 %v7213_v37, %v3215_v0 }
0x15f8   : > { %v3217_v38 = vsel %vm3198_vm12, %v3216_v40, 0.0 }
0x15f9   : > { %v3218_v12 = vadd.f32 %v3217_v38, %v3156_v58 }
0x15fb   : > { %5421 = vst [vmem:[%s5950_s20 + $0x20] sm:$0xff] %v3218_v12 }
0x1602   : > { %v7219_v23 = vld [vmem:[%s5950_s20 + $0x21] ss:$0 sm:$0xff] }
0x1603   : > { %v3274_v34 = vmul.f32 %v7219_v23, %v3218_v12  ;;  %v3265_v3 = vmul.f32 %v7219_v23, %v7219_v23 }
0x1605   : > { %3275 = vadd.xlane.f32.xlu1 %v3274_v34  ;;  %3266 = vadd.xlane.f32.xlu0 %v3265_v3 }
0x165d   : > { %v3114_v48 = vpop.xlane.xlu1 %3113 }
0x165e   : > { %v3115_v20 = vsub.f32 %v7064_v30, %v3114_v48 }
0x1660   : > { %v3116_v51 = vmul.f32 %v7150_v29, %v3115_v20 }
0x1661   : > { %v3227_v5 = vpop.xlane.xlu1 %3226 }
0x1662   : > { %v3117_v8 = vsel %vm3044_vm10, %v3116_v51, 0.0  ;;  %v3228_v44 = vsub.f32 %v6999_v35, %v3227_v5  ;;  %vm3344_vm10 = vmand %vm3324_vm9, %vm383_vm5 }
0x1663   : > { %v3118_v7 = vadd.f32 %v3117_v8, %v3041_v1 }
0x1664   : > { %v3229_v21 = vmul.f32 %v7213_v37, %v3228_v44 }
0x1665   : > { %v3189_v53 = vmul.f32 %v7161_v46, %v3118_v7  ;;  %v5432_v46 = vld [vmem:[%s5958_s21 + $0x21] ss:$0 sm:$0xff] }
0x1666   : > { %v3230_v18 = vsel %vm3198_vm12, %v3229_v21, 0.0  ;;  %v7278_v21 = vld [vmem:[%s5958_s21 + $0x28] sm:$0xff] }
0x1667   : > { %v3231_v10 = vadd.f32 %v3230_v18, %v3169_v6  ;;  %3190 = vadd.xlane.f32.xlu0 %v3189_v53 }
0x1669   : > { %v3289_v56 = vmul.f32 %v7219_v23, %v3231_v10 }
0x166b   : > { %3290 = vadd.xlane.f32.xlu0 %v3289_v56 }
0x1670   : > { %v3178_v54 = vpop.xlane.xlu0 %3177 }
0x1671   : > { %v3179_v29 = vsub.f32 %v7039_v41, %v3178_v54 }
0x1673   : > { %v3180_v9 = vmul.f32 %v7185_v32, %v3179_v29 }
0x1675   : > { %v3181_v13 = vsel %vm3121_vm13, %v3180_v9, 0.0 }
0x1676   : > { %v3182_v61 = vadd.f32 %v3181_v13, %v3105_v57 }
0x1678   : > { %v3238_v26 = vmul.f32 %v7191_v63, %v3182_v61 }
0x167a   : > { %3239 = vadd.xlane.f32.xlu1 %v3238_v26 }
0x1692   : > { %v3267_v60 = vpop.xlane.xlu0 %3266  ;;  %v3276_v36 = vpop.xlane.xlu1 %3275 }
0x1693   : > { %v3268_v19 = vsub.f32 %v5432_v46, %v3267_v60  ;;  %v3277_v58 = vsub.f32 %v7210_v50, %v3276_v36 }
0x1695   : > { %5819 = vrsqrt.f32 %v3268_v19 }
0x169f   : > { %v7238_v33 = vpop.eup %5819 }
0x16a0   : > { %v3278_v15 = vmul.f32 %v7238_v33, %v3277_v58 }
0x16a2   : > { %v3281_v11 = vsel %vm3280_vm15, %v3278_v15, 0.0 }
0x16a3   : > { %v3282_v4 = vadd.f32 %v3281_v11, %v3218_v12 }
0x16a5   : > { %5435 = vst [vmem:[%s5950_s20 + $0x20] sm:$0xff] %v3282_v4 }
0x16ac   : > { %v7245_v27 = vld [vmem:[%s5950_s20 + $0x22] ss:$0 sm:$0xff] }
0x16ad   : > { %v3338_v31 = vmul.f32 %v7245_v27, %v3282_v4  ;;  %v3329_v52 = vmul.f32 %v7245_v27, %v7245_v27 }
0x16af   : > { %3339 = vadd.xlane.f32.xlu0 %v3338_v31  ;;  %3330 = vadd.xlane.f32.xlu1 %v3329_v52 }
0x16f4   : > { %v3191_v55 = vpop.xlane.xlu0 %3190 }
0x16f5   : > { %v3192_v1 = vsub.f32 %v7064_v30, %v3191_v55 }
0x16f7   : > { %v3193_v47 = vmul.f32 %v7185_v32, %v3192_v1 }
0x16f8   : > { %v3291_v2 = vpop.xlane.xlu0 %3290 }
0x16f9   : > { %v3194_v49 = vsel %vm3121_vm13, %v3193_v47, 0.0  ;;  %v3292_v6 = vsub.f32 %v6999_v35, %v3291_v2 }
0x16fa   : > { %v3195_v42 = vadd.f32 %v3194_v49, %v3118_v7 }
0x16fb   : > { %v3293_v62 = vmul.f32 %v7238_v33, %v3292_v6 }
0x16fc   : > { %v3251_v28 = vmul.f32 %v7191_v63, %v3195_v42  ;;  %v5446_v63 = vld [vmem:[%s5958_s21 + $0x22] ss:$0 sm:$0xff] }
0x16fd   : > { %v3294_v24 = vsel %vm3260_vm3, %v3293_v62, 0.0 }
0x16fe   : > { %v3295_v17 = vadd.f32 %v3294_v24, %v3231_v10  ;;  %3252 = vadd.xlane.f32.xlu1 %v3251_v28 }
0x1700   : > { %v3353_v57 = vmul.f32 %v7245_v27, %v3295_v17 }
0x1702   : > { %3354 = vadd.xlane.f32.xlu1 %v3353_v57 }
0x1707   : > { %v3240_v14 = vpop.xlane.xlu1 %3239 }
0x1708   : > { %v3241_v16 = vsub.f32 %v7039_v41, %v3240_v14 }
0x170a   : > { %v3242_v59 = vmul.f32 %v7213_v37, %v3241_v16 }
0x170c   : > { %v3243_v35 = vsel %vm3198_vm12, %v3242_v59, 0.0 }
0x170d   : > { %v3244_v45 = vadd.f32 %v3243_v35, %v3182_v61 }
0x170f   : > { %v3302_v22 = vmul.f32 %v7219_v23, %v3244_v45 }
0x1711   : > { %3303 = vadd.xlane.f32.xlu0 %v3302_v22 }
0x173c   : > { %v3331_v0 = vpop.xlane.xlu1 %3330  ;;  %v3340_v38 = vpop.xlane.xlu0 %3339 }
0x173d   : > { %v3332_v40 = vsub.f32 %v5446_v63, %v3331_v0  ;;  %v3341_v12 = vsub.f32 %v7210_v50, %v3340_v38 }
0x173f   : > { %5821 = vrsqrt.f32 %v3332_v40 }
0x1749   : > { %v7264_v34 = vpop.eup %5821 }
0x174a   : > { %v3342_v3 = vmul.f32 %v7264_v34, %v3341_v12 }
0x174c   : > { %v3345_v48 = vsel %vm3344_vm10, %v3342_v3, 0.0 }
0x174d   : > { %v3346_v20 = vadd.f32 %v3345_v48, %v3282_v4 }
0x174f   : > { %5449 = vst [vmem:[%s5950_s20 + $0x20] sm:$0xff] %v3346_v20 }
0x1756   : > { %v7271_v51 = vld [vmem:[%s5950_s20 + $0x23] ss:$0 sm:$0xff] }
0x1757   : > { %v3402_v5 = vmul.f32 %v7271_v51, %v3346_v20  ;;  %v3393_v8 = vmul.f32 %v7271_v51, %v7271_v51 }
0x1759   : > { %3403 = vadd.xlane.f32.xlu1 %v3402_v5  ;;  %3394 = vadd.xlane.f32.xlu0 %v3393_v8 }
0x178b   : > { %v3253_v44 = vpop.xlane.xlu1 %3252 }
0x178c   : > { %v3254_v7 = vsub.f32 %v7064_v30, %v3253_v44 }
0x178e   : > { %v3255_v53 = vmul.f32 %v7213_v37, %v3254_v7 }
0x178f   : > { %v3355_v18 = vpop.xlane.xlu1 %3354 }
0x1790   : > { %v3256_v10 = vsel %vm3198_vm12, %v3255_v53, 0.0  ;;  %v3356_v56 = vsub.f32 %v7278_v21, %v3355_v18  ;;  %vm3408_vm12 = vmand %vm3388_vm4, %vm496_vm8 }
0x1791   : > { %v3257_v54 = vadd.f32 %v3256_v10, %v3195_v42 }
0x1792   : > { %v3357_v29 = vmul.f32 %v7264_v34, %v3356_v56 }
0x1793   : > { %v3315_v9 = vmul.f32 %v7219_v23, %v3257_v54  ;;  %v5460_v23 = vld [vmem:[%s5958_s21 + $0x23] ss:$0 sm:$0xff] }
0x1794   : > { %v3358_v13 = vsel %vm3324_vm9, %v3357_v29, 0.0 }
0x1795   : > { %v3359_v61 = vadd.f32 %v3358_v13, %v3295_v17  ;;  %3316 = vadd.xlane.f32.xlu0 %v3315_v9 }
0x1797   : > { %v3417_v26 = vmul.f32 %v7271_v51, %v3359_v61 }
0x1799   : > { %3418 = vadd.xlane.f32.xlu0 %v3417_v26 }
0x179e   : > { %v3304_v46 = vpop.xlane.xlu0 %3303 }
0x179f   : > { %v3305_v37 = vsub.f32 %v7039_v41, %v3304_v46 }
0x17a1   : > { %v3306_v60 = vmul.f32 %v7238_v33, %v3305_v37 }
0x17a3   : > { %v3307_v19 = vsel %vm3260_vm3, %v3306_v60, 0.0 }
0x17a4   : > { %v3308_v36 = vadd.f32 %v3307_v19, %v3244_v45 }
0x17a6   : > { %v3366_v58 = vmul.f32 %v7245_v27, %v3308_v36 }
0x17a8   : > { %3367 = vadd.xlane.f32.xlu1 %v3366_v58 }
0x17e6   : > { %v3395_v15 = vpop.xlane.xlu0 %3394  ;;  %v3404_v4 = vpop.xlane.xlu1 %3403 }
0x17e7   : > { %v3396_v11 = vsub.f32 %v5460_v23, %v3395_v15  ;;  %v3405_v31 = vsub.f32 %v7210_v50, %v3404_v4  ;;  %v5488_v4 = vld [vmem:[%s5958_s21 + $0x25] ss:$0 sm:$0xff] }
0x17e9   : > { %5823 = vrsqrt.f32 %v3396_v11 }
0x17f3   : > { %v7293_v52 = vpop.eup %5823 }
0x17f4   : > { %v3406_v55 = vmul.f32 %v7293_v52, %v3405_v31 }
0x17f6   : > { %v3409_v1 = vsel %vm3408_vm12, %v3406_v55, 0.0 }
0x17f7   : > { %v3410_v47 = vadd.f32 %v3409_v1, %v3346_v20 }
0x17f9   : > { %5463 = vst [vmem:[%s5950_s20 + $0x20] sm:$0xff] %v3410_v47 }
0x1800   : > { %v7300_v2 = vld [vmem:[%s5950_s20 + $0x24] ss:$0 sm:$0xff] }
0x1801   : > { %v3466_v49 = vmul.f32 %v7300_v2, %v3410_v47  ;;  %v3457_v6 = vmul.f32 %v7300_v2, %v7300_v2 }
0x1803   : > { %3467 = vadd.xlane.f32.xlu0 %v3466_v49  ;;  %3458 = vadd.xlane.f32.xlu1 %v3457_v6 }
0x1822   : > { %v3317_v42 = vpop.xlane.xlu0 %3316 }
0x1823   : > { %v3318_v62 = vsub.f32 %v7064_v30, %v3317_v42 }
0x1825   : > { %v3319_v28 = vmul.f32 %v7238_v33, %v3318_v62 }
0x1826   : > { %v3419_v24 = vpop.xlane.xlu0 %3418 }
0x1827   : > { %v3320_v17 = vsel %vm3260_vm3, %v3319_v28, 0.0  ;;  %v3420_v57 = vsub.f32 %v7278_v21, %v3419_v24  ;;  %vm3452_vm3 = vcmask 302368   ;;  %v7355_v28 = vld [vmem:[%s5958_s21 + $0x38] sm:$0xff] }
0x1828   : > { %v3321_v14 = vadd.f32 %v3320_v17, %v3257_v54  ;;  %vm3472_vm15 = vmand %vm3452_vm3, %vm609_vm11 }
0x1829   : > { %v3421_v16 = vmul.f32 %v7293_v52, %v3420_v57 }
0x182a   : > { %v3379_v59 = vmul.f32 %v7245_v27, %v3321_v14  ;;  %v5474_v27 = vld [vmem:[%s5958_s21 + $0x24] ss:$0 sm:$0xff] }
0x182b   : > { %v3422_v35 = vsel %vm3388_vm4, %v3421_v16, 0.0 }
0x182c   : > { %v3423_v45 = vadd.f32 %v3422_v35, %v3359_v61  ;;  %3380 = vadd.xlane.f32.xlu1 %v3379_v59 }
0x182e   : > { %v3481_v22 = vmul.f32 %v7300_v2, %v3423_v45 }
0x1830   : > { %3482 = vadd.xlane.f32.xlu1 %v3481_v22 }
0x1835   : > { %v3368_v63 = vpop.xlane.xlu1 %3367 }
0x1836   : > { %v3369_v33 = vsub.f32 %v7039_v41, %v3368_v63 }
0x1838   : > { %v3370_v0 = vmul.f32 %v7264_v34, %v3369_v33 }
0x183a   : > { %v3371_v40 = vsel %vm3324_vm9, %v3370_v0, 0.0 }
0x183b   : > { %v3372_v38 = vadd.f32 %v3371_v40, %v3308_v36 }
0x183d   : > { %v3430_v12 = vmul.f32 %v7271_v51, %v3372_v38 }
0x183f   : > { %3431 = vadd.xlane.f32.xlu0 %v3430_v12 }
0x1890   : > { %v3459_v3 = vpop.xlane.xlu1 %3458  ;;  %v3468_v20 = vpop.xlane.xlu0 %3467 }
0x1891   : > { %v3460_v48 = vsub.f32 %v5474_v27, %v3459_v3  ;;  %v3469_v5 = vsub.f32 %v7210_v50, %v3468_v20 }
0x1893   : > { %5825 = vrsqrt.f32 %v3460_v48 }
0x189d   : > { %v7319_v8 = vpop.eup %5825 }
0x189e   : > { %v3470_v41 = vmul.f32 %v7319_v8, %v3469_v5 }
0x18a0   : > { %v3473_v44 = vsel %vm3472_vm15, %v3470_v41, 0.0  ;;  %v5502_v41 = vld [vmem:[%s5958_s21 + $0x26] ss:$0 sm:$0xff]  ;;  %vm3708_vm15 = vcmask 335168  }
0x18a1   : > { %v3474_v7 = vadd.f32 %v3473_v44, %v3410_v47 }
0x18a3   : > { %5477 = vst [vmem:[%s5950_s20 + $0x20] sm:$0xff] %v3474_v7 }
0x18aa   : > { %v7326_v53 = vld [vmem:[%s5950_s20 + $0x25] ss:$0 sm:$0xff] }
0x18ab   : > { %v3530_v18 = vmul.f32 %v7326_v53, %v3474_v7  ;;  %v3521_v10 = vmul.f32 %v7326_v53, %v7326_v53 }
0x18ad   : > { %3531 = vadd.xlane.f32.xlu1 %v3530_v18  ;;  %3522 = vadd.xlane.f32.xlu0 %v3521_v10 }
0x18b9   : > { %v3381_v56 = vpop.xlane.xlu1 %3380 }
0x18ba   : > { %v3382_v54 = vsub.f32 %v7064_v30, %v3381_v56  ;;  %v7340_v30 = vld [vmem:[%s5958_s21 + $0x30] sm:$0xff] }
0x18bc   : > { %v3383_v29 = vmul.f32 %v7264_v34, %v3382_v54 }
0x18bd   : > { %v3483_v9 = vpop.xlane.xlu1 %3482 }
0x18be   : > { %v3384_v13 = vsel %vm3324_vm9, %v3383_v29, 0.0  ;;  %v3484_v61 = vsub.f32 %v7278_v21, %v3483_v9  ;;  %vm3516_vm9 = vcmask 310568  }
0x18bf   : > { %v3385_v26 = vadd.f32 %v3384_v13, %v3321_v14  ;;  %vm3536_vm10 = vmand %vm3516_vm9, %vm722_vm14 }
0x18c0   : > { %v3485_v46 = vmul.f32 %v7319_v8, %v3484_v61 }
0x18c1   : > { %v3443_v37 = vmul.f32 %v7271_v51, %v3385_v26 }
0x18c2   : > { %v3486_v60 = vsel %vm3452_vm3, %v3485_v46, 0.0 }
0x18c3   : > { %v3487_v19 = vadd.f32 %v3486_v60, %v3423_v45  ;;  %3444 = vadd.xlane.f32.xlu0 %v3443_v37 }
0x18c5   : > { %v3545_v36 = vmul.f32 %v7326_v53, %v3487_v19 }
0x18c7   : > { %3546 = vadd.xlane.f32.xlu0 %v3545_v36 }
0x18cc   : > { %v3432_v34 = vpop.xlane.xlu0 %3431 }
0x18cd   : > { %v3433_v58 = vsub.f32 %v7340_v30, %v3432_v34 }
0x18cf   : > { %v3434_v23 = vmul.f32 %v7293_v52, %v3433_v58 }
0x18d1   : > { %v3435_v15 = vsel %vm3388_vm4, %v3434_v23, 0.0 }
0x18d2   : > { %v3436_v11 = vadd.f32 %v3435_v15, %v3372_v38 }
0x18d4   : > { %v3494_v51 = vmul.f32 %v7300_v2, %v3436_v11 }
0x18d6   : > { %3495 = vadd.xlane.f32.xlu1 %v3494_v51 }
0x193a   : > { %v3523_v31 = vpop.xlane.xlu0 %3522  ;;  %v3532_v1 = vpop.xlane.xlu1 %3531 }
0x193b   : > { %v3524_v55 = vsub.f32 %v5488_v4, %v3523_v31  ;;  %v3533_v47 = vsub.f32 %v7210_v50, %v3532_v1 }
0x193d   : > { %5827 = vrsqrt.f32 %v3524_v55 }
0x1947   : > { %v7348_v49 = vpop.eup %5827 }
0x1948   : > { %v3534_v6 = vmul.f32 %v7348_v49, %v3533_v47 }
0x194a   : > { %v3537_v42 = vsel %vm3536_vm10, %v3534_v6, 0.0 }
0x194b   : > { %v3538_v62 = vadd.f32 %v3537_v42, %v3474_v7 }
0x194d   : > { %5491 = vst [vmem:[%s5950_s20 + $0x20] sm:$0xff] %v3538_v62 }
0x1950   : > { %v3445_v24 = vpop.xlane.xlu0 %3444 }
0x1951   : > { %v3446_v17 = vsub.f32 %v7355_v28, %v3445_v24  ;;  %v5516_v24 = vld [vmem:[%s5958_s21 + $0x27] ss:$0 sm:$0xff] }
0x1953   : > { %v3447_v57 = vmul.f32 %v7293_v52, %v3446_v17 }
0x1954   : > { %v7360_v14 = vld [vmem:[%s5950_s20 + $0x26] ss:$0 sm:$0xff]  ;;  %v3547_v16 = vpop.xlane.xlu0 %3546 }
0x1955   : > { %v3594_v59 = vmul.f32 %v7360_v14, %v3538_v62  ;;  %v3585_v35 = vmul.f32 %v7360_v14, %v7360_v14  ;;  %v3448_v45 = vsel %vm3388_vm4, %v3447_v57, 0.0  ;;  %v3548_v22 = vsub.f32 %v7278_v21, %v3547_v16 }
0x1956   : > { %v3449_v63 = vadd.f32 %v3448_v45, %v3385_v26  ;;  %vm3580_vm4 = vcmask 318768  }
0x1957   : > { %3595 = vadd.xlane.f32.xlu0 %v3594_v59  ;;  %3586 = vadd.xlane.f32.xlu1 %v3585_v35  ;;  %v3549_v33 = vmul.f32 %v7348_v49, %v3548_v22  ;;  %vm3600_vm12 = vmand %vm3580_vm4, %vm835_vm6 }
0x1958   : > { %v3507_v52 = vmul.f32 %v7300_v2, %v3449_v63 }
0x1959   : > { %v3550_v0 = vsel %vm3516_vm9, %v3549_v33, 0.0 }
0x195a   : > { %v3551_v40 = vadd.f32 %v3550_v0, %v3487_v19 }
0x195b   : > { %3508 = vadd.xlane.f32.xlu1 %v3507_v52 }
0x195c   : > { %v3609_v38 = vmul.f32 %v7360_v14, %v3551_v40 }
0x195f   : > { %3610 = vadd.xlane.f32.xlu1 %v3609_v38 }
0x1963   : > { %v3496_v12 = vpop.xlane.xlu1 %3495 }
0x1964   : > { %v3497_v27 = vsub.f32 %v7340_v30, %v3496_v12 }
0x1966   : > { %v3498_v3 = vmul.f32 %v7319_v8, %v3497_v27 }
0x1968   : > { %v3499_v48 = vsel %vm3452_vm3, %v3498_v3, 0.0 }
0x1969   : > { %v3500_v20 = vadd.f32 %v3499_v48, %v3436_v11 }
0x196b   : > { %v3558_v5 = vmul.f32 %v7326_v53, %v3500_v20 }
0x196d   : > { %3559 = vadd.xlane.f32.xlu0 %v3558_v5 }
0x19e4   : > { %v3587_v2 = vpop.xlane.xlu1 %3586  ;;  %v3596_v56 = vpop.xlane.xlu0 %3595 }
0x19e5   : > { %v3588_v44 = vsub.f32 %v5502_v41, %v3587_v2  ;;  %v3597_v9 = vsub.f32 %v7210_v50, %v3596_v56 }
0x19e7   : > { %5829 = vrsqrt.f32 %v3588_v44 }
0x19e8   : > { %v3509_v7 = vpop.xlane.xlu1 %3508 }
0x19e9   : > { %v3510_v18 = vsub.f32 %v7355_v28, %v3509_v7 }
0x19eb   : > { %v3511_v10 = vmul.f32 %v7319_v8, %v3510_v18 }
0x19ec   : > { %v3611_v26 = vpop.xlane.xlu1 %3610 }
0x19ed   : > { %v3512_v54 = vsel %vm3452_vm3, %v3511_v10, 0.0  ;;  %v3612_v8 = vsub.f32 %v7278_v21, %v3611_v26  ;;  %vm3644_vm3 = vcmask 326968  }
0x19ee   : > { %v3513_v29 = vadd.f32 %v3512_v54, %v3449_v63 }
0x19f0   : > { %v3571_v13 = vmul.f32 %v7326_v53, %v3513_v29 }
0x19f1   : > { %v5830_v61 = vpop.eup %5829 }
0x19f2   : > { %v3598_v46 = vmul.f32 %v5830_v61, %v3597_v9  ;;  %3572 = vadd.xlane.f32.xlu1 %v3571_v13  ;;  %v3613_v19 = vmul.f32 %v5830_v61, %v3612_v8 }
0x19f4   : > { %v3601_v37 = vsel %vm3600_vm12, %v3598_v46, 0.0  ;;  %v3614_v36 = vsel %vm3580_vm4, %v3613_v19, 0.0 }
0x19f5   : > { %v3602_v60 = vadd.f32 %v3601_v37, %v3538_v62  ;;  %v3615_v53 = vadd.f32 %v3614_v36, %v3551_v40 }
0x19f7   : > { %5505 = vst [vmem:[%s5950_s20 + $0x20] sm:$0xff] %v3602_v60 }
0x19fa   : > { %v3560_v34 = vpop.xlane.xlu0 %3559 }
0x19fb   : > { %v3561_v50 = vsub.f32 %v7340_v30, %v3560_v34 }
0x19fd   : > { %v3562_v58 = vmul.f32 %v7348_v49, %v3561_v50 }
0x19fe   : > { %v5515_v23 = vld [vmem:[%s5950_s20 + $0x27] ss:$0 sm:$0xff] }
0x19ff   : > { %v3649_v15 = vmul.f32 %v5515_v23, %v5515_v23  ;;  %v3563_v11 = vsel %vm3516_vm9, %v3562_v58, 0.0  ;;  %v3673_v51 = vmul.f32 %v5515_v23, %v3615_v53 }
0x1a00   : > { %v3564_v4 = vadd.f32 %v3563_v11, %v3500_v20 }
0x1a01   : > { %3650 = vadd.xlane.f32.xlu0 %v3649_v15  ;;  %3674 = vadd.xlane.f32.xlu1 %v3673_v51 }
0x1a02   : > { %v3622_v31 = vmul.f32 %v7360_v14, %v3564_v4 }
0x1a05   : > { %3623 = vadd.xlane.f32.xlu0 %v3622_v31 }
0x1a7f   : > { %v3573_v55 = vpop.xlane.xlu1 %3572 }
0x1a80   : > { %v3574_v1 = vsub.f32 %v7355_v28, %v3573_v55 }
0x1a82   : > { %v3575_v47 = vmul.f32 %v7348_v49, %v3574_v1 }
0x1a84   : > { %v3576_v6 = vsel %vm3516_vm9, %v3575_v47, 0.0  ;;  %vm3757_vm9 = vcmask 343368  }
0x1a85   : > { %v3577_v42 = vadd.f32 %v3576_v6, %v3513_v29  ;;  %v5530_v29 = vld [vmem:[%s5958_s21 + $0x28] ss:$0 sm:$0xff]  ;;  %v5541_v6 = vld [vmem:[%s5958_s21 + $0x29] ss:$0 sm:$0xff]  ;;  %vm3777_vm10 = vmand %vm3757_vm9, %vm270_vm2 }
0x1a87   : > { %v3635_v62 = vmul.f32 %v7360_v14, %v3577_v42 }
0x1a89   : > { %3636 = vadd.xlane.f32.xlu0 %v3635_v62 }
0x1a8e   : > { %v3651_v17 = vpop.xlane.xlu0 %3650  ;;  %v3675_v45 = vpop.xlane.xlu1 %3674 }
0x1a8f   : > { %v3652_v57 = vsub.f32 %v5516_v24, %v3651_v17  ;;  %v3676_v63 = vsub.f32 %v7278_v21, %v3675_v45 }
0x1a91   : > { %5831 = vrsqrt.f32 %v3652_v57 }
0x1a92   : > { %v3624_v16 = vpop.xlane.xlu0 %3623 }
0x1a93   : > { %v3625_v59 = vsub.f32 %v7340_v30, %v3624_v16 }
0x1a95   : > { %v3626_v35 = vmul.f32 %v5830_v61, %v3625_v59 }
0x1a97   : > { %v3627_v22 = vsel %vm3580_vm4, %v3626_v35, 0.0 }
0x1a98   : > { %v3628_v49 = vadd.f32 %v3627_v22, %v3564_v4 }
0x1a9a   : > { %v3686_v33 = vmul.f32 %v5515_v23, %v3628_v49 }
0x1a9b   : > { %v7399_v52 = vpop.eup %5831 }
0x1a9c   : > { %v3677_v14 = vmul.f32 %v7399_v52, %v3676_v63  ;;  %3687 = vadd.xlane.f32.xlu1 %v3686_v33 }
0x1a9e   : > { %v3678_v0 = vsel %vm3644_vm3, %v3677_v14, 0.0 }
0x1a9f   : > { %v3679_v40 = vadd.f32 %v3678_v0, %v3615_v53 }
0x1aa1   : > { %5522 = vst [vmem:[%s5950_s20 + $0x28] sm:$0xff] %v3679_v40 }
0x1aa8   : > { %v5529_v38 = vld [vmem:[%s5950_s20 + $0x28] ss:$0 sm:$0xff] }
0x1aa9   : > { %v3713_v12 = vmul.f32 %v5529_v38, %v5529_v38  ;;  %v3722_v27 = vmul.f32 %v5529_v38, %v3679_v40 }
0x1aab   : > { %3714 = vadd.xlane.f32.xlu0 %v3713_v12  ;;  %3723 = vadd.xlane.f32.xlu1 %v3722_v27 }
0x1b16   : > { %v3637_v3 = vpop.xlane.xlu0 %3636 }
0x1b17   : > { %v3638_v48 = vsub.f32 %v7355_v28, %v3637_v3 }
0x1b19   : > { %v3639_v20 = vmul.f32 %v5830_v61, %v3638_v48 }
0x1b1b   : > { %v3640_v5 = vsel %vm3580_vm4, %v3639_v20, 0.0  ;;  %vm3808_vm4 = vcmask 351568  }
0x1b1c   : > { %v3641_v41 = vadd.f32 %v3640_v5, %v3577_v42  ;;  %vm3828_vm12 = vmand %vm3808_vm4, %vm383_vm5 }
0x1b1e   : > { %v3699_v2 = vmul.f32 %v5515_v23, %v3641_v41 }
0x1b20   : > { %3700 = vadd.xlane.f32.xlu0 %v3699_v2 }
0x1b29   : > { %v3688_v44 = vpop.xlane.xlu1 %3687 }
0x1b2a   : > { %v3689_v7 = vsub.f32 %v7340_v30, %v3688_v44 }
0x1b2c   : > { %v3690_v18 = vmul.f32 %v7399_v52, %v3689_v7 }
0x1b2e   : > { %v3691_v10 = vsel %vm3644_vm3, %v3690_v18, 0.0 }
0x1b2f   : > { %v3692_v56 = vadd.f32 %v3691_v10, %v3628_v49 }
0x1b31   : > { %v3735_v54 = vmul.f32 %v5529_v38, %v3692_v56 }
0x1b33   : > { %3736 = vadd.xlane.f32.xlu1 %v3735_v54 }
0x1b38   : > { %v3715_v9 = vpop.xlane.xlu0 %3714  ;;  %v3724_v61 = vpop.xlane.xlu1 %3723 }
0x1b39   : > { %v3716_v13 = vsub.f32 %v5530_v29, %v3715_v9  ;;  %v3725_v26 = vsub.f32 %v7278_v21, %v3724_v61 }
0x1b3b   : > { %5833 = vrsqrt.f32 %v3716_v13 }
0x1b45   : > { %v5834_v46 = vpop.eup %5833 }
0x1b46   : > { %v3726_v37 = vmul.f32 %v5834_v46, %v3725_v26 }
0x1b48   : > { %v3727_v8 = vsel %vm3708_vm15, %v3726_v37, 0.0 }
0x1b49   : > { %v3728_v60 = vadd.f32 %v3727_v8, %v3679_v40 }
0x1b4b   : > { %5533 = vst [vmem:[%s5950_s20 + $0x28] sm:$0xff] %v3728_v60 }
0x1b52   : > { %v5540_v19 = vld [vmem:[%s5950_s20 + $0x29] ss:$0 sm:$0xff] }
0x1b53   : > { %v3771_v36 = vmul.f32 %v5540_v19, %v3728_v60  ;;  %v3762_v34 = vmul.f32 %v5540_v19, %v5540_v19 }
0x1b55   : > { %3772 = vadd.xlane.f32.xlu1 %v3771_v36  ;;  %3763 = vadd.xlane.f32.xlu0 %v3762_v34 }
0x1bad   : > { %v3701_v50 = vpop.xlane.xlu0 %3700 }
0x1bae   : > { %v3702_v53 = vsub.f32 %v7355_v28, %v3701_v50 }
0x1bb0   : > { %v3703_v58 = vmul.f32 %v7399_v52, %v3702_v53 }
0x1bb2   : > { %v3704_v23 = vsel %vm3644_vm3, %v3703_v58, 0.0 }
0x1bb3   : > { %v3705_v15 = vadd.f32 %v3704_v23, %v3641_v41  ;;  %v5552_v41 = vld [vmem:[%s5958_s21 + $0x2a] ss:$0 sm:$0xff] }
0x1bb5   : > { %v3748_v11 = vmul.f32 %v5529_v38, %v3705_v15 }
0x1bb7   : > { %3749 = vadd.xlane.f32.xlu0 %v3748_v11 }
0x1bc0   : > { %v3737_v51 = vpop.xlane.xlu1 %3736 }
0x1bc1   : > { %v3738_v4 = vsub.f32 %v7340_v30, %v3737_v51 }
0x1bc3   : > { %v3739_v31 = vmul.f32 %v5834_v46, %v3738_v4 }
0x1bc5   : > { %v3740_v55 = vsel %vm3708_vm15, %v3739_v31, 0.0 }
0x1bc6   : > { %v3741_v1 = vadd.f32 %v3740_v55, %v3692_v56 }
0x1bc8   : > { %v3786_v47 = vmul.f32 %v5540_v19, %v3741_v1 }
0x1bca   : > { %3787 = vadd.xlane.f32.xlu1 %v3786_v47 }
0x1be2   : > { %v3764_v42 = vpop.xlane.xlu0 %3763  ;;  %v3773_v24 = vpop.xlane.xlu1 %3772 }
0x1be3   : > { %v3765_v62 = vsub.f32 %v5541_v6, %v3764_v42  ;;  %v3774_v17 = vsub.f32 %v7278_v21, %v3773_v24 }
0x1be5   : > { %5835 = vrsqrt.f32 %v3765_v62 }
0x1bef   : > { %v5836_v57 = vpop.eup %5835 }
0x1bf0   : > { %v3775_v16 = vmul.f32 %v5836_v57, %v3774_v17 }
0x1bf2   : > { %v3778_v59 = vsel %vm3777_vm10, %v3775_v16, 0.0  ;;  %vm3910_vm10 = vcmask 367968  }
0x1bf3   : > { %v3779_v35 = vadd.f32 %v3778_v59, %v3728_v60 }
0x1bf5   : > { %5544 = vst [vmem:[%s5950_s20 + $0x28] sm:$0xff] %v3779_v35 }
0x1bfc   : > { %v5551_v45 = vld [vmem:[%s5950_s20 + $0x2a] ss:$0 sm:$0xff] }
0x1bfd   : > { %v3822_v22 = vmul.f32 %v5551_v45, %v3779_v35  ;;  %v3813_v49 = vmul.f32 %v5551_v45, %v5551_v45 }
0x1bff   : > { %3823 = vadd.xlane.f32.xlu1 %v3822_v22  ;;  %3814 = vadd.xlane.f32.xlu0 %v3813_v49 }
0x1c44   : > { %v3750_v63 = vpop.xlane.xlu0 %3749 }
0x1c45   : > { %v3751_v33 = vsub.f32 %v7355_v28, %v3750_v63 }
0x1c47   : > { %v3752_v14 = vmul.f32 %v5834_v46, %v3751_v33 }
0x1c49   : > { %v3753_v0 = vsel %vm3708_vm15, %v3752_v14, 0.0  ;;  %vm3859_vm15 = vcmask 359768  }
0x1c4a   : > { %v3754_v40 = vadd.f32 %v3753_v0, %v3705_v15  ;;  %v5563_v15 = vld [vmem:[%s5958_s21 + $0x2b] ss:$0 sm:$0xff] }
0x1c4c   : > { %v3799_v38 = vmul.f32 %v5540_v19, %v3754_v40 }
0x1c4e   : > { %3800 = vadd.xlane.f32.xlu0 %v3799_v38 }
0x1c57   : > { %v3788_v12 = vpop.xlane.xlu1 %3787 }
0x1c58   : > { %v3789_v27 = vsub.f32 %v7340_v30, %v3788_v12 }
0x1c5a   : > { %v3790_v3 = vmul.f32 %v5836_v57, %v3789_v27 }
0x1c5c   : > { %v3791_v48 = vsel %vm3757_vm9, %v3790_v3, 0.0 }
0x1c5d   : > { %v3792_v20 = vadd.f32 %v3791_v48, %v3741_v1 }
0x1c5f   : > { %v3837_v5 = vmul.f32 %v5551_v45, %v3792_v20 }
0x1c61   : > { %3838 = vadd.xlane.f32.xlu1 %v3837_v5 }
0x1c8c   : > { %v3815_v2 = vpop.xlane.xlu0 %3814  ;;  %v3824_v7 = vpop.xlane.xlu1 %3823 }
0x1c8d   : > { %v3816_v44 = vsub.f32 %v5552_v41, %v3815_v2  ;;  %v3825_v18 = vsub.f32 %v7278_v21, %v3824_v7 }
0x1c8f   : > { %5837 = vrsqrt.f32 %v3816_v44 }
0x1c99   : > { %v5838_v10 = vpop.eup %5837 }
0x1c9a   : > { %v3826_v56 = vmul.f32 %v5838_v10, %v3825_v18 }
0x1c9c   : > { %v3829_v54 = vsel %vm3828_vm12, %v3826_v56, 0.0  ;;  %vm3961_vm12 = vcmask 376168  }
0x1c9d   : > { %v3830_v29 = vadd.f32 %v3829_v54, %v3779_v35 }
0x1c9f   : > { %5555 = vst [vmem:[%s5950_s20 + $0x28] sm:$0xff] %v3830_v29 }
0x1ca6   : > { %v5562_v9 = vld [vmem:[%s5950_s20 + $0x2b] ss:$0 sm:$0xff] }
0x1ca7   : > { %v3873_v13 = vmul.f32 %v5562_v9, %v3830_v29  ;;  %v3864_v61 = vmul.f32 %v5562_v9, %v5562_v9 }
0x1ca9   : > { %3874 = vadd.xlane.f32.xlu1 %v3873_v13  ;;  %3865 = vadd.xlane.f32.xlu0 %v3864_v61 }
0x1cdb   : > { %v3801_v26 = vpop.xlane.xlu0 %3800 }
0x1cdc   : > { %v3802_v46 = vsub.f32 %v7355_v28, %v3801_v26 }
0x1cde   : > { %v3803_v37 = vmul.f32 %v5836_v57, %v3802_v46 }
0x1ce0   : > { %v3804_v8 = vsel %vm3757_vm9, %v3803_v37, 0.0  ;;  %vm3879_vm9 = vmand %vm3859_vm15, %vm496_vm8 }
0x1ce1   : > { %v3805_v60 = vadd.f32 %v3804_v8, %v3754_v40  ;;  %v5574_v40 = vld [vmem:[%s5958_s21 + $0x2c] ss:$0 sm:$0xff] }
0x1ce3   : > { %v3850_v19 = vmul.f32 %v5551_v45, %v3805_v60 }
0x1ce5   : > { %3851 = vadd.xlane.f32.xlu0 %v3850_v19 }
0x1cee   : > { %v3839_v36 = vpop.xlane.xlu1 %3838 }
0x1cef   : > { %v3840_v34 = vsub.f32 %v7340_v30, %v3839_v36 }
0x1cf1   : > { %v3841_v50 = vmul.f32 %v5838_v10, %v3840_v34 }
0x1cf3   : > { %v3842_v53 = vsel %vm3808_vm4, %v3841_v50, 0.0 }
0x1cf4   : > { %v3843_v58 = vadd.f32 %v3842_v53, %v3792_v20 }
0x1cf6   : > { %v3888_v23 = vmul.f32 %v5562_v9, %v3843_v58 }
0x1cf8   : > { %3889 = vadd.xlane.f32.xlu1 %v3888_v23 }
0x1d36   : > { %v3866_v11 = vpop.xlane.xlu0 %3865  ;;  %v3875_v4 = vpop.xlane.xlu1 %3874 }
0x1d37   : > { %v3867_v51 = vsub.f32 %v5563_v15, %v3866_v11  ;;  %v3876_v31 = vsub.f32 %v7278_v21, %v3875_v4 }
0x1d39   : > { %5839 = vrsqrt.f32 %v3867_v51 }
0x1d43   : > { %v5840_v55 = vpop.eup %5839 }
0x1d44   : > { %v3877_v1 = vmul.f32 %v5840_v55, %v3876_v31 }
0x1d46   : > { %v3880_v47 = vsel %vm3879_vm9, %v3877_v1, 0.0  ;;  %vm4012_vm9 = vcmask 384368  }
0x1d47   : > { %v3881_v6 = vadd.f32 %v3880_v47, %v3830_v29 }
0x1d49   : > { %5566 = vst [vmem:[%s5950_s20 + $0x28] sm:$0xff] %v3881_v6 }
0x1d50   : > { %v5573_v42 = vld [vmem:[%s5950_s20 + $0x2c] ss:$0 sm:$0xff] }
0x1d51   : > { %v3924_v62 = vmul.f32 %v5573_v42, %v3881_v6  ;;  %v3915_v24 = vmul.f32 %v5573_v42, %v5573_v42 }
0x1d53   : > { %3925 = vadd.xlane.f32.xlu1 %v3924_v62  ;;  %3916 = vadd.xlane.f32.xlu0 %v3915_v24 }
0x1d72   : > { %v3852_v17 = vpop.xlane.xlu0 %3851 }
0x1d73   : > { %v3853_v57 = vsub.f32 %v7355_v28, %v3852_v17 }
0x1d75   : > { %v3854_v16 = vmul.f32 %v5838_v10, %v3853_v57 }
0x1d77   : > { %v3855_v59 = vsel %vm3808_vm4, %v3854_v16, 0.0  ;;  %vm3930_vm4 = vmand %vm3910_vm10, %vm609_vm11 }
0x1d78   : > { %v3856_v35 = vadd.f32 %v3855_v59, %v3805_v60  ;;  %v5585_v60 = vld [vmem:[%s5958_s21 + $0x2d] ss:$0 sm:$0xff] }
0x1d7a   : > { %v3901_v45 = vmul.f32 %v5562_v9, %v3856_v35 }
0x1d7c   : > { %3902 = vadd.xlane.f32.xlu0 %v3901_v45 }
0x1d85   : > { %v3890_v22 = vpop.xlane.xlu1 %3889 }
0x1d86   : > { %v3891_v49 = vsub.f32 %v7340_v30, %v3890_v22 }
0x1d88   : > { %v3892_v63 = vmul.f32 %v5840_v55, %v3891_v49 }
0x1d8a   : > { %v3893_v33 = vsel %vm3859_vm15, %v3892_v63, 0.0 }
0x1d8b   : > { %v3894_v14 = vadd.f32 %v3893_v33, %v3843_v58 }
0x1d8d   : > { %v3939_v0 = vmul.f32 %v5573_v42, %v3894_v14 }
0x1d8f   : > { %3940 = vadd.xlane.f32.xlu1 %v3939_v0 }
0x1de0   : > { %v3917_v38 = vpop.xlane.xlu0 %3916  ;;  %v3926_v27 = vpop.xlane.xlu1 %3925 }
0x1de1   : > { %v3918_v12 = vsub.f32 %v5574_v40, %v3917_v38  ;;  %v3927_v3 = vsub.f32 %v7278_v21, %v3926_v27 }
0x1de3   : > { %5841 = vrsqrt.f32 %v3918_v12 }
0x1ded   : > { %v5842_v48 = vpop.eup %5841 }
0x1dee   : > { %v3928_v20 = vmul.f32 %v5842_v48, %v3927_v3 }
0x1df0   : > { %v3931_v5 = vsel %vm3930_vm4, %v3928_v20, 0.0  ;;  %vm4063_vm4 = vcmask 392568  }
0x1df1   : > { %v3932_v41 = vadd.f32 %v3931_v5, %v3881_v6 }
0x1df3   : > { %5577 = vst [vmem:[%s5950_s20 + $0x28] sm:$0xff] %v3932_v41 }
0x1dfa   : > { %v5584_v2 = vld [vmem:[%s5950_s20 + $0x2d] ss:$0 sm:$0xff] }
0x1dfb   : > { %v3975_v44 = vmul.f32 %v5584_v2, %v3932_v41  ;;  %v3966_v7 = vmul.f32 %v5584_v2, %v5584_v2 }
0x1dfd   : > { %3976 = vadd.xlane.f32.xlu1 %v3975_v44  ;;  %3967 = vadd.xlane.f32.xlu0 %v3966_v7 }
0x1e09   : > { %v3903_v18 = vpop.xlane.xlu0 %3902 }
0x1e0a   : > { %v3904_v10 = vsub.f32 %v7355_v28, %v3903_v18 }
0x1e0c   : > { %v3905_v56 = vmul.f32 %v5840_v55, %v3904_v10 }
0x1e0e   : > { %v3906_v54 = vsel %vm3859_vm15, %v3905_v56, 0.0  ;;  %vm3981_vm15 = vmand %vm3961_vm12, %vm722_vm14 }
0x1e0f   : > { %v3907_v29 = vadd.f32 %v3906_v54, %v3856_v35  ;;  %v5596_v35 = vld [vmem:[%s5958_s21 + $0x2e] ss:$0 sm:$0xff] }
0x1e11   : > { %v3952_v9 = vmul.f32 %v5573_v42, %v3907_v29 }
0x1e13   : > { %3953 = vadd.xlane.f32.xlu0 %v3952_v9 }
0x1e1c   : > { %v3941_v13 = vpop.xlane.xlu1 %3940 }
0x1e1d   : > { %v3942_v61 = vsub.f32 %v7340_v30, %v3941_v13 }
0x1e1f   : > { %v3943_v26 = vmul.f32 %v5842_v48, %v3942_v61 }
0x1e21   : > { %v3944_v46 = vsel %vm3910_vm10, %v3943_v26, 0.0  ;;  %v5607_v26 = vld [vmem:[%s5958_s21 + $0x2f] ss:$0 sm:$0xff] }
0x1e22   : > { %v3945_v37 = vadd.f32 %v3944_v46, %v3894_v14 }
0x1e24   : > { %v3990_v8 = vmul.f32 %v5584_v2, %v3945_v37 }
0x1e26   : > { %3991 = vadd.xlane.f32.xlu1 %v3990_v8 }
0x1e8a   : > { %v3968_v19 = vpop.xlane.xlu0 %3967  ;;  %v3977_v34 = vpop.xlane.xlu1 %3976 }
0x1e8b   : > { %v3969_v36 = vsub.f32 %v5585_v60, %v3968_v19  ;;  %v3978_v50 = vsub.f32 %v7278_v21, %v3977_v34 }
0x1e8d   : > { %5843 = vrsqrt.f32 %v3969_v36 }
0x1e97   : > { %v5844_v53 = vpop.eup %5843 }
0x1e98   : > { %v3979_v58 = vmul.f32 %v5844_v53, %v3978_v50 }
0x1e9a   : > { %v3982_v23 = vsel %vm3981_vm15, %v3979_v58, 0.0  ;;  %vm4150_vm15 = vcmask 408968  }
0x1e9b   : > { %v3983_v15 = vadd.f32 %v3982_v23, %v3932_v41 }
0x1e9d   : > { %5588 = vst [vmem:[%s5950_s20 + $0x28] sm:$0xff] %v3983_v15 }
0x1ea0   : > { %v3954_v11 = vpop.xlane.xlu0 %3953 }
0x1ea1   : > { %v3955_v51 = vsub.f32 %v7355_v28, %v3954_v11 }
0x1ea3   : > { %v3956_v4 = vmul.f32 %v5842_v48, %v3955_v51 }
0x1ea4   : > { %v5595_v31 = vld [vmem:[%s5950_s20 + $0x2e] ss:$0 sm:$0xff] }
0x1ea5   : > { %v4026_v55 = vmul.f32 %v5595_v31, %v3983_v15  ;;  %v4017_v1 = vmul.f32 %v5595_v31, %v5595_v31  ;;  %v3957_v47 = vsel %vm3910_vm10, %v3956_v4, 0.0  ;;  %vm4032_vm10 = vmand %vm4012_vm9, %vm835_vm6 }
0x1ea6   : > { %v3958_v6 = vadd.f32 %v3957_v47, %v3907_v29 }
0x1ea7   : > { %4027 = vadd.xlane.f32.xlu1 %v4026_v55  ;;  %4018 = vadd.xlane.f32.xlu0 %v4017_v1  ;;  %v5618_v1 = vld [vmem:[%s5958_s21 + $0x30] ss:$0 sm:$0xff] }
0x1ea8   : > { %v4003_v42 = vmul.f32 %v5584_v2, %v3958_v6 }
0x1eab   : > { %4004 = vadd.xlane.f32.xlu0 %v4003_v42 }
0x1eb3   : > { %v3992_v62 = vpop.xlane.xlu1 %3991 }
0x1eb4   : > { %v3993_v24 = vsub.f32 %v7340_v30, %v3992_v62 }
0x1eb6   : > { %v3994_v17 = vmul.f32 %v5844_v53, %v3993_v24 }
0x1eb8   : > { %v3995_v57 = vsel %vm3961_vm12, %v3994_v17, 0.0 }
0x1eb9   : > { %v3996_v16 = vadd.f32 %v3995_v57, %v3945_v37 }
0x1ebb   : > { %v4041_v59 = vmul.f32 %v5595_v31, %v3996_v16 }
0x1ebd   : > { %4042 = vadd.xlane.f32.xlu1 %v4041_v59 }
0x1f34   : > { %v4019_v45 = vpop.xlane.xlu0 %4018  ;;  %v4028_v14 = vpop.xlane.xlu1 %4027 }
0x1f35   : > { %v4020_v22 = vsub.f32 %v5596_v35, %v4019_v45  ;;  %v4029_v38 = vsub.f32 %v7278_v21, %v4028_v14 }
0x1f37   : > { %5845 = vrsqrt.f32 %v4020_v22 }
0x1f38   : > { %v4005_v49 = vpop.xlane.xlu0 %4004 }
0x1f39   : > { %v4006_v63 = vsub.f32 %v7355_v28, %v4005_v49 }
0x1f3b   : > { %v4007_v33 = vmul.f32 %v5844_v53, %v4006_v63 }
0x1f3d   : > { %v4008_v0 = vsel %vm3961_vm12, %v4007_v33, 0.0  ;;  %vm4114_vm12 = vcmask 400768  }
0x1f3e   : > { %v4009_v40 = vadd.f32 %v4008_v0, %v3958_v6 }
0x1f40   : > { %v4054_v12 = vmul.f32 %v5595_v31, %v4009_v40 }
0x1f41   : > { %v5846_v27 = vpop.eup %5845 }
0x1f42   : > { %v4030_v3 = vmul.f32 %v5846_v27, %v4029_v38  ;;  %4055 = vadd.xlane.f32.xlu1 %v4054_v12 }
0x1f44   : > { %v4033_v48 = vsel %vm4032_vm10, %v4030_v3, 0.0  ;;  %vm4188_vm10 = vcmask 417168  }
0x1f45   : > { %v7476_v20 = vadd.f32 %v4033_v48, %v3983_v15 }
0x1f47   : > { %5599 = vst [vmem:[%s5950_s20 + $0x28] sm:$0xff] %v7476_v20 }
0x1f4a   : > { %v4043_v5 = vpop.xlane.xlu1 %4042 }
0x1f4b   : > { %v4044_v41 = vsub.f32 %v7340_v30, %v4043_v5 }
0x1f4d   : > { %v4045_v2 = vmul.f32 %v5846_v27, %v4044_v41 }
0x1f4e   : > { %v7482_v44 = vld [vmem:[%s5950_s20 + $0x2f] ss:$0 sm:$0xff] }
0x1f4f   : > { %v4068_v21 = vmul.f32 %v7482_v44, %v7482_v44  ;;  %v4046_v7 = vsel %vm4012_vm9, %v4045_v2, 0.0 }
0x1f50   : > { %v4047_v18 = vadd.f32 %v4046_v7, %v3996_v16 }
0x1f51   : > { %4069 = vadd.xlane.f32.xlu0 %v4068_v21 }
0x1f52   : > { %v4092_v10 = vmul.f32 %v7482_v44, %v4047_v18 }
0x1f55   : > { %4093 = vadd.xlane.f32.xlu0 %v4092_v10 }
0x1fcf   : > { %v4056_v56 = vpop.xlane.xlu1 %4055 }
0x1fd0   : > { %v4057_v54 = vsub.f32 %v7355_v28, %v4056_v56 }
0x1fd2   : > { %v4058_v29 = vmul.f32 %v5846_v27, %v4057_v54 }
0x1fd4   : > { %v4059_v9 = vsel %vm4012_vm9, %v4058_v29, 0.0  ;;  %vm4170_vm9 = vmand %vm4150_vm15, %vm270_vm2 }
0x1fd5   : > { %v4060_v13 = vadd.f32 %v4059_v9, %v4009_v40  ;;  %v5626_v40 = vld [vmem:[%s5958_s21 + $0x31] ss:$0 sm:$0xff] }
0x1fd7   : > { %v4105_v61 = vmul.f32 %v7482_v44, %v4060_v13 }
0x1fd9   : > { %4106 = vadd.xlane.f32.xlu1 %v4105_v61 }
0x1fde   : > { %v4070_v46 = vpop.xlane.xlu0 %4069 }
0x1fdf   : > { %v4071_v37 = vsub.f32 %v5607_v26, %v4070_v46  ;;  %v7517_v46 = vld [vmem:[%s5958_s21 + $0x30] sm:$0xff] }
0x1fe1   : > { %5847 = vrsqrt.f32 %v4071_v37 }
0x1fe2   : > { %v4094_v8 = vpop.xlane.xlu0 %4093 }
0x1fe3   : > { %v4095_v60 = vsub.f32 %v7340_v30, %v4094_v8 }
0x1feb   : > { %v7493_v19 = vpop.eup %5847 }
0x1fec   : > { %v4096_v36 = vmul.f32 %v7493_v19, %v4095_v60 }
0x1fee   : > { %v4097_v34 = vsel %vm4063_vm4, %v4096_v36, 0.0 }
0x1fef   : > { %v4098_v50 = vadd.f32 %v4097_v34, %v4047_v18 }
0x1ff1   : > { %5613 = vst [vmem:[%s5950_s20 + $0x30] sm:$0xff] %v4098_v50 }
0x1ff8   : > { %v5617_v53 = vld [vmem:[%s5950_s20 + $0x30] ss:$0 sm:$0xff] }
0x1ff9   : > { %v4119_v58 = vmul.f32 %v5617_v53, %v5617_v53  ;;  %v4128_v23 = vmul.f32 %v5617_v53, %v4098_v50 }
0x1ffb   : > { %4120 = vadd.xlane.f32.xlu0 %v4119_v58  ;;  %4129 = vadd.xlane.f32.xlu1 %v4128_v23  ;;  %v7525_v23 = vld [vmem:[%s5958_s21 + $0x38] sm:$0xff] }
0x2066   : > { %v4107_v15 = vpop.xlane.xlu1 %4106 }
0x2067   : > { %v4108_v11 = vsub.f32 %v7355_v28, %v4107_v15 }
0x2069   : > { %v4109_v51 = vmul.f32 %v7493_v19, %v4108_v11 }
0x206b   : > { %v4110_v4 = vsel %vm4063_vm4, %v4109_v51, 0.0 }
0x206c   : > { %v4111_v31 = vadd.f32 %v4110_v4, %v4060_v13  ;;  %v5634_v13 = vld [vmem:[%s5958_s21 + $0x32] ss:$0 sm:$0xff] }
0x206e   : > { %v4141_v55 = vmul.f32 %v5617_v53, %v4111_v31 }
0x2070   : > { %4142 = vadd.xlane.f32.xlu0 %v4141_v55 }
0x2088   : > { %v4121_v47 = vpop.xlane.xlu0 %4120  ;;  %v4130_v42 = vpop.xlane.xlu1 %4129 }
0x2089   : > { %v4122_v6 = vsub.f32 %v5618_v1, %v4121_v47  ;;  %v4131_v62 = vsub.f32 %v7340_v30, %v4130_v42  ;;  %v5642_v1 = vld [vmem:[%s5958_s21 + $0x33] ss:$0 sm:$0xff] }
0x208b   : > { %5849 = vrsqrt.f32 %v4122_v6 }
0x2095   : > { %v5850_v24 = vpop.eup %5849 }
0x2096   : > { %v4132_v17 = vmul.f32 %v5850_v24, %v4131_v62 }
0x2098   : > { %v4133_v57 = vsel %vm4114_vm12, %v4132_v17, 0.0 }
0x2099   : > { %v4134_v16 = vadd.f32 %v4133_v57, %v4098_v50 }
0x209b   : > { %5621 = vst [vmem:[%s5950_s20 + $0x30] sm:$0xff] %v4134_v16 }
0x20a2   : > { %v5625_v59 = vld [vmem:[%s5950_s20 + $0x31] ss:$0 sm:$0xff] }
0x20a3   : > { %v4164_v35 = vmul.f32 %v5625_v59, %v4134_v16  ;;  %v4155_v45 = vmul.f32 %v5625_v59, %v5625_v59 }
0x20a5   : > { %4165 = vadd.xlane.f32.xlu0 %v4164_v35  ;;  %4156 = vadd.xlane.f32.xlu1 %v4155_v45 }
0x20fd   : > { %v4143_v22 = vpop.xlane.xlu0 %4142 }
0x20fe   : > { %v4144_v49 = vsub.f32 %v7355_v28, %v4143_v22 }
0x2100   : > { %v4145_v63 = vmul.f32 %v5850_v24, %v4144_v49 }
0x2102   : > { %v4146_v33 = vsel %vm4114_vm12, %v4145_v63, 0.0  ;;  %vm4208_vm12 = vmand %vm4188_vm10, %vm383_vm5 }
0x2103   : > { %v4147_v14 = vadd.f32 %v4146_v33, %v4111_v31 }
0x2105   : > { %v4179_v0 = vmul.f32 %v5625_v59, %v4147_v14 }
0x2107   : > { %4180 = vadd.xlane.f32.xlu1 %v4179_v0 }
0x2132   : > { %v4157_v38 = vpop.xlane.xlu1 %4156  ;;  %v4166_v27 = vpop.xlane.xlu0 %4165 }
0x2133   : > { %v4158_v12 = vsub.f32 %v5626_v40, %v4157_v38  ;;  %v4167_v3 = vsub.f32 %v7340_v30, %v4166_v27  ;;  %v5650_v40 = vld [vmem:[%s5958_s21 + $0x34] ss:$0 sm:$0xff] }
0x2135   : > { %5851 = vrsqrt.f32 %v4158_v12 }
0x213f   : > { %v5852_v48 = vpop.eup %5851 }
0x2140   : > { %v4168_v5 = vmul.f32 %v5852_v48, %v4167_v3 }
0x2142   : > { %v4171_v41 = vsel %vm4170_vm9, %v4168_v5, 0.0 }
0x2143   : > { %v4172_v2 = vadd.f32 %v4171_v41, %v4134_v16 }
0x2145   : > { %5629 = vst [vmem:[%s5950_s20 + $0x30] sm:$0xff] %v4172_v2 }
0x214c   : > { %v5633_v21 = vld [vmem:[%s5950_s20 + $0x32] ss:$0 sm:$0xff] }
0x214d   : > { %v4202_v7 = vmul.f32 %v5633_v21, %v4172_v2  ;;  %v4193_v18 = vmul.f32 %v5633_v21, %v5633_v21 }
0x214f   : > { %4203 = vadd.xlane.f32.xlu1 %v4202_v7  ;;  %4194 = vadd.xlane.f32.xlu0 %v4193_v18 }
0x2194   : > { %v4181_v10 = vpop.xlane.xlu1 %4180 }
0x2195   : > { %v4182_v56 = vsub.f32 %v7355_v28, %v4181_v10 }
0x2197   : > { %v4183_v54 = vmul.f32 %v5852_v48, %v4182_v56 }
0x2199   : > { %v4184_v30 = vsel %vm4150_vm15, %v4183_v54, 0.0  ;;  %vm4226_vm15 = vcmask 425368  }
0x219a   : > { %v4185_v29 = vadd.f32 %v4184_v30, %v4147_v14  ;;  %vm4246_vm9 = vmand %vm4226_vm15, %vm496_vm8 }
0x219c   : > { %v4217_v9 = vmul.f32 %v5633_v21, %v4185_v29 }
0x219e   : > { %4218 = vadd.xlane.f32.xlu0 %v4217_v9 }
0x21dc   : > { %v4195_v61 = vpop.xlane.xlu0 %4194  ;;  %v4204_v37 = vpop.xlane.xlu1 %4203 }
0x21dd   : > { %v4196_v26 = vsub.f32 %v5634_v13, %v4195_v61  ;;  %v4205_v8 = vsub.f32 %v7517_v46, %v4204_v37  ;;  %v5658_v13 = vld [vmem:[%s5958_s21 + $0x35] ss:$0 sm:$0xff] }
0x21df   : > { %5853 = vrsqrt.f32 %v4196_v26 }
0x21e9   : > { %v5854_v28 = vpop.eup %5853 }
0x21ea   : > { %v4206_v60 = vmul.f32 %v5854_v28, %v4205_v8 }
0x21ec   : > { %v4209_v36 = vsel %vm4208_vm12, %v4206_v60, 0.0 }
0x21ed   : > { %v4210_v34 = vadd.f32 %v4209_v36, %v4172_v2 }
0x21ef   : > { %5637 = vst [vmem:[%s5950_s20 + $0x30] sm:$0xff] %v4210_v34 }
0x21f6   : > { %v5641_v50 = vld [vmem:[%s5950_s20 + $0x33] ss:$0 sm:$0xff] }
0x21f7   : > { %v4240_v53 = vmul.f32 %v5641_v50, %v4210_v34  ;;  %v4231_v58 = vmul.f32 %v5641_v50, %v5641_v50 }
0x21f9   : > { %4241 = vadd.xlane.f32.xlu0 %v4240_v53  ;;  %4232 = vadd.xlane.f32.xlu1 %v4231_v58 }
0x222b   : > { %v4219_v15 = vpop.xlane.xlu0 %4218 }
0x222c   : > { %v4220_v11 = vsub.f32 %v7525_v23, %v4219_v15 }
0x222e   : > { %v4221_v51 = vmul.f32 %v5854_v28, %v4220_v11 }
0x2230   : > { %v4222_v4 = vsel %vm4188_vm10, %v4221_v51, 0.0  ;;  %vm4264_vm10 = vcmask 433568  }
0x2231   : > { %v4223_v31 = vadd.f32 %v4222_v4, %v4185_v29  ;;  %vm4284_vm12 = vmand %vm4264_vm10, %vm609_vm11 }
0x2233   : > { %v4255_v55 = vmul.f32 %v5641_v50, %v4223_v31 }
0x2235   : > { %4256 = vadd.xlane.f32.xlu1 %v4255_v55 }
0x2286   : > { %v4233_v47 = vpop.xlane.xlu1 %4232  ;;  %v4242_v42 = vpop.xlane.xlu0 %4241 }
0x2287   : > { %v4234_v6 = vsub.f32 %v5642_v1, %v4233_v47  ;;  %v4243_v62 = vsub.f32 %v7517_v46, %v4242_v42  ;;  %v5666_v1 = vld [vmem:[%s5958_s21 + $0x36] ss:$0 sm:$0xff] }
0x2289   : > { %5855 = vrsqrt.f32 %v4234_v6 }
0x2293   : > { %v5856_v24 = vpop.eup %5855 }
0x2294   : > { %v4244_v17 = vmul.f32 %v5856_v24, %v4243_v62 }
0x2296   : > { %v4247_v57 = vsel %vm4246_vm9, %v4244_v17, 0.0 }
0x2297   : > { %v4248_v16 = vadd.f32 %v4247_v57, %v4210_v34 }
0x2299   : > { %5645 = vst [vmem:[%s5950_s20 + $0x30] sm:$0xff] %v4248_v16 }
0x22a0   : > { %v5649_v59 = vld [vmem:[%s5950_s20 + $0x34] ss:$0 sm:$0xff] }
0x22a1   : > { %v4278_v35 = vmul.f32 %v5649_v59, %v4248_v16  ;;  %v4269_v45 = vmul.f32 %v5649_v59, %v5649_v59 }
0x22a3   : > { %4279 = vadd.xlane.f32.xlu1 %v4278_v35  ;;  %4270 = vadd.xlane.f32.xlu0 %v4269_v45 }
0x22c2   : > { %v4257_v22 = vpop.xlane.xlu1 %4256 }
0x22c3   : > { %v4258_v49 = vsub.f32 %v7525_v23, %v4257_v22 }
0x22c5   : > { %v4259_v63 = vmul.f32 %v5856_v24, %v4258_v49 }
0x22c7   : > { %v4260_v33 = vsel %vm4226_vm15, %v4259_v63, 0.0  ;;  %vm4302_vm15 = vcmask 441768  }
0x22c8   : > { %v4261_v14 = vadd.f32 %v4260_v33, %v4223_v31  ;;  %vm4322_vm9 = vmand %vm4302_vm15, %vm722_vm14 }
0x22ca   : > { %v4293_v0 = vmul.f32 %v5649_v59, %v4261_v14 }
0x22cc   : > { %4294 = vadd.xlane.f32.xlu0 %v4293_v0  ;;  %v5674_v0 = vld [vmem:[%s5958_s21 + $0x37] ss:$0 sm:$0xff] }
0x2330   : > { %v4271_v38 = vpop.xlane.xlu0 %4270  ;;  %v4280_v27 = vpop.xlane.xlu1 %4279 }
0x2331   : > { %v4272_v12 = vsub.f32 %v5650_v40, %v4271_v38  ;;  %v4281_v3 = vsub.f32 %v7517_v46, %v4280_v27 }
0x2333   : > { %5857 = vrsqrt.f32 %v4272_v12 }
0x233d   : > { %v5858_v48 = vpop.eup %5857 }
0x233e   : > { %v4282_v5 = vmul.f32 %v5858_v48, %v4281_v3 }
0x2340   : > { %v4285_v41 = vsel %vm4284_vm12, %v4282_v5, 0.0 }
0x2341   : > { %v4286_v2 = vadd.f32 %v4285_v41, %v4248_v16 }
0x2343   : > { %5653 = vst [vmem:[%s5950_s20 + $0x30] sm:$0xff] %v4286_v2 }
0x234a   : > { %v5657_v21 = vld [vmem:[%s5950_s20 + $0x35] ss:$0 sm:$0xff] }
0x234b   : > { %v4316_v7 = vmul.f32 %v5657_v21, %v4286_v2  ;;  %v4307_v18 = vmul.f32 %v5657_v21, %v5657_v21 }
0x234d   : > { %4317 = vadd.xlane.f32.xlu0 %v4316_v7  ;;  %4308 = vadd.xlane.f32.xlu1 %v4307_v18  ;;  %v5682_v18 = vld [vmem:[%s5958_s21 + $0x38] ss:$0 sm:$0xff] }
0x2359   : > { %v4295_v10 = vpop.xlane.xlu0 %4294 }
0x235a   : > { %v4296_v56 = vsub.f32 %v7525_v23, %v4295_v10 }
0x235c   : > { %v4297_v54 = vmul.f32 %v5858_v48, %v4296_v56 }
0x235e   : > { %v4298_v30 = vsel %vm4264_vm10, %v4297_v54, 0.0  ;;  %vm4340_vm10 = vcmask 449968  }
0x235f   : > { %v4299_v29 = vadd.f32 %v4298_v30, %v4261_v14  ;;  %vm4360_vm12 = vmand %vm4340_vm10, %vm835_vm6 }
0x2361   : > { %v4331_v9 = vmul.f32 %v5657_v21, %v4299_v29 }
0x2363   : > { %4332 = vadd.xlane.f32.xlu1 %v4331_v9 }
0x23da   : > { %v4309_v61 = vpop.xlane.xlu1 %4308  ;;  %v4318_v37 = vpop.xlane.xlu0 %4317 }
0x23db   : > { %v4310_v26 = vsub.f32 %v5658_v13, %v4309_v61  ;;  %v4319_v8 = vsub.f32 %v7517_v46, %v4318_v37 }
0x23dd   : > { %5859 = vrsqrt.f32 %v4310_v26 }
0x23e7   : > { %v5860_v28 = vpop.eup %5859 }
0x23e8   : > { %v4320_v60 = vmul.f32 %v5860_v28, %v4319_v8 }
0x23ea   : > { %v4323_v36 = vsel %vm4322_vm9, %v4320_v60, 0.0  ;;  %vm4416_vm9 = vcmask 466368  }
0x23eb   : > { %v4324_v34 = vadd.f32 %v4323_v36, %v4286_v2 }
0x23ed   : > { %5661 = vst [vmem:[%s5950_s20 + $0x30] sm:$0xff] %v4324_v34 }
0x23f0   : > { %v4333_v50 = vpop.xlane.xlu1 %4332 }
0x23f1   : > { %v4334_v53 = vsub.f32 %v7525_v23, %v4333_v50 }
0x23f3   : > { %v4335_v58 = vmul.f32 %v5860_v28, %v4334_v53  ;;  %v5687_v28 = vld [vmem:[%s5958_s21 + $0x39] ss:$0 sm:$0xff] }
0x23f4   : > { %v5665_v15 = vld [vmem:[%s5950_s20 + $0x36] ss:$0 sm:$0xff] }
0x23f5   : > { %v4354_v11 = vmul.f32 %v5665_v15, %v4324_v34  ;;  %v4345_v51 = vmul.f32 %v5665_v15, %v5665_v15  ;;  %v4336_v4 = vsel %vm4302_vm15, %v4335_v58, 0.0  ;;  %vm4378_vm15 = vcmask 458168  }
0x23f6   : > { %v4337_v31 = vadd.f32 %v4336_v4, %v4299_v29 }
0x23f7   : > { %4355 = vadd.xlane.f32.xlu1 %v4354_v11  ;;  %4346 = vadd.xlane.f32.xlu0 %v4345_v51 }
0x23f8   : > { %v4369_v55 = vmul.f32 %v5665_v15, %v4337_v31 }
0x23fb   : > { %4370 = vadd.xlane.f32.xlu0 %v4369_v55  ;;  %v5692_v55 = vld [vmem:[%s5958_s21 + $0x3a] ss:$0 sm:$0xff] }
0x2484   : > { %v4347_v47 = vpop.xlane.xlu0 %4346  ;;  %v4356_v42 = vpop.xlane.xlu1 %4355 }
0x2485   : > { %v4348_v6 = vsub.f32 %v5666_v1, %v4347_v47  ;;  %v4357_v62 = vsub.f32 %v7517_v46, %v4356_v42 }
0x2487   : > { %5861 = vrsqrt.f32 %v4348_v6 }
0x2488   : > { %v4371_v17 = vpop.xlane.xlu0 %4370 }
0x2489   : > { %v4372_v59 = vsub.f32 %v7525_v23, %v4371_v17 }
0x2491   : > { %v5862_v24 = vpop.eup %5861 }
0x2492   : > { %v4358_v57 = vmul.f32 %v5862_v24, %v4357_v62  ;;  %v4373_v45 = vmul.f32 %v5862_v24, %v4372_v59 }
0x2494   : > { %v4361_v16 = vsel %vm4360_vm12, %v4358_v57, 0.0  ;;  %v4374_v22 = vsel %vm4340_vm10, %v4373_v45, 0.0  ;;  %vm4439_vm10 = vcmask 474568  }
0x2495   : > { %v7555_v35 = vadd.f32 %v4361_v16, %v4324_v34  ;;  %v4375_v49 = vadd.f32 %v4374_v22, %v4337_v31  ;;  %vm4459_vm12 = vmand %vm4439_vm10, %vm270_vm2  ;;  %v5697_v22 = vld [vmem:[%s5958_s21 + $0x3b] ss:$0 sm:$0xff]  ;;  %vm4489_vm10 = vcmask 490968  }
0x2497   : > { %5669 = vst [vmem:[%s5950_s20 + $0x30] sm:$0xff] %v7555_v35 }
0x249e   : > { %v7560_v63 = vld [vmem:[%s5950_s20 + $0x37] ss:$0 sm:$0xff] }
0x249f   : > { %v4383_v33 = vmul.f32 %v7560_v63, %v7560_v63  ;;  %v4407_v14 = vmul.f32 %v7560_v63, %v4375_v49 }
0x24a1   : > { %4384 = vadd.xlane.f32.xlu1 %v4383_v33  ;;  %4408 = vadd.xlane.f32.xlu0 %v4407_v14 }
0x252e   : > { %v4385_v40 = vpop.xlane.xlu1 %4384  ;;  %v4409_v12 = vpop.xlane.xlu0 %4408 }
0x252f   : > { %v4386_v38 = vsub.f32 %v5674_v0, %v4385_v40  ;;  %v4410_v27 = vsub.f32 %v7525_v23, %v4409_v12 }
0x2531   : > { %5863 = vrsqrt.f32 %v4386_v38 }
0x253b   : > { %v7567_v3 = vpop.eup %5863 }
0x253c   : > { %v4411_v48 = vmul.f32 %v7567_v3, %v4410_v27 }
0x253e   : > { %v4412_v5 = vsel %vm4378_vm15, %v4411_v48, 0.0 }
0x253f   : > { %v4413_v41 = vadd.f32 %v4412_v5, %v4375_v49 }
0x2541   : > { %5680 = vst [vmem:[%s5950_s20 + $0x38] sm:$0xff] %v4413_v41 }
0x2548   : > { %v5681_v2 = vld [vmem:[%s5950_s20 + $0x38] ss:$0 sm:$0xff] }
0x2549   : > { %v4430_v21 = vmul.f32 %v5681_v2, %v4413_v41  ;;  %v4421_v7 = vmul.f32 %v5681_v2, %v5681_v2  ;;  %v5702_v2 = vld [vmem:[%s5958_s21 + $0x3c] ss:$0 sm:$0xff] }
0x254b   : > { %4431 = vadd.xlane.f32.xlu0 %v4430_v21  ;;  %4422 = vadd.xlane.f32.xlu1 %v4421_v7 }
0x25d8   : > { %v4423_v10 = vpop.xlane.xlu1 %4422  ;;  %v4432_v54 = vpop.xlane.xlu0 %4431 }
0x25d9   : > { %v4424_v56 = vsub.f32 %v5682_v18, %v4423_v10  ;;  %v4433_v30 = vsub.f32 %v7525_v23, %v4432_v54 }
0x25db   : > { %5865 = vrsqrt.f32 %v4424_v56 }
0x25e5   : > { %v5866_v29 = vpop.eup %5865 }
0x25e6   : > { %v4434_v9 = vmul.f32 %v5866_v29, %v4433_v30 }
0x25e8   : > { %v4435_v13 = vsel %vm4416_vm9, %v4434_v9, 0.0  ;;  %vm4464_vm9 = vcmask 482768  }
0x25e9   : > { %v4436_v61 = vadd.f32 %v4435_v13, %v4413_v41  ;;  %vm4484_vm2 = vmand %vm4464_vm9, %vm383_vm5 }
0x25ea   : > { %vm4509_vm5 = vmand %vm4489_vm10, %vm496_vm8 }
0x25eb   : > { %5685 = vst [vmem:[%s5950_s20 + $0x38] sm:$0xff] %v4436_v61 }
0x25f2   : > { %v5686_v26 = vld [vmem:[%s5950_s20 + $0x39] ss:$0 sm:$0xff] }
0x25f3   : > { %v4453_v37 = vmul.f32 %v5686_v26, %v4436_v61  ;;  %v4444_v8 = vmul.f32 %v5686_v26, %v5686_v26  ;;  %v5707_v26 = vld [vmem:[%s5958_s21 + $0x3d] ss:$0 sm:$0xff] }
0x25f5   : > { %4454 = vadd.xlane.f32.xlu0 %v4453_v37  ;;  %4445 = vadd.xlane.f32.xlu1 %v4444_v8 }
0x2682   : > { %v4446_v60 = vpop.xlane.xlu1 %4445  ;;  %v4455_v34 = vpop.xlane.xlu0 %4454 }
0x2683   : > { %v4447_v36 = vsub.f32 %v5687_v28, %v4446_v60  ;;  %v4456_v50 = vsub.f32 %v7525_v23, %v4455_v34 }
0x2685   : > { %5867 = vrsqrt.f32 %v4447_v36 }
0x268f   : > { %v5868_v53 = vpop.eup %5867 }
0x2690   : > { %v4457_v58 = vmul.f32 %v5868_v53, %v4456_v50 }
0x2692   : > { %v4460_v15 = vsel %vm4459_vm12, %v4457_v58, 0.0  ;;  %vm4514_vm12 = vcmask 499168  }
0x2693   : > { %v4461_v11 = vadd.f32 %v4460_v15, %v4436_v61  ;;  %vm4534_vm8 = vmand %vm4514_vm12, %vm609_vm11  ;;  %vm4539_vm11 = vcmask 507368   ;;  %vm4589_vm12 = vcmask 523768  }
0x2694   : > { %vm4559_vm9 = vmand %vm4539_vm11, %vm722_vm14  ;;  %vm948_vm14 = vcmask 1047559  }
0x2695   : > { %5690 = vst [vmem:[%s5950_s20 + $0x38] sm:$0xff] %v4461_v11  ;;  %vm1783_vm10 = vmand %vm1763_vm7, %vm948_vm14 }
0x2696   : > { %vm2514_vm7 = vmand %vm2494_vm0, %vm948_vm14 }
0x2697   : > { %vm3664_vm0 = vmand %vm3644_vm3, %vm948_vm14 }
0x2698   : > { %vm3141_vm3 = vmand %vm3121_vm13, %vm948_vm14 }
0x2699   : > { %vm4609_vm13 = vmand %vm4589_vm12, %vm948_vm14 }
0x269c   : > { %v5691_v51 = vld [vmem:[%s5950_s20 + $0x3a] ss:$0 sm:$0xff] }
0x269d   : > { %v4478_v4 = vmul.f32 %v5691_v51, %v4461_v11  ;;  %v4469_v31 = vmul.f32 %v5691_v51, %v5691_v51  ;;  %v942_v51 = vld [vmem:[%s5950_s20] sm:$0xff] }
0x269f   : > { %4479 = vadd.xlane.f32.xlu0 %v4478_v4  ;;  %4470 = vadd.xlane.f32.xlu1 %v4469_v31  ;;  %v5101_v4 = vld [vmem:[%s5950_s20 + $0x8] sm:$0xff]  ;;  %v5881_v31 = vld [vmem:[%s5950_s20 + $0x7] ss:$0 sm:$0xff] }
0x272c   : > { %v4471_v1 = vpop.xlane.xlu1 %4470  ;;  %v4480_v6 = vpop.xlane.xlu0 %4479 }
0x272d   : > { %v4472_v47 = vsub.f32 %v5692_v55, %v4471_v1  ;;  %v4481_v42 = vsub.f32 %v7525_v23, %v4480_v6  ;;  %v943_v55 = vmul.f32 %v5881_v31, %v942_v51  ;;  %v5882_v1 = vld [vmem:[%s5950_s20 + $0xf] ss:$0 sm:$0xff]  ;;  %v5264_v6 = vld [vmem:[%s5950_s20 + $0x10] sm:$0xff]  ;;  %v5402_v31 = vld [vmem:[%s5958_s21 + $0x18] sm:$0xff] }
0x272f   : > { %5869 = vrsqrt.f32 %v4472_v47  ;;  %v1777_v47 = vmul.f32 %v5882_v1, %v5101_v4 }
0x2739   : > { %v5870_v62 = vpop.eup %5869 }
0x273a   : > { %v4482_v24 = vmul.f32 %v5870_v62, %v4481_v42  ;;  %v5883_v42 = vld [vmem:[%s5950_s20 + $0x17] ss:$0 sm:$0xff] }
0x273b   : > { %v2508_v62 = vmul.f32 %v5883_v42, %v5264_v6 }
0x273c   : > { %v4485_v17 = vsel %vm4484_vm2, %v4482_v24, 0.0  ;;  %v5518_v24 = vld [vmem:[%s5950_s20 + $0x20] sm:$0xff]  ;;  %vm949_vm2 = vmand %vm931_vm1, %vm948_vm14  ;;  %vm4564_vm1 = vcmask 515568  }
0x273d   : > { %v4486_v57 = vadd.f32 %v4485_v17, %v4461_v11  ;;  %v5884_v17 = vld [vmem:[%s5950_s20 + $0x27] ss:$0 sm:$0xff] }
0x273f   : > { %5695 = vst [vmem:[%s5950_s20 + $0x38] sm:$0xff] %v4486_v57 }
0x2746   : > { %v5696_v16 = vld [vmem:[%s5950_s20 + $0x3b] ss:$0 sm:$0xff] }
0x2747   : > { %v4503_v59 = vmul.f32 %v5696_v16, %v4486_v57  ;;  %v4494_v45 = vmul.f32 %v5696_v16, %v5696_v16  ;;  %v4392_v16 = vmul.f32 %v7560_v63, %v7555_v35  ;;  %v5263_v63 = vld [vmem:[%s5958_s21 + $0x10] sm:$0xff] }
0x2749   : > { %4504 = vadd.xlane.f32.xlu0 %v4503_v59  ;;  %4495 = vadd.xlane.f32.xlu1 %v4494_v45  ;;  %v5712_v59 = vld [vmem:[%s5958_s21 + $0x3e] ss:$0 sm:$0xff] }
0x27d6   : > { %v4496_v49 = vpop.xlane.xlu1 %4495  ;;  %v4505_v14 = vpop.xlane.xlu0 %4504 }
0x27d7   : > { %v4497_v33 = vsub.f32 %v5697_v22, %v4496_v49  ;;  %v4506_v0 = vsub.f32 %v7525_v23, %v4505_v14  ;;  %v5100_v14 = vld [vmem:[%s5958_s21 + $0x8] sm:$0xff] }
0x27d9   : > { %5871 = vrsqrt.f32 %v4497_v33  ;;  %v941_v33 = vld [vmem:[%s5958_s21] sm:$0xff] }
0x27e3   : > { %v5872_v40 = vpop.eup %5871 }
0x27e4   : > { %v4507_v38 = vmul.f32 %v5872_v40, %v4506_v0 }
0x27e6   : > { %v4510_v12 = vsel %vm4509_vm5, %v4507_v38, 0.0  ;;  %vm4584_vm5 = vmand %vm4564_vm1, %vm835_vm6 }
0x27e7   : > { %v4511_v27 = vadd.f32 %v4510_v12, %v4486_v57  ;;  %v3658_v57 = vmul.f32 %v5884_v17, %v5518_v24  ;;  %vm4398_vm6 = vmand %vm4378_vm15, %vm948_vm14 }
0x27e8   : > { %vm4083_vm15 = vmand %vm4063_vm4, %vm948_vm14 }
0x27e9   : > { %5700 = vst [vmem:[%s5950_s20 + $0x38] sm:$0xff] %v4511_v27 }
0x27f0   : > { %v5701_v48 = vld [vmem:[%s5950_s20 + $0x3c] ss:$0 sm:$0xff] }
0x27f1   : > { %v4528_v5 = vmul.f32 %v5701_v48, %v4511_v27  ;;  %v4519_v41 = vmul.f32 %v5701_v48, %v5701_v48 }
0x27f3   : > { %4529 = vadd.xlane.f32.xlu0 %v4528_v5  ;;  %4520 = vadd.xlane.f32.xlu1 %v4519_v41 }
0x2880   : > { %v4521_v21 = vpop.xlane.xlu1 %4520  ;;  %v4530_v18 = vpop.xlane.xlu0 %4529 }
0x2881   : > { %v4522_v7 = vsub.f32 %v5702_v2, %v4521_v21  ;;  %v4531_v10 = vsub.f32 %v7525_v23, %v4530_v18 }
0x2883   : > { %5873 = vrsqrt.f32 %v4522_v7 }
0x288d   : > { %v5874_v56 = vpop.eup %5873 }
0x288e   : > { %v4532_v54 = vmul.f32 %v5874_v56, %v4531_v10 }
0x2890   : > { %v4535_v30 = vsel %vm4534_vm8, %v4532_v54, 0.0 }
0x2891   : > { %v4536_v29 = vadd.f32 %v4535_v30, %v4511_v27 }
0x2893   : > { %5705 = vst [vmem:[%s5950_s20 + $0x38] sm:$0xff] %v4536_v29 }
0x289a   : > { %v5706_v9 = vld [vmem:[%s5950_s20 + $0x3d] ss:$0 sm:$0xff] }
0x289b   : > { %v4553_v13 = vmul.f32 %v5706_v9, %v4536_v29  ;;  %v4544_v61 = vmul.f32 %v5706_v9, %v5706_v9 }
0x289d   : > { %4554 = vadd.xlane.f32.xlu0 %v4553_v13  ;;  %4545 = vadd.xlane.f32.xlu1 %v4544_v61 }
0x292a   : > { %v4546_v37 = vpop.xlane.xlu1 %4545  ;;  %v4555_v28 = vpop.xlane.xlu0 %4554 }
0x292b   : > { %v4547_v8 = vsub.f32 %v5707_v26, %v4546_v37  ;;  %v4556_v60 = vsub.f32 %v7525_v23, %v4555_v28 }
0x292d   : > { %5875 = vrsqrt.f32 %v4547_v8 }
0x2937   : > { %v5876_v36 = vpop.eup %5875 }
0x2938   : > { %v4557_v34 = vmul.f32 %v5876_v36, %v4556_v60 }
0x293a   : > { %v4560_v50 = vsel %vm4559_vm9, %v4557_v34, 0.0 }
0x293b   : > { %v7600_v53 = vadd.f32 %v4560_v50, %v4536_v29 }
0x293d   : > { %5710 = vst [vmem:[%s5950_s20 + $0x38] sm:$0xff] %v7600_v53 }
0x2944   : > { %v5711_v58 = vld [vmem:[%s5950_s20 + $0x3e] ss:$0 sm:$0xff] }
0x2945   : > { %v4578_v15 = vmul.f32 %v5711_v58, %v7600_v53  ;;  %v4569_v11 = vmul.f32 %v5711_v58, %v5711_v58  ;;  %v5403_v58 = vld [vmem:[%s5950_s20 + $0x18] sm:$0xff] }
0x2947   : > { %4579 = vadd.xlane.f32.xlu0 %v4578_v15  ;;  %4570 = vadd.xlane.f32.xlu1 %v4569_v11 }
0x294b   : > { %944 = vadd.xlane.f32.xlu0 %v943_v55  ;;  %1778 = vadd.xlane.f32.xlu1 %v1777_v47  ;;  %v5608_v47 = vld [vmem:[%s5958_s21 + $0x28] sm:$0xff] }
0x294f   : > { %2509 = vadd.xlane.f32.xlu0 %v2508_v62 }
0x2953   : > { %3659 = vadd.xlane.f32.xlu0 %v3658_v57 }
0x2957   : > { %4393 = vadd.xlane.f32.xlu0 %v4392_v16 }
0x29d4   : > { %v4580_v45 = vpop.xlane.xlu0 %4579  ;;  %v4571_v22 = vpop.xlane.xlu1 %4570 }
0x29d5   : > { %v4572_v49 = vsub.f32 %v5712_v59, %v4571_v22  ;;  %v4581_v10 = vsub.f32 %v7525_v23, %v4580_v45 }
0x29d7   : > { %5877 = vrsqrt.f32 %v4572_v49 }
0x29d8   : > { %v945_v0 = vpop.xlane.xlu0 %944  ;;  %v1779_v40 = vpop.xlane.xlu1 %1778 }
0x29d9   : > { %v946_v38 = vsub.f32 %v941_v33, %v945_v0  ;;  %v1780_v12 = vsub.f32 %v5100_v14, %v1779_v40 }
0x29db   : > { %v947_v27 = vmul.f32 %v6254_v43, %v946_v38  ;;  %v1781_v48 = vmul.f32 %v6616_v25, %v1780_v12  ;;  %v5517_v43 = vld [vmem:[%s5958_s21 + $0x20] sm:$0xff] }
0x29dc   : > { %v2510_v5 = vpop.xlane.xlu0 %2509 }
0x29dd   : > { %v950_v41 = vsel %vm949_vm2, %v947_v27, 0.0  ;;  %v1784_v2 = vsel %vm1783_vm10, %v1781_v48, 0.0  ;;  %v2511_v21 = vsub.f32 %v5263_v63, %v2510_v5 }
0x29de   : > { %v951_v7 = vadd.f32 %v950_v41, %v942_v51  ;;  %v1785_v18 = vadd.f32 %v5101_v4, %v1784_v2  ;;  %v5717_v51 = vld [vmem:[%s5958_s21 + $0x3f] ss:$0 sm:$0xff] }
0x29df   : > { %v2512_v25 = vmul.f32 %v6925_v39, %v2511_v21 }
0x29e0   : > { %952 = vst [vmem:[%s5950_s20] sm:$0xff] %v951_v7  ;;  %4665 = vst [vmem:[%s7630_s25] sm:$0xff] %v951_v7  ;;  %v3660_v56 = vpop.xlane.xlu0 %3659 }
0x29e1   : > { %5102 = vst [vmem:[%s5950_s20 + $0x8] sm:$0xff] %v1785_v18  ;;  %4667 = vst [vmem:[%s7630_s25 + $0x8] sm:$0xff] %v1785_v18  ;;  %v5878_v54 = vpop.eup %5877  ;;  %v2515_v30 = vsel %vm2514_vm7, %v2512_v25, 0.0  ;;  %v3661_v29 = vsub.f32 %v5517_v43, %v3660_v56 }
0x29e2   : > { %v4582_v9 = vmul.f32 %v5878_v54, %v4581_v10  ;;  %v2516_v13 = vadd.f32 %v5264_v6, %v2515_v30 }
0x29e3   : > { %v3662_v39 = vmul.f32 %v7399_v52, %v3661_v29 }
0x29e4   : > { %v4585_v61 = vsel %vm4584_vm5, %v4582_v9, 0.0  ;;  %5265 = vst [vmem:[%s5950_s20 + $0x10] sm:$0xff] %v2516_v13  ;;  %4669 = vst [vmem:[%s7630_s25 + $0x10] sm:$0xff] %v2516_v13  ;;  %v4394_v26 = vpop.xlane.xlu0 %4393 }
0x29e5   : > { %v4586_v37 = vadd.f32 %v4585_v61, %v7600_v53  ;;  %v3665_v8 = vsel %vm3664_vm0, %v3662_v39, 0.0  ;;  %v4395_v28 = vsub.f32 %v7517_v46, %v4394_v26  ;;  %v5885_v46 = vld [vmem:[%s5950_s20 + $0x1f] ss:$0 sm:$0xff] }
0x29e6   : > { %v3666_v60 = vadd.f32 %v5518_v24, %v3665_v8  ;;  %v3135_v15 = vmul.f32 %v5885_v46, %v5403_v58 }
0x29e7   : > { %5715 = vst [vmem:[%s5950_s20 + $0x38] sm:$0xff] %v4586_v37  ;;  %v4396_v52 = vmul.f32 %v7567_v3, %v4395_v28  ;;  %v4077_v3 = vmul.f32 %v7482_v44, %v7476_v20 }
0x29e8   : > { %5519 = vst [vmem:[%s5950_s20 + $0x20] sm:$0xff] %v3666_v60  ;;  %4673 = vst [vmem:[%s7630_s25 + $0x20] sm:$0xff] %v3666_v60 }
0x29e9   : > { %v4399_v36 = vsel %vm4398_vm6, %v4396_v52, 0.0 }
0x29ea   : > { %v4400_v34 = vadd.f32 %v4399_v36, %v7555_v35 }
0x29ec   : > { %5677 = vst [vmem:[%s5950_s20 + $0x30] sm:$0xff] %v4400_v34  ;;  %4677 = vst [vmem:[%s7630_s25 + $0x30] sm:$0xff] %v4400_v34 }
0x29ee   : > { %v5716_v50 = vld [vmem:[%s5950_s20 + $0x3f] ss:$0 sm:$0xff] }
0x29ef   : > { %v4594_v53 = vmul.f32 %v5716_v50, %v5716_v50  ;;  %v4603_v11 = vmul.f32 %v5716_v50, %v4586_v37 }
0x29f1   : > { %4595 = vadd.xlane.f32.xlu1 %v4594_v53 }
0x29f5   : > { %3136 = vadd.xlane.f32.xlu1 %v3135_v15 }
0x29f9   : > { %4078 = vadd.xlane.f32.xlu1 %v4077_v3 }
0x29fd   : > { %4604 = vadd.xlane.f32.xlu1 %v4603_v11 }
0x2a7e   : > { %v4596_v4 = vpop.xlane.xlu1 %4595 }
0x2a7f   : > { %v4597_v35 = vsub.f32 %v5717_v51, %v4596_v4 }
0x2a81   : > { %5879 = vrsqrt.f32 %v4597_v35 }
0x2a82   : > { %v3137_v55 = vpop.xlane.xlu1 %3136 }
0x2a83   : > { %v3138_v1 = vsub.f32 %v5402_v31, %v3137_v55 }
0x2a85   : > { %v3139_v6 = vmul.f32 %v7185_v32, %v3138_v1 }
0x2a86   : > { %v4079_v42 = vpop.xlane.xlu1 %4078 }
0x2a87   : > { %v3142_v44 = vsel %vm3141_vm3, %v3139_v6, 0.0  ;;  %v4080_v62 = vsub.f32 %v5608_v47, %v4079_v42 }
0x2a88   : > { %v3143_v24 = vadd.f32 %v5403_v58, %v3142_v44 }
0x2a89   : > { %v4081_v17 = vmul.f32 %v7493_v19, %v4080_v62 }
0x2a8a   : > { %5404 = vst [vmem:[%s5950_s20 + $0x18] sm:$0xff] %v3143_v24  ;;  %4671 = vst [vmem:[%s7630_s25 + $0x18] sm:$0xff] %v3143_v24  ;;  %v4605_v57 = vpop.xlane.xlu1 %4604 }
0x2a8b   : > { %v5880_v16 = vpop.eup %5879  ;;  %v4084_v59 = vsel %vm4083_vm15, %v4081_v17, 0.0  ;;  %v4606_v32 = vsub.f32 %v7525_v23, %v4605_v57 }
0x2a8c   : > { %v4085_v45 = vadd.f32 %v4084_v59, %v7476_v20 }
0x2a8d   : > { %v4607_v22 = vmul.f32 %v5880_v16, %v4606_v32 }
0x2a8e   : > { %5610 = vst [vmem:[%s5950_s20 + $0x28] sm:$0xff] %v4085_v45  ;;  %4675 = vst [vmem:[%s7630_s25 + $0x28] sm:$0xff] %v4085_v45 }
0x2a8f   : > { %v4610_v49 = vsel %vm4609_vm13, %v4607_v22, 0.0 }
0x2a90   : > { %v4611_v33 = vadd.f32 %v4610_v49, %v4586_v37 }
0x2a92   : > { %5720 = vst [vmem:[%s5950_s20 + $0x38] sm:$0xff] %v4611_v33  ;;  %4679 = vst [vmem:[%s7630_s25 + $0x38] sm:$0xff] %v4611_v33 }
0x2a93 PF: > { %s7_s8 = sadd.s32 1, %s5908_s8   ;;  %s7692_s6 = smov %s5904_s7 }
0x2a94   : > { %p4_p5 = scmp.ge.s32.totalorder %s7_s8, 4   ;;  %s7693_s7 = smov %s7695_s10 }
0x2a96   :  { %6 = sbr.rel (!%p4_p5) target bundleno = 2 (0x2), region = 1091 }

// kernel: custom-call.8
= control target key start
LH: loop header
LB: loop body
LE: loop exit
PB: predicated region body
PF: predicated region fallthrough
CT: control target
= control target key end

     0   :  { %s2142_s6 = smov 0   ;;  %s2144_s7 = smov 0   ;;  %s2845_s0 = inlined_call_operand.vmem [shape: f32[2,1,64,64], index: 0, kind: input, shape index: {}]   ;;  %s2846_s1 = inlined_call_operand.vmem [shape: f32[2,1,64,64], index: 1, kind: output, shape index: {}]  }
   0x1   :  { %s2146_s8 = smov 0  }
   0x2 LB: > { %s2034_s9 = sadd.s32 4294967295, %s2128_s8   ;;  %s33_s10 = sadd.s32 1, %s2124_s7  ;;  %s2128_s8 = sphi %s2146_s8, %s7_s8   ;;  %s2124_s7 = sphi %s2144_s7, %s2848_s7   ;;  %s2120_s6 = sphi %s2142_s6, %s2847_s6  }
   0x3   : > { %p35_p0 = scmp.ge.s32.totalorder %s33_s10, 2  ;;  %p2036_p1 = scmp.ge.s32.totalorder %s2128_s8, 2 }
   0x4   : > { %s49_s11 = sand.u32 (!%p2036_p1), 1, %s2128_s8   ;;  %s2062_s12 = sshll.u32 (!%p2036_p1), %s2124_s7, 6 }
   0x5   : > { %s2850_s10 = smov (%p35_p0, %s33_s10), 0  ;;  %47 = sbr.rel (%p2036_p1) target bundleno = 12 (0xc), region = 16 }
   0x6   : > { %s2037_s13 = sshll.u32 (!%p2036_p1), %s49_s11, 6  ;;  %s58_s16 = scalar_lea.vmem (!%p2036_p1), %s2845_s0, %s2062_s12 }
   0x7   : > { %v100_v0 = vld [vmem:[%s58_s16] sm:$0xff] (!%p2036_p1)  ;;  %v102_v1 = vld [vmem:[%s58_s16 + $0x8] sm:$0xff] (!%p2036_p1)  ;;  %v104_v2 = vld [vmem:[%s58_s16 + $0x10] sm:$0xff] (!%p2036_p1)  ;;  %s51_s17 = scalar_lea.vmem (!%p2036_p1), [#allocation0], %s2037_s13 }
   0x8   : > { %101 = vst [vmem:[%s51_s17] sm:$0xff] (!%p2036_p1), %v100_v0  ;;  %103 = vst [vmem:[%s51_s17 + $0x8] sm:$0xff] (!%p2036_p1), %v102_v1  ;;  %v106_v3 = vld [vmem:[%s58_s16 + $0x18] sm:$0xff] (!%p2036_p1)  ;;  %v108_v4 = vld [vmem:[%s58_s16 + $0x20] sm:$0xff] (!%p2036_p1) }
   0x9   : > { %105 = vst [vmem:[%s51_s17 + $0x10] sm:$0xff] (!%p2036_p1), %v104_v2  ;;  %v110_v5 = vld [vmem:[%s58_s16 + $0x28] sm:$0xff] (!%p2036_p1)  ;;  %107 = vst [vmem:[%s51_s17 + $0x18] sm:$0xff] (!%p2036_p1), %v106_v3  ;;  %v112_v6 = vld [vmem:[%s58_s16 + $0x30] sm:$0xff] (!%p2036_p1) }
   0xa   : > { %109 = vst [vmem:[%s51_s17 + $0x20] sm:$0xff] (!%p2036_p1), %v108_v4  ;;  %111 = vst [vmem:[%s51_s17 + $0x28] sm:$0xff] (!%p2036_p1), %v110_v5  ;;  %v114_v7 = vld [vmem:[%s58_s16 + $0x38] sm:$0xff] (!%p2036_p1) }
   0xb   : > { %113 = vst [vmem:[%s51_s17 + $0x30] sm:$0xff] (!%p2036_p1), %v112_v6  ;;  %115 = vst [vmem:[%s51_s17 + $0x38] sm:$0xff] (!%p2036_p1), %v114_v7 }
   0xc PF: > { %p2040_p2 = scmp.ge.s32.totalorder %s2128_s8, 1  ;;  %p120_p3 = scmp.lt.s32.totalorder %s2128_s8, 3 }
   0xe   : > { %p121_p4 = pnand %p2040_p2, %p120_p3 }
  0x10   : > { %124 = sbr.rel (%p121_p4) target bundleno = 9353 (0x2489), region = 54 }
  0x17   : > { %s127_s18 = sand.u32 1, %s2034_s9   ;;  %v138_v8 = vlaneseq  ;;  %v2130_v17 = vmov -1.0   ;;  %v2131_v61 = vmov 0.0   ;;  %s2063_s21 = sshll.u32 %s2120_s6, 6 }
  0x18   : > { %s2041_s19 = sshll.u32 %s127_s18, 6  ;;  %s2796_s24 = scalar_lea.vmem %s2846_s1, %s2063_s21 }
  0x19   : > { %v2171_v9 = vand.u32 127, %v138_v8  ;;  %v2173_v10 = vshrl.u32 %v138_v8, 7  ;;  %s2175_s20 = scalar_lea.vmem [#allocation0], %s2041_s19 }
  0x1a   : > { %v145_v11 = vld [vmem:[%s2175_s20] sm:$0xff]  ;;  %v2043_v44 = vld [vmem:[%s2175_s20 + $0x8] sm:$0xff] }
  0x1b   : > { %vm144_vm0 = vcmp.eq.s32.totalorder %v2173_v10, %v2171_v9  ;;  %vm140_vm1 = vcmp.lt.s32.totalorder %v2171_v9, 64  ;;  %vm149_vm2 = vcmp.ge.s32.totalorder %v2173_v10, %v2171_v9  ;;  %vm275_vm4 = vcmp.eq.s32.totalorder %v2171_v9, 0 }
  0x1c   : > { %v146_v12 = vsel %vm144_vm0, %v145_v11, 0.0  ;;  %vm150_vm3 = vmand %vm149_vm2, %vm140_vm1  ;;  %vm272_vm5 = vcmp.eq.s32.totalorder %v2171_v9, %v2173_v10  ;;  %v276_v18 = vsel %vm275_vm4, 1.0, %v2130_v17  ;;  %vm332_vm6 = vcmp.eq.s32.totalorder %v2171_v9, 1 }
  0x1d   : > { %147 = vadd.xlane.f32.xlu0 %v146_v12  ;;  %v151_v14 = vsel %vm150_vm3, %v145_v11, 0.0  ;;  %v277_v19 = vsel %vm272_vm5, %v276_v18, 0.0  ;;  %vm342_vm7 = vcmp.eq.s32.totalorder %v2171_v9, 2  ;;  %vm352_vm8 = vcmp.eq.s32.totalorder %v2171_v9, 3 }
  0x1e   : > { %vm362_vm9 = vcmp.eq.s32.totalorder %v2171_v9, 4  ;;  %v159_v39 = vadd.s32 8, %v2173_v10  ;;  %vm372_vm11 = vcmp.eq.s32.totalorder %v2171_v9, 5  ;;  %vm382_vm14 = vcmp.eq.s32.totalorder %v2171_v9, 6 }
  0x1f   : > { %vm392_vm0 = vcmp.eq.s32.totalorder %v2171_v9, 7  ;;  %vm402_vm2 = vcmp.eq.s32.totalorder %v2171_v9, 8  ;;  %vm416_vm3 = vcmp.eq.s32.totalorder %v2171_v9, 9  ;;  %vm430_vm4 = vcmp.eq.s32.totalorder %v2171_v9, 10 }
  0x20   : > { %vm160_vm10 = vcmp.eq.s32.totalorder %v159_v39, %v2171_v9  ;;  %vm165_vm12 = vcmp.ge.s32.totalorder %v159_v39, %v2171_v9  ;;  %vm283_vm15 = vcmp.eq.s32.totalorder %v2171_v9, %v159_v39  ;;  %vm444_vm5 = vcmp.eq.s32.totalorder %v2171_v9, 11 }
  0x21   : > { %v162_v45 = vsel %vm160_vm10, %v2043_v44, 0.0  ;;  %vm166_vm13 = vmand %vm165_vm12, %vm140_vm1  ;;  %v284_v62 = vsel %vm283_vm15, -1.0, %v2131_v61  ;;  %vm500_vm12 = vcmp.eq.s32.totalorder %v2171_v9, 15  ;;  %vm532_vm15 = vcmp.eq.s32.totalorder %v2171_v9, 17 }
  0x22   : > { %v167_v52 = vsel %vm166_vm13, %v2043_v44, 0.0 }
  0xaa   : > { %v2180_v13 = vpop.xlane.xlu0 %147 }
  0xab   : > { %2090 = vrcp.f32 %v2180_v13 }
  0xb5   : > { %v2188_v15 = vpop.eup %2090 }
  0xb6   : > { %v153_v16 = vmul.f32 %v2188_v15, %v151_v14 }
  0xb8   : > { %154 = vst [vmem:[#allocation2] sm:$0xff] %v153_v16 }
  0xbf   : > { %v328_v20 = vld [vmem:[#allocation2 + $0x1] ss:$0 sm:$0xff]  ;;  %v338_v23 = vld [vmem:[#allocation2 + $0x2] ss:$0 sm:$0xff]  ;;  %v348_v28 = vld [vmem:[#allocation2 + $0x3] ss:$0 sm:$0xff] }
  0xc0   : > { %v329_v21 = vxor.u32 2147483648, %v328_v20  ;;  %v339_v25 = vxor.u32 2147483648, %v338_v23  ;;  %v349_v30 = vxor.u32 2147483648, %v348_v28  ;;  %v358_v33 = vld [vmem:[#allocation2 + $0x4] ss:$0 sm:$0xff] }
  0xc1   : > { %v359_v35 = vxor.u32 2147483648, %v358_v33  ;;  %v368_v38 = vld [vmem:[#allocation2 + $0x5] ss:$0 sm:$0xff]  ;;  %v378_v46 = vld [vmem:[#allocation2 + $0x6] ss:$0 sm:$0xff] }
  0xc2   : > { %v333_v22 = vmul.f32 %v329_v21, %v277_v19  ;;  %v369_v41 = vxor.u32 2147483648, %v368_v38  ;;  %v379_v48 = vxor.u32 2147483648, %v378_v46  ;;  %v388_v55 = vld [vmem:[#allocation2 + $0x7] ss:$0 sm:$0xff] }
  0xc3   : > { %v389_v58 = vxor.u32 2147483648, %v388_v55  ;;  %v175_v55 = vadd.s32 16, %v2173_v10 }
  0xc4   : > { %334 = vadd.xlane.f32.xlu0 %v333_v22 }
  0xc5   : > { %vm181_vm10 = vcmp.ge.s32.totalorder %v175_v55, %v2171_v9  ;;  %vm290_vm13 = vcmp.eq.s32.totalorder %v2171_v9, %v175_v55 }
 0x151   : > { %v335_v24 = vpop.xlane.xlu0 %334 }
 0x152   : > { %v336_v26 = vsel %vm332_vm6, %v335_v24, %v277_v19  ;;  %vm458_vm6 = vcmp.eq.s32.totalorder %v2171_v9, 12 }
 0x153   : > { %v343_v27 = vmul.f32 %v339_v25, %v336_v26 }
 0x155   : > { %344 = vadd.xlane.f32.xlu1 %v343_v27 }
 0x1e2   : > { %v345_v29 = vpop.xlane.xlu1 %344 }
 0x1e3   : > { %v346_v31 = vsel %vm342_vm7, %v345_v29, %v336_v26  ;;  %vm472_vm7 = vcmp.eq.s32.totalorder %v2171_v9, 13 }
 0x1e4   : > { %v353_v32 = vmul.f32 %v349_v30, %v346_v31 }
 0x1e6   : > { %354 = vadd.xlane.f32.xlu1 %v353_v32 }
 0x273   : > { %v355_v34 = vpop.xlane.xlu1 %354 }
 0x274   : > { %v356_v36 = vsel %vm352_vm8, %v355_v34, %v346_v31  ;;  %vm176_vm8 = vcmp.eq.s32.totalorder %v175_v55, %v2171_v9 }
 0x275   : > { %v363_v37 = vmul.f32 %v359_v35, %v356_v36 }
 0x277   : > { %364 = vadd.xlane.f32.xlu0 %v363_v37 }
 0x304   : > { %v365_v40 = vpop.xlane.xlu0 %364 }
 0x305   : > { %v366_v42 = vsel %vm362_vm9, %v365_v40, %v356_v36  ;;  %vm486_vm9 = vcmp.eq.s32.totalorder %v2171_v9, 14 }
 0x306   : > { %v373_v43 = vmul.f32 %v369_v41, %v366_v42 }
 0x308   : > { %374 = vadd.xlane.f32.xlu1 %v373_v43 }
 0x30c   : > { %163 = vadd.xlane.f32.xlu1 %v162_v45 }
 0x395   : > { %v375_v47 = vpop.xlane.xlu1 %374 }
 0x396   : > { %v376_v49 = vsel %vm372_vm11, %v375_v47, %v366_v42  ;;  %vm182_vm11 = vmand %vm181_vm10, %vm140_vm1 }
 0x397   : > { %v383_v50 = vmul.f32 %v379_v48, %v376_v49 }
 0x399   : > { %384 = vadd.xlane.f32.xlu0 %v383_v50  ;;  %v2202_v51 = vpop.xlane.xlu1 %163 }
 0x39a   : > { %2092 = vrcp.f32 %v2202_v51 }
 0x3a4   : > { %v2208_v53 = vpop.eup %2092 }
 0x3a5   : > { %v169_v54 = vmul.f32 %v2208_v53, %v167_v52 }
 0x3a7   : > { %170 = vst [vmem:[#allocation2 + $0x8] sm:$0xff] %v169_v54 }
 0x3ae   : > { %v398_v56 = vld [vmem:[#allocation2 + $0x8] ss:$0 sm:$0xff]  ;;  %v412_v3 = vld [vmem:[#allocation2 + $0x9] ss:$0 sm:$0xff]  ;;  %v426_v14 = vld [vmem:[#allocation2 + $0xa] ss:$0 sm:$0xff] }
 0x3af   : > { %v399_v59 = vxor.u32 2147483648, %v398_v56  ;;  %v413_v6 = vxor.u32 2147483648, %v412_v3  ;;  %v427_v18 = vxor.u32 2147483648, %v426_v14  ;;  %v440_v23 = vld [vmem:[#allocation2 + $0xb] ss:$0 sm:$0xff] }
 0x3b0   : > { %v441_v26 = vxor.u32 2147483648, %v440_v23  ;;  %v454_v31 = vld [vmem:[#allocation2 + $0xc] ss:$0 sm:$0xff]  ;;  %v468_v39 = vld [vmem:[#allocation2 + $0xd] ss:$0 sm:$0xff] }
 0x3b1   : > { %v407_v0 = vmul.f32 %v399_v59, %v284_v62  ;;  %v455_v34 = vxor.u32 2147483648, %v454_v31  ;;  %v469_v42 = vxor.u32 2147483648, %v468_v39  ;;  %v482_v47 = vld [vmem:[#allocation2 + $0xe] ss:$0 sm:$0xff] }
 0x3b2   : > { %v483_v50 = vxor.u32 2147483648, %v482_v47 }
 0x426   : > { %v385_v57 = vpop.xlane.xlu0 %384 }
 0x427   : > { %v386_v60 = vsel %vm382_vm14, %v385_v57, %v376_v49  ;;  %vm514_vm14 = vcmp.eq.s32.totalorder %v2171_v9, 16 }
 0x428   : > { %v393_v63 = vmul.f32 %v389_v58, %v386_v60 }
 0x42a   : > { %394 = vadd.xlane.f32.xlu0 %v393_v63  ;;  %v496_v63 = vld [vmem:[#allocation2 + $0xf] ss:$0 sm:$0xff] }
 0x42e   : > { %408 = vadd.xlane.f32.xlu0 %v407_v0 }
 0x4b7   : > { %v395_v1 = vpop.xlane.xlu0 %394 }
 0x4b8   : > { %v396_v2 = vsel %vm392_vm0, %v395_v1, %v386_v60  ;;  %v497_v1 = vxor.u32 2147483648, %v496_v63  ;;  %vm550_vm0 = vcmp.eq.s32.totalorder %v2171_v9, 18 }
 0x4b9   : > { %v403_v4 = vmul.f32 %v399_v59, %v396_v2  ;;  %v2044_v59 = vld [vmem:[%s2175_s20 + $0x10] sm:$0xff] }
 0x4bb   : > { %v409_v5 = vpop.xlane.xlu0 %408  ;;  %404 = vadd.xlane.f32.xlu1 %v403_v4 }
 0x4bc   : > { %v410_v7 = vsel %vm402_vm2, %v409_v5, %v284_v62  ;;  %v178_v62 = vsel %vm176_vm8, %v2044_v59, 0.0 }
 0x4bd   : > { %v421_v8 = vmul.f32 %v413_v6, %v410_v7 }
 0x4bf   : > { %422 = vadd.xlane.f32.xlu0 %v421_v8 }
 0x548   : > { %v405_v11 = vpop.xlane.xlu1 %404 }
 0x549   : > { %v406_v12 = vsel %vm402_vm2, %v405_v11, %v396_v2  ;;  %vm568_vm2 = vcmp.eq.s32.totalorder %v2171_v9, 19 }
 0x54a   : > { %v417_v16 = vmul.f32 %v413_v6, %v406_v12 }
 0x54c   : > { %v423_v17 = vpop.xlane.xlu0 %422  ;;  %418 = vadd.xlane.f32.xlu1 %v417_v16 }
 0x54d   : > { %v424_v19 = vsel %vm416_vm3, %v423_v17, %v410_v7  ;;  %v183_v7 = vsel %vm182_vm11, %v2044_v59, 0.0  ;;  %vm658_vm11 = vcmp.eq.s32.totalorder %v2171_v9, 24 }
 0x54e   : > { %v435_v20 = vmul.f32 %v427_v18, %v424_v19 }
 0x550   : > { %436 = vadd.xlane.f32.xlu0 %v435_v20 }
 0x5d9   : > { %v419_v21 = vpop.xlane.xlu1 %418 }
 0x5da   : > { %v420_v22 = vsel %vm416_vm3, %v419_v21, %v406_v12  ;;  %vm586_vm3 = vcmp.eq.s32.totalorder %v2171_v9, 20 }
 0x5db   : > { %v431_v24 = vmul.f32 %v427_v18, %v420_v22 }
 0x5dd   : > { %v437_v25 = vpop.xlane.xlu0 %436  ;;  %432 = vadd.xlane.f32.xlu1 %v431_v24 }
 0x5de   : > { %v438_v27 = vsel %vm430_vm4, %v437_v25, %v424_v19 }
 0x5df   : > { %v449_v28 = vmul.f32 %v441_v26, %v438_v27 }
 0x5e1   : > { %450 = vadd.xlane.f32.xlu0 %v449_v28 }
 0x66a   : > { %v433_v29 = vpop.xlane.xlu1 %432 }
 0x66b   : > { %v434_v30 = vsel %vm430_vm4, %v433_v29, %v420_v22  ;;  %v291_v22 = vsel %vm290_vm13, -1.0, %v2131_v61  ;;  %vm604_vm4 = vcmp.eq.s32.totalorder %v2171_v9, 21  ;;  %vm702_vm13 = vcmp.eq.s32.totalorder %v2171_v9, 26 }
 0x66c   : > { %v445_v32 = vmul.f32 %v441_v26, %v434_v30 }
 0x66e   : > { %v451_v33 = vpop.xlane.xlu0 %450  ;;  %446 = vadd.xlane.f32.xlu1 %v445_v32 }
 0x66f   : > { %v452_v35 = vsel %vm444_vm5, %v451_v33, %v438_v27 }
 0x670   : > { %v463_v36 = vmul.f32 %v455_v34, %v452_v35 }
 0x672   : > { %464 = vadd.xlane.f32.xlu0 %v463_v36 }
 0x6fb   : > { %v447_v37 = vpop.xlane.xlu1 %446 }
 0x6fc   : > { %v448_v38 = vsel %vm444_vm5, %v447_v37, %v434_v30 }
 0x6fd   : > { %v459_v40 = vmul.f32 %v455_v34, %v448_v38 }
 0x6ff   : > { %v465_v41 = vpop.xlane.xlu0 %464  ;;  %460 = vadd.xlane.f32.xlu1 %v459_v40 }
 0x700   : > { %v466_v43 = vsel %vm458_vm6, %v465_v41, %v452_v35 }
 0x701   : > { %v477_v44 = vmul.f32 %v469_v42, %v466_v43 }
 0x703   : > { %478 = vadd.xlane.f32.xlu0 %v477_v44 }
 0x78c   : > { %v461_v45 = vpop.xlane.xlu1 %460 }
 0x78d   : > { %v462_v46 = vsel %vm458_vm6, %v461_v45, %v448_v38  ;;  %vm622_vm6 = vcmp.eq.s32.totalorder %v2171_v9, 22 }
 0x78e   : > { %v473_v48 = vmul.f32 %v469_v42, %v462_v46 }
 0x790   : > { %v479_v49 = vpop.xlane.xlu0 %478  ;;  %474 = vadd.xlane.f32.xlu1 %v473_v48 }
 0x791   : > { %v480_v52 = vsel %vm472_vm7, %v479_v49, %v466_v43 }
 0x792   : > { %v491_v54 = vmul.f32 %v483_v50, %v480_v52 }
 0x794   : > { %492 = vadd.xlane.f32.xlu0 %v491_v54 }
 0x81d   : > { %v475_v56 = vpop.xlane.xlu1 %474 }
 0x81e   : > { %v476_v57 = vsel %vm472_vm7, %v475_v56, %v462_v46 }
 0x81f   : > { %v487_v58 = vmul.f32 %v483_v50, %v476_v57 }
 0x821   : > { %v493_v60 = vpop.xlane.xlu0 %492  ;;  %488 = vadd.xlane.f32.xlu1 %v487_v58 }
 0x822   : > { %v494_v0 = vsel %vm486_vm9, %v493_v60, %v480_v52 }
 0x823   : > { %v505_v2 = vmul.f32 %v497_v1, %v494_v0 }
 0x825   : > { %179 = vadd.xlane.f32.xlu1 %v178_v62 }
 0x829   : > { %506 = vadd.xlane.f32.xlu1 %v505_v2 }
 0x8ae   : > { %v489_v3 = vpop.xlane.xlu1 %488 }
 0x8af   : > { %v490_v4 = vsel %vm486_vm9, %v489_v3, %v476_v57  ;;  %vm640_vm9 = vcmp.eq.s32.totalorder %v2171_v9, 23 }
 0x8b0   : > { %v501_v5 = vmul.f32 %v497_v1, %v490_v4 }
 0x8b2   : > { %502 = vadd.xlane.f32.xlu0 %v501_v5  ;;  %v2225_v6 = vpop.xlane.xlu1 %179 }
 0x8b3   : > { %2094 = vrcp.f32 %v2225_v6 }
 0x8b6   : > { %v507_v12 = vpop.xlane.xlu1 %506 }
 0x8b7   : > { %v508_v17 = vsel %vm500_vm12, %v507_v12, %v494_v0 }
 0x8bd   : > { %v2231_v8 = vpop.eup %2094 }
 0x8be   : > { %v185_v11 = vmul.f32 %v2231_v8, %v183_v7 }
 0x8c0   : > { %186 = vst [vmem:[#allocation2 + $0x10] sm:$0xff] %v185_v11 }
 0x8c7   : > { %v510_v14 = vld [vmem:[#allocation2 + $0x10] ss:$0 sm:$0xff]  ;;  %v528_v24 = vld [vmem:[#allocation2 + $0x11] ss:$0 sm:$0xff]  ;;  %v546_v35 = vld [vmem:[#allocation2 + $0x12] ss:$0 sm:$0xff] }
 0x8c8   : > { %v511_v16 = vxor.u32 2147483648, %v510_v14  ;;  %v529_v26 = vxor.u32 2147483648, %v528_v24  ;;  %v547_v37 = vxor.u32 2147483648, %v546_v35  ;;  %v564_v46 = vld [vmem:[#allocation2 + $0x13] ss:$0 sm:$0xff] }
 0x8c9   : > { %v565_v48 = vxor.u32 2147483648, %v564_v46  ;;  %v582_v59 = vld [vmem:[#allocation2 + $0x14] ss:$0 sm:$0xff]  ;;  %v600_v11 = vld [vmem:[#allocation2 + $0x15] ss:$0 sm:$0xff] }
 0x8ca   : > { %v519_v18 = vmul.f32 %v511_v16, %v508_v17  ;;  %v523_v23 = vmul.f32 %v511_v16, %v291_v22  ;;  %v583_v62 = vxor.u32 2147483648, %v582_v59  ;;  %v601_v14 = vxor.u32 2147483648, %v600_v11  ;;  %v618_v24 = vld [vmem:[#allocation2 + $0x16] ss:$0 sm:$0xff] }
 0x8cc   : > { %520 = vadd.xlane.f32.xlu1 %v519_v18 }
 0x93f   : > { %v503_v19 = vpop.xlane.xlu0 %502 }
 0x940   : > { %v504_v20 = vsel %vm500_vm12, %v503_v19, %v490_v4  ;;  %vm680_vm12 = vcmp.eq.s32.totalorder %v2171_v9, 25 }
 0x941   : > { %v515_v21 = vmul.f32 %v511_v16, %v504_v20 }
 0x943   : > { %516 = vadd.xlane.f32.xlu0 %v515_v21 }
 0x947   : > { %524 = vadd.xlane.f32.xlu0 %v523_v23 }
 0x959   : > { %v521_v25 = vpop.xlane.xlu1 %520 }
 0x95a   : > { %v522_v27 = vsel %vm514_vm14, %v521_v25, %v508_v17  ;;  %v191_v25 = vadd.s32 24, %v2173_v10 }
 0x95b   : > { %v537_v28 = vmul.f32 %v529_v26, %v522_v27 }
 0x95c   : > { %vm192_vm5 = vcmp.eq.s32.totalorder %v191_v25, %v2171_v9  ;;  %vm197_vm7 = vcmp.ge.s32.totalorder %v191_v25, %v2171_v9  ;;  %vm297_vm10 = vcmp.eq.s32.totalorder %v2171_v9, %v191_v25 }
 0x95d   : > { %538 = vadd.xlane.f32.xlu0 %v537_v28  ;;  %vm198_vm8 = vmand %vm197_vm7, %vm140_vm1  ;;  %v298_v59 = vsel %vm297_vm10, -1.0, %v2131_v61  ;;  %vm886_vm10 = vcmp.eq.s32.totalorder %v2171_v9, 34 }
 0x9d0   : > { %v517_v29 = vpop.xlane.xlu0 %516 }
 0x9d1   : > { %v518_v30 = vsel %vm514_vm14, %v517_v29, %v504_v20 }
 0x9d2   : > { %v533_v31 = vmul.f32 %v529_v26, %v518_v30 }
 0x9d4   : > { %v525_v32 = vpop.xlane.xlu0 %524  ;;  %534 = vadd.xlane.f32.xlu1 %v533_v31 }
 0x9d5   : > { %v526_v33 = vsel %vm514_vm14, %v525_v32, %v291_v22  ;;  %vm724_vm14 = vcmp.eq.s32.totalorder %v2171_v9, 27 }
 0x9d6   : > { %v541_v34 = vmul.f32 %v529_v26, %v526_v33 }
 0x9d8   : > { %542 = vadd.xlane.f32.xlu1 %v541_v34 }
 0x9ea   : > { %v539_v36 = vpop.xlane.xlu0 %538 }
 0x9eb   : > { %v540_v38 = vsel %vm532_vm15, %v539_v36, %v522_v27  ;;  %v619_v27 = vxor.u32 2147483648, %v618_v24 }
 0x9ec   : > { %v555_v39 = vmul.f32 %v547_v37, %v540_v38 }
 0x9ee   : > { %556 = vadd.xlane.f32.xlu1 %v555_v39 }
 0xa61   : > { %v535_v40 = vpop.xlane.xlu1 %534 }
 0xa62   : > { %v536_v41 = vsel %vm532_vm15, %v535_v40, %v518_v30  ;;  %v2045_v30 = vld [vmem:[%s2175_s20 + $0x18] sm:$0xff] }
 0xa63   : > { %v551_v42 = vmul.f32 %v547_v37, %v536_v41  ;;  %v194_v31 = vsel %vm192_vm5, %v2045_v30, 0.0 }
 0xa65   : > { %552 = vadd.xlane.f32.xlu0 %v551_v42  ;;  %v543_v43 = vpop.xlane.xlu1 %542 }
 0xa66   : > { %v544_v44 = vsel %vm532_vm15, %v543_v43, %v526_v33  ;;  %vm746_vm15 = vcmp.eq.s32.totalorder %v2171_v9, 28 }
 0xa67   : > { %v559_v45 = vmul.f32 %v547_v37, %v544_v44 }
 0xa69   : > { %560 = vadd.xlane.f32.xlu0 %v559_v45 }
 0xa7b   : > { %v557_v47 = vpop.xlane.xlu1 %556 }
 0xa7c   : > { %v558_v49 = vsel %vm550_vm0, %v557_v47, %v540_v38  ;;  %v636_v38 = vld [vmem:[#allocation2 + $0x17] ss:$0 sm:$0xff] }
 0xa7d   : > { %v573_v50 = vmul.f32 %v565_v48, %v558_v49  ;;  %v637_v40 = vxor.u32 2147483648, %v636_v38 }
 0xa7f   : > { %574 = vadd.xlane.f32.xlu0 %v573_v50 }
 0xaf2   : > { %v553_v52 = vpop.xlane.xlu0 %552 }
 0xaf3   : > { %v554_v54 = vsel %vm550_vm0, %v553_v52, %v536_v41 }
 0xaf4   : > { %v569_v55 = vmul.f32 %v565_v48, %v554_v54 }
 0xaf6   : > { %570 = vadd.xlane.f32.xlu1 %v569_v55  ;;  %v561_v56 = vpop.xlane.xlu0 %560 }
 0xaf7   : > { %v562_v57 = vsel %vm550_vm0, %v561_v56, %v544_v44  ;;  %v199_v44 = vsel %vm198_vm8, %v2045_v30, 0.0  ;;  %vm768_vm0 = vcmp.eq.s32.totalorder %v2171_v9, 29  ;;  %vm834_vm8 = vcmp.eq.s32.totalorder %v2171_v9, 32 }
 0xaf8   : > { %v577_v58 = vmul.f32 %v565_v48, %v562_v57 }
 0xafa   : > { %578 = vadd.xlane.f32.xlu1 %v577_v58 }
 0xb0c   : > { %v575_v60 = vpop.xlane.xlu0 %574 }
 0xb0d   : > { %v576_v63 = vsel %vm568_vm2, %v575_v60, %v558_v49 }
 0xb0e   : > { %v591_v0 = vmul.f32 %v583_v62, %v576_v63 }
 0xb10   : > { %592 = vadd.xlane.f32.xlu1 %v591_v0 }
 0xb83   : > { %v571_v1 = vpop.xlane.xlu1 %570 }
 0xb84   : > { %v572_v2 = vsel %vm568_vm2, %v571_v1, %v554_v54 }
 0xb85   : > { %v587_v3 = vmul.f32 %v583_v62, %v572_v2 }
 0xb87   : > { %588 = vadd.xlane.f32.xlu0 %v587_v3  ;;  %v579_v4 = vpop.xlane.xlu1 %578 }
 0xb88   : > { %v580_v5 = vsel %vm568_vm2, %v579_v4, %v562_v57 }
 0xb89   : > { %v595_v7 = vmul.f32 %v583_v62, %v580_v5 }
 0xb8b   : > { %596 = vadd.xlane.f32.xlu0 %v595_v7 }
 0xb9d   : > { %v593_v12 = vpop.xlane.xlu1 %592 }
 0xb9e   : > { %v594_v16 = vsel %vm586_vm3, %v593_v12, %v576_v63 }
 0xb9f   : > { %v609_v17 = vmul.f32 %v601_v14, %v594_v16 }
 0xba1   : > { %610 = vadd.xlane.f32.xlu0 %v609_v17 }
 0xc14   : > { %v589_v18 = vpop.xlane.xlu0 %588 }
 0xc15   : > { %v590_v19 = vsel %vm586_vm3, %v589_v18, %v572_v2 }
 0xc16   : > { %v605_v20 = vmul.f32 %v601_v14, %v590_v19 }
 0xc18   : > { %606 = vadd.xlane.f32.xlu1 %v605_v20  ;;  %v597_v21 = vpop.xlane.xlu0 %596 }
 0xc19   : > { %v598_v22 = vsel %vm586_vm3, %v597_v21, %v580_v5  ;;  %vm790_vm3 = vcmp.eq.s32.totalorder %v2171_v9, 30 }
 0xc1a   : > { %v613_v23 = vmul.f32 %v601_v14, %v598_v22 }
 0xc1c   : > { %614 = vadd.xlane.f32.xlu1 %v613_v23 }
 0xc2e   : > { %v611_v26 = vpop.xlane.xlu0 %610 }
 0xc2f   : > { %v612_v28 = vsel %vm604_vm4, %v611_v26, %v594_v16 }
 0xc30   : > { %v627_v29 = vmul.f32 %v619_v27, %v612_v28 }
 0xc32   : > { %628 = vadd.xlane.f32.xlu1 %v627_v29 }
 0xc36   : > { %195 = vadd.xlane.f32.xlu1 %v194_v31 }
 0xca5   : > { %v607_v32 = vpop.xlane.xlu1 %606 }
 0xca6   : > { %v608_v33 = vsel %vm604_vm4, %v607_v32, %v590_v19 }
 0xca7   : > { %v623_v34 = vmul.f32 %v619_v27, %v608_v33 }
 0xca9   : > { %624 = vadd.xlane.f32.xlu0 %v623_v34  ;;  %v615_v35 = vpop.xlane.xlu1 %614 }
 0xcaa   : > { %v616_v36 = vsel %vm604_vm4, %v615_v35, %v598_v22 }
 0xcab   : > { %v631_v37 = vmul.f32 %v619_v27, %v616_v36 }
 0xcad   : > { %632 = vadd.xlane.f32.xlu0 %v631_v37 }
 0xcbf   : > { %v629_v39 = vpop.xlane.xlu1 %628 }
 0xcc0   : > { %v630_v41 = vsel %vm622_vm6, %v629_v39, %v612_v28 }
 0xcc1   : > { %v645_v42 = vmul.f32 %v637_v40, %v630_v41 }
 0xcc3   : > { %646 = vadd.xlane.f32.xlu1 %v645_v42  ;;  %v2255_v43 = vpop.xlane.xlu1 %195 }
 0xcc4   : > { %2096 = vrcp.f32 %v2255_v43 }
 0xcce   : > { %v2261_v45 = vpop.eup %2096 }
 0xccf   : > { %v201_v46 = vmul.f32 %v2261_v45, %v199_v44 }
 0xcd1   : > { %202 = vst [vmem:[#allocation2 + $0x18] sm:$0xff] %v201_v46 }
 0xcd8   : > { %v654_v55 = vld [vmem:[#allocation2 + $0x18] ss:$0 sm:$0xff]  ;;  %v676_v5 = vld [vmem:[#allocation2 + $0x19] ss:$0 sm:$0xff]  ;;  %v698_v25 = vld [vmem:[#allocation2 + $0x1a] ss:$0 sm:$0xff] }
 0xcd9   : > { %v655_v56 = vxor.u32 2147483648, %v654_v55  ;;  %v677_v11 = vxor.u32 2147483648, %v676_v5  ;;  %v699_v27 = vxor.u32 2147483648, %v698_v25  ;;  %v720_v39 = vld [vmem:[#allocation2 + $0x1b] ss:$0 sm:$0xff] }
 0xcdb   : > { %v671_v62 = vmul.f32 %v655_v56, %v298_v59 }
 0xd36   : > { %v625_v47 = vpop.xlane.xlu0 %624 }
 0xd37   : > { %v626_v48 = vsel %vm622_vm6, %v625_v47, %v608_v33 }
 0xd38   : > { %v641_v49 = vmul.f32 %v637_v40, %v626_v48 }
 0xd3a   : > { %642 = vadd.xlane.f32.xlu0 %v641_v49  ;;  %v633_v50 = vpop.xlane.xlu0 %632 }
 0xd3b   : > { %v634_v52 = vsel %vm622_vm6, %v633_v50, %v616_v36  ;;  %vm812_vm6 = vcmp.eq.s32.totalorder %v2171_v9, 31 }
 0xd3c   : > { %v649_v54 = vmul.f32 %v637_v40, %v634_v52 }
 0xd3e   : > { %650 = vadd.xlane.f32.xlu0 %v649_v54 }
 0xd50   : > { %v647_v57 = vpop.xlane.xlu1 %646 }
 0xd51   : > { %v648_v58 = vsel %vm640_vm9, %v647_v57, %v630_v41  ;;  %v721_v41 = vxor.u32 2147483648, %v720_v39  ;;  %v742_v57 = vld [vmem:[#allocation2 + $0x1c] ss:$0 sm:$0xff]  ;;  %v207_v39 = vadd.s32 32, %v2173_v10 }
 0xd52   : > { %v663_v60 = vmul.f32 %v655_v56, %v648_v58 }
 0xd53   : > { %vm208_vm2 = vcmp.eq.s32.totalorder %v207_v39, %v2171_v9  ;;  %vm213_vm4 = vcmp.ge.s32.totalorder %v207_v39, %v2171_v9  ;;  %vm304_vm7 = vcmp.eq.s32.totalorder %v2171_v9, %v207_v39 }
 0xd54   : > { %664 = vadd.xlane.f32.xlu0 %v663_v60  ;;  %vm214_vm5 = vmand %vm213_vm4, %vm140_vm1 }
 0xd58   : > { %672 = vadd.xlane.f32.xlu0 %v671_v62 }
 0xdc7   : > { %v643_v63 = vpop.xlane.xlu0 %642 }
 0xdc8   : > { %v644_v0 = vsel %vm640_vm9, %v643_v63, %v626_v48 }
 0xdc9   : > { %v659_v1 = vmul.f32 %v655_v56, %v644_v0 }
 0xdcb   : > { %v651_v2 = vpop.xlane.xlu0 %650  ;;  %660 = vadd.xlane.f32.xlu1 %v659_v1 }
 0xdcc   : > { %v652_v3 = vsel %vm640_vm9, %v651_v2, %v634_v52  ;;  %vm860_vm9 = vcmp.eq.s32.totalorder %v2171_v9, 33 }
 0xdcd   : > { %v667_v4 = vmul.f32 %v655_v56, %v652_v3 }
 0xdcf   : > { %668 = vadd.xlane.f32.xlu1 %v667_v4 }
 0xde1   : > { %v665_v7 = vpop.xlane.xlu0 %664 }
 0xde2   : > { %v666_v12 = vsel %vm658_vm11, %v665_v7, %v648_v58 }
 0xde3   : > { %v685_v14 = vmul.f32 %v677_v11, %v666_v12 }
 0xde5   : > { %686 = vadd.xlane.f32.xlu0 %v685_v14  ;;  %v673_v16 = vpop.xlane.xlu0 %672 }
 0xde6   : > { %v674_v17 = vsel %vm658_vm11, %v673_v16, %v298_v59  ;;  %v743_v59 = vxor.u32 2147483648, %v742_v57 }
 0xde7   : > { %v693_v18 = vmul.f32 %v677_v11, %v674_v17 }
 0xde9   : > { %694 = vadd.xlane.f32.xlu0 %v693_v18 }
 0xe58   : > { %v661_v19 = vpop.xlane.xlu1 %660 }
 0xe59   : > { %v662_v20 = vsel %vm658_vm11, %v661_v19, %v644_v0 }
 0xe5a   : > { %v681_v21 = vmul.f32 %v677_v11, %v662_v20 }
 0xe5c   : > { %682 = vadd.xlane.f32.xlu1 %v681_v21  ;;  %v669_v22 = vpop.xlane.xlu1 %668 }
 0xe5d   : > { %v670_v23 = vsel %vm658_vm11, %v669_v22, %v652_v3  ;;  %vm912_vm11 = vcmp.eq.s32.totalorder %v2171_v9, 35 }
 0xe5e   : > { %v689_v24 = vmul.f32 %v677_v11, %v670_v23 }
 0xe60   : > { %690 = vadd.xlane.f32.xlu1 %v689_v24 }
 0xe72   : > { %v687_v26 = vpop.xlane.xlu0 %686 }
 0xe73   : > { %v688_v28 = vsel %vm680_vm12, %v687_v26, %v666_v12  ;;  %v764_v12 = vld [vmem:[#allocation2 + $0x1d] ss:$0 sm:$0xff] }
 0xe74   : > { %v707_v29 = vmul.f32 %v699_v27, %v688_v28  ;;  %v765_v16 = vxor.u32 2147483648, %v764_v12 }
 0xe76   : > { %708 = vadd.xlane.f32.xlu0 %v707_v29  ;;  %v695_v30 = vpop.xlane.xlu0 %694 }
 0xe77   : > { %v696_v31 = vsel %vm680_vm12, %v695_v30, %v674_v17 }
 0xe78   : > { %v715_v32 = vmul.f32 %v699_v27, %v696_v31 }
 0xe7a   : > { %716 = vadd.xlane.f32.xlu0 %v715_v32 }
 0xee9   : > { %v683_v33 = vpop.xlane.xlu1 %682 }
 0xeea   : > { %v684_v34 = vsel %vm680_vm12, %v683_v33, %v662_v20 }
 0xeeb   : > { %v703_v35 = vmul.f32 %v699_v27, %v684_v34 }
 0xeed   : > { %704 = vadd.xlane.f32.xlu1 %v703_v35  ;;  %v691_v36 = vpop.xlane.xlu1 %690 }
 0xeee   : > { %v692_v37 = vsel %vm680_vm12, %v691_v36, %v670_v23  ;;  %vm938_vm12 = vcmp.eq.s32.totalorder %v2171_v9, 36 }
 0xeef   : > { %v711_v38 = vmul.f32 %v699_v27, %v692_v37 }
 0xef1   : > { %712 = vadd.xlane.f32.xlu1 %v711_v38 }
 0xf03   : > { %v709_v40 = vpop.xlane.xlu0 %708 }
 0xf04   : > { %v710_v42 = vsel %vm702_vm13, %v709_v40, %v688_v28  ;;  %v786_v28 = vld [vmem:[#allocation2 + $0x1e] ss:$0 sm:$0xff] }
 0xf05   : > { %v729_v44 = vmul.f32 %v721_v41, %v710_v42  ;;  %v787_v30 = vxor.u32 2147483648, %v786_v28 }
 0xf07   : > { %730 = vadd.xlane.f32.xlu0 %v729_v44  ;;  %v717_v46 = vpop.xlane.xlu0 %716  ;;  %v2046_v44 = vld [vmem:[%s2175_s20 + $0x20] sm:$0xff] }
 0xf08   : > { %v718_v47 = vsel %vm702_vm13, %v717_v46, %v696_v31  ;;  %v210_v46 = vsel %vm208_vm2, %v2046_v44, 0.0 }
 0xf09   : > { %v737_v48 = vmul.f32 %v721_v41, %v718_v47 }
 0xf0b   : > { %738 = vadd.xlane.f32.xlu0 %v737_v48 }
 0xf7a   : > { %v705_v49 = vpop.xlane.xlu1 %704 }
 0xf7b   : > { %v706_v50 = vsel %vm702_vm13, %v705_v49, %v684_v34 }
 0xf7c   : > { %v725_v52 = vmul.f32 %v721_v41, %v706_v50 }
 0xf7e   : > { %726 = vadd.xlane.f32.xlu1 %v725_v52  ;;  %v713_v54 = vpop.xlane.xlu1 %712 }
 0xf7f   : > { %v714_v55 = vsel %vm702_vm13, %v713_v54, %v692_v37  ;;  %vm964_vm13 = vcmp.eq.s32.totalorder %v2171_v9, 37 }
 0xf80   : > { %v733_v56 = vmul.f32 %v721_v41, %v714_v55 }
 0xf82   : > { %734 = vadd.xlane.f32.xlu1 %v733_v56 }
 0xf94   : > { %v731_v58 = vpop.xlane.xlu0 %730 }
 0xf95   : > { %v732_v60 = vsel %vm724_vm14, %v731_v58, %v710_v42 }
 0xf96   : > { %v751_v62 = vmul.f32 %v743_v59, %v732_v60 }
 0xf98   : > { %752 = vadd.xlane.f32.xlu0 %v751_v62  ;;  %v739_v63 = vpop.xlane.xlu0 %738 }
 0xf99   : > { %v740_v0 = vsel %vm724_vm14, %v739_v63, %v718_v47  ;;  %v808_v47 = vld [vmem:[#allocation2 + $0x1f] ss:$0 sm:$0xff] }
 0xf9a   : > { %v759_v1 = vmul.f32 %v743_v59, %v740_v0  ;;  %v809_v49 = vxor.u32 2147483648, %v808_v47 }
 0xf9c   : > { %760 = vadd.xlane.f32.xlu0 %v759_v1  ;;  %v215_v1 = vsel %vm214_vm5, %v2046_v44, 0.0  ;;  %vm1042_vm5 = vcmp.eq.s32.totalorder %v2171_v9, 40 }
0x100b   : > { %v727_v2 = vpop.xlane.xlu1 %726 }
0x100c   : > { %v728_v3 = vsel %vm724_vm14, %v727_v2, %v706_v50 }
0x100d   : > { %v747_v4 = vmul.f32 %v743_v59, %v728_v3 }
0x100f   : > { %748 = vadd.xlane.f32.xlu1 %v747_v4  ;;  %v735_v5 = vpop.xlane.xlu1 %734 }
0x1010   : > { %v736_v7 = vsel %vm724_vm14, %v735_v5, %v714_v55 }
0x1011   : > { %v755_v11 = vmul.f32 %v743_v59, %v736_v7 }
0x1013   : > { %756 = vadd.xlane.f32.xlu1 %v755_v11 }
0x1025   : > { %v753_v14 = vpop.xlane.xlu0 %752 }
0x1026   : > { %v754_v17 = vsel %vm746_vm15, %v753_v14, %v732_v60 }
0x1027   : > { %v773_v18 = vmul.f32 %v765_v16, %v754_v17 }
0x1029   : > { %774 = vadd.xlane.f32.xlu0 %v773_v18  ;;  %v761_v19 = vpop.xlane.xlu0 %760 }
0x102a   : > { %v762_v20 = vsel %vm746_vm15, %v761_v19, %v740_v0 }
0x102b   : > { %v781_v21 = vmul.f32 %v765_v16, %v762_v20 }
0x102d   : > { %782 = vadd.xlane.f32.xlu0 %v781_v21 }
0x109c   : > { %v749_v22 = vpop.xlane.xlu1 %748 }
0x109d   : > { %v750_v23 = vsel %vm746_vm15, %v749_v22, %v728_v3 }
0x109e   : > { %v769_v24 = vmul.f32 %v765_v16, %v750_v23 }
0x10a0   : > { %770 = vadd.xlane.f32.xlu1 %v769_v24  ;;  %v757_v25 = vpop.xlane.xlu1 %756  ;;  %v305_v24 = vsel %vm304_vm7, -1.0, %v2131_v61  ;;  %vm1102_vm7 = vcmp.eq.s32.totalorder %v2171_v9, 42 }
0x10a1   : > { %v758_v26 = vsel %vm746_vm15, %v757_v25, %v736_v7  ;;  %vm990_vm15 = vcmp.eq.s32.totalorder %v2171_v9, 38 }
0x10a2   : > { %v777_v27 = vmul.f32 %v765_v16, %v758_v26 }
0x10a4   : > { %778 = vadd.xlane.f32.xlu1 %v777_v27 }
0x10b6   : > { %v775_v29 = vpop.xlane.xlu0 %774 }
0x10b7   : > { %v776_v31 = vsel %vm768_vm0, %v775_v29, %v754_v17 }
0x10b8   : > { %v795_v32 = vmul.f32 %v787_v30, %v776_v31 }
0x10ba   : > { %796 = vadd.xlane.f32.xlu0 %v795_v32  ;;  %v783_v33 = vpop.xlane.xlu0 %782 }
0x10bb   : > { %v784_v34 = vsel %vm768_vm0, %v783_v33, %v762_v20 }
0x10bc   : > { %v803_v35 = vmul.f32 %v787_v30, %v784_v34 }
0x10be   : > { %804 = vadd.xlane.f32.xlu0 %v803_v35 }
0x112d   : > { %v771_v36 = vpop.xlane.xlu1 %770 }
0x112e   : > { %v772_v37 = vsel %vm768_vm0, %v771_v36, %v750_v23 }
0x112f   : > { %v791_v38 = vmul.f32 %v787_v30, %v772_v37 }
0x1131   : > { %792 = vadd.xlane.f32.xlu1 %v791_v38  ;;  %v779_v40 = vpop.xlane.xlu1 %778 }
0x1132   : > { %v780_v41 = vsel %vm768_vm0, %v779_v40, %v758_v26 }
0x1133   : > { %v799_v42 = vmul.f32 %v787_v30, %v780_v41 }
0x1135   : > { %800 = vadd.xlane.f32.xlu1 %v799_v42 }
0x1139   : > { %211 = vadd.xlane.f32.xlu1 %v210_v46 }
0x1147   : > { %v797_v48 = vpop.xlane.xlu0 %796 }
0x1148   : > { %v798_v50 = vsel %vm790_vm3, %v797_v48, %v776_v31 }
0x1149   : > { %v817_v52 = vmul.f32 %v809_v49, %v798_v50 }
0x114b   : > { %v805_v54 = vpop.xlane.xlu0 %804  ;;  %818 = vadd.xlane.f32.xlu1 %v817_v52 }
0x114c   : > { %v806_v55 = vsel %vm790_vm3, %v805_v54, %v784_v34 }
0x114d   : > { %v825_v56 = vmul.f32 %v809_v49, %v806_v55 }
0x114f   : > { %826 = vadd.xlane.f32.xlu1 %v825_v56 }
0x11be   : > { %v793_v57 = vpop.xlane.xlu1 %792 }
0x11bf   : > { %v794_v58 = vsel %vm790_vm3, %v793_v57, %v772_v37 }
0x11c0   : > { %v813_v59 = vmul.f32 %v809_v49, %v794_v58 }
0x11c2   : > { %814 = vadd.xlane.f32.xlu0 %v813_v59  ;;  %v801_v60 = vpop.xlane.xlu1 %800 }
0x11c3   : > { %v802_v62 = vsel %vm790_vm3, %v801_v60, %v780_v41  ;;  %vm1016_vm3 = vcmp.eq.s32.totalorder %v2171_v9, 39 }
0x11c4   : > { %v821_v63 = vmul.f32 %v809_v49, %v802_v62 }
0x11c6   : > { %822 = vadd.xlane.f32.xlu0 %v821_v63  ;;  %v2289_v0 = vpop.xlane.xlu1 %211 }
0x11c7   : > { %2098 = vrcp.f32 %v2289_v0 }
0x11d1   : > { %v2295_v2 = vpop.eup %2098 }
0x11d2   : > { %v217_v3 = vmul.f32 %v2295_v2, %v215_v1 }
0x11d4   : > { %218 = vst [vmem:[#allocation2 + $0x20] sm:$0xff] %v217_v3 }
0x11d8   : > { %v819_v4 = vpop.xlane.xlu1 %818 }
0x11d9   : > { %v820_v12 = vsel %vm812_vm6, %v819_v4, %v798_v50 }
0x11db   : > { %v830_v5 = vld [vmem:[#allocation2 + $0x20] ss:$0 sm:$0xff]  ;;  %v856_v26 = vld [vmem:[#allocation2 + $0x21] ss:$0 sm:$0xff]  ;;  %v882_v44 = vld [vmem:[#allocation2 + $0x22] ss:$0 sm:$0xff] }
0x11dc   : > { %v827_v7 = vpop.xlane.xlu1 %826  ;;  %v831_v11 = vxor.u32 2147483648, %v830_v5  ;;  %v857_v28 = vxor.u32 2147483648, %v856_v26  ;;  %v883_v47 = vxor.u32 2147483648, %v882_v44  ;;  %v908_v3 = vld [vmem:[#allocation2 + $0x23] ss:$0 sm:$0xff] }
0x11dd   : > { %v828_v16 = vsel %vm812_vm6, %v827_v7, %v806_v55  ;;  %v909_v4 = vxor.u32 2147483648, %v908_v3  ;;  %v934_v26 = vld [vmem:[#allocation2 + $0x24] ss:$0 sm:$0xff]  ;;  %v960_v44 = vld [vmem:[#allocation2 + $0x25] ss:$0 sm:$0xff] }
0x11de   : > { %v839_v14 = vmul.f32 %v831_v11, %v820_v12  ;;  %v847_v17 = vmul.f32 %v831_v11, %v828_v16  ;;  %v851_v25 = vmul.f32 %v831_v11, %v305_v24  ;;  %v986_v3 = vld [vmem:[#allocation2 + $0x26] ss:$0 sm:$0xff] }
0x11e0   : > { %840 = vadd.xlane.f32.xlu1 %v839_v14 }
0x11e4   : > { %848 = vadd.xlane.f32.xlu1 %v847_v17 }
0x124f   : > { %v815_v18 = vpop.xlane.xlu0 %814 }
0x1250   : > { %v816_v22 = vsel %vm812_vm6, %v815_v18, %v794_v58 }
0x1251   : > { %v835_v23 = vmul.f32 %v831_v11, %v816_v22 }
0x1253   : > { %v823_v19 = vpop.xlane.xlu0 %822 }
0x1254   : > { %v824_v20 = vsel %vm812_vm6, %v823_v19, %v802_v62  ;;  %vm1072_vm6 = vcmp.eq.s32.totalorder %v2171_v9, 41 }
0x1255   : > { %v843_v21 = vmul.f32 %v831_v11, %v824_v20 }
0x1257   : > { %844 = vadd.xlane.f32.xlu0 %v843_v21 }
0x125b   : > { %836 = vadd.xlane.f32.xlu0 %v835_v23 }
0x125f   : > { %852 = vadd.xlane.f32.xlu0 %v851_v25 }
0x126d   : > { %v841_v27 = vpop.xlane.xlu1 %840 }
0x126e   : > { %v842_v29 = vsel %vm834_vm8, %v841_v27, %v820_v12  ;;  %v935_v27 = vxor.u32 2147483648, %v934_v26 }
0x126f   : > { %v865_v30 = vmul.f32 %v857_v28, %v842_v29 }
0x1271   : > { %866 = vadd.xlane.f32.xlu0 %v865_v30  ;;  %v849_v31 = vpop.xlane.xlu1 %848 }
0x1272   : > { %v850_v32 = vsel %vm834_vm8, %v849_v31, %v828_v16 }
0x1273   : > { %v873_v33 = vmul.f32 %v857_v28, %v850_v32 }
0x1275   : > { %874 = vadd.xlane.f32.xlu0 %v873_v33 }
0x12e4   : > { %v845_v34 = vpop.xlane.xlu0 %844 }
0x12e5   : > { %v846_v35 = vsel %vm834_vm8, %v845_v34, %v824_v20 }
0x12e6   : > { %v869_v36 = vmul.f32 %v857_v28, %v846_v35 }
0x12e8   : > { %v837_v37 = vpop.xlane.xlu0 %836  ;;  %870 = vadd.xlane.f32.xlu1 %v869_v36 }
0x12e9   : > { %v838_v38 = vsel %vm834_vm8, %v837_v37, %v816_v22 }
0x12ea   : > { %v861_v39 = vmul.f32 %v857_v28, %v838_v38 }
0x12ec   : > { %v853_v40 = vpop.xlane.xlu0 %852  ;;  %862 = vadd.xlane.f32.xlu1 %v861_v39 }
0x12ed   : > { %v854_v41 = vsel %vm834_vm8, %v853_v40, %v305_v24  ;;  %vm1132_vm8 = vcmp.eq.s32.totalorder %v2171_v9, 43 }
0x12ee   : > { %v877_v42 = vmul.f32 %v857_v28, %v854_v41 }
0x12f0   : > { %878 = vadd.xlane.f32.xlu1 %v877_v42 }
0x12fe   : > { %v867_v46 = vpop.xlane.xlu0 %866 }
0x12ff   : > { %v868_v48 = vsel %vm860_vm9, %v867_v46, %v842_v29  ;;  %v961_v46 = vxor.u32 2147483648, %v960_v44 }
0x1300   : > { %v891_v49 = vmul.f32 %v883_v47, %v868_v48 }
0x1302   : > { %892 = vadd.xlane.f32.xlu1 %v891_v49  ;;  %v875_v50 = vpop.xlane.xlu0 %874 }
0x1303   : > { %v876_v52 = vsel %vm860_vm9, %v875_v50, %v850_v32 }
0x1304   : > { %v899_v54 = vmul.f32 %v883_v47, %v876_v52 }
0x1306   : > { %900 = vadd.xlane.f32.xlu1 %v899_v54 }
0x1375   : > { %v871_v55 = vpop.xlane.xlu1 %870 }
0x1376   : > { %v872_v56 = vsel %vm860_vm9, %v871_v55, %v846_v35 }
0x1377   : > { %v895_v57 = vmul.f32 %v883_v47, %v872_v56 }
0x1379   : > { %896 = vadd.xlane.f32.xlu0 %v895_v57  ;;  %v863_v58 = vpop.xlane.xlu1 %862 }
0x137a   : > { %v864_v59 = vsel %vm860_vm9, %v863_v58, %v838_v38 }
0x137b   : > { %v887_v60 = vmul.f32 %v883_v47, %v864_v59 }
0x137d   : > { %888 = vadd.xlane.f32.xlu0 %v887_v60  ;;  %v879_v62 = vpop.xlane.xlu1 %878 }
0x137e   : > { %v880_v63 = vsel %vm860_vm9, %v879_v62, %v854_v41  ;;  %vm1162_vm9 = vcmp.eq.s32.totalorder %v2171_v9, 44 }
0x137f   : > { %v903_v1 = vmul.f32 %v883_v47, %v880_v63 }
0x1381   : > { %904 = vadd.xlane.f32.xlu0 %v903_v1 }
0x138f   : > { %v893_v5 = vpop.xlane.xlu1 %892 }
0x1390   : > { %v894_v7 = vsel %vm886_vm10, %v893_v5, %v868_v48 }
0x1391   : > { %v917_v11 = vmul.f32 %v909_v4, %v894_v7 }
0x1393   : > { %918 = vadd.xlane.f32.xlu0 %v917_v11  ;;  %v901_v12 = vpop.xlane.xlu1 %900 }
0x1394   : > { %v902_v14 = vsel %vm886_vm10, %v901_v12, %v876_v52  ;;  %v2360_v12 = vadd.s32 40, %v2173_v10 }
0x1395   : > { %v925_v16 = vmul.f32 %v909_v4, %v902_v14 }
0x1396   : > { %vm224_vm14 = vcmp.eq.s32.totalorder %v2360_v12, %v2171_v9  ;;  %vm229_vm0 = vcmp.ge.s32.totalorder %v2360_v12, %v2171_v9  ;;  %vm311_vm4 = vcmp.eq.s32.totalorder %v2171_v9, %v2360_v12 }
0x1397   : > { %926 = vadd.xlane.f32.xlu0 %v925_v16  ;;  %vm230_vm2 = vmand %vm229_vm0, %vm140_vm1 }
0x1406   : > { %v897_v17 = vpop.xlane.xlu0 %896 }
0x1407   : > { %v898_v18 = vsel %vm886_vm10, %v897_v17, %v872_v56 }
0x1408   : > { %v921_v19 = vmul.f32 %v909_v4, %v898_v18 }
0x140a   : > { %922 = vadd.xlane.f32.xlu1 %v921_v19  ;;  %v889_v20 = vpop.xlane.xlu0 %888 }
0x140b   : > { %v890_v21 = vsel %vm886_vm10, %v889_v20, %v864_v59 }
0x140c   : > { %v913_v22 = vmul.f32 %v909_v4, %v890_v21 }
0x140e   : > { %914 = vadd.xlane.f32.xlu1 %v913_v22  ;;  %v905_v23 = vpop.xlane.xlu0 %904 }
0x140f   : > { %v906_v24 = vsel %vm886_vm10, %v905_v23, %v880_v63  ;;  %vm1192_vm10 = vcmp.eq.s32.totalorder %v2171_v9, 45 }
0x1410   : > { %v929_v25 = vmul.f32 %v909_v4, %v906_v24  ;;  %v987_v4 = vxor.u32 2147483648, %v986_v3 }
0x1412   : > { %930 = vadd.xlane.f32.xlu1 %v929_v25 }
0x1420   : > { %v919_v28 = vpop.xlane.xlu0 %918 }
0x1421   : > { %v920_v29 = vsel %vm912_vm11, %v919_v28, %v894_v7 }
0x1422   : > { %v943_v30 = vmul.f32 %v935_v27, %v920_v29 }
0x1424   : > { %944 = vadd.xlane.f32.xlu1 %v943_v30  ;;  %v927_v31 = vpop.xlane.xlu0 %926 }
0x1425   : > { %v928_v32 = vsel %vm912_vm11, %v927_v31, %v902_v14 }
0x1426   : > { %v951_v33 = vmul.f32 %v935_v27, %v928_v32 }
0x1428   : > { %952 = vadd.xlane.f32.xlu1 %v951_v33 }
0x1497   : > { %v923_v34 = vpop.xlane.xlu1 %922 }
0x1498   : > { %v924_v35 = vsel %vm912_vm11, %v923_v34, %v898_v18  ;;  %v2047_v18 = vld [vmem:[%s2175_s20 + $0x28] sm:$0xff] }
0x1499   : > { %v947_v36 = vmul.f32 %v935_v27, %v924_v35  ;;  %v226_v19 = vsel %vm224_vm14, %v2047_v18, 0.0 }
0x149b   : > { %948 = vadd.xlane.f32.xlu0 %v947_v36  ;;  %v915_v37 = vpop.xlane.xlu1 %914 }
0x149c   : > { %v916_v38 = vsel %vm912_vm11, %v915_v37, %v890_v21 }
0x149d   : > { %v939_v39 = vmul.f32 %v935_v27, %v916_v38 }
0x149f   : > { %940 = vadd.xlane.f32.xlu0 %v939_v39  ;;  %v931_v40 = vpop.xlane.xlu1 %930 }
0x14a0   : > { %v932_v41 = vsel %vm912_vm11, %v931_v40, %v906_v24 }
0x14a1   : > { %v955_v42 = vmul.f32 %v935_v27, %v932_v41 }
0x14a3   : > { %956 = vadd.xlane.f32.xlu0 %v955_v42 }
0x14b1   : > { %v945_v47 = vpop.xlane.xlu1 %944 }
0x14b2   : > { %v946_v48 = vsel %vm938_vm12, %v945_v47, %v920_v29  ;;  %v1012_v29 = vld [vmem:[#allocation2 + $0x27] ss:$0 sm:$0xff] }
0x14b3   : > { %v969_v49 = vmul.f32 %v961_v46, %v946_v48  ;;  %v1013_v30 = vxor.u32 2147483648, %v1012_v29 }
0x14b5   : > { %970 = vadd.xlane.f32.xlu0 %v969_v49  ;;  %v953_v50 = vpop.xlane.xlu1 %952 }
0x14b6   : > { %v954_v52 = vsel %vm938_vm12, %v953_v50, %v928_v32 }
0x14b7   : > { %v977_v54 = vmul.f32 %v961_v46, %v954_v52 }
0x14b9   : > { %978 = vadd.xlane.f32.xlu0 %v977_v54 }
0x1528   : > { %v949_v55 = vpop.xlane.xlu0 %948 }
0x1529   : > { %v950_v56 = vsel %vm938_vm12, %v949_v55, %v924_v35 }
0x152a   : > { %v973_v57 = vmul.f32 %v961_v46, %v950_v56 }
0x152c   : > { %974 = vadd.xlane.f32.xlu1 %v973_v57  ;;  %v941_v58 = vpop.xlane.xlu0 %940 }
0x152d   : > { %v942_v59 = vsel %vm938_vm12, %v941_v58, %v916_v38  ;;  %v231_v38 = vsel %vm230_vm2, %v2047_v18, 0.0  ;;  %vm1282_vm2 = vcmp.eq.s32.totalorder %v2171_v9, 48 }
0x152e   : > { %v965_v60 = vmul.f32 %v961_v46, %v942_v59 }
0x1530   : > { %966 = vadd.xlane.f32.xlu1 %v965_v60  ;;  %v957_v62 = vpop.xlane.xlu0 %956 }
0x1531   : > { %v958_v63 = vsel %vm938_vm12, %v957_v62, %v932_v41  ;;  %v312_v62 = vsel %vm311_vm4, -1.0, %v2131_v61  ;;  %vm1222_vm12 = vcmp.eq.s32.totalorder %v2171_v9, 46  ;;  %vm1350_vm4 = vcmp.eq.s32.totalorder %v2171_v9, 50 }
0x1532   : > { %v981_v1 = vmul.f32 %v961_v46, %v958_v63 }
0x1534   : > { %982 = vadd.xlane.f32.xlu1 %v981_v1 }
0x1542   : > { %v971_v5 = vpop.xlane.xlu0 %970 }
0x1543   : > { %v972_v7 = vsel %vm964_vm13, %v971_v5, %v946_v48 }
0x1544   : > { %v995_v11 = vmul.f32 %v987_v4, %v972_v7 }
0x1546   : > { %996 = vadd.xlane.f32.xlu1 %v995_v11  ;;  %v979_v14 = vpop.xlane.xlu0 %978 }
0x1547   : > { %v980_v16 = vsel %vm964_vm13, %v979_v14, %v954_v52 }
0x1548   : > { %v1003_v17 = vmul.f32 %v987_v4, %v980_v16 }
0x154a   : > { %1004 = vadd.xlane.f32.xlu1 %v1003_v17 }
0x154e   : > { %227 = vadd.xlane.f32.xlu1 %v226_v19 }
0x15b9   : > { %v975_v20 = vpop.xlane.xlu1 %974 }
0x15ba   : > { %v976_v21 = vsel %vm964_vm13, %v975_v20, %v950_v56 }
0x15bb   : > { %v999_v22 = vmul.f32 %v987_v4, %v976_v21 }
0x15bd   : > { %1000 = vadd.xlane.f32.xlu0 %v999_v22  ;;  %v967_v23 = vpop.xlane.xlu1 %966 }
0x15be   : > { %v968_v24 = vsel %vm964_vm13, %v967_v23, %v942_v59 }
0x15bf   : > { %v991_v25 = vmul.f32 %v987_v4, %v968_v24 }
0x15c1   : > { %992 = vadd.xlane.f32.xlu0 %v991_v25  ;;  %v983_v26 = vpop.xlane.xlu1 %982 }
0x15c2   : > { %v984_v27 = vsel %vm964_vm13, %v983_v26, %v958_v63 }
0x15c3   : > { %v1007_v28 = vmul.f32 %v987_v4, %v984_v27 }
0x15c5   : > { %1008 = vadd.xlane.f32.xlu0 %v1007_v28 }
0x15d3   : > { %v997_v31 = vpop.xlane.xlu1 %996 }
0x15d4   : > { %v998_v32 = vsel %vm990_vm15, %v997_v31, %v972_v7 }
0x15d5   : > { %v1021_v33 = vmul.f32 %v1013_v30, %v998_v32 }
0x15d7   : > { %1022 = vadd.xlane.f32.xlu1 %v1021_v33  ;;  %v1005_v34 = vpop.xlane.xlu1 %1004 }
0x15d8   : > { %v1006_v35 = vsel %vm990_vm15, %v1005_v34, %v980_v16 }
0x15d9   : > { %v1029_v36 = vmul.f32 %v1013_v30, %v1006_v35 }
0x15db   : > { %1030 = vadd.xlane.f32.xlu1 %v1029_v36  ;;  %v2378_v37 = vpop.xlane.xlu1 %227 }
0x15dc   : > { %2100 = vrcp.f32 %v2378_v37 }
0x15e6   : > { %v2385_v39 = vpop.eup %2100 }
0x15e7   : > { %v233_v40 = vmul.f32 %v2385_v39, %v231_v38 }
0x15e9   : > { %234 = vst [vmem:[#allocation2 + $0x28] sm:$0xff] %v233_v40 }
0x15f0   : > { %v1038_v54 = vld [vmem:[#allocation2 + $0x28] ss:$0 sm:$0xff]  ;;  %v1068_v18 = vld [vmem:[#allocation2 + $0x29] ss:$0 sm:$0xff]  ;;  %v1098_v40 = vld [vmem:[#allocation2 + $0x2a] ss:$0 sm:$0xff] }
0x15f1   : > { %v1039_v55 = vxor.u32 2147483648, %v1038_v54  ;;  %v1069_v19 = vxor.u32 2147483648, %v1068_v18 }
0x15f3   : > { %v1063_v1 = vmul.f32 %v1039_v55, %v312_v62 }
0x164a   : > { %v1001_v41 = vpop.xlane.xlu0 %1000 }
0x164b   : > { %v1002_v42 = vsel %vm990_vm15, %v1001_v41, %v976_v21  ;;  %v1099_v41 = vxor.u32 2147483648, %v1098_v40 }
0x164c   : > { %v1025_v44 = vmul.f32 %v1013_v30, %v1002_v42 }
0x164e   : > { %v993_v46 = vpop.xlane.xlu0 %992  ;;  %1026 = vadd.xlane.f32.xlu0 %v1025_v44 }
0x164f   : > { %v994_v47 = vsel %vm990_vm15, %v993_v46, %v968_v24 }
0x1650   : > { %v1017_v48 = vmul.f32 %v1013_v30, %v994_v47 }
0x1652   : > { %1018 = vadd.xlane.f32.xlu0 %v1017_v48  ;;  %v1009_v49 = vpop.xlane.xlu0 %1008 }
0x1653   : > { %v1010_v50 = vsel %vm990_vm15, %v1009_v49, %v984_v27  ;;  %vm1252_vm15 = vcmp.eq.s32.totalorder %v2171_v9, 47 }
0x1654   : > { %v1033_v52 = vmul.f32 %v1013_v30, %v1010_v50 }
0x1656   : > { %1034 = vadd.xlane.f32.xlu0 %v1033_v52 }
0x1664   : > { %v1023_v56 = vpop.xlane.xlu1 %1022 }
0x1665   : > { %v1024_v57 = vsel %vm1016_vm3, %v1023_v56, %v998_v32 }
0x1666   : > { %v1047_v58 = vmul.f32 %v1039_v55, %v1024_v57 }
0x1668   : > { %1048 = vadd.xlane.f32.xlu0 %v1047_v58  ;;  %v1031_v59 = vpop.xlane.xlu1 %1030 }
0x1669   : > { %v1032_v60 = vsel %vm1016_vm3, %v1031_v59, %v1006_v35 }
0x166a   : > { %v1055_v63 = vmul.f32 %v1039_v55, %v1032_v60 }
0x166c   : > { %1056 = vadd.xlane.f32.xlu0 %v1055_v63 }
0x1670   : > { %1064 = vadd.xlane.f32.xlu0 %v1063_v1 }
0x16db   : > { %v1027_v3 = vpop.xlane.xlu0 %1026 }
0x16dc   : > { %v1028_v4 = vsel %vm1016_vm3, %v1027_v3, %v1002_v42  ;;  %v1128_v3 = vld [vmem:[#allocation2 + $0x2b] ss:$0 sm:$0xff] }
0x16dd   : > { %v1051_v5 = vmul.f32 %v1039_v55, %v1028_v4 }
0x16df   : > { %v1019_v7 = vpop.xlane.xlu0 %1018  ;;  %1052 = vadd.xlane.f32.xlu1 %v1051_v5 }
0x16e0   : > { %v1020_v11 = vsel %vm1016_vm3, %v1019_v7, %v994_v47 }
0x16e1   : > { %v1043_v12 = vmul.f32 %v1039_v55, %v1020_v11 }
0x16e3   : > { %v1035_v14 = vpop.xlane.xlu0 %1034  ;;  %1044 = vadd.xlane.f32.xlu1 %v1043_v12 }
0x16e4   : > { %v1036_v16 = vsel %vm1016_vm3, %v1035_v14, %v1010_v50  ;;  %vm1316_vm3 = vcmp.eq.s32.totalorder %v2171_v9, 49 }
0x16e5   : > { %v1059_v17 = vmul.f32 %v1039_v55, %v1036_v16 }
0x16e7   : > { %1060 = vadd.xlane.f32.xlu1 %v1059_v17 }
0x16f5   : > { %v1049_v20 = vpop.xlane.xlu0 %1048 }
0x16f6   : > { %v1050_v21 = vsel %vm1042_vm5, %v1049_v20, %v1024_v57 }
0x16f7   : > { %v1077_v22 = vmul.f32 %v1069_v19, %v1050_v21 }
0x16f9   : > { %1078 = vadd.xlane.f32.xlu0 %v1077_v22  ;;  %v1057_v23 = vpop.xlane.xlu0 %1056 }
0x16fa   : > { %v1058_v24 = vsel %vm1042_vm5, %v1057_v23, %v1032_v60 }
0x16fb   : > { %v1085_v25 = vmul.f32 %v1069_v19, %v1058_v24 }
0x16fd   : > { %1086 = vadd.xlane.f32.xlu0 %v1085_v25  ;;  %v1065_v26 = vpop.xlane.xlu0 %1064 }
0x16fe   : > { %v1066_v27 = vsel %vm1042_vm5, %v1065_v26, %v312_v62 }
0x16ff   : > { %v1093_v28 = vmul.f32 %v1069_v19, %v1066_v27 }
0x1701   : > { %1094 = vadd.xlane.f32.xlu0 %v1093_v28 }
0x176c   : > { %v1053_v29 = vpop.xlane.xlu1 %1052 }
0x176d   : > { %v1054_v30 = vsel %vm1042_vm5, %v1053_v29, %v1028_v4  ;;  %v1129_v4 = vxor.u32 2147483648, %v1128_v3  ;;  %v1158_v29 = vld [vmem:[#allocation2 + $0x2c] ss:$0 sm:$0xff] }
0x176e   : > { %v1081_v31 = vmul.f32 %v1069_v19, %v1054_v30 }
0x1770   : > { %1082 = vadd.xlane.f32.xlu1 %v1081_v31  ;;  %v1045_v32 = vpop.xlane.xlu1 %1044 }
0x1771   : > { %v1046_v33 = vsel %vm1042_vm5, %v1045_v32, %v1020_v11 }
0x1772   : > { %v1073_v34 = vmul.f32 %v1069_v19, %v1046_v33 }
0x1774   : > { %1074 = vadd.xlane.f32.xlu1 %v1073_v34  ;;  %v1061_v35 = vpop.xlane.xlu1 %1060 }
0x1775   : > { %v1062_v36 = vsel %vm1042_vm5, %v1061_v35, %v1036_v16  ;;  %vm1384_vm5 = vcmp.eq.s32.totalorder %v2171_v9, 51 }
0x1776   : > { %v1089_v38 = vmul.f32 %v1069_v19, %v1062_v36 }
0x1778   : > { %1090 = vadd.xlane.f32.xlu1 %v1089_v38 }
0x1786   : > { %v1079_v42 = vpop.xlane.xlu0 %1078 }
0x1787   : > { %v1080_v44 = vsel %vm1072_vm6, %v1079_v42, %v1050_v21 }
0x1788   : > { %v1107_v46 = vmul.f32 %v1099_v41, %v1080_v44 }
0x178a   : > { %1108 = vadd.xlane.f32.xlu0 %v1107_v46  ;;  %v1087_v47 = vpop.xlane.xlu0 %1086 }
0x178b   : > { %v1088_v48 = vsel %vm1072_vm6, %v1087_v47, %v1058_v24 }
0x178c   : > { %v1115_v49 = vmul.f32 %v1099_v41, %v1088_v48 }
0x178e   : > { %1116 = vadd.xlane.f32.xlu0 %v1115_v49  ;;  %v1095_v50 = vpop.xlane.xlu0 %1094 }
0x178f   : > { %v1096_v52 = vsel %vm1072_vm6, %v1095_v50, %v1066_v27 }
0x1790   : > { %v1123_v54 = vmul.f32 %v1099_v41, %v1096_v52 }
0x1792   : > { %1124 = vadd.xlane.f32.xlu0 %v1123_v54 }
0x17fd   : > { %v1083_v55 = vpop.xlane.xlu1 %1082 }
0x17fe   : > { %v1084_v56 = vsel %vm1072_vm6, %v1083_v55, %v1054_v30  ;;  %v1159_v30 = vxor.u32 2147483648, %v1158_v29  ;;  %v1188_v55 = vld [vmem:[#allocation2 + $0x2d] ss:$0 sm:$0xff] }
0x17ff   : > { %v1111_v57 = vmul.f32 %v1099_v41, %v1084_v56 }
0x1801   : > { %1112 = vadd.xlane.f32.xlu1 %v1111_v57  ;;  %v1075_v58 = vpop.xlane.xlu1 %1074 }
0x1802   : > { %v1076_v59 = vsel %vm1072_vm6, %v1075_v58, %v1046_v33 }
0x1803   : > { %v1103_v60 = vmul.f32 %v1099_v41, %v1076_v59 }
0x1805   : > { %1104 = vadd.xlane.f32.xlu1 %v1103_v60  ;;  %v1091_v62 = vpop.xlane.xlu1 %1090 }
0x1806   : > { %v1092_v63 = vsel %vm1072_vm6, %v1091_v62, %v1062_v36  ;;  %vm1418_vm6 = vcmp.eq.s32.totalorder %v2171_v9, 52 }
0x1807   : > { %v1119_v1 = vmul.f32 %v1099_v41, %v1092_v63 }
0x1809   : > { %1120 = vadd.xlane.f32.xlu1 %v1119_v1 }
0x1817   : > { %v1109_v5 = vpop.xlane.xlu0 %1108 }
0x1818   : > { %v1110_v7 = vsel %vm1102_vm7, %v1109_v5, %v1080_v44 }
0x1819   : > { %v1137_v11 = vmul.f32 %v1129_v4, %v1110_v7 }
0x181b   : > { %1138 = vadd.xlane.f32.xlu0 %v1137_v11  ;;  %v1117_v12 = vpop.xlane.xlu0 %1116 }
0x181c   : > { %v1118_v14 = vsel %vm1102_vm7, %v1117_v12, %v1088_v48 }
0x181d   : > { %v1145_v16 = vmul.f32 %v1129_v4, %v1118_v14 }
0x181f   : > { %1146 = vadd.xlane.f32.xlu0 %v1145_v16  ;;  %v1125_v17 = vpop.xlane.xlu0 %1124 }
0x1820   : > { %v1126_v18 = vsel %vm1102_vm7, %v1125_v17, %v1096_v52 }
0x1821   : > { %v1153_v19 = vmul.f32 %v1129_v4, %v1126_v18 }
0x1823   : > { %1154 = vadd.xlane.f32.xlu0 %v1153_v19 }
0x188e   : > { %v1113_v20 = vpop.xlane.xlu1 %1112 }
0x188f   : > { %v1114_v21 = vsel %vm1102_vm7, %v1113_v20, %v1084_v56  ;;  %v1189_v56 = vxor.u32 2147483648, %v1188_v55  ;;  %v1218_v20 = vld [vmem:[#allocation2 + $0x2e] ss:$0 sm:$0xff] }
0x1890   : > { %v1141_v22 = vmul.f32 %v1129_v4, %v1114_v21 }
0x1892   : > { %1142 = vadd.xlane.f32.xlu1 %v1141_v22  ;;  %v1105_v23 = vpop.xlane.xlu1 %1104 }
0x1893   : > { %v1106_v24 = vsel %vm1102_vm7, %v1105_v23, %v1076_v59 }
0x1894   : > { %v1133_v25 = vmul.f32 %v1129_v4, %v1106_v24 }
0x1896   : > { %1134 = vadd.xlane.f32.xlu1 %v1133_v25  ;;  %v1121_v26 = vpop.xlane.xlu1 %1120 }
0x1897   : > { %v1122_v27 = vsel %vm1102_vm7, %v1121_v26, %v1092_v63  ;;  %vm1452_vm7 = vcmp.eq.s32.totalorder %v2171_v9, 53 }
0x1898   : > { %v1149_v28 = vmul.f32 %v1129_v4, %v1122_v27 }
0x189a   : > { %1150 = vadd.xlane.f32.xlu1 %v1149_v28 }
0x18a8   : > { %v1139_v31 = vpop.xlane.xlu0 %1138 }
0x18a9   : > { %v1140_v32 = vsel %vm1132_vm8, %v1139_v31, %v1110_v7 }
0x18aa   : > { %v1167_v33 = vmul.f32 %v1159_v30, %v1140_v32 }
0x18ac   : > { %1168 = vadd.xlane.f32.xlu0 %v1167_v33  ;;  %v1147_v34 = vpop.xlane.xlu0 %1146 }
0x18ad   : > { %v1148_v35 = vsel %vm1132_vm8, %v1147_v34, %v1118_v14 }
0x18ae   : > { %v1175_v36 = vmul.f32 %v1159_v30, %v1148_v35 }
0x18b0   : > { %1176 = vadd.xlane.f32.xlu0 %v1175_v36  ;;  %v1155_v38 = vpop.xlane.xlu0 %1154 }
0x18b1   : > { %v1156_v40 = vsel %vm1132_vm8, %v1155_v38, %v1126_v18  ;;  %v2485_v38 = vadd.s32 48, %v2173_v10 }
0x18b2   : > { %v1183_v41 = vmul.f32 %v1159_v30, %v1156_v40 }
0x18b3   : > { %vm240_vm11 = vcmp.eq.s32.totalorder %v2485_v38, %v2171_v9  ;;  %vm245_vm13 = vcmp.ge.s32.totalorder %v2485_v38, %v2171_v9  ;;  %vm318_vm0 = vcmp.eq.s32.totalorder %v2171_v9, %v2485_v38 }
0x18b4   : > { %1184 = vadd.xlane.f32.xlu0 %v1183_v41  ;;  %vm246_vm14 = vmand %vm245_vm13, %vm140_vm1  ;;  %vm1554_vm13 = vcmp.eq.s32.totalorder %v2171_v9, 56 }
0x191f   : > { %v1143_v42 = vpop.xlane.xlu1 %1142 }
0x1920   : > { %v1144_v44 = vsel %vm1132_vm8, %v1143_v42, %v1114_v21  ;;  %v1219_v21 = vxor.u32 2147483648, %v1218_v20 }
0x1921   : > { %v1171_v46 = vmul.f32 %v1159_v30, %v1144_v44 }
0x1923   : > { %1172 = vadd.xlane.f32.xlu1 %v1171_v46  ;;  %v1135_v47 = vpop.xlane.xlu1 %1134 }
0x1924   : > { %v1136_v48 = vsel %vm1132_vm8, %v1135_v47, %v1106_v24  ;;  %v1248_v47 = vld [vmem:[#allocation2 + $0x2f] ss:$0 sm:$0xff] }
0x1925   : > { %v1163_v49 = vmul.f32 %v1159_v30, %v1136_v48 }
0x1927   : > { %1164 = vadd.xlane.f32.xlu1 %v1163_v49  ;;  %v1151_v50 = vpop.xlane.xlu1 %1150 }
0x1928   : > { %v1152_v52 = vsel %vm1132_vm8, %v1151_v50, %v1122_v27 }
0x1929   : > { %v1179_v54 = vmul.f32 %v1159_v30, %v1152_v52 }
0x192b   : > { %1180 = vadd.xlane.f32.xlu1 %v1179_v54 }
0x1939   : > { %v1169_v57 = vpop.xlane.xlu0 %1168 }
0x193a   : > { %v1170_v58 = vsel %vm1162_vm9, %v1169_v57, %v1140_v32 }
0x193b   : > { %v1197_v59 = vmul.f32 %v1189_v56, %v1170_v58 }
0x193d   : > { %1198 = vadd.xlane.f32.xlu0 %v1197_v59  ;;  %v1177_v60 = vpop.xlane.xlu0 %1176 }
0x193e   : > { %v1178_v62 = vsel %vm1162_vm9, %v1177_v60, %v1148_v35 }
0x193f   : > { %v1205_v63 = vmul.f32 %v1189_v56, %v1178_v62 }
0x1941   : > { %1206 = vadd.xlane.f32.xlu0 %v1205_v63  ;;  %v1185_v1 = vpop.xlane.xlu0 %1184 }
0x1942   : > { %v1186_v3 = vsel %vm1162_vm9, %v1185_v1, %v1156_v40 }
0x1943   : > { %v1213_v4 = vmul.f32 %v1189_v56, %v1186_v3 }
0x1945   : > { %1214 = vadd.xlane.f32.xlu0 %v1213_v4 }
0x19b0   : > { %v1173_v5 = vpop.xlane.xlu1 %1172 }
0x19b1   : > { %v1174_v7 = vsel %vm1162_vm9, %v1173_v5, %v1144_v44  ;;  %v2048_v44 = vld [vmem:[%s2175_s20 + $0x30] sm:$0xff] }
0x19b2   : > { %v1201_v11 = vmul.f32 %v1189_v56, %v1174_v7  ;;  %v242_v46 = vsel %vm240_vm11, %v2048_v44, 0.0 }
0x19b4   : > { %1202 = vadd.xlane.f32.xlu1 %v1201_v11  ;;  %v1165_v12 = vpop.xlane.xlu1 %1164 }
0x19b5   : > { %v1166_v14 = vsel %vm1162_vm9, %v1165_v12, %v1136_v48  ;;  %v1249_v48 = vxor.u32 2147483648, %v1248_v47 }
0x19b6   : > { %v1193_v16 = vmul.f32 %v1189_v56, %v1166_v14 }
0x19b8   : > { %1194 = vadd.xlane.f32.xlu1 %v1193_v16  ;;  %v1181_v17 = vpop.xlane.xlu1 %1180 }
0x19b9   : > { %v1182_v18 = vsel %vm1162_vm9, %v1181_v17, %v1152_v52  ;;  %vm1486_vm9 = vcmp.eq.s32.totalorder %v2171_v9, 54 }
0x19ba   : > { %v1209_v19 = vmul.f32 %v1189_v56, %v1182_v18 }
0x19bc   : > { %1210 = vadd.xlane.f32.xlu1 %v1209_v19 }
0x19ca   : > { %v1199_v22 = vpop.xlane.xlu0 %1198 }
0x19cb   : > { %v1200_v23 = vsel %vm1192_vm10, %v1199_v22, %v1170_v58 }
0x19cc   : > { %v1227_v24 = vmul.f32 %v1219_v21, %v1200_v23 }
0x19ce   : > { %1228 = vadd.xlane.f32.xlu0 %v1227_v24  ;;  %v1207_v25 = vpop.xlane.xlu0 %1206 }
0x19cf   : > { %v1208_v26 = vsel %vm1192_vm10, %v1207_v25, %v1178_v62 }
0x19d0   : > { %v1235_v27 = vmul.f32 %v1219_v21, %v1208_v26 }
0x19d2   : > { %1236 = vadd.xlane.f32.xlu0 %v1235_v27  ;;  %v1215_v28 = vpop.xlane.xlu0 %1214 }
0x19d3   : > { %v1216_v29 = vsel %vm1192_vm10, %v1215_v28, %v1186_v3 }
0x19d4   : > { %v1243_v30 = vmul.f32 %v1219_v21, %v1216_v29 }
0x19d6   : > { %1244 = vadd.xlane.f32.xlu0 %v1243_v30 }
0x1a41   : > { %v1203_v31 = vpop.xlane.xlu1 %1202 }
0x1a42   : > { %v1204_v32 = vsel %vm1192_vm10, %v1203_v31, %v1174_v7 }
0x1a43   : > { %v1231_v33 = vmul.f32 %v1219_v21, %v1204_v32 }
0x1a45   : > { %1232 = vadd.xlane.f32.xlu1 %v1231_v33  ;;  %v1195_v34 = vpop.xlane.xlu1 %1194 }
0x1a46   : > { %v1196_v35 = vsel %vm1192_vm10, %v1195_v34, %v1166_v14  ;;  %v247_v14 = vsel %vm246_vm14, %v2048_v44, 0.0  ;;  %vm1592_vm14 = vcmp.eq.s32.totalorder %v2171_v9, 57 }
0x1a47   : > { %v1223_v36 = vmul.f32 %v1219_v21, %v1196_v35 }
0x1a49   : > { %1224 = vadd.xlane.f32.xlu1 %v1223_v36  ;;  %v1211_v40 = vpop.xlane.xlu1 %1210 }
0x1a4a   : > { %v1212_v41 = vsel %vm1192_vm10, %v1211_v40, %v1182_v18 }
0x1a4b   : > { %v1239_v42 = vmul.f32 %v1219_v21, %v1212_v41 }
0x1a4d   : > { %1240 = vadd.xlane.f32.xlu1 %v1239_v42 }
0x1a51   : > { %243 = vadd.xlane.f32.xlu1 %v242_v46 }
0x1a5b   : > { %v1229_v49 = vpop.xlane.xlu0 %1228 }
0x1a5c   : > { %v1230_v50 = vsel %vm1222_vm12, %v1229_v49, %v1200_v23 }
0x1a5d   : > { %v1257_v52 = vmul.f32 %v1249_v48, %v1230_v50 }
0x1a5f   : > { %v1237_v54 = vpop.xlane.xlu0 %1236  ;;  %1258 = vadd.xlane.f32.xlu1 %v1257_v52 }
0x1a60   : > { %v1238_v55 = vsel %vm1222_vm12, %v1237_v54, %v1208_v26 }
0x1a61   : > { %v1265_v56 = vmul.f32 %v1249_v48, %v1238_v55 }
0x1a63   : > { %v1245_v57 = vpop.xlane.xlu0 %1244  ;;  %1266 = vadd.xlane.f32.xlu1 %v1265_v56 }
0x1a64   : > { %v1246_v58 = vsel %vm1222_vm12, %v1245_v57, %v1216_v29 }
0x1a65   : > { %v1273_v59 = vmul.f32 %v1249_v48, %v1246_v58 }
0x1a67   : > { %1274 = vadd.xlane.f32.xlu1 %v1273_v59 }
0x1ad2   : > { %v1233_v60 = vpop.xlane.xlu1 %1232 }
0x1ad3   : > { %v1234_v62 = vsel %vm1222_vm12, %v1233_v60, %v1204_v32 }
0x1ad4   : > { %v1261_v63 = vmul.f32 %v1249_v48, %v1234_v62 }
0x1ad6   : > { %1262 = vadd.xlane.f32.xlu0 %v1261_v63  ;;  %v1225_v1 = vpop.xlane.xlu1 %1224 }
0x1ad7   : > { %v1226_v3 = vsel %vm1222_vm12, %v1225_v1, %v1196_v35 }
0x1ad8   : > { %v1253_v4 = vmul.f32 %v1249_v48, %v1226_v3 }
0x1ada   : > { %1254 = vadd.xlane.f32.xlu0 %v1253_v4  ;;  %v1241_v5 = vpop.xlane.xlu1 %1240 }
0x1adb   : > { %v1242_v7 = vsel %vm1222_vm12, %v1241_v5, %v1212_v41  ;;  %v319_v41 = vsel %vm318_vm0, -1.0, %v2131_v61  ;;  %vm1668_vm0 = vcmp.eq.s32.totalorder %v2171_v9, 59 }
0x1adc   : > { %v1269_v11 = vmul.f32 %v1249_v48, %v1242_v7 }
0x1ade   : > { %1270 = vadd.xlane.f32.xlu0 %v1269_v11  ;;  %v2505_v12 = vpop.xlane.xlu1 %243 }
0x1adf   : > { %2102 = vrcp.f32 %v2505_v12 }
0x1ae9   : > { %v2512_v16 = vpop.eup %2102 }
0x1aea   : > { %v249_v17 = vmul.f32 %v2512_v16, %v247_v14 }
0x1aec   : > { %250 = vst [vmem:[#allocation2 + $0x30] sm:$0xff] %v249_v17  ;;  %v1259_v18 = vpop.xlane.xlu1 %1258 }
0x1aed   : > { %v1260_v22 = vsel %vm1252_vm15, %v1259_v18, %v1230_v50 }
0x1af0   : > { %v1267_v19 = vpop.xlane.xlu1 %1266 }
0x1af1   : > { %v1268_v25 = vsel %vm1252_vm15, %v1267_v19, %v1238_v55 }
0x1af3   : > { %v1278_v20 = vld [vmem:[#allocation2 + $0x30] ss:$0 sm:$0xff]  ;;  %v1312_v44 = vld [vmem:[#allocation2 + $0x31] ss:$0 sm:$0xff]  ;;  %v1346_v14 = vld [vmem:[#allocation2 + $0x32] ss:$0 sm:$0xff] }
0x1af4   : > { %v1279_v21 = vxor.u32 2147483648, %v1278_v20  ;;  %v1275_v24 = vpop.xlane.xlu1 %1274  ;;  %v1313_v46 = vxor.u32 2147483648, %v1312_v44  ;;  %v1347_v17 = vxor.u32 2147483648, %v1346_v14 }
0x1af5   : > { %v1276_v27 = vsel %vm1252_vm15, %v1275_v24, %v1246_v58 }
0x1af6   : > { %v1287_v23 = vmul.f32 %v1279_v21, %v1260_v22  ;;  %v1295_v26 = vmul.f32 %v1279_v21, %v1268_v25  ;;  %v1303_v28 = vmul.f32 %v1279_v21, %v1276_v27  ;;  %v1307_v42 = vmul.f32 %v1279_v21, %v319_v41 }
0x1af8   : > { %1288 = vadd.xlane.f32.xlu1 %v1287_v23 }
0x1afc   : > { %1296 = vadd.xlane.f32.xlu1 %v1295_v26 }
0x1b00   : > { %1304 = vadd.xlane.f32.xlu1 %v1303_v28 }
0x1b63   : > { %v1263_v29 = vpop.xlane.xlu0 %1262 }
0x1b64   : > { %v1264_v30 = vsel %vm1252_vm15, %v1263_v29, %v1234_v62 }
0x1b65   : > { %v1291_v31 = vmul.f32 %v1279_v21, %v1264_v30 }
0x1b67   : > { %v1255_v32 = vpop.xlane.xlu0 %1254  ;;  %1292 = vadd.xlane.f32.xlu0 %v1291_v31 }
0x1b68   : > { %v1256_v36 = vsel %vm1252_vm15, %v1255_v32, %v1226_v3 }
0x1b69   : > { %v1283_v40 = vmul.f32 %v1279_v21, %v1256_v36 }
0x1b6b   : > { %v1271_v33 = vpop.xlane.xlu0 %1270 }
0x1b6c   : > { %v1272_v34 = vsel %vm1252_vm15, %v1271_v33, %v1242_v7  ;;  %vm1630_vm15 = vcmp.eq.s32.totalorder %v2171_v9, 58 }
0x1b6d   : > { %v1299_v35 = vmul.f32 %v1279_v21, %v1272_v34 }
0x1b6f   : > { %1300 = vadd.xlane.f32.xlu0 %v1299_v35 }
0x1b73   : > { %1284 = vadd.xlane.f32.xlu0 %v1283_v40 }
0x1b77   : > { %1308 = vadd.xlane.f32.xlu0 %v1307_v42  ;;  %v1380_v42 = vld [vmem:[#allocation2 + $0x33] ss:$0 sm:$0xff] }
0x1b78   : > { %v1381_v44 = vxor.u32 2147483648, %v1380_v42 }
0x1b85   : > { %v1289_v47 = vpop.xlane.xlu1 %1288 }
0x1b86   : > { %v1290_v48 = vsel %vm1282_vm2, %v1289_v47, %v1260_v22 }
0x1b87   : > { %v1321_v49 = vmul.f32 %v1313_v46, %v1290_v48 }
0x1b89   : > { %1322 = vadd.xlane.f32.xlu0 %v1321_v49  ;;  %v1297_v50 = vpop.xlane.xlu1 %1296 }
0x1b8a   : > { %v1298_v38 = vsel %vm1282_vm2, %v1297_v50, %v1268_v25 }
0x1b8b   : > { %v1329_v52 = vmul.f32 %v1313_v46, %v1298_v38 }
0x1b8d   : > { %1330 = vadd.xlane.f32.xlu0 %v1329_v52  ;;  %v1305_v54 = vpop.xlane.xlu1 %1304 }
0x1b8e   : > { %v1306_v55 = vsel %vm1282_vm2, %v1305_v54, %v1276_v27 }
0x1b8f   : > { %v1337_v56 = vmul.f32 %v1313_v46, %v1306_v55 }
0x1b91   : > { %1338 = vadd.xlane.f32.xlu0 %v1337_v56 }
0x1bf4   : > { %v1293_v57 = vpop.xlane.xlu0 %1292 }
0x1bf5   : > { %v1294_v58 = vsel %vm1282_vm2, %v1293_v57, %v1264_v30 }
0x1bf6   : > { %v1325_v59 = vmul.f32 %v1313_v46, %v1294_v58 }
0x1bf8   : > { %1326 = vadd.xlane.f32.xlu1 %v1325_v59 }
0x1bfc   : > { %v1301_v60 = vpop.xlane.xlu0 %1300 }
0x1bfd   : > { %v1302_v62 = vsel %vm1282_vm2, %v1301_v60, %v1272_v34 }
0x1bfe   : > { %v1333_v63 = vmul.f32 %v1313_v46, %v1302_v62 }
0x1c00   : > { %v1285_v1 = vpop.xlane.xlu0 %1284  ;;  %1334 = vadd.xlane.f32.xlu1 %v1333_v63 }
0x1c01   : > { %v1286_v3 = vsel %vm1282_vm2, %v1285_v1, %v1256_v36 }
0x1c02   : > { %v1317_v4 = vmul.f32 %v1313_v46, %v1286_v3 }
0x1c04   : > { %v1309_v5 = vpop.xlane.xlu0 %1308  ;;  %1318 = vadd.xlane.f32.xlu1 %v1317_v4 }
0x1c05   : > { %v1310_v7 = vsel %vm1282_vm2, %v1309_v5, %v319_v41  ;;  %vm1706_vm2 = vcmp.eq.s32.totalorder %v2171_v9, 60 }
0x1c06   : > { %v1341_v11 = vmul.f32 %v1313_v46, %v1310_v7 }
0x1c08   : > { %1342 = vadd.xlane.f32.xlu1 %v1341_v11  ;;  %v1414_v11 = vld [vmem:[#allocation2 + $0x34] ss:$0 sm:$0xff] }
0x1c09   : > { %v1415_v14 = vxor.u32 2147483648, %v1414_v11 }
0x1c16   : > { %v1323_v18 = vpop.xlane.xlu0 %1322 }
0x1c17   : > { %v1324_v19 = vsel %vm1316_vm3, %v1323_v18, %v1290_v48 }
0x1c18   : > { %v1355_v20 = vmul.f32 %v1347_v17, %v1324_v19 }
0x1c1a   : > { %1356 = vadd.xlane.f32.xlu1 %v1355_v20  ;;  %v1331_v21 = vpop.xlane.xlu0 %1330 }
0x1c1b   : > { %v1332_v22 = vsel %vm1316_vm3, %v1331_v21, %v1298_v38 }
0x1c1c   : > { %v1363_v23 = vmul.f32 %v1347_v17, %v1332_v22 }
0x1c1e   : > { %1364 = vadd.xlane.f32.xlu1 %v1363_v23  ;;  %v1339_v24 = vpop.xlane.xlu0 %1338 }
0x1c1f   : > { %v1340_v25 = vsel %vm1316_vm3, %v1339_v24, %v1306_v55 }
0x1c20   : > { %v1371_v26 = vmul.f32 %v1347_v17, %v1340_v25 }
0x1c22   : > { %1372 = vadd.xlane.f32.xlu1 %v1371_v26 }
0x1c85   : > { %v1327_v27 = vpop.xlane.xlu1 %1326 }
0x1c86   : > { %v1328_v28 = vsel %vm1316_vm3, %v1327_v27, %v1294_v58 }
0x1c87   : > { %v1359_v29 = vmul.f32 %v1347_v17, %v1328_v28 }
0x1c89   : > { %1360 = vadd.xlane.f32.xlu0 %v1359_v29 }
0x1c8d   : > { %v1335_v30 = vpop.xlane.xlu1 %1334 }
0x1c8e   : > { %v1336_v31 = vsel %vm1316_vm3, %v1335_v30, %v1302_v62 }
0x1c8f   : > { %v1367_v32 = vmul.f32 %v1347_v17, %v1336_v31 }
0x1c91   : > { %1368 = vadd.xlane.f32.xlu0 %v1367_v32  ;;  %v1319_v33 = vpop.xlane.xlu1 %1318 }
0x1c92   : > { %v1320_v34 = vsel %vm1316_vm3, %v1319_v33, %v1286_v3 }
0x1c93   : > { %v1351_v35 = vmul.f32 %v1347_v17, %v1320_v34 }
0x1c95   : > { %1352 = vadd.xlane.f32.xlu0 %v1351_v35  ;;  %v1343_v36 = vpop.xlane.xlu1 %1342 }
0x1c96   : > { %v1344_v40 = vsel %vm1316_vm3, %v1343_v36, %v1310_v7  ;;  %vm1744_vm3 = vcmp.eq.s32.totalorder %v2171_v9, 61 }
0x1c97   : > { %v1375_v41 = vmul.f32 %v1347_v17, %v1344_v40 }
0x1c99   : > { %1376 = vadd.xlane.f32.xlu0 %v1375_v41  ;;  %v1448_v41 = vld [vmem:[#allocation2 + $0x35] ss:$0 sm:$0xff] }
0x1c9a   : > { %v1449_v42 = vxor.u32 2147483648, %v1448_v41 }
0x1ca7   : > { %v1357_v46 = vpop.xlane.xlu1 %1356 }
0x1ca8   : > { %v1358_v47 = vsel %vm1350_vm4, %v1357_v46, %v1324_v19 }
0x1ca9   : > { %v1389_v48 = vmul.f32 %v1381_v44, %v1358_v47 }
0x1cab   : > { %1390 = vadd.xlane.f32.xlu0 %v1389_v48  ;;  %v1365_v49 = vpop.xlane.xlu1 %1364 }
0x1cac   : > { %v1366_v50 = vsel %vm1350_vm4, %v1365_v49, %v1332_v22 }
0x1cad   : > { %v1397_v38 = vmul.f32 %v1381_v44, %v1366_v50 }
0x1caf   : > { %1398 = vadd.xlane.f32.xlu0 %v1397_v38  ;;  %v1373_v52 = vpop.xlane.xlu1 %1372 }
0x1cb0   : > { %v1374_v54 = vsel %vm1350_vm4, %v1373_v52, %v1340_v25 }
0x1cb1   : > { %v1405_v55 = vmul.f32 %v1381_v44, %v1374_v54 }
0x1cb3   : > { %1406 = vadd.xlane.f32.xlu0 %v1405_v55 }
0x1d16   : > { %v1361_v56 = vpop.xlane.xlu0 %1360 }
0x1d17   : > { %v1362_v57 = vsel %vm1350_vm4, %v1361_v56, %v1328_v28 }
0x1d18   : > { %v1393_v58 = vmul.f32 %v1381_v44, %v1362_v57 }
0x1d1a   : > { %1394 = vadd.xlane.f32.xlu1 %v1393_v58 }
0x1d1e   : > { %v1369_v59 = vpop.xlane.xlu0 %1368 }
0x1d1f   : > { %v1370_v60 = vsel %vm1350_vm4, %v1369_v59, %v1336_v31 }
0x1d20   : > { %v1401_v62 = vmul.f32 %v1381_v44, %v1370_v60 }
0x1d22   : > { %1402 = vadd.xlane.f32.xlu1 %v1401_v62  ;;  %v1353_v63 = vpop.xlane.xlu0 %1352 }
0x1d23   : > { %v1354_v1 = vsel %vm1350_vm4, %v1353_v63, %v1320_v34 }
0x1d24   : > { %v1385_v3 = vmul.f32 %v1381_v44, %v1354_v1 }
0x1d26   : > { %1386 = vadd.xlane.f32.xlu1 %v1385_v3  ;;  %v1377_v4 = vpop.xlane.xlu0 %1376 }
0x1d27   : > { %v1378_v5 = vsel %vm1350_vm4, %v1377_v4, %v1344_v40  ;;  %vm1782_vm4 = vcmp.eq.s32.totalorder %v2171_v9, 62 }
0x1d28   : > { %v1409_v7 = vmul.f32 %v1381_v44, %v1378_v5 }
0x1d2a   : > { %1410 = vadd.xlane.f32.xlu1 %v1409_v7  ;;  %v1482_v7 = vld [vmem:[#allocation2 + $0x36] ss:$0 sm:$0xff] }
0x1d2b   : > { %v1483_v11 = vxor.u32 2147483648, %v1482_v7 }
0x1d38   : > { %v1391_v17 = vpop.xlane.xlu0 %1390 }
0x1d39   : > { %v1392_v18 = vsel %vm1384_vm5, %v1391_v17, %v1358_v47 }
0x1d3a   : > { %v1423_v19 = vmul.f32 %v1415_v14, %v1392_v18 }
0x1d3c   : > { %1424 = vadd.xlane.f32.xlu1 %v1423_v19  ;;  %v1399_v20 = vpop.xlane.xlu0 %1398 }
0x1d3d   : > { %v1400_v21 = vsel %vm1384_vm5, %v1399_v20, %v1366_v50 }
0x1d3e   : > { %v1431_v22 = vmul.f32 %v1415_v14, %v1400_v21 }
0x1d40   : > { %1432 = vadd.xlane.f32.xlu1 %v1431_v22  ;;  %v1407_v23 = vpop.xlane.xlu0 %1406  ;;  %v2612_v22 = vadd.s32 56, %v2173_v10 }
0x1d41   : > { %v1408_v24 = vsel %vm1384_vm5, %v1407_v23, %v1374_v54 }
0x1d42   : > { %v1439_v25 = vmul.f32 %v1415_v14, %v1408_v24  ;;  %vm256_vm8 = vcmp.eq.s32.totalorder %v2612_v22, %v2171_v9  ;;  %vm261_vm10 = vcmp.ge.s32.totalorder %v2612_v22, %v2171_v9  ;;  %vm325_vm12 = vcmp.eq.s32.totalorder %v2171_v9, %v2612_v22 }
0x1d43   : > { %vm262_vm11 = vmand %vm261_vm10, %vm140_vm1  ;;  %vm1520_vm1 = vcmp.eq.s32.totalorder %v2171_v9, 55  ;;  %vm1866_vm10 = vweird.f32 %v2225_v6 }
0x1d44   : > { %1440 = vadd.xlane.f32.xlu1 %v1439_v25 }
0x1da7   : > { %v1395_v26 = vpop.xlane.xlu1 %1394 }
0x1da8   : > { %v1396_v27 = vsel %vm1384_vm5, %v1395_v26, %v1362_v57  ;;  %v2049_v26 = vld [vmem:[%s2175_s20 + $0x38] sm:$0xff] }
0x1da9   : > { %v1427_v28 = vmul.f32 %v1415_v14, %v1396_v27 }
0x1dab   : > { %1428 = vadd.xlane.f32.xlu0 %v1427_v28 }
0x1daf   : > { %v1403_v29 = vpop.xlane.xlu1 %1402 }
0x1db0   : > { %v1404_v30 = vsel %vm1384_vm5, %v1403_v29, %v1370_v60 }
0x1db1   : > { %v1435_v31 = vmul.f32 %v1415_v14, %v1404_v30 }
0x1db3   : > { %1436 = vadd.xlane.f32.xlu0 %v1435_v31  ;;  %v1387_v32 = vpop.xlane.xlu1 %1386 }
0x1db4   : > { %v1388_v33 = vsel %vm1384_vm5, %v1387_v32, %v1354_v1 }
0x1db5   : > { %v1419_v34 = vmul.f32 %v1415_v14, %v1388_v33 }
0x1db7   : > { %1420 = vadd.xlane.f32.xlu0 %v1419_v34  ;;  %v1411_v35 = vpop.xlane.xlu1 %1410 }
0x1db8   : > { %v1412_v36 = vsel %vm1384_vm5, %v1411_v35, %v1378_v5  ;;  %vm1820_vm5 = vcmp.eq.s32.totalorder %v2171_v9, 63 }
0x1db9   : > { %v1443_v40 = vmul.f32 %v1415_v14, %v1412_v36 }
0x1dbb   : > { %1444 = vadd.xlane.f32.xlu0 %v1443_v40 }
0x1dc9   : > { %v1425_v44 = vpop.xlane.xlu1 %1424 }
0x1dca   : > { %v1426_v46 = vsel %vm1418_vm6, %v1425_v44, %v1392_v18 }
0x1dcb   : > { %v1457_v47 = vmul.f32 %v1449_v42, %v1426_v46 }
0x1dcd   : > { %1458 = vadd.xlane.f32.xlu0 %v1457_v47  ;;  %v1433_v48 = vpop.xlane.xlu1 %1432 }
0x1dce   : > { %v1434_v49 = vsel %vm1418_vm6, %v1433_v48, %v1400_v21 }
0x1dcf   : > { %v1465_v50 = vmul.f32 %v1449_v42, %v1434_v49 }
0x1dd1   : > { %1466 = vadd.xlane.f32.xlu0 %v1465_v50  ;;  %v1441_v38 = vpop.xlane.xlu1 %1440 }
0x1dd2   : > { %v1442_v52 = vsel %vm1418_vm6, %v1441_v38, %v1408_v24 }
0x1dd3   : > { %v1473_v54 = vmul.f32 %v1449_v42, %v1442_v52 }
0x1dd5   : > { %1474 = vadd.xlane.f32.xlu0 %v1473_v54 }
0x1e38   : > { %v1429_v55 = vpop.xlane.xlu0 %1428 }
0x1e39   : > { %v1430_v56 = vsel %vm1418_vm6, %v1429_v55, %v1396_v27  ;;  %v258_v27 = vsel %vm256_vm8, %v2049_v26, 0.0  ;;  %vm1884_vm8 = vweird.f32 %v2378_v37 }
0x1e3a   : > { %v1461_v57 = vmul.f32 %v1449_v42, %v1430_v56 }
0x1e3c   : > { %1462 = vadd.xlane.f32.xlu1 %v1461_v57  ;;  %v263_v57 = vsel %vm262_vm11, %v2049_v26, 0.0  ;;  %vm1878_vm11 = vweird.f32 %v2289_v0 }
0x1e40   : > { %v1437_v58 = vpop.xlane.xlu0 %1436 }
0x1e41   : > { %v1438_v59 = vsel %vm1418_vm6, %v1437_v58, %v1404_v30 }
0x1e42   : > { %v1469_v60 = vmul.f32 %v1449_v42, %v1438_v59 }
0x1e44   : > { %1470 = vadd.xlane.f32.xlu1 %v1469_v60  ;;  %v1421_v62 = vpop.xlane.xlu0 %1420 }
0x1e45   : > { %v1422_v63 = vsel %vm1418_vm6, %v1421_v62, %v1388_v33 }
0x1e46   : > { %v1453_v1 = vmul.f32 %v1449_v42, %v1422_v63 }
0x1e48   : > { %1454 = vadd.xlane.f32.xlu1 %v1453_v1  ;;  %v1445_v3 = vpop.xlane.xlu0 %1444 }
0x1e49   : > { %v1446_v4 = vsel %vm1418_vm6, %v1445_v3, %v1412_v36  ;;  %vm1860_vm6 = vweird.f32 %v2202_v51 }
0x1e4a   : > { %v1477_v5 = vmul.f32 %v1449_v42, %v1446_v4  ;;  %v1516_v42 = vld [vmem:[#allocation2 + $0x37] ss:$0 sm:$0xff] }
0x1e4b   : > { %v1517_v44 = vxor.u32 2147483648, %v1516_v42 }
0x1e4c   : > { %1478 = vadd.xlane.f32.xlu1 %v1477_v5 }
0x1e5a   : > { %v1459_v14 = vpop.xlane.xlu0 %1458 }
0x1e5b   : > { %v1460_v17 = vsel %vm1452_vm7, %v1459_v14, %v1426_v46 }
0x1e5c   : > { %v1491_v18 = vmul.f32 %v1483_v11, %v1460_v17 }
0x1e5e   : > { %1492 = vadd.xlane.f32.xlu1 %v1491_v18  ;;  %v1467_v19 = vpop.xlane.xlu0 %1466 }
0x1e5f   : > { %v1468_v20 = vsel %vm1452_vm7, %v1467_v19, %v1434_v49 }
0x1e60   : > { %v1499_v21 = vmul.f32 %v1483_v11, %v1468_v20 }
0x1e62   : > { %1500 = vadd.xlane.f32.xlu1 %v1499_v21  ;;  %v1475_v23 = vpop.xlane.xlu0 %1474 }
0x1e63   : > { %v1476_v24 = vsel %vm1452_vm7, %v1475_v23, %v1442_v52 }
0x1e64   : > { %v1507_v25 = vmul.f32 %v1483_v11, %v1476_v24 }
0x1e66   : > { %1508 = vadd.xlane.f32.xlu1 %v1507_v25 }
0x1e6a   : > { %259 = vadd.xlane.f32.xlu1 %v258_v27 }
0x1ec9   : > { %v1463_v28 = vpop.xlane.xlu1 %1462 }
0x1eca   : > { %v1464_v29 = vsel %vm1452_vm7, %v1463_v28, %v1430_v56 }
0x1ecb   : > { %v1495_v30 = vmul.f32 %v1483_v11, %v1464_v29 }
0x1ecd   : > { %1496 = vadd.xlane.f32.xlu0 %v1495_v30  ;;  %v326_v30 = vsel %vm325_vm12, -1.0, %v2131_v61  ;;  %vm1890_vm12 = vweird.f32 %v2505_v12 }
0x1ed1   : > { %v1471_v10 = vpop.xlane.xlu1 %1470 }
0x1ed2   : > { %v1472_v31 = vsel %vm1452_vm7, %v1471_v10, %v1438_v59 }
0x1ed3   : > { %v1503_v32 = vmul.f32 %v1483_v11, %v1472_v31 }
0x1ed5   : > { %1504 = vadd.xlane.f32.xlu0 %v1503_v32  ;;  %v1455_v33 = vpop.xlane.xlu1 %1454 }
0x1ed6   : > { %v1456_v34 = vsel %vm1452_vm7, %v1455_v33, %v1422_v63 }
0x1ed7   : > { %v1487_v35 = vmul.f32 %v1483_v11, %v1456_v34 }
0x1ed9   : > { %1488 = vadd.xlane.f32.xlu0 %v1487_v35  ;;  %v1479_v36 = vpop.xlane.xlu1 %1478 }
0x1eda   : > { %v1480_v40 = vsel %vm1452_vm7, %v1479_v36, %v1446_v4  ;;  %vm1872_vm7 = vweird.f32 %v2255_v43 }
0x1edb   : > { %v1511_v41 = vmul.f32 %v1483_v11, %v1480_v40 }
0x1edd   : > { %1512 = vadd.xlane.f32.xlu0 %v1511_v41 }
0x1eeb   : > { %v1493_v46 = vpop.xlane.xlu1 %1492 }
0x1eec   : > { %v1494_v47 = vsel %vm1486_vm9, %v1493_v46, %v1460_v17 }
0x1eed   : > { %v1525_v48 = vmul.f32 %v1517_v44, %v1494_v47 }
0x1eef   : > { %1526 = vadd.xlane.f32.xlu1 %v1525_v48  ;;  %v1501_v49 = vpop.xlane.xlu1 %1500 }
0x1ef0   : > { %v1502_v50 = vsel %vm1486_vm9, %v1501_v49, %v1468_v20 }
0x1ef1   : > { %v1533_v38 = vmul.f32 %v1517_v44, %v1502_v50 }
0x1ef3   : > { %1534 = vadd.xlane.f32.xlu1 %v1533_v38  ;;  %v1509_v52 = vpop.xlane.xlu1 %1508 }
0x1ef4   : > { %v1510_v54 = vsel %vm1486_vm9, %v1509_v52, %v1476_v24 }
0x1ef5   : > { %v1541_v55 = vmul.f32 %v1517_v44, %v1510_v54 }
0x1ef7   : > { %1542 = vadd.xlane.f32.xlu1 %v1541_v55  ;;  %v2634_v56 = vpop.xlane.xlu1 %259 }
0x1ef8   : > { %2104 = vrcp.f32 %v2634_v56 }
0x1f02   : > { %v2641_v58 = vpop.eup %2104 }
0x1f03   : > { %v265_v59 = vmul.f32 %v2641_v58, %v263_v57 }
0x1f05   : > { %266 = vst [vmem:[#allocation2 + $0x38] sm:$0xff] %v265_v59 }
0x1f0c   : > { %v1550_v19 = vld [vmem:[#allocation2 + $0x38] ss:$0 sm:$0xff] }
0x1f0d   : > { %v1551_v20 = vxor.u32 2147483648, %v1550_v19 }
0x1f5a   : > { %v1497_v60 = vpop.xlane.xlu0 %1496 }
0x1f5b   : > { %v1498_v62 = vsel %vm1486_vm9, %v1497_v60, %v1464_v29 }
0x1f5c   : > { %v1529_v63 = vmul.f32 %v1517_v44, %v1498_v62 }
0x1f5e   : > { %1530 = vadd.xlane.f32.xlu0 %v1529_v63 }
0x1f62   : > { %v1505_v1 = vpop.xlane.xlu0 %1504 }
0x1f63   : > { %v1506_v3 = vsel %vm1486_vm9, %v1505_v1, %v1472_v31  ;;  %v1583_v31 = vmul.f32 %v1551_v20, %v326_v30 }
0x1f64   : > { %v1537_v4 = vmul.f32 %v1517_v44, %v1506_v3 }
0x1f66   : > { %v1489_v5 = vpop.xlane.xlu0 %1488  ;;  %1538 = vadd.xlane.f32.xlu0 %v1537_v4 }
0x1f67   : > { %v1490_v7 = vsel %vm1486_vm9, %v1489_v5, %v1456_v34 }
0x1f68   : > { %v1521_v11 = vmul.f32 %v1517_v44, %v1490_v7 }
0x1f6a   : > { %1522 = vadd.xlane.f32.xlu0 %v1521_v11  ;;  %v1513_v14 = vpop.xlane.xlu0 %1512 }
0x1f6b   : > { %v1514_v17 = vsel %vm1486_vm9, %v1513_v14, %v1480_v40  ;;  %vm1896_vm9 = vweird.f32 %v2634_v56 }
0x1f6c   : > { %v1545_v18 = vmul.f32 %v1517_v44, %v1514_v17 }
0x1f6e   : > { %1546 = vadd.xlane.f32.xlu0 %v1545_v18 }
0x1f7c   : > { %v1527_v21 = vpop.xlane.xlu1 %1526 }
0x1f7d   : > { %v1528_v23 = vsel %vm1520_vm1, %v1527_v21, %v1494_v47  ;;  %v1588_v47 = vld [vmem:[#allocation2 + $0x39] ss:$0 sm:$0xff] }
0x1f7e   : > { %v1559_v24 = vmul.f32 %v1551_v20, %v1528_v23  ;;  %v1589_v48 = vxor.u32 2147483648, %v1588_v47 }
0x1f80   : > { %1560 = vadd.xlane.f32.xlu0 %v1559_v24  ;;  %v1535_v25 = vpop.xlane.xlu1 %1534  ;;  %v1626_v24 = vld [vmem:[#allocation2 + $0x3a] ss:$0 sm:$0xff] }
0x1f81   : > { %v1536_v26 = vsel %vm1520_vm1, %v1535_v25, %v1502_v50  ;;  %v1627_v25 = vxor.u32 2147483648, %v1626_v24 }
0x1f82   : > { %v1567_v27 = vmul.f32 %v1551_v20, %v1536_v26 }
0x1f84   : > { %1568 = vadd.xlane.f32.xlu0 %v1567_v27  ;;  %v1543_v28 = vpop.xlane.xlu1 %1542 }
0x1f85   : > { %v1544_v29 = vsel %vm1520_vm1, %v1543_v28, %v1510_v54 }
0x1f86   : > { %v1575_v10 = vmul.f32 %v1551_v20, %v1544_v29 }
0x1f88   : > { %1576 = vadd.xlane.f32.xlu0 %v1575_v10 }
0x1f8c   : > { %1584 = vadd.xlane.f32.xlu0 %v1583_v31 }
0x1feb   : > { %v1531_v32 = vpop.xlane.xlu0 %1530 }
0x1fec   : > { %v1532_v33 = vsel %vm1520_vm1, %v1531_v32, %v1498_v62 }
0x1fed   : > { %v1563_v34 = vmul.f32 %v1551_v20, %v1532_v33 }
0x1fef   : > { %1564 = vadd.xlane.f32.xlu1 %v1563_v34 }
0x1ff3   : > { %v1539_v35 = vpop.xlane.xlu0 %1538 }
0x1ff4   : > { %v1540_v22 = vsel %vm1520_vm1, %v1539_v35, %v1506_v3 }
0x1ff5   : > { %v1571_v36 = vmul.f32 %v1551_v20, %v1540_v22 }
0x1ff7   : > { %v1523_v40 = vpop.xlane.xlu0 %1522  ;;  %1572 = vadd.xlane.f32.xlu1 %v1571_v36 }
0x1ff8   : > { %v1524_v61 = vsel %vm1520_vm1, %v1523_v40, %v1490_v7 }
0x1ff9   : > { %v1555_v41 = vmul.f32 %v1551_v20, %v1524_v61 }
0x1ffb   : > { %v1547_v42 = vpop.xlane.xlu0 %1546  ;;  %1556 = vadd.xlane.f32.xlu1 %v1555_v41 }
0x1ffc   : > { %v1548_v44 = vsel %vm1520_vm1, %v1547_v42, %v1514_v17  ;;  %vm1855_vm1 = vweird.f32 %v2180_v13 }
0x1ffd   : > { %v1579_v46 = vmul.f32 %v1551_v20, %v1548_v44 }
0x1fff   : > { %1580 = vadd.xlane.f32.xlu1 %v1579_v46 }
0x200d   : > { %v1561_v49 = vpop.xlane.xlu0 %1560 }
0x200e   : > { %v1562_v50 = vsel %vm1554_vm13, %v1561_v49, %v1528_v23 }
0x200f   : > { %v1597_v38 = vmul.f32 %v1589_v48, %v1562_v50 }
0x2011   : > { %v1569_v52 = vpop.xlane.xlu0 %1568  ;;  %1598 = vadd.xlane.f32.xlu0 %v1597_v38 }
0x2012   : > { %v1570_v54 = vsel %vm1554_vm13, %v1569_v52, %v1536_v26  ;;  %v1664_v52 = vld [vmem:[#allocation2 + $0x3b] ss:$0 sm:$0xff] }
0x2013   : > { %v1605_v55 = vmul.f32 %v1589_v48, %v1570_v54 }
0x2015   : > { %1606 = vadd.xlane.f32.xlu0 %v1605_v55  ;;  %v1577_v57 = vpop.xlane.xlu0 %1576 }
0x2016   : > { %v1578_v59 = vsel %vm1554_vm13, %v1577_v57, %v1544_v29 }
0x2017   : > { %v1613_v60 = vmul.f32 %v1589_v48, %v1578_v59 }
0x2019   : > { %1614 = vadd.xlane.f32.xlu0 %v1613_v60  ;;  %v1585_v62 = vpop.xlane.xlu0 %1584 }
0x201a   : > { %v1586_v63 = vsel %vm1554_vm13, %v1585_v62, %v326_v30 }
0x201b   : > { %v1621_v1 = vmul.f32 %v1589_v48, %v1586_v63 }
0x201d   : > { %1622 = vadd.xlane.f32.xlu0 %v1621_v1 }
0x207c   : > { %v1565_v3 = vpop.xlane.xlu1 %1564 }
0x207d   : > { %v1566_v4 = vsel %vm1554_vm13, %v1565_v3, %v1532_v33 }
0x207e   : > { %v1601_v5 = vmul.f32 %v1589_v48, %v1566_v4 }
0x2080   : > { %1602 = vadd.xlane.f32.xlu1 %v1601_v5 }
0x2084   : > { %v1573_v7 = vpop.xlane.xlu1 %1572 }
0x2085   : > { %v1574_v11 = vsel %vm1554_vm13, %v1573_v7, %v1540_v22 }
0x2086   : > { %v1609_v14 = vmul.f32 %v1589_v48, %v1574_v11 }
0x2088   : > { %1610 = vadd.xlane.f32.xlu1 %v1609_v14  ;;  %v1557_v17 = vpop.xlane.xlu1 %1556 }
0x2089   : > { %v1558_v18 = vsel %vm1554_vm13, %v1557_v17, %v1524_v61 }
0x208a   : > { %v1593_v19 = vmul.f32 %v1589_v48, %v1558_v18 }
0x208c   : > { %1594 = vadd.xlane.f32.xlu1 %v1593_v19  ;;  %v1581_v20 = vpop.xlane.xlu1 %1580 }
0x208d   : > { %v1582_v21 = vsel %vm1554_vm13, %v1581_v20, %v1548_v44 }
0x208e   : > { %v1617_v23 = vmul.f32 %v1589_v48, %v1582_v21 }
0x2090   : > { %1618 = vadd.xlane.f32.xlu1 %v1617_v23 }
0x209e   : > { %v1599_v26 = vpop.xlane.xlu0 %1598 }
0x209f   : > { %v1600_v27 = vsel %vm1592_vm14, %v1599_v26, %v1562_v50 }
0x20a0   : > { %v1635_v28 = vmul.f32 %v1627_v25, %v1600_v27 }
0x20a2   : > { %1636 = vadd.xlane.f32.xlu0 %v1635_v28  ;;  %v1607_v29 = vpop.xlane.xlu0 %1606 }
0x20a3   : > { %v1608_v30 = vsel %vm1592_vm14, %v1607_v29, %v1570_v54  ;;  %v1665_v54 = vxor.u32 2147483648, %v1664_v52  ;;  %v1702_v29 = vld [vmem:[#allocation2 + $0x3c] ss:$0 sm:$0xff] }
0x20a4   : > { %v1643_v10 = vmul.f32 %v1627_v25, %v1608_v30 }
0x20a6   : > { %1644 = vadd.xlane.f32.xlu0 %v1643_v10  ;;  %v1615_v31 = vpop.xlane.xlu0 %1614 }
0x20a7   : > { %v1616_v32 = vsel %vm1592_vm14, %v1615_v31, %v1578_v59 }
0x20a8   : > { %v1651_v33 = vmul.f32 %v1627_v25, %v1616_v32 }
0x20aa   : > { %1652 = vadd.xlane.f32.xlu0 %v1651_v33  ;;  %v1623_v34 = vpop.xlane.xlu0 %1622 }
0x20ab   : > { %v1624_v35 = vsel %vm1592_vm14, %v1623_v34, %v1586_v63 }
0x20ac   : > { %v1659_v22 = vmul.f32 %v1627_v25, %v1624_v35 }
0x20ae   : > { %1660 = vadd.xlane.f32.xlu0 %v1659_v22 }
0x210d   : > { %v1603_v36 = vpop.xlane.xlu1 %1602 }
0x210e   : > { %v1604_v40 = vsel %vm1592_vm14, %v1603_v36, %v1566_v4 }
0x210f   : > { %v1639_v61 = vmul.f32 %v1627_v25, %v1604_v40 }
0x2111   : > { %1640 = vadd.xlane.f32.xlu1 %v1639_v61 }
0x2115   : > { %v1611_v41 = vpop.xlane.xlu1 %1610 }
0x2116   : > { %v1612_v42 = vsel %vm1592_vm14, %v1611_v41, %v1574_v11 }
0x2117   : > { %v1647_v44 = vmul.f32 %v1627_v25, %v1612_v42 }
0x2119   : > { %1648 = vadd.xlane.f32.xlu1 %v1647_v44  ;;  %v1595_v46 = vpop.xlane.xlu1 %1594 }
0x211a   : > { %v1596_v47 = vsel %vm1592_vm14, %v1595_v46, %v1558_v18 }
0x211b   : > { %v1631_v48 = vmul.f32 %v1627_v25, %v1596_v47 }
0x211d   : > { %1632 = vadd.xlane.f32.xlu1 %v1631_v48  ;;  %v1619_v49 = vpop.xlane.xlu1 %1618 }
0x211e   : > { %v1620_v50 = vsel %vm1592_vm14, %v1619_v49, %v1582_v21 }
0x211f   : > { %v1655_v38 = vmul.f32 %v1627_v25, %v1620_v50 }
0x2121   : > { %1656 = vadd.xlane.f32.xlu1 %v1655_v38 }
0x212f   : > { %v1637_v55 = vpop.xlane.xlu0 %1636 }
0x2130   : > { %v1638_v57 = vsel %vm1630_vm15, %v1637_v55, %v1600_v27 }
0x2131   : > { %v1673_v59 = vmul.f32 %v1665_v54, %v1638_v57 }
0x2133   : > { %1674 = vadd.xlane.f32.xlu0 %v1673_v59  ;;  %v1645_v60 = vpop.xlane.xlu0 %1644 }
0x2134   : > { %v1646_v62 = vsel %vm1630_vm15, %v1645_v60, %v1608_v30  ;;  %v1703_v30 = vxor.u32 2147483648, %v1702_v29  ;;  %v1740_v60 = vld [vmem:[#allocation2 + $0x3d] ss:$0 sm:$0xff] }
0x2135   : > { %v1681_v63 = vmul.f32 %v1665_v54, %v1646_v62 }
0x2137   : > { %1682 = vadd.xlane.f32.xlu0 %v1681_v63  ;;  %v1653_v1 = vpop.xlane.xlu0 %1652 }
0x2138   : > { %v1654_v3 = vsel %vm1630_vm15, %v1653_v1, %v1616_v32 }
0x2139   : > { %v1689_v4 = vmul.f32 %v1665_v54, %v1654_v3 }
0x213b   : > { %1690 = vadd.xlane.f32.xlu0 %v1689_v4  ;;  %v1661_v5 = vpop.xlane.xlu0 %1660 }
0x213c   : > { %v1662_v7 = vsel %vm1630_vm15, %v1661_v5, %v1624_v35 }
0x213d   : > { %v1697_v11 = vmul.f32 %v1665_v54, %v1662_v7 }
0x213f   : > { %1698 = vadd.xlane.f32.xlu0 %v1697_v11 }
0x219e   : > { %v1641_v14 = vpop.xlane.xlu1 %1640 }
0x219f   : > { %v1642_v17 = vsel %vm1630_vm15, %v1641_v14, %v1604_v40 }
0x21a0   : > { %v1677_v18 = vmul.f32 %v1665_v54, %v1642_v17 }
0x21a2   : > { %1678 = vadd.xlane.f32.xlu1 %v1677_v18 }
0x21a6   : > { %v1649_v19 = vpop.xlane.xlu1 %1648 }
0x21a7   : > { %v1650_v20 = vsel %vm1630_vm15, %v1649_v19, %v1612_v42 }
0x21a8   : > { %v1685_v21 = vmul.f32 %v1665_v54, %v1650_v20 }
0x21aa   : > { %1686 = vadd.xlane.f32.xlu1 %v1685_v21  ;;  %v1633_v23 = vpop.xlane.xlu1 %1632 }
0x21ab   : > { %v1634_v24 = vsel %vm1630_vm15, %v1633_v23, %v1596_v47 }
0x21ac   : > { %v1669_v25 = vmul.f32 %v1665_v54, %v1634_v24 }
0x21ae   : > { %1670 = vadd.xlane.f32.xlu1 %v1669_v25  ;;  %v1657_v26 = vpop.xlane.xlu1 %1656 }
0x21af   : > { %v1658_v27 = vsel %vm1630_vm15, %v1657_v26, %v1620_v50 }
0x21b0   : > { %v1693_v28 = vmul.f32 %v1665_v54, %v1658_v27 }
0x21b2   : > { %1694 = vadd.xlane.f32.xlu1 %v1693_v28 }
0x21c0   : > { %v1675_v10 = vpop.xlane.xlu0 %1674 }
0x21c1   : > { %v1676_v31 = vsel %vm1668_vm0, %v1675_v10, %v1638_v57 }
0x21c2   : > { %v1711_v32 = vmul.f32 %v1703_v30, %v1676_v31 }
0x21c4   : > { %1712 = vadd.xlane.f32.xlu0 %v1711_v32  ;;  %v1683_v33 = vpop.xlane.xlu0 %1682 }
0x21c5   : > { %v1684_v34 = vsel %vm1668_vm0, %v1683_v33, %v1646_v62  ;;  %v1741_v62 = vxor.u32 2147483648, %v1740_v60  ;;  %v1778_v33 = vld [vmem:[#allocation2 + $0x3e] ss:$0 sm:$0xff] }
0x21c6   : > { %v1719_v35 = vmul.f32 %v1703_v30, %v1684_v34 }
0x21c8   : > { %1720 = vadd.xlane.f32.xlu0 %v1719_v35  ;;  %v1691_v22 = vpop.xlane.xlu0 %1690 }
0x21c9   : > { %v1692_v36 = vsel %vm1668_vm0, %v1691_v22, %v1654_v3 }
0x21ca   : > { %v1727_v40 = vmul.f32 %v1703_v30, %v1692_v36 }
0x21cc   : > { %1728 = vadd.xlane.f32.xlu0 %v1727_v40  ;;  %v1699_v61 = vpop.xlane.xlu0 %1698 }
0x21cd   : > { %v1700_v41 = vsel %vm1668_vm0, %v1699_v61, %v1662_v7 }
0x21ce   : > { %v1735_v42 = vmul.f32 %v1703_v30, %v1700_v41 }
0x21d0   : > { %1736 = vadd.xlane.f32.xlu0 %v1735_v42 }
0x222f   : > { %v1679_v44 = vpop.xlane.xlu1 %1678 }
0x2230   : > { %v1680_v46 = vsel %vm1668_vm0, %v1679_v44, %v1642_v17 }
0x2231   : > { %v1715_v47 = vmul.f32 %v1703_v30, %v1680_v46 }
0x2233   : > { %1716 = vadd.xlane.f32.xlu1 %v1715_v47 }
0x2237   : > { %v1687_v48 = vpop.xlane.xlu1 %1686 }
0x2238   : > { %v1688_v49 = vsel %vm1668_vm0, %v1687_v48, %v1650_v20 }
0x2239   : > { %v1723_v50 = vmul.f32 %v1703_v30, %v1688_v49 }
0x223b   : > { %1724 = vadd.xlane.f32.xlu1 %v1723_v50  ;;  %v1671_v38 = vpop.xlane.xlu1 %1670 }
0x223c   : > { %v1672_v52 = vsel %vm1668_vm0, %v1671_v38, %v1634_v24 }
0x223d   : > { %v1707_v54 = vmul.f32 %v1703_v30, %v1672_v52 }
0x223f   : > { %1708 = vadd.xlane.f32.xlu1 %v1707_v54  ;;  %v1695_v55 = vpop.xlane.xlu1 %1694 }
0x2240   : > { %v1696_v57 = vsel %vm1668_vm0, %v1695_v55, %v1658_v27 }
0x2241   : > { %v1731_v59 = vmul.f32 %v1703_v30, %v1696_v57 }
0x2243   : > { %1732 = vadd.xlane.f32.xlu1 %v1731_v59 }
0x2251   : > { %v1713_v63 = vpop.xlane.xlu0 %1712 }
0x2252   : > { %v1714_v1 = vsel %vm1706_vm2, %v1713_v63, %v1676_v31 }
0x2253   : > { %v1749_v3 = vmul.f32 %v1741_v62, %v1714_v1 }
0x2255   : > { %1750 = vadd.xlane.f32.xlu0 %v1749_v3  ;;  %v1721_v4 = vpop.xlane.xlu0 %1720 }
0x2256   : > { %v1722_v5 = vsel %vm1706_vm2, %v1721_v4, %v1684_v34  ;;  %v1779_v34 = vxor.u32 2147483648, %v1778_v33  ;;  %v1816_v4 = vld [vmem:[#allocation2 + $0x3f] ss:$0 sm:$0xff] }
0x2257   : > { %v1757_v7 = vmul.f32 %v1741_v62, %v1722_v5 }
0x2259   : > { %1758 = vadd.xlane.f32.xlu0 %v1757_v7  ;;  %v1729_v11 = vpop.xlane.xlu0 %1728 }
0x225a   : > { %v1730_v14 = vsel %vm1706_vm2, %v1729_v11, %v1692_v36 }
0x225b   : > { %v1765_v17 = vmul.f32 %v1741_v62, %v1730_v14 }
0x225d   : > { %1766 = vadd.xlane.f32.xlu0 %v1765_v17  ;;  %v1737_v18 = vpop.xlane.xlu0 %1736 }
0x225e   : > { %v1738_v19 = vsel %vm1706_vm2, %v1737_v18, %v1700_v41 }
0x225f   : > { %v1773_v20 = vmul.f32 %v1741_v62, %v1738_v19 }
0x2261   : > { %1774 = vadd.xlane.f32.xlu0 %v1773_v20 }
0x22c0   : > { %v1717_v21 = vpop.xlane.xlu1 %1716 }
0x22c1   : > { %v1718_v23 = vsel %vm1706_vm2, %v1717_v21, %v1680_v46 }
0x22c2   : > { %v1753_v24 = vmul.f32 %v1741_v62, %v1718_v23 }
0x22c4   : > { %1754 = vadd.xlane.f32.xlu1 %v1753_v24 }
0x22c8   : > { %v1725_v25 = vpop.xlane.xlu1 %1724 }
0x22c9   : > { %v1726_v26 = vsel %vm1706_vm2, %v1725_v25, %v1688_v49 }
0x22ca   : > { %v1761_v27 = vmul.f32 %v1741_v62, %v1726_v26 }
0x22cc   : > { %1762 = vadd.xlane.f32.xlu1 %v1761_v27  ;;  %v1709_v28 = vpop.xlane.xlu1 %1708 }
0x22cd   : > { %v1710_v29 = vsel %vm1706_vm2, %v1709_v28, %v1672_v52 }
0x22ce   : > { %v1745_v30 = vmul.f32 %v1741_v62, %v1710_v29 }
0x22d0   : > { %1746 = vadd.xlane.f32.xlu1 %v1745_v30  ;;  %v1733_v10 = vpop.xlane.xlu1 %1732 }
0x22d1   : > { %v1734_v31 = vsel %vm1706_vm2, %v1733_v10, %v1696_v57 }
0x22d2   : > { %v1769_v32 = vmul.f32 %v1741_v62, %v1734_v31 }
0x22d4   : > { %1770 = vadd.xlane.f32.xlu1 %v1769_v32 }
0x22e2   : > { %v1751_v35 = vpop.xlane.xlu0 %1750 }
0x22e3   : > { %v1752_v22 = vsel %vm1744_vm3, %v1751_v35, %v1714_v1 }
0x22e4   : > { %v1787_v36 = vmul.f32 %v1779_v34, %v1752_v22 }
0x22e6   : > { %1788 = vadd.xlane.f32.xlu0 %v1787_v36  ;;  %v1759_v40 = vpop.xlane.xlu0 %1758 }
0x22e7   : > { %v1760_v61 = vsel %vm1744_vm3, %v1759_v40, %v1722_v5  ;;  %v1817_v5 = vxor.u32 2147483648, %v1816_v4 }
0x22e8   : > { %v1795_v41 = vmul.f32 %v1779_v34, %v1760_v61 }
0x22ea   : > { %1796 = vadd.xlane.f32.xlu0 %v1795_v41  ;;  %v1767_v42 = vpop.xlane.xlu0 %1766 }
0x22eb   : > { %v1768_v44 = vsel %vm1744_vm3, %v1767_v42, %v1730_v14 }
0x22ec   : > { %v1803_v46 = vmul.f32 %v1779_v34, %v1768_v44 }
0x22ee   : > { %1804 = vadd.xlane.f32.xlu0 %v1803_v46  ;;  %v1775_v47 = vpop.xlane.xlu0 %1774 }
0x22ef   : > { %v1776_v48 = vsel %vm1744_vm3, %v1775_v47, %v1738_v19 }
0x22f0   : > { %v1811_v49 = vmul.f32 %v1779_v34, %v1776_v48 }
0x22f2   : > { %1812 = vadd.xlane.f32.xlu0 %v1811_v49 }
0x2351   : > { %v1755_v50 = vpop.xlane.xlu1 %1754 }
0x2352   : > { %v1756_v38 = vsel %vm1744_vm3, %v1755_v50, %v1718_v23 }
0x2353   : > { %v1791_v52 = vmul.f32 %v1779_v34, %v1756_v38 }
0x2355   : > { %1792 = vadd.xlane.f32.xlu1 %v1791_v52 }
0x2359   : > { %v1763_v54 = vpop.xlane.xlu1 %1762 }
0x235a   : > { %v1764_v55 = vsel %vm1744_vm3, %v1763_v54, %v1726_v26 }
0x235b   : > { %v1799_v57 = vmul.f32 %v1779_v34, %v1764_v55 }
0x235d   : > { %1800 = vadd.xlane.f32.xlu1 %v1799_v57  ;;  %v1747_v59 = vpop.xlane.xlu1 %1746 }
0x235e   : > { %v1748_v60 = vsel %vm1744_vm3, %v1747_v59, %v1710_v29 }
0x235f   : > { %v1783_v62 = vmul.f32 %v1779_v34, %v1748_v60 }
0x2361   : > { %1784 = vadd.xlane.f32.xlu1 %v1783_v62  ;;  %v1771_v63 = vpop.xlane.xlu1 %1770 }
0x2362   : > { %v1772_v1 = vsel %vm1744_vm3, %v1771_v63, %v1734_v31 }
0x2363   : > { %v1807_v3 = vmul.f32 %v1779_v34, %v1772_v1 }
0x2365   : > { %1808 = vadd.xlane.f32.xlu1 %v1807_v3 }
0x2373   : > { %v1789_v7 = vpop.xlane.xlu0 %1788 }
0x2374   : > { %v1790_v11 = vsel %vm1782_vm4, %v1789_v7, %v1752_v22 }
0x2375   : > { %v1825_v14 = vmul.f32 %v1817_v5, %v1790_v11 }
0x2377   : > { %1826 = vadd.xlane.f32.xlu0 %v1825_v14  ;;  %v1797_v17 = vpop.xlane.xlu0 %1796 }
0x2378   : > { %v1798_v18 = vsel %vm1782_vm4, %v1797_v17, %v1760_v61 }
0x2379   : > { %v1833_v19 = vmul.f32 %v1817_v5, %v1798_v18 }
0x237b   : > { %1834 = vadd.xlane.f32.xlu0 %v1833_v19  ;;  %v1805_v20 = vpop.xlane.xlu0 %1804 }
0x237c   : > { %v1806_v21 = vsel %vm1782_vm4, %v1805_v20, %v1768_v44 }
0x237d   : > { %v1841_v23 = vmul.f32 %v1817_v5, %v1806_v21 }
0x237f   : > { %1842 = vadd.xlane.f32.xlu0 %v1841_v23  ;;  %v1813_v24 = vpop.xlane.xlu0 %1812 }
0x2380   : > { %v1814_v25 = vsel %vm1782_vm4, %v1813_v24, %v1776_v48 }
0x2381   : > { %v1849_v26 = vmul.f32 %v1817_v5, %v1814_v25 }
0x2383   : > { %1850 = vadd.xlane.f32.xlu0 %v1849_v26 }
0x23e2   : > { %v1793_v27 = vpop.xlane.xlu1 %1792 }
0x23e3   : > { %v1794_v28 = vsel %vm1782_vm4, %v1793_v27, %v1756_v38 }
0x23e4   : > { %v1829_v29 = vmul.f32 %v1817_v5, %v1794_v28 }
0x23e6   : > { %1830 = vadd.xlane.f32.xlu1 %v1829_v29 }
0x23ea   : > { %v1801_v30 = vpop.xlane.xlu1 %1800 }
0x23eb   : > { %v1802_v10 = vsel %vm1782_vm4, %v1801_v30, %v1764_v55 }
0x23ec   : > { %v1837_v31 = vmul.f32 %v1817_v5, %v1802_v10 }
0x23ee   : > { %1838 = vadd.xlane.f32.xlu1 %v1837_v31  ;;  %v1785_v32 = vpop.xlane.xlu1 %1784 }
0x23ef   : > { %v1786_v33 = vsel %vm1782_vm4, %v1785_v32, %v1748_v60 }
0x23f0   : > { %v1821_v34 = vmul.f32 %v1817_v5, %v1786_v33 }
0x23f2   : > { %1822 = vadd.xlane.f32.xlu1 %v1821_v34  ;;  %v1809_v35 = vpop.xlane.xlu1 %1808 }
0x23f3   : > { %v1810_v22 = vsel %vm1782_vm4, %v1809_v35, %v1772_v1 }
0x23f4   : > { %v1845_v36 = vmul.f32 %v1817_v5, %v1810_v22 }
0x23f6   : > { %1846 = vadd.xlane.f32.xlu1 %v1845_v36 }
0x2404   : > { %v1827_v40 = vpop.xlane.xlu0 %1826 }
0x2405   : > { %v1828_v61 = vsel %vm1820_vm5, %v1827_v40, %v1790_v11 }
0x2406   : > { %v1859_v41 = vmul.f32 %v2208_v53, %v1828_v61 }
0x2408   : > { %v1861_v42 = vsel %vm1860_vm6, %v1828_v61, %v1859_v41  ;;  %v1835_v44 = vpop.xlane.xlu0 %1834 }
0x2409   : > { %1955 = vst [vmem:[%s2796_s24 + $0x8] sm:$0xff] %v1861_v42  ;;  %v1836_v46 = vsel %vm1820_vm5, %v1835_v44, %v1798_v18 }
0x240a   : > { %v1871_v47 = vmul.f32 %v2261_v45, %v1836_v46 }
0x240c   : > { %v1873_v48 = vsel %vm1872_vm7, %v1836_v46, %v1871_v47  ;;  %v1843_v49 = vpop.xlane.xlu0 %1842 }
0x240d   : > { %1959 = vst [vmem:[%s2796_s24 + $0x18] sm:$0xff] %v1873_v48  ;;  %v1844_v53 = vsel %vm1820_vm5, %v1843_v49, %v1806_v21 }
0x240e   : > { %v1883_v51 = vmul.f32 %v2385_v39, %v1844_v53 }
0x2410   : > { %v1885_v50 = vsel %vm1884_vm8, %v1844_v53, %v1883_v51  ;;  %v1851_v38 = vpop.xlane.xlu0 %1850 }
0x2411   : > { %1963 = vst [vmem:[%s2796_s24 + $0x28] sm:$0xff] %v1885_v50  ;;  %v1852_v52 = vsel %vm1820_vm5, %v1851_v38, %v1814_v25 }
0x2412   : > { %v1895_v45 = vmul.f32 %v2641_v58, %v1852_v52 }
0x2414   : > { %v1897_v43 = vsel %vm1896_vm9, %v1852_v52, %v1895_v45 }
0x2415   : > { %1967 = vst [vmem:[%s2796_s24 + $0x38] sm:$0xff] %v1897_v43 }
0x2473   : > { %v1831_v54 = vpop.xlane.xlu1 %1830 }
0x2474   : > { %v1832_v55 = vsel %vm1820_vm5, %v1831_v54, %v1794_v28 }
0x2475   : > { %v1865_v39 = vmul.f32 %v2231_v8, %v1832_v55 }
0x2477   : > { %v1867_v37 = vsel %vm1866_vm10, %v1832_v55, %v1865_v39 }
0x2478   : > { %1957 = vst [vmem:[%s2796_s24 + $0x10] sm:$0xff] %v1867_v37 }
0x247b   : > { %v1839_v57 = vpop.xlane.xlu1 %1838 }
0x247c   : > { %v1840_v58 = vsel %vm1820_vm5, %v1839_v57, %v1802_v10 }
0x247d   : > { %v1877_v56 = vmul.f32 %v2295_v2, %v1840_v58 }
0x247f   : > { %v1879_v59 = vsel %vm1878_vm11, %v1840_v58, %v1877_v56  ;;  %v1823_v60 = vpop.xlane.xlu1 %1822 }
0x2480   : > { %1961 = vst [vmem:[%s2796_s24 + $0x20] sm:$0xff] %v1879_v59  ;;  %v1824_v8 = vsel %vm1820_vm5, %v1823_v60, %v1786_v33 }
0x2481   : > { %v1854_v62 = vmul.f32 %v2188_v15, %v1824_v8 }
0x2483   : > { %v1856_v6 = vsel %vm1855_vm1, %v1824_v8, %v1854_v62  ;;  %v1847_v63 = vpop.xlane.xlu1 %1846 }
0x2484   : > { %1953 = vst [vmem:[%s2796_s24] sm:$0xff] %v1856_v6  ;;  %v1848_v1 = vsel %vm1820_vm5, %v1847_v63, %v1810_v22 }
0x2485   : > { %v1889_v2 = vmul.f32 %v2512_v16, %v1848_v1 }
0x2487   : > { %v1891_v0 = vsel %vm1890_vm12, %v1848_v1, %v1889_v2 }
0x2488   : > { %1965 = vst [vmem:[%s2796_s24 + $0x30] sm:$0xff] %v1891_v0 }
0x2489 PF: > { %s7_s8 = sadd.s32 1, %s2128_s8   ;;  %s2847_s6 = smov %s2124_s7 }
0x248a   : > { %p4_p5 = scmp.ge.s32.totalorder %s7_s8, 4   ;;  %s2848_s7 = smov %s2850_s10 }
0x248c   :  { %6 = sbr.rel (!%p4_p5) target bundleno = 2 (0x2), region = 202 }

// kernel: loss_my.1
= control target key start
LH: loop header
LB: loop body
LE: loop exit
PB: predicated region body
PF: predicated region fallthrough
CT: control target
= control target key end

     0   :  { %11 = vsyncpa [#allocation3], 0  ;;  %s6359_s0 = inlined_call_operand.hbm [shape: f32[2,2,8,8], index: 0, kind: input, shape index: {}]   ;;  %s6360_s1 = inlined_call_operand.hbm [shape: f32[2,2,8,32], index: 1, kind: input, shape index: {}]   ;;  %s6361_s2 = inlined_call_operand.hbm [shape: f32[2,2,8,8], index: 2, kind: input, shape index: {}]   ;;  %s6362_s3 = inlined_call_operand.hbm [shape: f32[2,2,8,32], index: 3, kind: input, shape index: {}]   ;;  %s6363_s4 = inlined_call_operand.vmem [shape: f32[2,32,128], index: 4, kind: output, shape index: {0}]   ;;  %s6364_s5 = inlined_call_operand.hbm [shape: f32[1], index: 5, kind: output, shape index: {1}]  }
   0x1   :  { %12 = vsyncpa [#allocation6], 0 }
   0x2   :  { %13 = vsyncpa [#allocation9], 0 }
   0x3   :  { %14 = vsyncpa [#allocation4], 0  ;;  %s5721_s18 = smov [#allocation5]   ;;  %s5722_s20 = smov [#allocation2]  }
   0x4   :  { %s32_s19 = sshll.u32 %s5721_s18, 4  ;;  %s20_s21 = sshll.u32 %s5722_s20, 4  ;;  %s33_s19 = int_to_ptr.vmem [resolvable:$true] %s32_s19  ;;  %s5764_s21 = int_to_ptr.vmem [resolvable:$true] %s20_s21 }
   0x5   :  { %s5615_s24 = scalar_lea.hbm %s6360_s1, 512 }
   0x6   :  { %p5616_p0 = scmp.ne.s32.totalorder %s6360_s1, %s5615_s24  ;;  %p5619_p1 = scmp.lt.u32.totalorder %s5615_s24, %s6360_s1 }
   0x8   :  { %p5621_p2 = pnand %p5619_p1, %p5616_p0 }
   0xa   :  { %5624 = shalt.err (!%p5621_p2)
}
   0xb   :  { %s5625_s29 = scalar_lea.vmem %s33_s19, 512  ;;  %p5630_p4 = scmp.lt.s32.totalorder %s33_s19, %s33_s19 }
   0xc   :  { %p5626_p3 = scmp.ne.s32.totalorder %s33_s19, %s5625_s29  ;;  %p5631_p5 = scmp.lt.s32.totalorder %s5625_s29, %s5625_s29 }
   0xe   :  { %p5632_p6 = por %p5631_p5, %p5630_p4 }
  0x10   :  { %p5633_p7 = pnand %p5632_p6, %p5626_p3 }
  0x12   :  { %5636 = shalt.err (!%p5633_p7)
}
  0x13   :  { %s5723_s30 = smov 128   ;;  %s5724_s6 = smov 8  }
  0x14   :  { %38 = dma.hbm_to_vmem [thread:$0]  %s6360_s1, 512, %s33_s19, [#allocation6], %s5723_s30, %s5723_s30, %s5724_s6  }
  0x15   :  { %s5637_s11 = scalar_lea.hbm %s6359_s0, 512 }
  0x16   :  { %p5638_p8 = scmp.ne.s32.totalorder %s6359_s0, %s5637_s11  ;;  %p5641_p9 = scmp.lt.u32.totalorder %s5637_s11, %s6359_s0 }
  0x18   :  { %p5643_p10 = pnand %p5641_p9, %p5638_p8 }
  0x1a   :  { %5646 = shalt.err (!%p5643_p10)
}
  0x1b   :  { %s5647_s16 = scalar_lea.vmem %s5764_s21, 512  ;;  %p5652_p12 = scmp.lt.s32.totalorder %s5764_s21, %s5764_s21 }
  0x1c   :  { %p5648_p11 = scmp.ne.s32.totalorder %s5764_s21, %s5647_s16  ;;  %p5653_p13 = scmp.lt.s32.totalorder %s5647_s16, %s5647_s16 }
  0x1e   :  { %p5654_p0 = por %p5653_p13, %p5652_p12 }
  0x20   :  { %p5655_p1 = pnand %p5654_p0, %p5648_p11 }
  0x22   :  { %5658 = shalt.err (!%p5655_p1)
}
  0x23   :  { %26 = dma.hbm_to_vmem [thread:$0]  %s6359_s0, 512, %s5764_s21, [#allocation3], %s5723_s30, %s5723_s30, %s5724_s6  }
  0x24   :  { %s5725_s18 = smov [#allocation7]   ;;  %s5726_s20 = smov [#allocation8]  }
  0x25   :  { %s44_s19 = sshll.u32 %s5725_s18, 4  ;;  %s56_s22 = sshll.u32 %s5726_s20, 4  ;;  %s45_s19 = int_to_ptr.vmem [resolvable:$true] %s44_s19  ;;  %s5801_s22 = int_to_ptr.vmem [resolvable:$true] %s56_s22 }
  0x26   :  { %s5659_s25 = scalar_lea.hbm %s6361_s2, 512 }
  0x27   :  { %p5660_p2 = scmp.ne.s32.totalorder %s6361_s2, %s5659_s25  ;;  %p5663_p3 = scmp.lt.u32.totalorder %s5659_s25, %s6361_s2 }
  0x29   :  { %p5665_p4 = pnand %p5663_p3, %p5660_p2 }
  0x2b   :  { %5668 = shalt.err (!%p5665_p4)
}
  0x2c   :  { %s5669_s0 = scalar_lea.vmem %s45_s19, 512  ;;  %p5674_p6 = scmp.lt.s32.totalorder %s45_s19, %s45_s19 }
  0x2d   :  { %p5670_p5 = scmp.ne.s32.totalorder %s45_s19, %s5669_s0  ;;  %p5675_p7 = scmp.lt.s32.totalorder %s5669_s0, %s5669_s0 }
  0x2f   :  { %p5676_p8 = por %p5675_p7, %p5674_p6 }
  0x31   :  { %p5677_p9 = pnand %p5676_p8, %p5670_p5 }
  0x33   :  { %5680 = shalt.err (!%p5677_p9)
}
  0x34   :  { %50 = dma.hbm_to_vmem [thread:$0]  %s6361_s2, 512, %s45_s19, [#allocation6], %s5723_s30, %s5723_s30, %s5724_s6  }
  0x35   :  { %s5681_s10 = scalar_lea.hbm %s6362_s3, 512 }
  0x36   :  { %p5682_p10 = scmp.ne.s32.totalorder %s6362_s3, %s5681_s10  ;;  %p5685_p11 = scmp.lt.u32.totalorder %s5681_s10, %s6362_s3 }
  0x38   :  { %p5687_p12 = pnand %p5685_p11, %p5682_p10 }
  0x3a   :  { %5690 = shalt.err (!%p5687_p12)
}
  0x3b   :  { %s5691_s15 = scalar_lea.vmem %s5801_s22, 512  ;;  %p5696_p0 = scmp.lt.s32.totalorder %s5801_s22, %s5801_s22 }
  0x3c   :  { %p5692_p13 = scmp.ne.s32.totalorder %s5801_s22, %s5691_s15  ;;  %p5697_p1 = scmp.lt.s32.totalorder %s5691_s15, %s5691_s15 }
  0x3e   :  { %p5698_p2 = por %p5697_p1, %p5696_p0 }
  0x40   :  { %p5699_p3 = pnand %p5698_p2, %p5692_p13 }
  0x42   :  { %5702 = shalt.err (!%p5699_p3)
}
  0x43   :  { %62 = dma.hbm_to_vmem [thread:$0]  %s6362_s3, 512, %s5801_s22, [#allocation9], %s5723_s30, %s5723_s30, %s5724_s6  }
  0x44   :  { %5713 = dma.done.wait [#allocation3], 512  }
  0x45   :  { %5714 = vsyncadd [#allocation3], 4294966784 }
  0x46   :  { %5715 = dma.done.wait [#allocation6], 1024  }
  0x47   :  { %5716 = vsyncadd [#allocation6], 4294966272 }
  0x48   :  { %5717 = dma.done.wait [#allocation9], 512  }
  0x49   :  { %5718 = vsyncadd [#allocation9], 4294966784  ;;  %v5727_v0 = vmov 0.0|0.0   ;;  %vm5728_vm0 = vmmov 0   ;;  %v5729_v1 = vmov 0.0   ;;  %v5841_v2 = vld [vmem:[#allocation5] sm:$0xff] }
  0x4a   :  { %5312 = vmatprep.subr.bf16.mxu0 %v5727_v0  ;;  %4908 = vmatprep.mubr.msk.f32.mxu0 %vm5728_vm0, %v5729_v1  ;;  %v78_v3 = vld [vmem:[#allocation2 + $0x8] sm:$0xff]  ;;  %s5730_s1 = smov 32   ;;  %v5851_v6 = vld [vmem:[#allocation8] sm:$0xff]  ;;  %vm104_vm1 = vcmask 261120   ;;  %vm88_vm2 = vcmask 64512   ;;  %vm161_vm3 = vcmask 130048  }
  0x4b   :  { %111 = vrot.lane.b32.xlu1 %v5841_v2, %s5730_s1  ;;  %82 = vrot.lane.b32.xlu0 %v78_v3, %s5724_s6  ;;  %v5846_v4 = vld [vmem:[#allocation5 + $0x8] sm:$0xff]  ;;  %v75_v9 = vld [vmem:[#allocation2] sm:$0xff]  ;;  %s5731_s3 = smov 96   ;;  %s5732_s30 = smov 64   ;;  %vm2386_vm4 = vcmask 523264  }
  0x4c   :  { %v122_v5 = vld [vmem:[#allocation7 + $0x8] sm:$0xff]  ;;  %v107_v8 = vsub.f32 0.0, %v5846_v4  ;;  %v119_v39 = vld [vmem:[#allocation7] sm:$0xff]  ;;  %s5703_s28 = scalar_lea.hbm %s6364_s5, 16 }
  0x4d   :  { %v5853_v7 = vld [vmem:[#allocation8 + $0x8] sm:$0xff]  ;;  %p5704_p4 = scmp.ne.s32.totalorder %s6364_s5, %s5703_s28  ;;  %p5707_p5 = scmp.lt.u32.totalorder %s5703_s28, %s6364_s5 }
  0x4e   :  { %v149_v36 = vsub.f32 0.0, %v5853_v7 }
  0x4f   :  { %98 = vrot.lane.b32.xlu0 %v5846_v4, %s5730_s1  ;;  %126 = vrot.lane.b32.xlu1 %v122_v5, %s5724_s6  ;;  %p5709_p6 = pnand %p5707_p5, %p5704_p4 }
  0x53   :  { %153 = vrot.lane.b32.xlu1 %v5851_v6, %s5730_s1  ;;  %141 = vrot.lane.b32.xlu0 %v5853_v7, %s5730_s1 }
  0xbd   :  { %v112_v10 = vpop.permute.xlu1 %111  ;;  %v83_v11 = vpop.permute.xlu0 %82 }
  0xbe   :  { %v117_v12 = vsel %vm104_vm1, %v107_v8, %v112_v10  ;;  %v89_v13 = vsel %vm88_vm2, %v75_v9, %v83_v11 }
  0xbf   :  { %v169_v14 = vand.u32 4294901760, %v117_v12  ;;  %v163_v15 = vsel %vm161_vm3, %v89_v13, 0  ;;  %v5915_v13 = vld [vmem:[#allocation8 + $0x18] sm:$0xff] }
  0xc0   :  { %v5863_v16 = vand.u32 4294901760, %v163_v15 }
  0xc1   :  { %v251_v17 = vsub.f32 %v117_v12, %v169_v14  ;;  %v99_v18 = vpop.permute.xlu0 %98  ;;  %v127_v35 = vpop.permute.xlu1 %126  ;;  %v123_v12 = vld [vmem:[#allocation7 + $0x18] sm:$0xff] }
  0xc2   :  { %v233_v19 = vsub.f32 %v163_v15, %v5863_v16  ;;  %v105_v20 = vsel %vm104_vm1, %v5841_v2, %v99_v18  ;;  %v132_v42 = vsel %vm88_vm2, %v119_v39, %v127_v35 }
  0xc3   :  { %v252_v21 = vand.u32 4294901760, %v251_v17  ;;  %v166_v22 = vand.u32 4294901760, %v105_v20  ;;  %v1267_v46 = vsel %vm161_vm3, %v132_v42, 0  ;;  %v79_v42 = vld [vmem:[#allocation2 + $0x18] sm:$0xff] }
  0xc4   :  { %v234_v23 = vand.u32 4294901760, %v233_v19  ;;  %v1336_v49 = vand.u32 4294901760, %v1267_v46 }
  0xc5   :  { %v244_v24 = vsub.f32 %v105_v20, %v166_v22  ;;  %v5313_v25 = vpack.c.bf16 %v169_v14, %v166_v22  ;;  %v253_v27 = vsub.f32 %v251_v17, %v252_v21  ;;  %v154_v37 = vpop.permute.xlu1 %153  ;;  %v142_v38 = vpop.permute.xlu0 %141  ;;  %v5919_v14 = vld [vmem:[#allocation8 + $0x10] sm:$0xff] }
  0xc6   :  { %v235_v26 = vsub.f32 %v233_v19, %v234_v23  ;;  %v159_v40 = vsel %vm104_vm1, %v149_v36, %v154_v37  ;;  %v147_v41 = vsel %vm104_vm1, %v5851_v6, %v142_v38  ;;  %v1337_v52 = vsub.f32 %v1267_v46, %v1336_v49 }
  0xc7   :  { %v245_v28 = vand.u32 4294901760, %v244_v24  ;;  %5314 = vmatpush3.bf16.msra.mxu0 %v5313_v25  ;;  %v254_v31 = vand.u32 4294901760, %v253_v27  ;;  %v5319_v34 = vpack.c.bf16 %v251_v17, %v244_v24  ;;  %v1273_v43 = vand.u32 4294901760, %v159_v40 }
  0xc8   :  { %v236_v29 = vand.u32 4294901760, %v235_v26  ;;  %5315 = vmatprep.subr.bf16.mxu0 %v5727_v0  ;;  %v1270_v44 = vand.u32 4294901760, %v147_v41  ;;  %v1338_v55 = vand.u32 4294901760, %v1337_v52 }
  0xc9   :  { %v246_v30 = vsub.f32 %v244_v24, %v245_v28  ;;  %v5325_v45 = vpack.c.bf16 %v252_v21, %v245_v28  ;;  %v1355_v47 = vsub.f32 %v159_v40, %v1273_v43 }
  0xca   :  { %4909 = vmatmul.mubr.f32.vlgmr.msra.gmra.mrb[0].mxu0 %v236_v29  ;;  %v1348_v48 = vsub.f32 %v147_v41, %v1270_v44  ;;  %v5355_v57 = vpack.c.bf16 %v1273_v43, %v1270_v44  ;;  %v1339_v59 = vsub.f32 %v1337_v52, %v1338_v55  ;;  %v5960_v43 = vld [vmem:[#allocation5 + $0x10] sm:$0xff]  ;;  %v5964_v44 = vld [vmem:[#allocation5 + $0x18] sm:$0xff] }
  0xcb   :  { %v247_v32 = vand.u32 4294901760, %v246_v30  ;;  %4915 = vmatprep.mubr.msk.f32.mxu0 %vm5728_vm0, %v5729_v1  ;;  %v1356_v50 = vand.u32 4294901760, %v1355_v47 }
  0xcc   :  { %v1349_v51 = vand.u32 4294901760, %v1348_v48  ;;  %v1340_v61 = vand.u32 4294901760, %v1339_v59  ;;  %v5361_v62 = vpack.c.bf16 %v1355_v47, %v1348_v48 }
  0xcd   :  { %v5316_v33 = vpack.c.bf16 %v254_v31, %v247_v32  ;;  %v1357_v53 = vsub.f32 %v1355_v47, %v1356_v50 }
  0xce   :  { %v1350_v54 = vsub.f32 %v1348_v48, %v1349_v51  ;;  %v5367_v63 = vpack.c.bf16 %v1356_v50, %v1349_v51 }
  0xcf   :  { %5317 = vmatpush3.bf16.msra.mxu0 %v5316_v33  ;;  %v1358_v56 = vand.u32 4294901760, %v1357_v53 }
  0xd0   :  { %5318 = vmatprep.subr.bf16.mxu0 %v5727_v0  ;;  %v1351_v58 = vand.u32 4294901760, %v1350_v54 }
  0xd2   :  { %4916 = vmatmul.mubr.f32.vlgmr.msra.gmra.mrb[0].mxu0 %v5863_v16  ;;  %v5358_v60 = vpack.c.bf16 %v1358_v56, %v1351_v58 }
  0xd3   :  { %5320 = vmatpush3.bf16.msra.mxu0 %v5319_v34  ;;  %4922 = vmatprep.mubr.msk.f32.mxu0 %vm5728_vm0, %v5729_v1 }
  0xd4   :  { %5321 = vmatprep.subr.bf16.mxu0 %v5727_v0 }
  0xda   :  { %4923 = vmatmul.mubr.f32.vlgmr.msra.gmra.mrb[0].mxu0 %v233_v19 }
  0xdb   :  { %5323 = vmatpush3.bf16.msra.mxu0 %v5313_v25  ;;  %4929 = vmatprep.mubr.msk.f32.mxu0 %vm5728_vm0, %v5729_v1 }
  0xdc   :  { %5324 = vmatprep.subr.bf16.mxu0 %v5727_v0 }
  0xe2   :  { %4930 = vmatmul.mubr.f32.vlgmr.msra.gmra.mrb[0].mxu0 %v234_v23 }
  0xe3   :  { %5326 = vmatpush3.bf16.msra.mxu0 %v5325_v45  ;;  %4936 = vmatprep.mubr.msk.f32.mxu0 %vm5728_vm0, %v5729_v1 }
  0xe4   :  { %5327 = vmatprep.subr.bf16.mxu0 %v5727_v0 }
  0xea   :  { %4937 = vmatmul.mubr.f32.vlgmr.msra.gmra.mrb[0].mxu0 %v5863_v16 }
  0xeb   :  { %5329 = vmatpush3.bf16.msra.mxu0 %v5313_v25  ;;  %4943 = vmatprep.mubr.msk.f32.mxu0 %vm5728_vm0, %v5729_v1 }
  0xec   :  { %5354 = vmatprep.subr.bf16.mxu0 %v5727_v0 }
  0xf2   :  { %4944 = vmatmul.mubr.f32.vlgmr.msra.gmra.mrb[0].mxu0 %v5863_v16 }
  0xf3   :  { %5356 = vmatpush3.bf16.msra.mxu0 %v5355_v57  ;;  %5010 = vmatprep.mubr.msk.f32.mxu0 %vm5728_vm0, %v5729_v1 }
  0xf4   :  { %5357 = vmatprep.subr.bf16.mxu0 %v5727_v0 }
  0xf6   :  { %5011 = vmatmul.mubr.f32.vlgmr.msra.gmra.mrb[2].mxu0 %v1340_v61 }
  0xf7   :  { %5359 = vmatpush3.bf16.msra.mxu0 %v5358_v60  ;;  %5017 = vmatprep.mubr.msk.f32.mxu0 %vm5728_vm0, %v5729_v1 }
  0xf8   :  { %5360 = vmatprep.subr.bf16.mxu0 %v5727_v0 }
  0xfe   :  { %5018 = vmatmul.mubr.f32.vlgmr.msra.gmra.mrb[2].mxu0 %v1336_v49 }
  0xff   :  { %5362 = vmatpush3.bf16.msra.mxu0 %v5361_v62  ;;  %5024 = vmatprep.mubr.msk.f32.mxu0 %vm5728_vm0, %v5729_v1 }
 0x100   :  { %5363 = vmatprep.subr.bf16.mxu0 %v5727_v0 }
 0x106   :  { %5025 = vmatmul.mubr.f32.vlgmr.msra.gmra.mrb[2].mxu0 %v1337_v52 }
 0x107   :  { %5365 = vmatpush3.bf16.msra.mxu0 %v5355_v57  ;;  %5031 = vmatprep.mubr.msk.f32.mxu0 %vm5728_vm0, %v5729_v1 }
 0x108   :  { %5366 = vmatprep.subr.bf16.mxu0 %v5727_v0 }
 0x10e   :  { %5032 = vmatmul.mubr.f32.vlgmr.msra.gmra.mrb[2].mxu0 %v1338_v55 }
 0x10f   :  { %5368 = vmatpush3.bf16.msra.mxu0 %v5367_v63  ;;  %5038 = vmatprep.mubr.msk.f32.mxu0 %vm5728_vm0, %v5729_v1 }
 0x110   :  { %5369 = vmatprep.subr.bf16.mxu0 %v5727_v0 }
 0x116   :  { %5039 = vmatmul.mubr.f32.vlgmr.msra.gmra.mrb[2].mxu0 %v1336_v49 }
 0x117   :  { %5371 = vmatpush3.bf16.msra.mxu0 %v5355_v57  ;;  %5045 = vmatprep.mubr.msk.f32.mxu0 %vm5728_vm0, %v5729_v1 }
 0x11e   :  { %5046 = vmatmul.mubr.f32.vlgmr.msra.gmra.mrb[2].mxu0 %v1336_v49 }
 0x1c5   :  { %v620_v3 = vpop.f32.mrb[0].mxu0 }
 0x1c6   :  { %v4945_v5 = vpop.f32.mrb[1].mxu0  ;;  %v624_v11 = vsub.f32 0.0, %v620_v3  ;;  %v679_v17 = vand.u32 4294901760, %v620_v3 }
 0x1c8   :  { %v5926_v22 = vsub.f32 %v620_v3, %v679_v17 }
 0x1ca   :  { %v788_v31 = vand.u32 4294901760, %v5926_v22 }
 0x1cc   :  { %v789_v36 = vsub.f32 %v5926_v22, %v788_v31 }
 0x1ce   :  { %v790_v39 = vand.u32 4294901760, %v789_v36 }
 0x1f1   :  { %v1724_v8 = vpop.f32.mrb[2].mxu0 }
 0x1f2   :  { %1730 = vrot.lane.b32.xlu0 %v1724_v8, %s5731_s3  ;;  %v5047_v9 = vpop.f32.mrb[3].mxu0  ;;  %v1728_v10 = vsub.f32 0.0, %v1724_v8  ;;  %v1783_v16 = vand.u32 4294901760, %v1724_v8 }
 0x1f4   :  { %1734 = vrot.lane.b32.xlu1 %v1728_v10, %s5730_s1  ;;  %v5924_v20 = vsub.f32 %v1724_v8, %v1783_v16 }
 0x1f6   :  { %626 = vrot.lane.b32.xlu0 %v620_v3, %s5731_s3  ;;  %v1892_v29 = vand.u32 4294901760, %v5924_v20 }
 0x1f8   :  { %630 = vrot.lane.b32.xlu1 %v624_v11, %s5730_s1  ;;  %v150_v11 = vsub.f32 0.0, %v5915_v13 }
 0x1fa   :  { %128 = vrot.lane.b32.xlu0 %v123_v12, %s5724_s6  ;;  %v120_v12 = vld [vmem:[#allocation7 + $0x10] sm:$0xff] }
 0x1fe   :  { %143 = vrot.lane.b32.xlu0 %v5915_v13, %s5730_s1 }
 0x202   :  { %155 = vrot.lane.b32.xlu0 %v5919_v14, %s5730_s1 }
 0x220   :  { %634 = vxpose.xlu0.b32.start [1/2] (short) (narrow) %v620_v3, 32 }
 0x221   :  { %1738 = vxpose.xlu1.b32.start [1/2] (short) (narrow) %v1724_v8, 32 }
 0x264   :  { %v1731_v15 = vpop.permute.xlu0 %1730 }
 0x266   :  { %v1735_v18 = vpop.permute.xlu1 %1734 }
 0x267   :  { %v1737_v19 = vsel %vm104_vm1, %v1731_v15, %v1735_v18 }
 0x268   :  { %1739 = vxpose.xlu1.b32.end [2/2] (short) (narrow) %v1737_v19, 32  ;;  %v1786_v21 = vand.u32 4294901760, %v1737_v19  ;;  %v627_v23 = vpop.permute.xlu0 %626 }
 0x26a   :  { %v5928_v24 = vpack.c.bf16 %v1786_v21, %v1783_v16  ;;  %v5930_v25 = vsub.f32 %v1737_v19, %v1786_v21  ;;  %v631_v26 = vpop.permute.xlu1 %630 }
 0x26b   :  { %v633_v27 = vsel %vm104_vm1, %v627_v23, %v631_v26 }
 0x26c   :  { %5385 = vmatprep.subr.bf16.mxu0 %v5928_v24  ;;  %635 = vxpose.xlu0.b32.end [2/2] (short) (narrow) %v633_v27, 32  ;;  %v682_v28 = vand.u32 4294901760, %v633_v27  ;;  %v1899_v30 = vand.u32 4294901760, %v5930_v25  ;;  %v129_v45 = vpop.permute.xlu0 %128 }
 0x26d   :  { %5387 = vmatpush3.bf16.msra.mxu0 %v5928_v24 }
 0x26e   :  { %v5938_v32 = vpack.c.bf16 %v682_v28, %v679_v17  ;;  %v5940_v33 = vsub.f32 %v633_v27, %v682_v28  ;;  %v5388_v34 = vpack.c.bf16 %v1899_v30, %v1892_v29  ;;  %v5945_v35 = vsub.f32 %v5930_v25, %v1899_v30 }
 0x26f   :  { %v133_v30 = vsel %vm88_vm2, %v120_v12, %v129_v45 }
 0x270   :  { %5331 = vmatprep.subr.bf16.mxu1 %v5938_v32  ;;  %5389 = vmatprep.subr.bf16.mxu0 %v5388_v34  ;;  %v795_v37 = vand.u32 4294901760, %v5940_v33  ;;  %v144_v46 = vpop.permute.xlu0 %143 }
 0x271   :  { %5333 = vmatpush3.bf16.msra.mxu1 %v5938_v32  ;;  %v148_v36 = vsel %vm104_vm1, %v5919_v14, %v144_v46 }
 0x272   :  { %v796_v38 = vsub.f32 %v5940_v33, %v795_v37 }
 0x274   :  { %v797_v40 = vand.u32 4294901760, %v796_v38  ;;  %v156_v47 = vpop.permute.xlu0 %155 }
 0x276   :  { %v5956_v41 = vpack.c.bf16 %v797_v40, %v790_v39 }
 0x278   :  { %5335 = vmatprep.subr.bf16.mxu1 %v5956_v41 }
 0x28e   :  { %84 = vrot.lane.b32.xlu1 %v79_v42, %s5724_s6 }
 0x292   :  { %113 = vrot.lane.b32.xlu1 %v5960_v43, %s5730_s1 }
 0x29d   :  { %100 = vrot.lane.b32.xlu0 %v5964_v44, %s5730_s1 }
 0x2e4   :  { %v1754_v48 = vpop.trf.xlu1 }
 0x2e5   :  { %v1771_v49 = vsel %vm161_vm3, %v1754_v48, 0 }
 0x2e6   :  { %v5969_v50 = vand.u32 4294901760, %v1771_v49 }
 0x2e8   :  { %v5972_v51 = vsub.f32 %v1771_v49, %v5969_v50  ;;  %v650_v52 = vpop.trf.xlu0  ;;  %v1755_v53 = vpop.trf.xlu1 }
 0x2e9   :  { %v667_v54 = vsel %vm161_vm3, %v650_v52, 0  ;;  %v1774_v55 = vsel %vm161_vm3, %v1755_v53, 0 }
 0x2ea   :  { %v5976_v56 = vand.u32 4294901760, %v667_v54  ;;  %v5978_v57 = vand.u32 4294901760, %v1774_v55  ;;  %v1851_v58 = vand.u32 4294901760, %v5972_v51 }
 0x2ec   :  { %v5982_v59 = vsub.f32 %v667_v54, %v5976_v56  ;;  %v5985_v60 = vsub.f32 %v1774_v55, %v5978_v57  ;;  %v651_v61 = vpop.trf.xlu0  ;;  %v1756_v62 = vpop.trf.xlu1  ;;  %5082 = vmatprep.mubr.f32.mxu0 %v1851_v58  ;;  %v3510_v54 = vsel %vm161_vm3, %v133_v30, 0  ;;  %v3513_v55 = vand.u32 4294901760, %v148_v36 }
 0x2ed   :  { %v670_v63 = vsel %vm161_vm3, %v651_v61, 0  ;;  %v1777_v3 = vsel %vm161_vm3, %v1756_v62, 0 }
 0x2ee   :  { %v1861_v5 = vand.u32 4294901760, %v5985_v60  ;;  %v5992_v8 = vand.u32 4294901760, %v670_v63  ;;  %v5994_v9 = vand.u32 4294901760, %v1777_v3  ;;  %v747_v10 = vand.u32 4294901760, %v5982_v59 }
 0x2f0   :  { %v5999_v15 = vsub.f32 %v670_v63, %v5992_v8  ;;  %v6002_v16 = vsub.f32 %v1777_v3, %v5994_v9  ;;  %v652_v17 = vpop.trf.xlu0  ;;  %5083 = vmatmul.mubr.f32.vlgmr.msra.gmra.mrb[4].mxu0 %v1861_v5  ;;  %v1757_v18 = vpop.trf.xlu1  ;;  %v748_v19 = vsub.f32 %v5982_v59, %v747_v10  ;;  %v5338_v63 = vpack.c.bf16 %v5940_v33, %v5926_v22 }
 0x2f1   :  { %v673_v21 = vsel %vm161_vm3, %v652_v17, 0  ;;  %5391 = vmatpush3.bf16.msra.mxu0 %v5388_v34  ;;  %v1780_v23 = vsel %vm161_vm3, %v1757_v18, 0  ;;  %v160_v34 = vsel %vm104_vm1, %v150_v11, %v156_v47  ;;  %v6051_v11 = vand.u32 4294901760, %v3510_v54 }
 0x2f2   :  { %v757_v26 = vand.u32 4294901760, %v5999_v15  ;;  %v6012_v27 = vand.u32 4294901760, %v673_v21  ;;  %v6014_v28 = vand.u32 4294901760, %v1780_v23  ;;  %5393 = vmatprep.subr.bf16.mxu0 %v5928_v24  ;;  %v749_v38 = vand.u32 4294901760, %v748_v19 }
 0x2f3   :  { %v1871_v39 = vand.u32 4294901760, %v6002_v16  ;;  %v3516_v61 = vand.u32 4294901760, %v160_v34  ;;  %v6054_v18 = vsub.f32 %v148_v36, %v3513_v55  ;;  %v1901_v33 = vand.u32 4294901760, %v5945_v35 }
 0x2f4   :  { %v6023_v40 = vsub.f32 %v673_v21, %v6012_v27  ;;  %v6026_v42 = vsub.f32 %v1780_v23, %v6014_v28  ;;  %v653_v48 = vpop.trf.xlu0  ;;  %v758_v49 = vsub.f32 %v5999_v15, %v757_v26  ;;  %4950 = vmatprep.mubr.f32.mxu1 %v749_v38  ;;  %v108_v35 = vsub.f32 0.0, %v5964_v44 }
 0x2f5   :  { %v676_v45 = vsel %vm161_vm3, %v653_v48, 0  ;;  %5085 = vmatprep.mubr.f32.mxu0 %v1871_v39  ;;  %v6056_v19 = vsub.f32 %v160_v34, %v3516_v61  ;;  %v3592_v30 = vand.u32 4294901760, %v6054_v18  ;;  %v6075_v48 = vpack.c.bf16 %v3516_v61, %v3513_v55 }
 0x2f6   :  { %v767_v46 = vand.u32 4294901760, %v6023_v40  ;;  %v6035_v47 = vand.u32 4294901760, %v676_v45  ;;  %v759_v52 = vand.u32 4294901760, %v758_v49  ;;  %v1881_v53 = vand.u32 4294901760, %v6026_v42 }
 0x2f7   :  { %v3599_v36 = vand.u32 4294901760, %v6056_v19  ;;  %v3593_v34 = vsub.f32 %v6054_v18, %v3592_v30  ;;  %v5445_v22 = vpack.c.bf16 %v6056_v19, %v6054_v18 }
 0x2f8   :  { %v6040_v62 = vsub.f32 %v676_v45, %v6035_v47  ;;  %4951 = vmatmul.mubr.f32.vlgmr.msra.gmra.mrb[0].mxu1 %v759_v52  ;;  %5086 = vmatmul.mubr.f32.gmra.mrb[6].mxu0 %v1881_v53  ;;  %v768_v3 = vsub.f32 %v6023_v40, %v767_v46 }
 0x2f9   :  { %5337 = vmatpush3.bf16.msra.mxu1 %v5956_v41  ;;  %5092 = vmatprep.mubr.f32.mxu0 %v5969_v50  ;;  %v6063_v41 = vsub.f32 %v3510_v54, %v6051_v11  ;;  %v3600_v49 = vsub.f32 %v6056_v19, %v3599_v36  ;;  %v3594_v52 = vand.u32 4294901760, %v3593_v34 }
 0x2fa   :  { %v777_v12 = vand.u32 4294901760, %v6040_v62  ;;  %5339 = vmatprep.subr.bf16.mxu1 %v5338_v63  ;;  %v769_v17 = vand.u32 4294901760, %v768_v3 }
 0x2fb   :  { %v3581_v38 = vand.u32 4294901760, %v6063_v41  ;;  %v3601_v54 = vand.u32 4294901760, %v3600_v49 }
 0x2fc   :  { %5093 = vmatmul.mubr.f32.vlgmr.msra.gmra.mrb[4].mxu0 %v5978_v57  ;;  %4953 = vmatprep.mubr.f32.mxu1 %v769_v17  ;;  %v778_v21 = vsub.f32 %v6040_v62, %v777_v12 }
 0x2fd   :  { %5395 = vmatpush3.bf16.msra.mxu0 %v5928_v24  ;;  %5095 = vmatprep.mubr.f32.mxu0 %v5994_v9  ;;  %v3582_v45 = vsub.f32 %v6063_v41, %v3581_v38  ;;  %v5442_v61 = vpack.c.bf16 %v3601_v54, %v3594_v52 }
 0x2fe   :  { %v779_v23 = vand.u32 4294901760, %v778_v21  ;;  %5438 = vmatprep.subr.bf16.mxu0 %v5727_v0 }
 0x2ff   :  { %v3583_v55 = vand.u32 4294901760, %v3582_v45 }
 0x300   :  { %4954 = vmatmul.mubr.f32.gmra.mrb[2].mxu1 %v779_v23  ;;  %5096 = vmatmul.mubr.f32.gmra.mrb[6].mxu0 %v6014_v28 }
 0x301   :  { %5102 = vmatprep.mubr.f32.mxu0 %v5969_v50  ;;  %4960 = vmatprep.mubr.f32.mxu1 %v5976_v56 }
 0x304   :  { %4961 = vmatmul.mubr.f32.vlgmr.msra.gmra.mrb[0].mxu1 %v5992_v8  ;;  %5103 = vmatmul.mubr.f32.vlgmr.msra.gmra.mrb[4].mxu0 %v5978_v57 }
 0x305   :  { %5341 = vmatpush3.bf16.msra.mxu1 %v5338_v63  ;;  %5440 = vmatpush3.bf16.msra.mxu0 %v6075_v48  ;;  %v5346_v63 = vpack.c.bf16 %v795_v37, %v788_v31  ;;  %v1893_v31 = vsub.f32 %v5924_v20, %v1892_v29  ;;  %v1852_v29 = vsub.f32 %v5972_v51, %v1851_v58  ;;  %v76_v58 = vld [vmem:[#allocation2 + $0x10] sm:$0xff] }
 0x306   :  { %5343 = vmatprep.subr.bf16.mxu1 %v5938_v32  ;;  %5105 = vmatprep.mubr.f32.mxu0 %v5994_v9 }
 0x307   :  { %4963 = vmatprep.mubr.f32.mxu1 %v6012_v27  ;;  %5441 = vmatprep.subr.bf16.mxu0 %v5727_v0  ;;  %v1894_v37 = vand.u32 4294901760, %v1893_v31 }
 0x308   :  { %4964 = vmatmul.mubr.f32.gmra.mrb[2].mxu1 %v6035_v47  ;;  %5106 = vmatmul.mubr.f32.gmra.mrb[6].mxu0 %v6014_v28 }
 0x309   :  { %4970 = vmatprep.mubr.f32.mxu1 %v5982_v59  ;;  %5214 = vmatprep.mubr.msk.f32.mxu0 %vm5728_vm0, %v5729_v1  ;;  %v5451_v59 = vpack.c.bf16 %v3599_v36, %v3592_v30 }
 0x30c   :  { %4971 = vmatmul.mubr.f32.vlgmr.msra.gmra.mrb[0].mxu1 %v5999_v15  ;;  %5215 = vmatmul.mubr.f32.vlgmr.msra.gmra.mrb[8].mxu0 %v3583_v55  ;;  %v1862_v15 = vsub.f32 %v5985_v60, %v1861_v5 }
 0x30d   :  { %5345 = vmatpush3.bf16.msra.mxu1 %v5938_v32  ;;  %5443 = vmatpush3.bf16.msra.mxu0 %v5442_v61 }
 0x30e   :  { %5347 = vmatprep.subr.bf16.mxu1 %v5346_v63  ;;  %4973 = vmatprep.mubr.f32.mxu1 %v6023_v40  ;;  %v1863_v5 = vand.u32 4294901760, %v1862_v15 }
 0x30f   :  { %5221 = vmatprep.mubr.msk.f32.mxu0 %vm5728_vm0, %v5729_v1  ;;  %5444 = vmatprep.subr.bf16.mxu0 %v5727_v0 }
 0x310   :  { %4974 = vmatmul.mubr.f32.gmra.mrb[2].mxu1 %v6040_v62 }
 0x311   :  { %4980 = vmatprep.mubr.f32.mxu1 %v747_v10  ;;  %v5376_v10 = vpack.c.bf16 %v1901_v33, %v1894_v37 }
 0x314   :  { %4981 = vmatmul.mubr.f32.vlgmr.msra.gmra.mrb[0].mxu1 %v757_v26  ;;  %5222 = vmatmul.mubr.f32.vlgmr.msra.gmra.mrb[8].mxu0 %v6051_v11 }
 0x315   :  { %5349 = vmatpush3.bf16.msra.mxu1 %v5346_v63  ;;  %5446 = vmatpush3.bf16.msra.mxu0 %v5445_v22 }
 0x316   :  { %5351 = vmatprep.subr.bf16.mxu1 %v5938_v32  ;;  %4983 = vmatprep.mubr.f32.mxu1 %v767_v46 }
 0x317   :  { %5228 = vmatprep.mubr.msk.f32.mxu0 %vm5728_vm0, %v5729_v1  ;;  %5447 = vmatprep.subr.bf16.mxu0 %v5727_v0 }
 0x318   :  { %4984 = vmatmul.mubr.f32.gmra.mrb[2].mxu1 %v777_v12 }
 0x319   :  { %4990 = vmatprep.mubr.f32.mxu1 %v5976_v56 }
 0x31c   :  { %4991 = vmatmul.mubr.f32.vlgmr.msra.gmra.mrb[0].mxu1 %v5992_v8  ;;  %5229 = vmatmul.mubr.f32.vlgmr.msra.gmra.mrb[8].mxu0 %v6063_v41 }
 0x31d   :  { %5353 = vmatpush3.bf16.msra.mxu1 %v5938_v32  ;;  %5449 = vmatpush3.bf16.msra.mxu0 %v6075_v48  ;;  %v85_v32 = vpop.permute.xlu1 %84 }
 0x31e   :  { %4993 = vmatprep.mubr.f32.mxu1 %v6012_v27  ;;  %5373 = vmatprep.subr.bf16.mxu1 %v5928_v24  ;;  %v90_v40 = vsel %vm88_vm2, %v76_v58, %v85_v32 }
 0x31f   :  { %5235 = vmatprep.mubr.msk.f32.mxu0 %vm5728_vm0, %v5729_v1  ;;  %5450 = vmatprep.subr.bf16.mxu0 %v5727_v0  ;;  %v2406_v3 = vsel %vm161_vm3, %v90_v40, 0 }
 0x320   :  { %4994 = vmatmul.mubr.f32.gmra.mrb[2].mxu1 %v6035_v47  ;;  %v2475_v18 = vand.u32 4294901760, %v2406_v3 }
 0x321   :  { %5000 = vmatprep.mubr.f32.mxu1 %v5976_v56  ;;  %v1853_v56 = vand.u32 4294901760, %v1852_v29  ;;  %v114_v26 = vpop.permute.xlu1 %113 }
 0x322   :  { %v118_v62 = vsel %vm104_vm1, %v108_v35, %v114_v26 }
 0x323   :  { %v2412_v12 = vand.u32 4294901760, %v118_v62 }
 0x324   :  { %5001 = vmatmul.mubr.f32.vlgmr.msra.gmra.mrb[0].mxu1 %v5992_v8  ;;  %5236 = vmatmul.mubr.f32.vlgmr.msra.gmra.mrb[8].mxu0 %v3581_v38  ;;  %v101_v8 = vpop.permute.xlu0 %100 }
 0x325   :  { %5375 = vmatpush3.bf16.msra.mxu1 %v5928_v24  ;;  %5452 = vmatpush3.bf16.msra.mxu0 %v5451_v59  ;;  %v1872_v24 = vsub.f32 %v6002_v16, %v1871_v39  ;;  %v106_v46 = vsel %vm104_vm1, %v5960_v43, %v101_v8  ;;  %v5380_v39 = vpack.c.bf16 %v5930_v25, %v5924_v20 }
 0x326   :  { %5003 = vmatprep.mubr.f32.mxu1 %v6012_v27  ;;  %5377 = vmatprep.subr.bf16.mxu1 %v5376_v10  ;;  %v1882_v27 = vsub.f32 %v6026_v42, %v1881_v53  ;;  %v2409_v53 = vand.u32 4294901760, %v106_v46  ;;  %v2494_v21 = vsub.f32 %v118_v62, %v2412_v12  ;;  %v2476_v20 = vsub.f32 %v2406_v3, %v2475_v18 }
 0x327   :  { %5242 = vmatprep.mubr.msk.f32.mxu0 %vm5728_vm0, %v5729_v1  ;;  %5453 = vmatprep.subr.bf16.mxu0 %v5727_v0 }
 0x328   :  { %5004 = vmatmul.mubr.f32.gmra.mrb[2].mxu1 %v6035_v47  ;;  %v1873_v47 = vand.u32 4294901760, %v1872_v24  ;;  %v1883_v17 = vand.u32 4294901760, %v1882_v27  ;;  %v2487_v19 = vsub.f32 %v106_v46, %v2409_v53  ;;  %v2495_v41 = vand.u32 4294901760, %v2494_v21 }
 0x329   :  { %5052 = vmatprep.mubr.f32.mxu1 %v1853_v56  ;;  %v2477_v23 = vand.u32 4294901760, %v2476_v20  ;;  %v5397_v30 = vpack.c.bf16 %v2412_v12, %v2409_v53  ;;  %v2397_v12 = vsub.f32 %v5841_v2, %v5851_v6 }
 0x32a   :  { %v2488_v25 = vand.u32 4294901760, %v2487_v19  ;;  %v2496_v36 = vsub.f32 %v2494_v21, %v2495_v41 }
 0x32b   :  { %v2478_v38 = vsub.f32 %v2476_v20, %v2477_v23 }
 0x32c   :  { %5053 = vmatmul.mubr.f32.vlgmr.msra.gmra.mrb[4].mxu1 %v1863_v5  ;;  %5243 = vmatmul.mubr.f32.vlgmr.msra.gmra.mrb[8].mxu0 %v6051_v11 }
 0x32d   :  { %5379 = vmatpush3.bf16.msra.mxu1 %v5376_v10  ;;  %5455 = vmatpush3.bf16.msra.mxu0 %v6075_v48 }
 0x32e   :  { %5055 = vmatprep.mubr.f32.mxu1 %v1873_v47  ;;  %5381 = vmatprep.subr.bf16.mxu1 %v5380_v39 }
 0x32f   :  { %5249 = vmatprep.mubr.msk.f32.mxu0 %vm5728_vm0, %v5729_v1 }
 0x330   :  { %5056 = vmatmul.mubr.f32.gmra.mrb[6].mxu1 %v1883_v17  ;;  %v2402_v17 = vsub.f32 %v5846_v4, %v5853_v7 }
 0x331   :  { %5062 = vmatprep.mubr.f32.mxu1 %v5969_v50  ;;  %v2489_v50 = vsub.f32 %v2487_v19, %v2488_v25 }
 0x334   :  { %5063 = vmatmul.mubr.f32.vlgmr.msra.gmra.mrb[4].mxu1 %v5978_v57  ;;  %5250 = vmatmul.mubr.f32.vlgmr.msra.gmra.mrb[8].mxu0 %v6051_v11  ;;  %v2490_v57 = vand.u32 4294901760, %v2489_v50  ;;  %v2497_v11 = vand.u32 4294901760, %v2496_v36 }
 0x335   :  { %5383 = vmatpush3.bf16.msra.mxu1 %v5380_v39  ;;  %5065 = vmatprep.mubr.f32.mxu1 %v5994_v9  ;;  %v2479_v9 = vand.u32 4294901760, %v2478_v38 }
 0x336   :  { %5396 = vmatprep.subr.bf16.mxu1 %v5727_v0 }
 0x338   :  { %5066 = vmatmul.mubr.f32.gmra.mrb[6].mxu1 %v6014_v28 }
 0x339   :  { %5072 = vmatprep.mubr.f32.mxu1 %v5972_v51  ;;  %v5400_v51 = vpack.c.bf16 %v2497_v11, %v2490_v57 }
 0x33c   :  { %5073 = vmatmul.mubr.f32.vlgmr.msra.gmra.mrb[4].mxu1 %v5985_v60  ;;  %v5403_v60 = vpack.c.bf16 %v2494_v21, %v2487_v19  ;;  %v2403_v19 = vmul.f32 %v2402_v17, %v2402_v17  ;;  %v4642_v21 = vsub.f32 %v5960_v43, %v5919_v14 }
 0x33d   :  { %5075 = vmatprep.mubr.f32.mxu1 %v6002_v16  ;;  %5398 = vmatpush3.bf16.msra.mxu1 %v5397_v30  ;;  %v5409_v16 = vpack.c.bf16 %v2495_v41, %v2488_v25  ;;  %v4649_v41 = vsub.f32 %v5964_v44, %v5915_v13 }
 0x33e   :  { %5399 = vmatprep.subr.bf16.mxu1 %v5727_v0  ;;  %v4643_v25 = vmul.f32 %v4642_v21, %v4642_v21 }
 0x33f   :  { %v4650_v50 = vmul.f32 %v4649_v41, %v4649_v41 }
 0x340   :  { %5076 = vmatmul.mubr.f32.gmra.mrb[6].mxu1 %v6026_v42 }
 0x341   :  { %5112 = vmatprep.mubr.msk.f32.mxu1 %vm5728_vm0, %v5729_v1 }
 0x344   :  { %5113 = vmatmul.mubr.f32.vlgmr.msra.gmra.mrb[8].mxu1 %v2479_v9 }
 0x345   :  { %5401 = vmatpush3.bf16.msra.mxu1 %v5400_v51  ;;  %5119 = vmatprep.mubr.msk.f32.mxu1 %vm5728_vm0, %v5729_v1 }
 0x346   :  { %5402 = vmatprep.subr.bf16.mxu1 %v5727_v0 }
 0x34c   :  { %5120 = vmatmul.mubr.f32.vlgmr.msra.gmra.mrb[8].mxu1 %v2475_v18 }
 0x34d   :  { %5404 = vmatpush3.bf16.msra.mxu1 %v5403_v60  ;;  %5126 = vmatprep.mubr.msk.f32.mxu1 %vm5728_vm0, %v5729_v1 }
 0x34e   :  { %5405 = vmatprep.subr.bf16.mxu1 %v5727_v0 }
 0x354   :  { %5127 = vmatmul.mubr.f32.vlgmr.msra.gmra.mrb[8].mxu1 %v2476_v20 }
 0x355   :  { %5407 = vmatpush3.bf16.msra.mxu1 %v5397_v30  ;;  %5133 = vmatprep.mubr.msk.f32.mxu1 %vm5728_vm0, %v5729_v1 }
 0x356   :  { %5408 = vmatprep.subr.bf16.mxu1 %v5727_v0 }
 0x35c   :  { %5134 = vmatmul.mubr.f32.vlgmr.msra.gmra.mrb[8].mxu1 %v2477_v23 }
 0x35d   :  { %5410 = vmatpush3.bf16.msra.mxu1 %v5409_v16  ;;  %5140 = vmatprep.mubr.msk.f32.mxu1 %vm5728_vm0, %v5729_v1 }
 0x35e   :  { %5411 = vmatprep.subr.bf16.mxu1 %v5727_v0 }
 0x364   :  { %5141 = vmatmul.mubr.f32.vlgmr.msra.gmra.mrb[8].mxu1 %v2475_v18 }
 0x365   :  { %5413 = vmatpush3.bf16.msra.mxu1 %v5397_v30  ;;  %5147 = vmatprep.mubr.msk.f32.mxu1 %vm5728_vm0, %v5729_v1 }
 0x36c   :  { %5148 = vmatmul.mubr.f32.vlgmr.msra.gmra.mrb[8].mxu1 %v2475_v18  ;;  %v2398_v18 = vmul.f32 %v2397_v12, %v2397_v12 }
 0x36e   :  { %v2404_v20 = vadd.f32 %v2403_v19, %v2398_v18 }
 0x370   :  { %v4644_v23 = vadd.f32 %v4643_v25, %v2404_v20 }
 0x372   :  { %v4651_v36 = vadd.f32 %v4650_v50, %v4644_v23 }
 0x374   :  { %v4652_v2 = vsel %vm104_vm1, %v4651_v36, 0.0 }
 0x3d7   :  { %v5104_v28 = vpop.f32.mrb[4].mxu0 }
 0x3d8   :  { %v2348_v42 = vpop.f32.mrb[5].mxu0 }
 0x3db   :  { %v5107_v34 = vpop.f32.mrb[6].mxu0 }
 0x3dc   :  { %v2360_v48 = vpop.f32.mrb[7].mxu0 }
 0x3f7   :  { %v6191_v49 = vpop.f32.mrb[0].mxu1 }
 0x3f8   :  { %v6193_v45 = vpop.f32.mrb[1].mxu1 }
 0x3fb   :  { %v6195_v52 = vpop.f32.mrb[2].mxu1 }
 0x3fc   :  { %v6197_v54 = vpop.f32.mrb[3].mxu1 }
 0x407   :  { %v3967_v55 = vpop.f32.mrb[8].mxu0 }
 0x408   :  { %3973 = vrot.lane.b32.xlu1 %v3967_v55, %s5731_s3  ;;  %v5251_v0 = vpop.f32.mrb[9].mxu0  ;;  %v3971_v61 = vsub.f32 0.0, %v3967_v55  ;;  %v4026_v35 = vand.u32 4294901760, %v3967_v55 }
 0x40a   :  { %v6209_v58 = vsub.f32 %v3967_v55, %v4026_v35 }
 0x40c   :  { %3977 = vrot.lane.b32.xlu1 %v3971_v61, %s5730_s1  ;;  %v4135_v5 = vand.u32 4294901760, %v6209_v58 }
 0x40e   :  { %v4136_v46 = vsub.f32 %v6209_v58, %v4135_v5 }
 0x40f   :  { %v5074_v1 = vpop.f32.mrb[4].mxu1 }
 0x410   :  { %v6201_v63 = vadd.f32 %v5104_v28, %v5074_v1  ;;  %v2060_v22 = vpop.f32.mrb[5].mxu1  ;;  %v4137_v39 = vand.u32 4294901760, %v4136_v46 }
 0x411   :  { %v6203_v31 = vadd.f32 %v2348_v42, %v2060_v22 }
 0x413   :  { %v5077_v33 = vpop.f32.mrb[6].mxu1 }
 0x414   :  { %v6205_v32 = vadd.f32 %v5107_v34, %v5077_v33  ;;  %v2074_v37 = vpop.f32.mrb[7].mxu1 }
 0x415   :  { %v5483_v59 = vadd.f32 %v2360_v48, %v2074_v37 }
 0x43f   :  { %v2863_v29 = vpop.f32.mrb[8].mxu1 }
 0x440   :  { %2869 = vrot.lane.b32.xlu0 %v2863_v29, %s5731_s3  ;;  %v5149_v10 = vpop.f32.mrb[9].mxu1  ;;  %v2867_v15 = vsub.f32 0.0, %v2863_v29  ;;  %v2922_v30 = vand.u32 4294901760, %v2863_v29 }
 0x442   :  { %2873 = vrot.lane.b32.xlu1 %v2867_v15, %s5730_s1  ;;  %v6237_v38 = vsub.f32 %v2863_v29, %v2922_v30 }
 0x444   :  { %v3031_v14 = vand.u32 4294901760, %v6237_v38 }
 0x446   :  { %v3032_v44 = vsub.f32 %v6237_v38, %v3031_v14 }
 0x448   :  { %v3033_v51 = vand.u32 4294901760, %v3032_v44 }
 0x45e   :  { %3981 = vxpose.xlu0.b32.start [1/2] (short) (narrow) %v3967_v55, 32 }
 0x46b   :  { %2877 = vxpose.xlu1.b32.start [1/2] (short) (narrow) %v2863_v29, 32 }
 0x47a   :  { %v3974_v56 = vpop.permute.xlu1 %3973 }
 0x47e   :  { %v3978_v8 = vpop.permute.xlu1 %3977 }
 0x47f   :  { %v3980_v26 = vsel %vm104_vm1, %v3974_v56, %v3978_v8 }
 0x480   :  { %v4029_v24 = vand.u32 4294901760, %v3980_v26  ;;  %3982 = vxpose.xlu0.b32.end [2/2] (short) (narrow) %v3980_v26, 32 }
 0x482   :  { %v6213_v27 = vpack.c.bf16 %v4029_v24, %v4026_v35  ;;  %v6215_v40 = vsub.f32 %v3980_v26, %v4029_v24 }
 0x484   :  { %5457 = vmatprep.subr.bf16.mxu0 %v6213_v27  ;;  %v4142_v62 = vand.u32 4294901760, %v6215_v40  ;;  %v5464_v46 = vpack.c.bf16 %v6215_v40, %v6209_v58 }
 0x485   :  { %5459 = vmatpush3.bf16.msra.mxu0 %v6213_v27 }
 0x486   :  { %v4143_v47 = vsub.f32 %v6215_v40, %v4142_v62 }
 0x488   :  { %v4144_v3 = vand.u32 4294901760, %v4143_v47 }
 0x48a   :  { %v6226_v53 = vpack.c.bf16 %v4144_v3, %v4137_v39 }
 0x48c   :  { %5461 = vmatprep.subr.bf16.mxu0 %v6226_v53 }
 0x4b2   :  { %v2870_v6 = vpop.permute.xlu0 %2869 }
 0x4b4   :  { %v2874_v4 = vpop.permute.xlu1 %2873 }
 0x4b5   :  { %v2876_v7 = vsel %vm104_vm1, %v2870_v6, %v2874_v4  ;;  %4653 = vadd.xlane.f32.xlu0 %v4652_v2 }
 0x4b6   :  { %v2925_v57 = vand.u32 4294901760, %v2876_v7  ;;  %2878 = vxpose.xlu1.b32.end [2/2] (short) (narrow) %v2876_v7, 32 }
 0x4b8   :  { %v6242_v43 = vpack.c.bf16 %v2925_v57, %v2922_v30  ;;  %v6244_v13 = vsub.f32 %v2876_v7, %v2925_v57 }
 0x4ba   :  { %5415 = vmatprep.subr.bf16.mxu1 %v6242_v43  ;;  %v3038_v11 = vand.u32 4294901760, %v6244_v13 }
 0x4bb   :  { %5417 = vmatpush3.bf16.msra.mxu1 %v6242_v43 }
 0x4bc   :  { %v3039_v9 = vsub.f32 %v6244_v13, %v3038_v11 }
 0x4be   :  { %v3040_v60 = vand.u32 4294901760, %v3039_v9 }
 0x4c0   :  { %v6255_v16 = vpack.c.bf16 %v3040_v60, %v3033_v51 }
 0x4c2   :  { %5419 = vmatprep.subr.bf16.mxu1 %v6255_v16 }
 0x4cb   :  { %2378 = vrot.lane.b32.xlu0 %v5483_v59, %s5732_s30 }
 0x4dc   :  { %2374 = vrot.lane.b32.xlu1 %v6203_v31, %s5732_s30 }
 0x4e0   :  { %2376 = vrot.lane.b32.xlu1 %v6201_v63, %s5732_s30 }
 0x4e4   :  { %2380 = vrot.lane.b32.xlu1 %v6205_v32, %s5732_s30 }
 0x4fc   :  { %v3997_v28 = vpop.trf.xlu0 }
 0x4fd   :  { %v4014_v42 = vsel %vm161_vm3, %v3997_v28, 0  ;;  %v5422_v28 = vpack.c.bf16 %v6244_v13, %v6237_v38 }
 0x4fe   :  { %v4092_v34 = vand.u32 4294901760, %v4014_v42 }
 0x500   :  { %v4093_v48 = vsub.f32 %v4014_v42, %v4092_v34  ;;  %v3998_v55 = vpop.trf.xlu0 }
 0x501   :  { %v4017_v0 = vsel %vm161_vm3, %v3998_v55, 0 }
 0x502   :  { %v4094_v61 = vand.u32 4294901760, %v4093_v48  ;;  %v4102_v1 = vand.u32 4294901760, %v4017_v0 }
 0x504   :  { %v4103_v22 = vsub.f32 %v4017_v0, %v4102_v1  ;;  %v3999_v33 = vpop.trf.xlu0  ;;  %v4095_v37 = vsub.f32 %v4093_v48, %v4094_v61 }
 0x505   :  { %v4020_v31 = vsel %vm161_vm3, %v3999_v33, 0 }
 0x506   :  { %v4104_v59 = vand.u32 4294901760, %v4103_v22  ;;  %v4112_v63 = vand.u32 4294901760, %v4020_v31  ;;  %v4096_v29 = vand.u32 4294901760, %v4095_v37 }
 0x508   :  { %v4105_v10 = vsub.f32 %v4103_v22, %v4104_v59  ;;  %v4113_v32 = vsub.f32 %v4020_v31, %v4112_v63  ;;  %v4000_v15 = vpop.trf.xlu0  ;;  %5256 = vmatprep.mubr.f32.mxu0 %v4096_v29 }
 0x509   :  { %v4023_v35 = vsel %vm161_vm3, %v4000_v15, 0 }
 0x50a   :  { %v4106_v56 = vand.u32 4294901760, %v4105_v10  ;;  %v4114_v8 = vand.u32 4294901760, %v4113_v32  ;;  %v4122_v26 = vand.u32 4294901760, %v4023_v35 }
 0x50c   :  { %v4123_v24 = vsub.f32 %v4023_v35, %v4122_v26  ;;  %5257 = vmatmul.mubr.f32.vlgmr.msra.gmra.mrb[10].mxu0 %v4106_v56  ;;  %v4115_v47 = vsub.f32 %v4113_v32, %v4114_v8 }
 0x50d   :  { %5463 = vmatpush3.bf16.msra.mxu0 %v6226_v53  ;;  %v5472_v53 = vpack.c.bf16 %v4142_v62, %v4135_v5 }
 0x50e   :  { %v4124_v39 = vand.u32 4294901760, %v4123_v24  ;;  %5465 = vmatprep.subr.bf16.mxu0 %v5464_v46  ;;  %v4116_v3 = vand.u32 4294901760, %v4115_v47 }
 0x510   :  { %5259 = vmatprep.mubr.f32.mxu0 %v4116_v3  ;;  %v4125_v12 = vsub.f32 %v4123_v24, %v4124_v39 }
 0x512   :  { %v4126_v17 = vand.u32 4294901760, %v4125_v12 }
 0x514   :  { %5260 = vmatmul.mubr.f32.gmra.mrb[12].mxu0 %v4126_v17 }
 0x515   :  { %5266 = vmatprep.mubr.f32.mxu0 %v4092_v34 }
 0x518   :  { %5267 = vmatmul.mubr.f32.vlgmr.msra.gmra.mrb[10].mxu0 %v4102_v1 }
 0x519   :  { %5467 = vmatpush3.bf16.msra.mxu0 %v5464_v46  ;;  %5269 = vmatprep.mubr.f32.mxu0 %v4112_v63 }
 0x51a   :  { %5469 = vmatprep.subr.bf16.mxu0 %v6213_v27 }
 0x51c   :  { %5270 = vmatmul.mubr.f32.gmra.mrb[12].mxu0 %v4122_v26 }
 0x51d   :  { %5276 = vmatprep.mubr.f32.mxu0 %v4093_v48 }
 0x520   :  { %5277 = vmatmul.mubr.f32.vlgmr.msra.gmra.mrb[10].mxu0 %v4103_v22 }
 0x521   :  { %5471 = vmatpush3.bf16.msra.mxu0 %v6213_v27  ;;  %5279 = vmatprep.mubr.f32.mxu0 %v4113_v32 }
 0x522   :  { %5473 = vmatprep.subr.bf16.mxu0 %v5472_v53 }
 0x524   :  { %5280 = vmatmul.mubr.f32.gmra.mrb[12].mxu0 %v4123_v24 }
 0x525   :  { %5286 = vmatprep.mubr.f32.mxu0 %v4094_v61 }
 0x528   :  { %5287 = vmatmul.mubr.f32.vlgmr.msra.gmra.mrb[10].mxu0 %v4104_v59 }
 0x529   :  { %5475 = vmatpush3.bf16.msra.mxu0 %v5472_v53  ;;  %5289 = vmatprep.mubr.f32.mxu0 %v4114_v8 }
 0x52a   :  { %5477 = vmatprep.subr.bf16.mxu0 %v6213_v27 }
 0x52c   :  { %5290 = vmatmul.mubr.f32.gmra.mrb[12].mxu0 %v4124_v39 }
 0x52d   :  { %5296 = vmatprep.mubr.f32.mxu0 %v4092_v34 }
 0x530   :  { %5297 = vmatmul.mubr.f32.vlgmr.msra.gmra.mrb[10].mxu0 %v4102_v1 }
 0x531   :  { %5479 = vmatpush3.bf16.msra.mxu0 %v6213_v27  ;;  %5299 = vmatprep.mubr.f32.mxu0 %v4112_v63 }
 0x532   :  { %v2893_v58 = vpop.trf.xlu1 }
 0x533   :  { %v2910_v5 = vsel %vm161_vm3, %v2893_v58, 0 }
 0x534   :  { %v6281_v40 = vand.u32 4294901760, %v2910_v5  ;;  %5300 = vmatmul.mubr.f32.gmra.mrb[12].mxu0 %v4122_v26 }
 0x535   :  { %5306 = vmatprep.mubr.f32.mxu0 %v4092_v34 }
 0x536   :  { %v2989_v62 = vsub.f32 %v2910_v5, %v6281_v40  ;;  %v2894_v18 = vpop.trf.xlu1 }
 0x537   :  { %v2913_v19 = vsel %vm161_vm3, %v2894_v18, 0 }
 0x538   :  { %v2990_v21 = vand.u32 4294901760, %v2989_v62  ;;  %v6285_v20 = vand.u32 4294901760, %v2913_v19  ;;  %5307 = vmatmul.mubr.f32.vlgmr.msra.gmra.mrb[10].mxu0 %v4102_v1 }
 0x539   :  { %5309 = vmatprep.mubr.f32.mxu0 %v4112_v63 }
 0x53a   :  { %v2999_v27 = vsub.f32 %v2913_v19, %v6285_v20  ;;  %v2895_v25 = vpop.trf.xlu1  ;;  %v2991_v41 = vsub.f32 %v2989_v62, %v2990_v21 }
 0x53b   :  { %v2916_v23 = vsel %vm161_vm3, %v2895_v25, 0 }
 0x53c   :  { %v3000_v50 = vand.u32 4294901760, %v2999_v27  ;;  %v3008_v30 = vand.u32 4294901760, %v2916_v23  ;;  %5310 = vmatmul.mubr.f32.gmra.mrb[12].mxu0 %v4122_v26  ;;  %v2992_v36 = vand.u32 4294901760, %v2991_v41 }
 0x53e   :  { %v3001_v2 = vsub.f32 %v2999_v27, %v3000_v50  ;;  %v3009_v6 = vsub.f32 %v2916_v23, %v3008_v30  ;;  %v2896_v4 = vpop.trf.xlu1  ;;  %5154 = vmatprep.mubr.f32.mxu1 %v2992_v36 }
 0x53f   :  { %v2919_v7 = vsel %vm161_vm3, %v2896_v4, 0 }
 0x540   :  { %v3002_v57 = vand.u32 4294901760, %v3001_v2  ;;  %v3010_v44 = vand.u32 4294901760, %v3009_v6  ;;  %v3018_v9 = vand.u32 4294901760, %v2919_v7 }
 0x542   :  { %v3019_v51 = vsub.f32 %v2919_v7, %v3018_v9  ;;  %v4654_v60 = vpop.xlane.xlu0 %4653  ;;  %5155 = vmatmul.mubr.f32.vlgmr.msra.gmra.mrb[10].mxu1 %v3002_v57  ;;  %v3011_v42 = vsub.f32 %v3009_v6, %v3010_v44 }
 0x543   :  { %5421 = vmatpush3.bf16.msra.mxu1 %v6255_v16 }
 0x544   :  { %v3020_v34 = vand.u32 4294901760, %v3019_v51  ;;  %5423 = vmatprep.subr.bf16.mxu1 %v5422_v28  ;;  %v3012_v48 = vand.u32 4294901760, %v3011_v42 }
 0x546   :  { %v2379_v55 = vpop.permute.xlu0 %2378  ;;  %5157 = vmatprep.mubr.f32.mxu1 %v3012_v48  ;;  %v3021_v0 = vsub.f32 %v3019_v51, %v3020_v34 }
 0x547   :  { %v2389_v61 = vsel %vm2386_vm4, %v6197_v54, %v2379_v55 }
 0x548   :  { %2393 = vst [vmem:[%s6363_s4 + $0x10] sm:$0xff] %v2389_v61  ;;  %v3022_v1 = vand.u32 4294901760, %v3021_v0 }
 0x54a   :  { %5158 = vmatmul.mubr.f32.gmra.mrb[12].mxu1 %v3022_v1 }
 0x54b   :  { %5164 = vmatprep.mubr.f32.mxu1 %v6281_v40 }
 0x54e   :  { %5165 = vmatmul.mubr.f32.vlgmr.msra.gmra.mrb[10].mxu1 %v6285_v20  ;;  %v2375_v16 = vpop.permute.xlu1 %2374 }
 0x54f   :  { %5425 = vmatpush3.bf16.msra.mxu1 %v5422_v28  ;;  %v2387_v22 = vsel %vm2386_vm4, %v6193_v45, %v2375_v16  ;;  %5167 = vmatprep.mubr.f32.mxu1 %v3008_v30  ;;  %v5430_v45 = vpack.c.bf16 %v3038_v11, %v3031_v14 }
 0x550   :  { %2391 = vst [vmem:[%s6363_s4] sm:$0xff] %v2387_v22  ;;  %5427 = vmatprep.subr.bf16.mxu1 %v6242_v43 }
 0x552   :  { %5168 = vmatmul.mubr.f32.gmra.mrb[12].mxu1 %v3018_v9  ;;  %v2377_v54 = vpop.permute.xlu1 %2376 }
 0x553   :  { %v2388_v33 = vsel %vm2386_vm4, %v6191_v49, %v2377_v54  ;;  %5174 = vmatprep.mubr.f32.mxu1 %v2989_v62  ;;  %v4655_v49 = vrot.slane %v4654_v60, 4 }
 0x554   :  { %2392 = vst [vmem:[%s6363_s4 + $0x8] sm:$0xff] %v2388_v33 }
 0x556   :  { %5175 = vmatmul.mubr.f32.vlgmr.msra.gmra.mrb[10].mxu1 %v2999_v27  ;;  %v2381_v37 = vpop.permute.xlu1 %2380 }
 0x557   :  { %5429 = vmatpush3.bf16.msra.mxu1 %v6242_v43  ;;  %v2390_v31 = vsel %vm2386_vm4, %v6195_v52, %v2381_v37  ;;  %5177 = vmatprep.mubr.f32.mxu1 %v3009_v6  ;;  %v4656_v52 = vadd.f32 %v4655_v49, %v4654_v60 }
 0x558   :  { %2394 = vst [vmem:[%s6363_s4 + $0x18] sm:$0xff] %v2390_v31  ;;  %5431 = vmatprep.subr.bf16.mxu1 %v5430_v45 }
 0x559   :  { %v4657_v38 = vrot.slane %v4656_v52, 2 }
 0x55a   :  { %5178 = vmatmul.mubr.f32.gmra.mrb[12].mxu1 %v3019_v51 }
 0x55b   :  { %5184 = vmatprep.mubr.f32.mxu1 %v2990_v21  ;;  %v4658_v14 = vadd.f32 %v4657_v38, %v4656_v52 }
 0x55d   :  { %v4659_v13 = vrot.slane %v4658_v14, 1 }
 0x55e   :  { %5185 = vmatmul.mubr.f32.vlgmr.msra.gmra.mrb[10].mxu1 %v3000_v50 }
 0x55f   :  { %5433 = vmatpush3.bf16.msra.mxu1 %v5430_v45  ;;  %5187 = vmatprep.mubr.f32.mxu1 %v3010_v44  ;;  %v4660_v11 = vadd.f32 %v4659_v13, %v4658_v14 }
 0x560   :  { %5435 = vmatprep.subr.bf16.mxu1 %v6242_v43 }
 0x561   :  { %5600 = vpush %v4660_v11 }
 0x562   :  { %5188 = vmatmul.mubr.f32.gmra.mrb[12].mxu1 %v3020_v34 }
 0x563   :  { %5194 = vmatprep.mubr.f32.mxu1 %v6281_v40 }
 0x566   :  { %5195 = vmatmul.mubr.f32.vlgmr.msra.gmra.mrb[10].mxu1 %v6285_v20 }
 0x567   :  { %5437 = vmatpush3.bf16.msra.mxu1 %v6242_v43  ;;  %5197 = vmatprep.mubr.f32.mxu1 %v3008_v30 }
 0x56a   :  { %5198 = vmatmul.mubr.f32.gmra.mrb[12].mxu1 %v3018_v9 }
 0x56b   :  { %5204 = vmatprep.mubr.f32.mxu1 %v6281_v40 }
 0x56e   :  { %5205 = vmatmul.mubr.f32.vlgmr.msra.gmra.mrb[10].mxu1 %v6285_v20 }
 0x56f   :  { %5207 = vmatprep.mubr.f32.mxu1 %v3008_v30 }
 0x572   :  { %5208 = vmatmul.mubr.f32.gmra.mrb[12].mxu1 %v3018_v9 }
 0x592   :  { %s5601_s25 = spop %5600 }
 0x593   :  { %4663 = sst [smem:[#allocation10]] %s5601_s25 }
 0x60b   :  { %v5308_v59 = vpop.f32.mrb[10].mxu0 }
 0x60c   :  { %v4591_v63 = vpop.f32.mrb[11].mxu0  ;;  %4619 = vrot.lane.b32.xlu1 %v5308_v59, %s5732_s30 }
 0x60d   :  { %5712 = shalt.err (!%p5709_p6)
}
 0x60e   :  { %s5733_s8 = smov [#allocation10]  }
 0x60f   :  { %4673 = dma.smem_to_hbm %s5733_s8, 16, %s6364_s5, [#allocation4]   ;;  %v5311_v43 = vpop.f32.mrb[12].mxu0 }
 0x610   :  { %v4603_v29 = vpop.f32.mrb[13].mxu0  ;;  %4617 = vrot.lane.b32.xlu1 %v4591_v63, %s5732_s30 }
 0x614   :  { %4621 = vrot.lane.b32.xlu1 %v4603_v29, %s5732_s30 }
 0x618   :  { %4623 = vrot.lane.b32.xlu1 %v5311_v43, %s5732_s30 }
 0x641   :  { %v5206_v10 = vpop.f32.mrb[10].mxu1 }
 0x642   :  { %v3487_v32 = vpop.f32.mrb[11].mxu1 }
 0x645   :  { %v5209_v15 = vpop.f32.mrb[12].mxu1 }
 0x646   :  { %v3499_v35 = vpop.f32.mrb[13].mxu1 }
 0x67e   :  { %v4620_v56 = vpop.permute.xlu1 %4619 }
 0x67f   :  { %v4630_v8 = vsel %vm2386_vm4, %v5206_v10, %v4620_v56 }
 0x680   :  { %4685 = vst [vmem:[%s6363_s4 + $0x28] sm:$0xff] %v4630_v8 }
 0x682   :  { %v4618_v26 = vpop.permute.xlu1 %4617 }
 0x683   :  { %v4629_v24 = vsel %vm2386_vm4, %v3487_v32, %v4618_v26 }
 0x684   :  { %4684 = vst [vmem:[%s6363_s4 + $0x20] sm:$0xff] %v4629_v24 }
 0x686   :  { %v4622_v46 = vpop.permute.xlu1 %4621 }
 0x687   :  { %v4631_v47 = vsel %vm2386_vm4, %v3499_v35, %v4622_v46 }
 0x688   :  { %4686 = vst [vmem:[%s6363_s4 + $0x30] sm:$0xff] %v4631_v47 }
 0x68a   :  { %v4624_v39 = vpop.permute.xlu1 %4623 }
 0x68b   :  { %v4632_v3 = vsel %vm2386_vm4, %v5209_v15, %v4624_v39 }
 0x68c   :  { %4687 = vst [vmem:[%s6363_s4 + $0x38] sm:$0xff] %v4632_v3 }
 0x68d   :  { %5719 = dma.done.wait [#allocation4], 16  }
 0x68e   :  { %5720 = vsyncadd [#allocation4], 4294967280 }
 0x68f   :  { %4679 = sfence }
 0x690   :  { %4680 = vsyncpa [#allocation3], 1 }
 0x691   :  { %4681 = vsyncpa [#allocation6], 1 }
 0x692   :  { %4682 = vsyncpa [#allocation9], 1 }
 0x693   :  { %4683 = vsyncpa [#allocation4], 1 }

</bundles_post_ra>
